<compile_context>
chip_gen: v6e
topology: v6e:2x2x1
jax: 0.10.0
libtpu: 0.0.40
codegen_flags: <defaults>
</compile_context>

<pallas_src>
import functools

import jax
import jax.numpy as jnp
from jax import lax
from jax.experimental import pallas as pl
from jax.experimental.pallas import tpu as pltpu


def _residual_stack_kernel(x_ref, w1_ref, w2_ref, o_ref, pad_ref, acc_ref, *,
                           H, W, n_layers):
    """Full ResidualStack forward for one batch element.

    x_ref:   (H*W, C)        input pixels-major tile
    w1_ref:  (L, 9, C, Ch)   3x3 conv weights, taps flattened (di*3 + dj)
    w2_ref:  (L, Ch, C)      1x1 conv weights
    o_ref:   (H*W, C)        output tile
    pad_ref: (H+2, W+2, C)   f32 scratch: zero halo + ReLU'd activation
    acc_ref: (H*W, Ch)       f32 scratch: 3x3-conv accumulator
    """
    HW = H * W
    C = x_ref.shape[-1]

    # Zero the padded-activation scratch; only the interior is written per
    # layer below, so the halo stays zero.  Done every grid step on purpose:
    # with "parallel" batch sharding each TensorCore has its own scratch, so
    # a program_id(0)==0 one-time init would be unsafe.
    pad_ref[...] = jnp.zeros_like(pad_ref)

    # x stays resident (VMEM/vregs) as (H*W, C) f32 for the whole stack.
    x = x_ref[...].astype(jnp.float32)

    for l in range(n_layers):
        # ReLU, then scatter into the interior of the zero-padded halo buffer.
        h = jnp.maximum(x, 0.0)
        pad_ref[1:H + 1, 1:W + 1, :] = h.reshape(H, W, C)

        # 3x3 "same" conv as 9 shifted-tap matmuls accumulated in VMEM.
        acc_ref[...] = jnp.zeros_like(acc_ref)
        for di in range(3):
            for dj in range(3):
                patch = pad_ref[di:di + H, dj:dj + W, :].reshape(HW, C)
                acc_ref[...] += jnp.dot(
                    patch, w1_ref[l, di * 3 + dj].astype(jnp.float32),
                    preferred_element_type=jnp.float32)

        # ReLU -> 1x1 conv (channel matmul) -> residual add (Cin == Cout).
        h2 = jnp.maximum(acc_ref[...], 0.0)
        x = x + jnp.dot(h2, w2_ref[l].astype(jnp.float32),
                        preferred_element_type=jnp.float32)

    # Trailing ReLU of the stack; single store for the whole fused stack.
    o_ref[...] = jnp.maximum(x, 0.0).astype(o_ref.dtype)


def residual_stack_forward(x_nchw, params):
    """ResidualStack.forward.  Input/output in NCHW to match PyTorch."""
    N, C, H, W = x_nchw.shape
    L = len(params)
    Ch = params[0][0].shape[-1]

    # Stack per-layer weights (glue): (L, 9, Cin, Ch) and (L, Ch, Cout).
    w1_all = jnp.stack([w1.reshape(9, C, Ch) for (w1, _) in params])
    w2_all = jnp.stack([w2 for (_, w2) in params])

    # NCHW -> (N, H*W, C) pixels-major slab (glue).
    x_pix = jnp.transpose(x_nchw, (0, 2, 3, 1)).reshape(N, H * W, C)

    kernel = functools.partial(_residual_stack_kernel, H=H, W=W, n_layers=L)
    out_pix = pl.pallas_call(
        kernel,
        out_shape=jax.ShapeDtypeStruct((N, H * W, C), x_nchw.dtype),
        grid=(N,),
        in_specs=[
            pl.BlockSpec((None, H * W, C), lambda n: (n, 0, 0)),
            pl.BlockSpec((L, 9, C, Ch), lambda n: (0, 0, 0, 0)),
            pl.BlockSpec((L, Ch, C), lambda n: (0, 0, 0)),
        ],
        out_specs=pl.BlockSpec((None, H * W, C), lambda n: (n, 0, 0)),
        scratch_shapes=[
            pltpu.VMEM((H + 2, W + 2, C), jnp.float32),   # padded activation
            pltpu.VMEM((H * W, Ch), jnp.float32),         # conv accumulator
        ],
        compiler_params=pltpu.CompilerParams(
            dimension_semantics=("parallel",),
            vmem_limit_bytes=32 * 1024 * 1024,
        ),
    )(x_pix, w1_all, w2_all)

    # (N, H*W, C) -> NCHW (glue).
    return jnp.transpose(out_pix.reshape(N, H, W, C), (0, 3, 1, 2))


def _reference_forward(x_nchw, params):
    """Pure-JAX reference (lax.conv) for correctness checking."""
    x = jnp.transpose(x_nchw, (0, 2, 3, 1))  # NHWC
    for (w1, w2) in params:
        h = jax.nn.relu(x)
        h = lax.conv_general_dilated(
            h, w1, window_strides=(1, 1), padding="SAME",
            dimension_numbers=("NHWC", "HWIO", "NHWC"))
        h = jax.nn.relu(h)
        h = lax.conv_general_dilated(
            h, w2[None, None], window_strides=(1, 1), padding="VALID",
            dimension_numbers=("NHWC", "HWIO", "NHWC"))
        x = x + h
    x = jax.nn.relu(x)
    return jnp.transpose(x, (0, 3, 1, 2))


def init_params(key, in_channels, num_hiddens, num_residual_layers,
                num_residual_hiddens):
    """Deterministic synthetic weights (kaiming-ish scale), no bias."""
    assert in_channels == num_hiddens, "residual add requires Cin == num_hiddens"
    params = []
    for _ in range(num_residual_layers):
        k1, k2, key = jax.random.split(key, 3)
        fan1 = 3 * 3 * in_channels
        w1 = jax.random.normal(k1, (3, 3, in_channels, num_residual_hiddens),
                               jnp.float32) * (2.0 / fan1) ** 0.5
        fan2 = num_residual_hiddens
        w2 = jax.random.normal(k2, (num_residual_hiddens, num_hiddens),
                               jnp.float32) * (2.0 / fan2) ** 0.5
        params.append((w1, w2))
    return params


if __name__ == "__main__":
    key = jax.random.PRNGKey(0)
    kx, kp = jax.random.split(key)

    # Small shapes consistent with the module (in_channels == num_hiddens).
    N, C, H, W = 2, 8, 16, 16
    num_residual_layers = 2
    num_residual_hiddens = 4

    x = jax.random.normal(kx, (N, C, H, W), jnp.float32)   # NCHW like PyTorch
    params = init_params(kp, C, C, num_residual_layers, num_residual_hiddens)

    out = residual_stack_forward(x, params)
    out = jax.block_until_ready(out)

    ref = _reference_forward(x, params)
    assert out.shape == ref.shape == (N, C, H, W)
    assert jnp.allclose(out, ref, atol=1e-4, rtol=1e-4), "mismatch vs reference"

    print("KERNEL_OK")
</pallas_src>

<mosaic_0001>
module attributes {stable_mosaic.version = 11 : i64} {
  func.func @_residual_stack_kernel(%arg0: i32, %arg1: memref<1x256x8xf32, #tpu.memory_space<vmem>>, %arg2: memref<2x9x8x4xf32, #tpu.memory_space<vmem>>, %arg3: memref<2x4x8xf32, #tpu.memory_space<vmem>>, %arg4: memref<1x256x8xf32, #tpu.memory_space<vmem>>, %arg5: memref<18x18x8xf32, #tpu.memory_space<vmem>>, %arg6: memref<256x4xf32, #tpu.memory_space<vmem>>) attributes {dimension_semantics = [#tpu.dimension_semantics<parallel>], iteration_bounds = array<i64: 2>, scalar_prefetch = 0 : i64, scratch_operands = 2 : i64, tpu.core_type = #tpu.core_type<tc>, window_params = [{transform_indices = @transform_0, window_bounds = array<i64: 1, 256, 8>}, {pipeline_mode = #tpu.pipeline_mode<synchronous>, transform_indices = @transform_1, window_bounds = array<i64: 2, 9, 8, 4>}, {pipeline_mode = #tpu.pipeline_mode<synchronous>, transform_indices = @transform_2, window_bounds = array<i64: 2, 4, 8>}, {transform_indices = @transform_3, window_bounds = array<i64: 1, 256, 8>}]} {
    %cst = arith.constant 0.000000e+00 : f32
    %0 = vector.broadcast %cst : f32 to vector<18x18x8xf32>
    %c0 = arith.constant 0 : index
    %c0_0 = arith.constant 0 : index
    %c0_1 = arith.constant 0 : index
    %1 = vector.load %arg5[%c0, %c0_0, %c0_1] : memref<18x18x8xf32, #tpu.memory_space<vmem>>, vector<18x18x8xf32>
    tpu.vector_store %arg5[%c0, %c0_0, %c0_1], %0 {strides = array<i32>} : memref<18x18x8xf32, #tpu.memory_space<vmem>>, vector<18x18x8xf32>,
    %c0_2 = arith.constant 0 : index
    %c0_3 = arith.constant 0 : index
    %c0_4 = arith.constant 0 : index
    %2 = vector.load %arg1[%c0_2, %c0_3, %c0_4] : memref<1x256x8xf32, #tpu.memory_space<vmem>>, vector<1x256x8xf32>
    %3 = vector.shape_cast %2 : vector<1x256x8xf32> to vector<256x8xf32>
    %cst_5 = arith.constant 0.000000e+00 : f32
    %4 = vector.broadcast %cst_5 : f32 to vector<256x8xf32>
    %5 = arith.maximumf %3, %4 : vector<256x8xf32>
    %6 = vector.shape_cast %5 : vector<256x8xf32> to vector<16x16x8xf32>
    %c1 = arith.constant 1 : index
    %c1_6 = arith.constant 1 : index
    %c0_7 = arith.constant 0 : index
    %7 = vector.load %arg5[%c1, %c1_6, %c0_7] : memref<18x18x8xf32, #tpu.memory_space<vmem>>, vector<16x16x8xf32>
    tpu.vector_store %arg5[%c1, %c1_6, %c0_7], %6 {strides = array<i32>} : memref<18x18x8xf32, #tpu.memory_space<vmem>>, vector<16x16x8xf32>,
    %cst_8 = arith.constant 0.000000e+00 : f32
    %8 = vector.broadcast %cst_8 : f32 to vector<256x4xf32>
    %c0_9 = arith.constant 0 : index
    %c0_10 = arith.constant 0 : index
    %9 = vector.load %arg6[%c0_9, %c0_10] : memref<256x4xf32, #tpu.memory_space<vmem>>, vector<256x4xf32>
    tpu.vector_store %arg6[%c0_9, %c0_10], %8 {strides = array<i32>} : memref<256x4xf32, #tpu.memory_space<vmem>>, vector<256x4xf32>,
    %c0_11 = arith.constant 0 : index
    %c0_12 = arith.constant 0 : index
    %c0_13 = arith.constant 0 : index
    %10 = vector.load %arg5[%c0_11, %c0_12, %c0_13] : memref<18x18x8xf32, #tpu.memory_space<vmem>>, vector<16x16x8xf32>
    %11 = vector.shape_cast %10 : vector<16x16x8xf32> to vector<256x8xf32>
    %c0_14 = arith.constant 0 : index
    %c0_15 = arith.constant 0 : index
    %12 = vector.load %arg6[%c0_14, %c0_15] : memref<256x4xf32, #tpu.memory_space<vmem>>, vector<256x4xf32>
    %c0_16 = arith.constant 0 : index
    %c0_17 = arith.constant 0 : index
    %c0_18 = arith.constant 0 : index
    %c0_19 = arith.constant 0 : index
    %13 = vector.load %arg2[%c0_16, %c0_17, %c0_18, %c0_19] : memref<2x9x8x4xf32, #tpu.memory_space<vmem>>, vector<1x1x8x4xf32>
    %14 = vector.shape_cast %13 : vector<1x1x8x4xf32> to vector<8x4xf32>
    %cst_20 = arith.constant dense<0.000000e+00> : vector<256x4xf32>
    %15 = tpu.matmul %11, %14, %cst_20 {dimension_numbers = #tpu.dot_dimension_numbers<[1], [0], [0], [1], [0, 0, 1, 1], [], []>} : vector<256x8xf32>, vector<8x4xf32>, vector<256x4xf32> -> vector<256x4xf32>
    %16 = arith.addf %12, %15 : vector<256x4xf32>
    %c0_21 = arith.constant 0 : index
    %c0_22 = arith.constant 0 : index
    %17 = vector.load %arg6[%c0_21, %c0_22] : memref<256x4xf32, #tpu.memory_space<vmem>>, vector<256x4xf32>
    tpu.vector_store %arg6[%c0_21, %c0_22], %16 {strides = array<i32>} : memref<256x4xf32, #tpu.memory_space<vmem>>, vector<256x4xf32>,
    %c0_23 = arith.constant 0 : index
    %c1_24 = arith.constant 1 : index
    %c0_25 = arith.constant 0 : index
    %18 = vector.load %arg5[%c0_23, %c1_24, %c0_25] : memref<18x18x8xf32, #tpu.memory_space<vmem>>, vector<16x16x8xf32>
    %19 = vector.shape_cast %18 : vector<16x16x8xf32> to vector<256x8xf32>
    %c0_26 = arith.constant 0 : index
    %c0_27 = arith.constant 0 : index
    %20 = vector.load %arg6[%c0_26, %c0_27] : memref<256x4xf32, #tpu.memory_space<vmem>>, vector<256x4xf32>
    %c0_28 = arith.constant 0 : index
    %c1_29 = arith.constant 1 : index
    %c0_30 = arith.constant 0 : index
    %c0_31 = arith.constant 0 : index
    %21 = vector.load %arg2[%c0_28, %c1_29, %c0_30, %c0_31] : memref<2x9x8x4xf32, #tpu.memory_space<vmem>>, vector<1x1x8x4xf32>
    %22 = vector.shape_cast %21 : vector<1x1x8x4xf32> to vector<8x4xf32>
    %cst_32 = arith.constant dense<0.000000e+00> : vector<256x4xf32>
    %23 = tpu.matmul %19, %22, %cst_32 {dimension_numbers = #tpu.dot_dimension_numbers<[1], [0], [0], [1], [0, 0, 1, 1], [], []>} : vector<256x8xf32>, vector<8x4xf32>, vector<256x4xf32> -> vector<256x4xf32>
    %24 = arith.addf %20, %23 : vector<256x4xf32>
    %c0_33 = arith.constant 0 : index
    %c0_34 = arith.constant 0 : index
    %25 = vector.load %arg6[%c0_33, %c0_34] : memref<256x4xf32, #tpu.memory_space<vmem>>, vector<256x4xf32>
    tpu.vector_store %arg6[%c0_33, %c0_34], %24 {strides = array<i32>} : memref<256x4xf32, #tpu.memory_space<vmem>>, vector<256x4xf32>,
    %c0_35 = arith.constant 0 : index
    %c2 = arith.constant 2 : index
    %c0_36 = arith.constant 0 : index
    %26 = vector.load %arg5[%c0_35, %c2, %c0_36] : memref<18x18x8xf32, #tpu.memory_space<vmem>>, vector<16x16x8xf32>
    %27 = vector.shape_cast %26 : vector<16x16x8xf32> to vector<256x8xf32>
    %c0_37 = arith.constant 0 : index
    %c0_38 = arith.constant 0 : index
    %28 = vector.load %arg6[%c0_37, %c0_38] : memref<256x4xf32, #tpu.memory_space<vmem>>, vector<256x4xf32>
    %c0_39 = arith.constant 0 : index
    %c2_40 = arith.constant 2 : index
    %c0_41 = arith.constant 0 : index
    %c0_42 = arith.constant 0 : index
    %29 = vector.load %arg2[%c0_39, %c2_40, %c0_41, %c0_42] : memref<2x9x8x4xf32, #tpu.memory_space<vmem>>, vector<1x1x8x4xf32>
    %30 = vector.shape_cast %29 : vector<1x1x8x4xf32> to vector<8x4xf32>
    %cst_43 = arith.constant dense<0.000000e+00> : vector<256x4xf32>
    %31 = tpu.matmul %27, %30, %cst_43 {dimension_numbers = #tpu.dot_dimension_numbers<[1], [0], [0], [1], [0, 0, 1, 1], [], []>} : vector<256x8xf32>, vector<8x4xf32>, vector<256x4xf32> -> vector<256x4xf32>
    %32 = arith.addf %28, %31 : vector<256x4xf32>
    %c0_44 = arith.constant 0 : index
    %c0_45 = arith.constant 0 : index
    %33 = vector.load %arg6[%c0_44, %c0_45] : memref<256x4xf32, #tpu.memory_space<vmem>>, vector<256x4xf32>
    tpu.vector_store %arg6[%c0_44, %c0_45], %32 {strides = array<i32>} : memref<256x4xf32, #tpu.memory_space<vmem>>, vector<256x4xf32>,
    %c1_46 = arith.constant 1 : index
    %c0_47 = arith.constant 0 : index
    %c0_48 = arith.constant 0 : index
    %34 = vector.load %arg5[%c1_46, %c0_47, %c0_48] : memref<18x18x8xf32, #tpu.memory_space<vmem>>, vector<16x16x8xf32>
    %35 = vector.shape_cast %34 : vector<16x16x8xf32> to vector<256x8xf32>
    %c0_49 = arith.constant 0 : index
    %c0_50 = arith.constant 0 : index
    %36 = vector.load %arg6[%c0_49, %c0_50] : memref<256x4xf32, #tpu.memory_space<vmem>>, vector<256x4xf32>
    %c0_51 = arith.constant 0 : index
    %c3 = arith.constant 3 : index
    %c0_52 = arith.constant 0 : index
    %c0_53 = arith.constant 0 : index
    %37 = vector.load %arg2[%c0_51, %c3, %c0_52, %c0_53] : memref<2x9x8x4xf32, #tpu.memory_space<vmem>>, vector<1x1x8x4xf32>
    %38 = vector.shape_cast %37 : vector<1x1x8x4xf32> to vector<8x4xf32>
    %cst_54 = arith.constant dense<0.000000e+00> : vector<256x4xf32>
    %39 = tpu.matmul %35, %38, %cst_54 {dimension_numbers = #tpu.dot_dimension_numbers<[1], [0], [0], [1], [0, 0, 1, 1], [], []>} : vector<256x8xf32>, vector<8x4xf32>, vector<256x4xf32> -> vector<256x4xf32>
    %40 = arith.addf %36, %39 : vector<256x4xf32>
    %c0_55 = arith.constant 0 : index
    %c0_56 = arith.constant 0 : index
    %41 = vector.load %arg6[%c0_55, %c0_56] : memref<256x4xf32, #tpu.memory_space<vmem>>, vector<256x4xf32>
    tpu.vector_store %arg6[%c0_55, %c0_56], %40 {strides = array<i32>} : memref<256x4xf32, #tpu.memory_space<vmem>>, vector<256x4xf32>,
    %c1_57 = arith.constant 1 : index
    %c1_58 = arith.constant 1 : index
    %c0_59 = arith.constant 0 : index
    %42 = vector.load %arg5[%c1_57, %c1_58, %c0_59] : memref<18x18x8xf32, #tpu.memory_space<vmem>>, vector<16x16x8xf32>
    %43 = vector.shape_cast %42 : vector<16x16x8xf32> to vector<256x8xf32>
    %c0_60 = arith.constant 0 : index
    %c0_61 = arith.constant 0 : index
    %44 = vector.load %arg6[%c0_60, %c0_61] : memref<256x4xf32, #tpu.memory_space<vmem>>, vector<256x4xf32>
    %c0_62 = arith.constant 0 : index
    %c4 = arith.constant 4 : index
    %c0_63 = arith.constant 0 : index
    %c0_64 = arith.constant 0 : index
    %45 = vector.load %arg2[%c0_62, %c4, %c0_63, %c0_64] : memref<2x9x8x4xf32, #tpu.memory_space<vmem>>, vector<1x1x8x4xf32>
    %46 = vector.shape_cast %45 : vector<1x1x8x4xf32> to vector<8x4xf32>
    %cst_65 = arith.constant dense<0.000000e+00> : vector<256x4xf32>
    %47 = tpu.matmul %43, %46, %cst_65 {dimension_numbers = #tpu.dot_dimension_numbers<[1], [0], [0], [1], [0, 0, 1, 1], [], []>} : vector<256x8xf32>, vector<8x4xf32>, vector<256x4xf32> -> vector<256x4xf32>
    %48 = arith.addf %44, %47 : vector<256x4xf32>
    %c0_66 = arith.constant 0 : index
    %c0_67 = arith.constant 0 : index
    %49 = vector.load %arg6[%c0_66, %c0_67] : memref<256x4xf32, #tpu.memory_space<vmem>>, vector<256x4xf32>
    tpu.vector_store %arg6[%c0_66, %c0_67], %48 {strides = array<i32>} : memref<256x4xf32, #tpu.memory_space<vmem>>, vector<256x4xf32>,
    %c1_68 = arith.constant 1 : index
    %c2_69 = arith.constant 2 : index
    %c0_70 = arith.constant 0 : index
    %50 = vector.load %arg5[%c1_68, %c2_69, %c0_70] : memref<18x18x8xf32, #tpu.memory_space<vmem>>, vector<16x16x8xf32>
    %51 = vector.shape_cast %50 : vector<16x16x8xf32> to vector<256x8xf32>
    %c0_71 = arith.constant 0 : index
    %c0_72 = arith.constant 0 : index
    %52 = vector.load %arg6[%c0_71, %c0_72] : memref<256x4xf32, #tpu.memory_space<vmem>>, vector<256x4xf32>
    %c0_73 = arith.constant 0 : index
    %c5 = arith.constant 5 : index
    %c0_74 = arith.constant 0 : index
    %c0_75 = arith.constant 0 : index
    %53 = vector.load %arg2[%c0_73, %c5, %c0_74, %c0_75] : memref<2x9x8x4xf32, #tpu.memory_space<vmem>>, vector<1x1x8x4xf32>
    %54 = vector.shape_cast %53 : vector<1x1x8x4xf32> to vector<8x4xf32>
    %cst_76 = arith.constant dense<0.000000e+00> : vector<256x4xf32>
    %55 = tpu.matmul %51, %54, %cst_76 {dimension_numbers = #tpu.dot_dimension_numbers<[1], [0], [0], [1], [0, 0, 1, 1], [], []>} : vector<256x8xf32>, vector<8x4xf32>, vector<256x4xf32> -> vector<256x4xf32>
    %56 = arith.addf %52, %55 : vector<256x4xf32>
    %c0_77 = arith.constant 0 : index
    %c0_78 = arith.constant 0 : index
    %57 = vector.load %arg6[%c0_77, %c0_78] : memref<256x4xf32, #tpu.memory_space<vmem>>, vector<256x4xf32>
    tpu.vector_store %arg6[%c0_77, %c0_78], %56 {strides = array<i32>} : memref<256x4xf32, #tpu.memory_space<vmem>>, vector<256x4xf32>,
    %c2_79 = arith.constant 2 : index
    %c0_80 = arith.constant 0 : index
    %c0_81 = arith.constant 0 : index
    %58 = vector.load %arg5[%c2_79, %c0_80, %c0_81] : memref<18x18x8xf32, #tpu.memory_space<vmem>>, vector<16x16x8xf32>
    %59 = vector.shape_cast %58 : vector<16x16x8xf32> to vector<256x8xf32>
    %c0_82 = arith.constant 0 : index
    %c0_83 = arith.constant 0 : index
    %60 = vector.load %arg6[%c0_82, %c0_83] : memref<256x4xf32, #tpu.memory_space<vmem>>, vector<256x4xf32>
    %c0_84 = arith.constant 0 : index
    %c6 = arith.constant 6 : index
    %c0_85 = arith.constant 0 : index
    %c0_86 = arith.constant 0 : index
    %61 = vector.load %arg2[%c0_84, %c6, %c0_85, %c0_86] : memref<2x9x8x4xf32, #tpu.memory_space<vmem>>, vector<1x1x8x4xf32>
    %62 = vector.shape_cast %61 : vector<1x1x8x4xf32> to vector<8x4xf32>
    %cst_87 = arith.constant dense<0.000000e+00> : vector<256x4xf32>
    %63 = tpu.matmul %59, %62, %cst_87 {dimension_numbers = #tpu.dot_dimension_numbers<[1], [0], [0], [1], [0, 0, 1, 1], [], []>} : vector<256x8xf32>, vector<8x4xf32>, vector<256x4xf32> -> vector<256x4xf32>
    %64 = arith.addf %60, %63 : vector<256x4xf32>
    %c0_88 = arith.constant 0 : index
    %c0_89 = arith.constant 0 : index
    %65 = vector.load %arg6[%c0_88, %c0_89] : memref<256x4xf32, #tpu.memory_space<vmem>>, vector<256x4xf32>
    tpu.vector_store %arg6[%c0_88, %c0_89], %64 {strides = array<i32>} : memref<256x4xf32, #tpu.memory_space<vmem>>, vector<256x4xf32>,
    %c2_90 = arith.constant 2 : index
    %c1_91 = arith.constant 1 : index
    %c0_92 = arith.constant 0 : index
    %66 = vector.load %arg5[%c2_90, %c1_91, %c0_92] : memref<18x18x8xf32, #tpu.memory_space<vmem>>, vector<16x16x8xf32>
    %67 = vector.shape_cast %66 : vector<16x16x8xf32> to vector<256x8xf32>
    %c0_93 = arith.constant 0 : index
    %c0_94 = arith.constant 0 : index
    %68 = vector.load %arg6[%c0_93, %c0_94] : memref<256x4xf32, #tpu.memory_space<vmem>>, vector<256x4xf32>
    %c0_95 = arith.constant 0 : index
    %c7 = arith.constant 7 : index
    %c0_96 = arith.constant 0 : index
    %c0_97 = arith.constant 0 : index
    %69 = vector.load %arg2[%c0_95, %c7, %c0_96, %c0_97] : memref<2x9x8x4xf32, #tpu.memory_space<vmem>>, vector<1x1x8x4xf32>
    %70 = vector.shape_cast %69 : vector<1x1x8x4xf32> to vector<8x4xf32>
    %cst_98 = arith.constant dense<0.000000e+00> : vector<256x4xf32>
    %71 = tpu.matmul %67, %70, %cst_98 {dimension_numbers = #tpu.dot_dimension_numbers<[1], [0], [0], [1], [0, 0, 1, 1], [], []>} : vector<256x8xf32>, vector<8x4xf32>, vector<256x4xf32> -> vector<256x4xf32>
    %72 = arith.addf %68, %71 : vector<256x4xf32>
    %c0_99 = arith.constant 0 : index
    %c0_100 = arith.constant 0 : index
    %73 = vector.load %arg6[%c0_99, %c0_100] : memref<256x4xf32, #tpu.memory_space<vmem>>, vector<256x4xf32>
    tpu.vector_store %arg6[%c0_99, %c0_100], %72 {strides = array<i32>} : memref<256x4xf32, #tpu.memory_space<vmem>>, vector<256x4xf32>,
    %c2_101 = arith.constant 2 : index
    %c2_102 = arith.constant 2 : index
    %c0_103 = arith.constant 0 : index
    %74 = vector.load %arg5[%c2_101, %c2_102, %c0_103] : memref<18x18x8xf32, #tpu.memory_space<vmem>>, vector<16x16x8xf32>
    %75 = vector.shape_cast %74 : vector<16x16x8xf32> to vector<256x8xf32>
    %c0_104 = arith.constant 0 : index
    %c0_105 = arith.constant 0 : index
    %76 = vector.load %arg6[%c0_104, %c0_105] : memref<256x4xf32, #tpu.memory_space<vmem>>, vector<256x4xf32>
    %c0_106 = arith.constant 0 : index
    %c8 = arith.constant 8 : index
    %c0_107 = arith.constant 0 : index
    %c0_108 = arith.constant 0 : index
    %77 = vector.load %arg2[%c0_106, %c8, %c0_107, %c0_108] : memref<2x9x8x4xf32, #tpu.memory_space<vmem>>, vector<1x1x8x4xf32>
    %78 = vector.shape_cast %77 : vector<1x1x8x4xf32> to vector<8x4xf32>
    %cst_109 = arith.constant dense<0.000000e+00> : vector<256x4xf32>
    %79 = tpu.matmul %75, %78, %cst_109 {dimension_numbers = #tpu.dot_dimension_numbers<[1], [0], [0], [1], [0, 0, 1, 1], [], []>} : vector<256x8xf32>, vector<8x4xf32>, vector<256x4xf32> -> vector<256x4xf32>
    %80 = arith.addf %76, %79 : vector<256x4xf32>
    %c0_110 = arith.constant 0 : index
    %c0_111 = arith.constant 0 : index
    %81 = vector.load %arg6[%c0_110, %c0_111] : memref<256x4xf32, #tpu.memory_space<vmem>>, vector<256x4xf32>
    tpu.vector_store %arg6[%c0_110, %c0_111], %80 {strides = array<i32>} : memref<256x4xf32, #tpu.memory_space<vmem>>, vector<256x4xf32>,
    %c0_112 = arith.constant 0 : index
    %c0_113 = arith.constant 0 : index
    %82 = vector.load %arg6[%c0_112, %c0_113] : memref<256x4xf32, #tpu.memory_space<vmem>>, vector<256x4xf32>
    %cst_114 = arith.constant 0.000000e+00 : f32
    %83 = vector.broadcast %cst_114 : f32 to vector<256x4xf32>
    %84 = arith.maximumf %82, %83 : vector<256x4xf32>
    %c0_115 = arith.constant 0 : index
    %c0_116 = arith.constant 0 : index
    %c0_117 = arith.constant 0 : index
    %85 = vector.load %arg3[%c0_115, %c0_116, %c0_117] : memref<2x4x8xf32, #tpu.memory_space<vmem>>, vector<1x4x8xf32>
    %86 = vector.shape_cast %85 : vector<1x4x8xf32> to vector<4x8xf32>
    %cst_118 = arith.constant dense<0.000000e+00> : vector<256x8xf32>
    %87 = tpu.matmul %84, %86, %cst_118 {dimension_numbers = #tpu.dot_dimension_numbers<[1], [0], [0], [1], [0, 0, 1, 1], [], []>} : vector<256x4xf32>, vector<4x8xf32>, vector<256x8xf32> -> vector<256x8xf32>
    %88 = arith.addf %3, %87 : vector<256x8xf32>
    %cst_119 = arith.constant 0.000000e+00 : f32
    %89 = vector.broadcast %cst_119 : f32 to vector<256x8xf32>
    %90 = arith.maximumf %88, %89 : vector<256x8xf32>
    %91 = vector.shape_cast %90 : vector<256x8xf32> to vector<16x16x8xf32>
    %c1_120 = arith.constant 1 : index
    %c1_121 = arith.constant 1 : index
    %c0_122 = arith.constant 0 : index
    %92 = vector.load %arg5[%c1_120, %c1_121, %c0_122] : memref<18x18x8xf32, #tpu.memory_space<vmem>>, vector<16x16x8xf32>
    tpu.vector_store %arg5[%c1_120, %c1_121, %c0_122], %91 {strides = array<i32>} : memref<18x18x8xf32, #tpu.memory_space<vmem>>, vector<16x16x8xf32>,
    %cst_123 = arith.constant 0.000000e+00 : f32
    %93 = vector.broadcast %cst_123 : f32 to vector<256x4xf32>
    %c0_124 = arith.constant 0 : index
    %c0_125 = arith.constant 0 : index
    %94 = vector.load %arg6[%c0_124, %c0_125] : memref<256x4xf32, #tpu.memory_space<vmem>>, vector<256x4xf32>
    tpu.vector_store %arg6[%c0_124, %c0_125], %93 {strides = array<i32>} : memref<256x4xf32, #tpu.memory_space<vmem>>, vector<256x4xf32>,
    %c0_126 = arith.constant 0 : index
    %c0_127 = arith.constant 0 : index
    %c0_128 = arith.constant 0 : index
    %95 = vector.load %arg5[%c0_126, %c0_127, %c0_128] : memref<18x18x8xf32, #tpu.memory_space<vmem>>, vector<16x16x8xf32>
    %96 = vector.shape_cast %95 : vector<16x16x8xf32> to vector<256x8xf32>
    %c0_129 = arith.constant 0 : index
    %c0_130 = arith.constant 0 : index
    %97 = vector.load %arg6[%c0_129, %c0_130] : memref<256x4xf32, #tpu.memory_space<vmem>>, vector<256x4xf32>
    %c1_131 = arith.constant 1 : index
    %c0_132 = arith.constant 0 : index
    %c0_133 = arith.constant 0 : index
    %c0_134 = arith.constant 0 : index
    %98 = vector.load %arg2[%c1_131, %c0_132, %c0_133, %c0_134] : memref<2x9x8x4xf32, #tpu.memory_space<vmem>>, vector<1x1x8x4xf32>
    %99 = vector.shape_cast %98 : vector<1x1x8x4xf32> to vector<8x4xf32>
    %cst_135 = arith.constant dense<0.000000e+00> : vector<256x4xf32>
    %100 = tpu.matmul %96, %99, %cst_135 {dimension_numbers = #tpu.dot_dimension_numbers<[1], [0], [0], [1], [0, 0, 1, 1], [], []>} : vector<256x8xf32>, vector<8x4xf32>, vector<256x4xf32> -> vector<256x4xf32>
    %101 = arith.addf %97, %100 : vector<256x4xf32>
    %c0_136 = arith.constant 0 : index
    %c0_137 = arith.constant 0 : index
    %102 = vector.load %arg6[%c0_136, %c0_137] : memref<256x4xf32, #tpu.memory_space<vmem>>, vector<256x4xf32>
    tpu.vector_store %arg6[%c0_136, %c0_137], %101 {strides = array<i32>} : memref<256x4xf32, #tpu.memory_space<vmem>>, vector<256x4xf32>,
    %c0_138 = arith.constant 0 : index
    %c1_139 = arith.constant 1 : index
    %c0_140 = arith.constant 0 : index
    %103 = vector.load %arg5[%c0_138, %c1_139, %c0_140] : memref<18x18x8xf32, #tpu.memory_space<vmem>>, vector<16x16x8xf32>
    %104 = vector.shape_cast %103 : vector<16x16x8xf32> to vector<256x8xf32>
    %c0_141 = arith.constant 0 : index
    %c0_142 = arith.constant 0 : index
    %105 = vector.load %arg6[%c0_141, %c0_142] : memref<256x4xf32, #tpu.memory_space<vmem>>, vector<256x4xf32>
    %c1_143 = arith.constant 1 : index
    %c1_144 = arith.constant 1 : index
    %c0_145 = arith.constant 0 : index
    %c0_146 = arith.constant 0 : index
    %106 = vector.load %arg2[%c1_143, %c1_144, %c0_145, %c0_146] : memref<2x9x8x4xf32, #tpu.memory_space<vmem>>, vector<1x1x8x4xf32>
    %107 = vector.shape_cast %106 : vector<1x1x8x4xf32> to vector<8x4xf32>
    %cst_147 = arith.constant dense<0.000000e+00> : vector<256x4xf32>
    %108 = tpu.matmul %104, %107, %cst_147 {dimension_numbers = #tpu.dot_dimension_numbers<[1], [0], [0], [1], [0, 0, 1, 1], [], []>} : vector<256x8xf32>, vector<8x4xf32>, vector<256x4xf32> -> vector<256x4xf32>
    %109 = arith.addf %105, %108 : vector<256x4xf32>
    %c0_148 = arith.constant 0 : index
    %c0_149 = arith.constant 0 : index
    %110 = vector.load %arg6[%c0_148, %c0_149] : memref<256x4xf32, #tpu.memory_space<vmem>>, vector<256x4xf32>
    tpu.vector_store %arg6[%c0_148, %c0_149], %109 {strides = array<i32>} : memref<256x4xf32, #tpu.memory_space<vmem>>, vector<256x4xf32>,
    %c0_150 = arith.constant 0 : index
    %c2_151 = arith.constant 2 : index
    %c0_152 = arith.constant 0 : index
    %111 = vector.load %arg5[%c0_150, %c2_151, %c0_152] : memref<18x18x8xf32, #tpu.memory_space<vmem>>, vector<16x16x8xf32>
    %112 = vector.shape_cast %111 : vector<16x16x8xf32> to vector<256x8xf32>
    %c0_153 = arith.constant 0 : index
    %c0_154 = arith.constant 0 : index
    %113 = vector.load %arg6[%c0_153, %c0_154] : memref<256x4xf32, #tpu.memory_space<vmem>>, vector<256x4xf32>
    %c1_155 = arith.constant 1 : index
    %c2_156 = arith.constant 2 : index
    %c0_157 = arith.constant 0 : index
    %c0_158 = arith.constant 0 : index
    %114 = vector.load %arg2[%c1_155, %c2_156, %c0_157, %c0_158] : memref<2x9x8x4xf32, #tpu.memory_space<vmem>>, vector<1x1x8x4xf32>
    %115 = vector.shape_cast %114 : vector<1x1x8x4xf32> to vector<8x4xf32>
    %cst_159 = arith.constant dense<0.000000e+00> : vector<256x4xf32>
    %116 = tpu.matmul %112, %115, %cst_159 {dimension_numbers = #tpu.dot_dimension_numbers<[1], [0], [0], [1], [0, 0, 1, 1], [], []>} : vector<256x8xf32>, vector<8x4xf32>, vector<256x4xf32> -> vector<256x4xf32>
    %117 = arith.addf %113, %116 : vector<256x4xf32>
    %c0_160 = arith.constant 0 : index
    %c0_161 = arith.constant 0 : index
    %118 = vector.load %arg6[%c0_160, %c0_161] : memref<256x4xf32, #tpu.memory_space<vmem>>, vector<256x4xf32>
    tpu.vector_store %arg6[%c0_160, %c0_161], %117 {strides = array<i32>} : memref<256x4xf32, #tpu.memory_space<vmem>>, vector<256x4xf32>,
    %c1_162 = arith.constant 1 : index
    %c0_163 = arith.constant 0 : index
    %c0_164 = arith.constant 0 : index
    %119 = vector.load %arg5[%c1_162, %c0_163, %c0_164] : memref<18x18x8xf32, #tpu.memory_space<vmem>>, vector<16x16x8xf32>
    %120 = vector.shape_cast %119 : vector<16x16x8xf32> to vector<256x8xf32>
    %c0_165 = arith.constant 0 : index
    %c0_166 = arith.constant 0 : index
    %121 = vector.load %arg6[%c0_165, %c0_166] : memref<256x4xf32, #tpu.memory_space<vmem>>, vector<256x4xf32>
    %c1_167 = arith.constant 1 : index
    %c3_168 = arith.constant 3 : index
    %c0_169 = arith.constant 0 : index
    %c0_170 = arith.constant 0 : index
    %122 = vector.load %arg2[%c1_167, %c3_168, %c0_169, %c0_170] : memref<2x9x8x4xf32, #tpu.memory_space<vmem>>, vector<1x1x8x4xf32>
    %123 = vector.shape_cast %122 : vector<1x1x8x4xf32> to vector<8x4xf32>
    %cst_171 = arith.constant dense<0.000000e+00> : vector<256x4xf32>
    %124 = tpu.matmul %120, %123, %cst_171 {dimension_numbers = #tpu.dot_dimension_numbers<[1], [0], [0], [1], [0, 0, 1, 1], [], []>} : vector<256x8xf32>, vector<8x4xf32>, vector<256x4xf32> -> vector<256x4xf32>
    %125 = arith.addf %121, %124 : vector<256x4xf32>
    %c0_172 = arith.constant 0 : index
    %c0_173 = arith.constant 0 : index
    %126 = vector.load %arg6[%c0_172, %c0_173] : memref<256x4xf32, #tpu.memory_space<vmem>>, vector<256x4xf32>
    tpu.vector_store %arg6[%c0_172, %c0_173], %125 {strides = array<i32>} : memref<256x4xf32, #tpu.memory_space<vmem>>, vector<256x4xf32>,
    %c1_174 = arith.constant 1 : index
    %c1_175 = arith.constant 1 : index
    %c0_176 = arith.constant 0 : index
    %127 = vector.load %arg5[%c1_174, %c1_175, %c0_176] : memref<18x18x8xf32, #tpu.memory_space<vmem>>, vector<16x16x8xf32>
    %128 = vector.shape_cast %127 : vector<16x16x8xf32> to vector<256x8xf32>
    %c0_177 = arith.constant 0 : index
    %c0_178 = arith.constant 0 : index
    %129 = vector.load %arg6[%c0_177, %c0_178] : memref<256x4xf32, #tpu.memory_space<vmem>>, vector<256x4xf32>
    %c1_179 = arith.constant 1 : index
    %c4_180 = arith.constant 4 : index
    %c0_181 = arith.constant 0 : index
    %c0_182 = arith.constant 0 : index
    %130 = vector.load %arg2[%c1_179, %c4_180, %c0_181, %c0_182] : memref<2x9x8x4xf32, #tpu.memory_space<vmem>>, vector<1x1x8x4xf32>
    %131 = vector.shape_cast %130 : vector<1x1x8x4xf32> to vector<8x4xf32>
    %cst_183 = arith.constant dense<0.000000e+00> : vector<256x4xf32>
    %132 = tpu.matmul %128, %131, %cst_183 {dimension_numbers = #tpu.dot_dimension_numbers<[1], [0], [0], [1], [0, 0, 1, 1], [], []>} : vector<256x8xf32>, vector<8x4xf32>, vector<256x4xf32> -> vector<256x4xf32>
    %133 = arith.addf %129, %132 : vector<256x4xf32>
    %c0_184 = arith.constant 0 : index
    %c0_185 = arith.constant 0 : index
    %134 = vector.load %arg6[%c0_184, %c0_185] : memref<256x4xf32, #tpu.memory_space<vmem>>, vector<256x4xf32>
    tpu.vector_store %arg6[%c0_184, %c0_185], %133 {strides = array<i32>} : memref<256x4xf32, #tpu.memory_space<vmem>>, vector<256x4xf32>,
    %c1_186 = arith.constant 1 : index
    %c2_187 = arith.constant 2 : index
    %c0_188 = arith.constant 0 : index
    %135 = vector.load %arg5[%c1_186, %c2_187, %c0_188] : memref<18x18x8xf32, #tpu.memory_space<vmem>>, vector<16x16x8xf32>
    %136 = vector.shape_cast %135 : vector<16x16x8xf32> to vector<256x8xf32>
    %c0_189 = arith.constant 0 : index
    %c0_190 = arith.constant 0 : index
    %137 = vector.load %arg6[%c0_189, %c0_190] : memref<256x4xf32, #tpu.memory_space<vmem>>, vector<256x4xf32>
    %c1_191 = arith.constant 1 : index
    %c5_192 = arith.constant 5 : index
    %c0_193 = arith.constant 0 : index
    %c0_194 = arith.constant 0 : index
    %138 = vector.load %arg2[%c1_191, %c5_192, %c0_193, %c0_194] : memref<2x9x8x4xf32, #tpu.memory_space<vmem>>, vector<1x1x8x4xf32>
    %139 = vector.shape_cast %138 : vector<1x1x8x4xf32> to vector<8x4xf32>
    %cst_195 = arith.constant dense<0.000000e+00> : vector<256x4xf32>
    %140 = tpu.matmul %136, %139, %cst_195 {dimension_numbers = #tpu.dot_dimension_numbers<[1], [0], [0], [1], [0, 0, 1, 1], [], []>} : vector<256x8xf32>, vector<8x4xf32>, vector<256x4xf32> -> vector<256x4xf32>
    %141 = arith.addf %137, %140 : vector<256x4xf32>
    %c0_196 = arith.constant 0 : index
    %c0_197 = arith.constant 0 : index
    %142 = vector.load %arg6[%c0_196, %c0_197] : memref<256x4xf32, #tpu.memory_space<vmem>>, vector<256x4xf32>
    tpu.vector_store %arg6[%c0_196, %c0_197], %141 {strides = array<i32>} : memref<256x4xf32, #tpu.memory_space<vmem>>, vector<256x4xf32>,
    %c2_198 = arith.constant 2 : index
    %c0_199 = arith.constant 0 : index
    %c0_200 = arith.constant 0 : index
    %143 = vector.load %arg5[%c2_198, %c0_199, %c0_200] : memref<18x18x8xf32, #tpu.memory_space<vmem>>, vector<16x16x8xf32>
    %144 = vector.shape_cast %143 : vector<16x16x8xf32> to vector<256x8xf32>
    %c0_201 = arith.constant 0 : index
    %c0_202 = arith.constant 0 : index
    %145 = vector.load %arg6[%c0_201, %c0_202] : memref<256x4xf32, #tpu.memory_space<vmem>>, vector<256x4xf32>
    %c1_203 = arith.constant 1 : index
    %c6_204 = arith.constant 6 : index
    %c0_205 = arith.constant 0 : index
    %c0_206 = arith.constant 0 : index
    %146 = vector.load %arg2[%c1_203, %c6_204, %c0_205, %c0_206] : memref<2x9x8x4xf32, #tpu.memory_space<vmem>>, vector<1x1x8x4xf32>
    %147 = vector.shape_cast %146 : vector<1x1x8x4xf32> to vector<8x4xf32>
    %cst_207 = arith.constant dense<0.000000e+00> : vector<256x4xf32>
    %148 = tpu.matmul %144, %147, %cst_207 {dimension_numbers = #tpu.dot_dimension_numbers<[1], [0], [0], [1], [0, 0, 1, 1], [], []>} : vector<256x8xf32>, vector<8x4xf32>, vector<256x4xf32> -> vector<256x4xf32>
    %149 = arith.addf %145, %148 : vector<256x4xf32>
    %c0_208 = arith.constant 0 : index
    %c0_209 = arith.constant 0 : index
    %150 = vector.load %arg6[%c0_208, %c0_209] : memref<256x4xf32, #tpu.memory_space<vmem>>, vector<256x4xf32>
    tpu.vector_store %arg6[%c0_208, %c0_209], %149 {strides = array<i32>} : memref<256x4xf32, #tpu.memory_space<vmem>>, vector<256x4xf32>,
    %c2_210 = arith.constant 2 : index
    %c1_211 = arith.constant 1 : index
    %c0_212 = arith.constant 0 : index
    %151 = vector.load %arg5[%c2_210, %c1_211, %c0_212] : memref<18x18x8xf32, #tpu.memory_space<vmem>>, vector<16x16x8xf32>
    %152 = vector.shape_cast %151 : vector<16x16x8xf32> to vector<256x8xf32>
    %c0_213 = arith.constant 0 : index
    %c0_214 = arith.constant 0 : index
    %153 = vector.load %arg6[%c0_213, %c0_214] : memref<256x4xf32, #tpu.memory_space<vmem>>, vector<256x4xf32>
    %c1_215 = arith.constant 1 : index
    %c7_216 = arith.constant 7 : index
    %c0_217 = arith.constant 0 : index
    %c0_218 = arith.constant 0 : index
    %154 = vector.load %arg2[%c1_215, %c7_216, %c0_217, %c0_218] : memref<2x9x8x4xf32, #tpu.memory_space<vmem>>, vector<1x1x8x4xf32>
    %155 = vector.shape_cast %154 : vector<1x1x8x4xf32> to vector<8x4xf32>
    %cst_219 = arith.constant dense<0.000000e+00> : vector<256x4xf32>
    %156 = tpu.matmul %152, %155, %cst_219 {dimension_numbers = #tpu.dot_dimension_numbers<[1], [0], [0], [1], [0, 0, 1, 1], [], []>} : vector<256x8xf32>, vector<8x4xf32>, vector<256x4xf32> -> vector<256x4xf32>
    %157 = arith.addf %153, %156 : vector<256x4xf32>
    %c0_220 = arith.constant 0 : index
    %c0_221 = arith.constant 0 : index
    %158 = vector.load %arg6[%c0_220, %c0_221] : memref<256x4xf32, #tpu.memory_space<vmem>>, vector<256x4xf32>
    tpu.vector_store %arg6[%c0_220, %c0_221], %157 {strides = array<i32>} : memref<256x4xf32, #tpu.memory_space<vmem>>, vector<256x4xf32>,
    %c2_222 = arith.constant 2 : index
    %c2_223 = arith.constant 2 : index
    %c0_224 = arith.constant 0 : index
    %159 = vector.load %arg5[%c2_222, %c2_223, %c0_224] : memref<18x18x8xf32, #tpu.memory_space<vmem>>, vector<16x16x8xf32>
    %160 = vector.shape_cast %159 : vector<16x16x8xf32> to vector<256x8xf32>
    %c0_225 = arith.constant 0 : index
    %c0_226 = arith.constant 0 : index
    %161 = vector.load %arg6[%c0_225, %c0_226] : memref<256x4xf32, #tpu.memory_space<vmem>>, vector<256x4xf32>
    %c1_227 = arith.constant 1 : index
    %c8_228 = arith.constant 8 : index
    %c0_229 = arith.constant 0 : index
    %c0_230 = arith.constant 0 : index
    %162 = vector.load %arg2[%c1_227, %c8_228, %c0_229, %c0_230] : memref<2x9x8x4xf32, #tpu.memory_space<vmem>>, vector<1x1x8x4xf32>
    %163 = vector.shape_cast %162 : vector<1x1x8x4xf32> to vector<8x4xf32>
    %cst_231 = arith.constant dense<0.000000e+00> : vector<256x4xf32>
    %164 = tpu.matmul %160, %163, %cst_231 {dimension_numbers = #tpu.dot_dimension_numbers<[1], [0], [0], [1], [0, 0, 1, 1], [], []>} : vector<256x8xf32>, vector<8x4xf32>, vector<256x4xf32> -> vector<256x4xf32>
    %165 = arith.addf %161, %164 : vector<256x4xf32>
    %c0_232 = arith.constant 0 : index
    %c0_233 = arith.constant 0 : index
    %166 = vector.load %arg6[%c0_232, %c0_233] : memref<256x4xf32, #tpu.memory_space<vmem>>, vector<256x4xf32>
    tpu.vector_store %arg6[%c0_232, %c0_233], %165 {strides = array<i32>} : memref<256x4xf32, #tpu.memory_space<vmem>>, vector<256x4xf32>,
    %c0_234 = arith.constant 0 : index
    %c0_235 = arith.constant 0 : index
    %167 = vector.load %arg6[%c0_234, %c0_235] : memref<256x4xf32, #tpu.memory_space<vmem>>, vector<256x4xf32>
    %cst_236 = arith.constant 0.000000e+00 : f32
    %168 = vector.broadcast %cst_236 : f32 to vector<256x4xf32>
    %169 = arith.maximumf %167, %168 : vector<256x4xf32>
    %c1_237 = arith.constant 1 : index
    %c0_238 = arith.constant 0 : index
    %c0_239 = arith.constant 0 : index
    %170 = vector.load %arg3[%c1_237, %c0_238, %c0_239] : memref<2x4x8xf32, #tpu.memory_space<vmem>>, vector<1x4x8xf32>
    %171 = vector.shape_cast %170 : vector<1x4x8xf32> to vector<4x8xf32>
    %cst_240 = arith.constant dense<0.000000e+00> : vector<256x8xf32>
    %172 = tpu.matmul %169, %171, %cst_240 {dimension_numbers = #tpu.dot_dimension_numbers<[1], [0], [0], [1], [0, 0, 1, 1], [], []>} : vector<256x4xf32>, vector<4x8xf32>, vector<256x8xf32> -> vector<256x8xf32>
    %173 = arith.addf %88, %172 : vector<256x8xf32>
    %cst_241 = arith.constant 0.000000e+00 : f32
    %174 = vector.broadcast %cst_241 : f32 to vector<256x8xf32>
    %175 = arith.maximumf %173, %174 : vector<256x8xf32>
    %c0_242 = arith.constant 0 : index
    %c0_243 = arith.constant 0 : index
    %c0_244 = arith.constant 0 : index
    %176 = vector.load %arg4[%c0_242, %c0_243, %c0_244] : memref<1x256x8xf32, #tpu.memory_space<vmem>>, vector<1x256x8xf32>
    %177 = vector.shape_cast %176 : vector<1x256x8xf32> to vector<256x8xf32>
    %178 = vector.shape_cast %175 : vector<256x8xf32> to vector<1x256x8xf32>
    tpu.vector_store %arg4[%c0_242, %c0_243, %c0_244], %178 {strides = array<i32>} : memref<1x256x8xf32, #tpu.memory_space<vmem>>, vector<1x256x8xf32>,
    return
  }
  func.func @transform_0(%arg0: i32) -> (i32, i32, i32) {
    %c0_i32 = arith.constant 0 : i32
    %c0_i32_0 = arith.constant 0 : i32
    %c0_i32_1 = arith.constant 0 : i32
    return %arg0, %c0_i32, %c0_i32_0 : i32, i32, i32
  }
  func.func @transform_1(%arg0: i32) -> (i32, i32, i32, i32) {
    %c0_i32 = arith.constant 0 : i32
    %c0_i32_0 = arith.constant 0 : i32
    %c0_i32_1 = arith.constant 0 : i32
    %c0_i32_2 = arith.constant 0 : i32
    %c0_i32_3 = arith.constant 0 : i32
    return %c0_i32, %c0_i32_0, %c0_i32_1, %c0_i32_2 : i32, i32, i32, i32
  }
  func.func @transform_2(%arg0: i32) -> (i32, i32, i32) {
    %c0_i32 = arith.constant 0 : i32
    %c0_i32_0 = arith.constant 0 : i32
    %c0_i32_1 = arith.constant 0 : i32
    %c0_i32_2 = arith.constant 0 : i32
    return %c0_i32, %c0_i32_0, %c0_i32_1 : i32, i32, i32
  }
  func.func @transform_3(%arg0: i32) -> (i32, i32, i32) {
    %c0_i32 = arith.constant 0 : i32
    %c0_i32_0 = arith.constant 0 : i32
    %c0_i32_1 = arith.constant 0 : i32
    return %arg0, %c0_i32, %c0_i32_0 : i32, i32, i32
  }
}

</mosaic_0001>

<bundles_post_ra>
// kernel: tpu_custom_call.1
= control target key start
LH: loop header
LB: loop body
LE: loop exit
PB: predicated region body
PF: predicated region fallthrough
CT: control target
= control target key end

     0   :  { %s11937_s12 = smov 0   ;;  %s14679_s0 = inlined_call_operand.vmem [shape: f32[2,256,8], index: 0, kind: input, shape index: {}]   ;;  %s14680_s1 = inlined_call_operand.vmem [shape: f32[2,9,8,4], index: 1, kind: input, shape index: {}]   ;;  %s14681_s2 = inlined_call_operand.vmem [shape: f32[2,4,8], index: 2, kind: input, shape index: {}]   ;;  %s14682_s3 = inlined_call_operand.vmem [shape: f32[2,256,8], index: 3, kind: output, shape index: {}]  }
   0x1 LB: > { %s9534_s13 = sadd.s32 4294967295, %s11914_s12   ;;  %p9538_p0 = scmp.ge.s32.totalorder %s11914_s12, 1  ;;  %s11914_s12 = sphi %s11937_s12, %s13_s12  }
   0x2   : > { %p137_p1 = scmp.lt.s32.totalorder %s11914_s12, 3 }
   0x4   : > { %p138_p2 = pnand %p9538_p0, %p137_p1 }
   0x6   : > { %141 = sbr.rel (%p138_p2) target bundleno = 1437 (0x59d), region = 32 }
   0xb   : > { %v421_v0 = vld [vmem:[%s14680_s1] sm:$0xff]  ;;  %vm171_vm0 = vcmask 64512   ;;  %v11951_v1 = vld [vmem:[%s14680_s1 + $0x10] sm:$0xff]  ;;  %p11955_p3 = scmp.lt.s32.totalorder %s9534_s13, 1  ;;  %vm174_vm1 = vcmask 58368   ;;  %v14685_v2 = vmov 0.0  }
   0xc   : > { %10867 = vmatprep.subr.mxu0 %v421_v0  ;;  %172 = vst.msk [vmem:[#allocation2] sm:$0xff] %vm171_vm0, %v14685_v2  ;;  %173 = vst.msk [vmem:[#allocation2 + $0x8] sm:$0xff] %vm171_vm0, %v14685_v2  ;;  %v9575_v3 = vld [vmem:[%s14680_s1 + $0x8] sm:$0xff]  ;;  %v9641_v4 = vld [vmem:[%s14680_s1 + $0x18] sm:$0xff]  ;;  %vm324_vm2 = vcmask 31744   ;;  %vm4577_vm3 = vcmask 1043456  }
   0xd   : > { %176 = vst.msk [vmem:[#allocation2 + $0x18] sm:$0xff] %vm171_vm0, %v14685_v2  ;;  %177 = vst.msk [vmem:[#allocation2 + $0x20] sm:$0xff] %vm171_vm0, %v14685_v2  ;;  %10868 = vmatpush3.msra.mxu0 %v421_v0  ;;  %s14841_s13 = smov (!%p11955_p3, %s9534_s13), 1  ;;  %10917 = vmatprep.subr.mxu1 %v9575_v3  ;;  %v12097_v14 = vld [vmem:[%s14680_s1 + $0x20] sm:$0xff]  ;;  %v12102_v15 = vld [vmem:[%s14680_s1 + $0x28] sm:$0xff] }
   0xe   : > { %179 = vst.msk [vmem:[#allocation2 + $0x30] sm:$0xff] %vm171_vm0, %v14685_v2  ;;  %180 = vst.msk [vmem:[#allocation2 + $0x38] sm:$0xff] %vm171_vm0, %v14685_v2  ;;  %10967 = vmatprep.subr.mxu0 %v11951_v1  ;;  %10918 = vmatpush3.msra.mxu1 %v9575_v3  ;;  %s10205_s23 = sshll.u32 %s14841_s13, 8 }
   0xf   : > { %182 = vst.msk [vmem:[#allocation2 + $0x48] sm:$0xff] %vm171_vm0, %v14685_v2  ;;  %183 = vst.msk [vmem:[#allocation2 + $0x50] sm:$0xff] %vm171_vm0, %v14685_v2  ;;  %11017 = vmatprep.subr.mxu1 %v9641_v4  ;;  %s12086_s26 = scalar_lea.vmem %s14679_s0, %s10205_s23  ;;  %s14579_s10 = scalar_lea.vmem %s14682_s3, %s10205_s23 }
  0x10   : > { %185 = vst.msk [vmem:[#allocation2 + $0x60] sm:$0xff] %vm171_vm0, %v14685_v2  ;;  %186 = vst.msk [vmem:[#allocation2 + $0x68] sm:$0xff] %vm171_vm0, %v14685_v2  ;;  %v227_v5 = vld [vmem:[%s12086_s26] sm:$0xff]  ;;  %v228_v6 = vld [vmem:[%s12086_s26 + $0x8] sm:$0xff] }
  0x11   : > { %188 = vst.msk [vmem:[#allocation2 + $0x78] sm:$0xff] %vm171_vm0, %v14685_v2  ;;  %189 = vst.msk [vmem:[#allocation2 + $0x80] sm:$0xff] %vm171_vm0, %v14685_v2  ;;  %v229_v7 = vld [vmem:[%s12086_s26 + $0x10] sm:$0xff]  ;;  %v259_v8 = vmax.f32 %v227_v5, 0.0  ;;  %v260_v9 = vmax.f32 %v228_v6, 0.0  ;;  %v230_v11 = vld [vmem:[%s12086_s26 + $0x18] sm:$0xff] }
  0x12   : > { %191 = vst.msk [vmem:[#allocation2 + $0x90] sm:$0xff] %vm171_vm0, %v14685_v2  ;;  %192 = vst.msk [vmem:[#allocation2 + $0x98] sm:$0xff] %vm171_vm0, %v14685_v2  ;;  %v261_v10 = vmax.f32 %v229_v7, 0.0  ;;  %v231_v12 = vld [vmem:[%s12086_s26 + $0x20] sm:$0xff]  ;;  %v232_v13 = vld [vmem:[%s12086_s26 + $0x28] sm:$0xff]  ;;  %v262_v19 = vmax.f32 %v230_v11, 0.0 }
  0x13   : > { %194 = vst.msk [vmem:[#allocation2 + $0xa8] sm:$0xff] %vm171_vm0, %v14685_v2  ;;  %195 = vst.msk [vmem:[#allocation2 + $0xb0] sm:$0xff] %vm171_vm0, %v14685_v2  ;;  %v357_v16 = vld [vmem:[#allocation2] sm:$0xff]  ;;  %v358_v17 = vld [vmem:[#allocation2 + $0x8] sm:$0xff]  ;;  %v263_v20 = vmax.f32 %v231_v12, 0.0  ;;  %v264_v21 = vmax.f32 %v232_v13, 0.0 }
  0x14   : > { %197 = vst.msk [vmem:[#allocation2 + $0xc0] sm:$0xff] %vm171_vm0, %v14685_v2  ;;  %198 = vst.msk [vmem:[#allocation2 + $0xc8] sm:$0xff] %vm171_vm0, %v14685_v2  ;;  %v807_v18 = vld [vmem:[#allocation2 + $0x1] sm:$0xff]  ;;  %10869 = vmatprep.mubr.msk.f32.mxu0 %vm171_vm0, %v357_v16  ;;  %v233_v23 = vld [vmem:[%s12086_s26 + $0x30] sm:$0xff] }
  0x15   : > { %200 = vst.msk [vmem:[#allocation2 + $0xd8] sm:$0xff] %vm171_vm0, %v14685_v2  ;;  %201 = vst.msk [vmem:[#allocation2 + $0xe0] sm:$0xff] %vm171_vm0, %v14685_v2  ;;  %10919 = vmatprep.mubr.msk.f32.mxu1 %vm171_vm0, %v807_v18  ;;  %v234_v24 = vld [vmem:[%s12086_s26 + $0x38] sm:$0xff]  ;;  %10870 = vmatmul.mubr.msk.f32.vlgmr.msra.gmra.mxu0 %vm171_vm0, %v358_v17  ;;  %v265_v25 = vmax.f32 %v233_v23, 0.0  ;;  %v235_v27 = vld [vmem:[%s12086_s26 + $0x40] sm:$0xff] }
  0x16   : > { %203 = vst.msk [vmem:[#allocation2 + $0xf0] sm:$0xff] %vm171_vm0, %v14685_v2  ;;  %204 = vst.msk [vmem:[#allocation2 + $0xf8] sm:$0xff] %vm171_vm0, %v14685_v2  ;;  %v266_v26 = vmax.f32 %v234_v24, 0.0  ;;  %v236_v28 = vld [vmem:[%s12086_s26 + $0x48] sm:$0xff]  ;;  %v237_v29 = vld [vmem:[%s12086_s26 + $0x50] sm:$0xff]  ;;  %10968 = vmatpush3.msra.mxu0 %v11951_v1  ;;  %v267_v30 = vmax.f32 %v235_v27, 0.0 }
  0x17   : > { %206 = vst.msk [vmem:[#allocation2 + $0x108] sm:$0xff] %vm171_vm0, %v14685_v2  ;;  %207 = vst.msk [vmem:[#allocation2 + $0x110] sm:$0xff] %vm171_vm0, %v14685_v2  ;;  %v268_v31 = vmax.f32 %v236_v28, 0.0  ;;  %v269_v32 = vmax.f32 %v237_v29, 0.0  ;;  %v238_v33 = vld [vmem:[%s12086_s26 + $0x58] sm:$0xff]  ;;  %v239_v34 = vld [vmem:[%s12086_s26 + $0x60] sm:$0xff]  ;;  %11067 = vmatprep.subr.mxu0 %v12097_v14 }
  0x18   : > { %209 = vst.msk [vmem:[#allocation2 + $0x120] sm:$0xff] %vm171_vm0, %v14685_v2  ;;  %210 = vst.msk [vmem:[#allocation2 + $0x128] sm:$0xff] %vm171_vm0, %v14685_v2  ;;  %v240_v35 = vld [vmem:[%s12086_s26 + $0x68] sm:$0xff]  ;;  %v270_v36 = vmax.f32 %v238_v33, 0.0  ;;  %v271_v37 = vmax.f32 %v239_v34, 0.0  ;;  %v241_v39 = vld [vmem:[%s12086_s26 + $0x70] sm:$0xff] }
  0x19   : > { %212 = vst.msk [vmem:[#allocation2 + $0x138] sm:$0xff] %vm171_vm0, %v14685_v2  ;;  %213 = vst.msk [vmem:[#allocation2 + $0x140] sm:$0xff] %vm171_vm0, %v14685_v2  ;;  %v272_v38 = vmax.f32 %v240_v35, 0.0  ;;  %v242_v40 = vld [vmem:[%s12086_s26 + $0x78] sm:$0xff]  ;;  %v243_v41 = vld [vmem:[%s12086_s26 + $0x80] sm:$0xff]  ;;  %v273_v42 = vmax.f32 %v241_v39, 0.0 }
  0x1a   : > { %215 = vst.msk [vmem:[#allocation2 + $0x150] sm:$0xff] %vm171_vm0, %v14685_v2  ;;  %216 = vst.msk [vmem:[#allocation2 + $0x158] sm:$0xff] %vm171_vm0, %v14685_v2  ;;  %v274_v43 = vmax.f32 %v242_v40, 0.0  ;;  %v275_v44 = vmax.f32 %v243_v41, 0.0  ;;  %v244_v45 = vld [vmem:[%s12086_s26 + $0x88] sm:$0xff]  ;;  %v245_v46 = vld [vmem:[%s12086_s26 + $0x90] sm:$0xff] }
  0x1b   : > { %218 = vst.msk [vmem:[#allocation2 + $0x168] sm:$0xff] %vm171_vm0, %v14685_v2  ;;  %219 = vst.msk [vmem:[#allocation2 + $0x170] sm:$0xff] %vm171_vm0, %v14685_v2  ;;  %v246_v47 = vld [vmem:[%s12086_s26 + $0x98] sm:$0xff]  ;;  %v276_v48 = vmax.f32 %v244_v45, 0.0  ;;  %v277_v49 = vmax.f32 %v245_v46, 0.0  ;;  %v247_v51 = vld [vmem:[%s12086_s26 + $0xa0] sm:$0xff] }
  0x1c   : > { %221 = vst.msk [vmem:[#allocation2 + $0x180] sm:$0xff] %vm171_vm0, %v14685_v2  ;;  %222 = vst.msk [vmem:[#allocation2 + $0x188] sm:$0xff] %vm171_vm0, %v14685_v2  ;;  %v278_v50 = vmax.f32 %v246_v47, 0.0  ;;  %v248_v52 = vld [vmem:[%s12086_s26 + $0xa8] sm:$0xff]  ;;  %v249_v53 = vld [vmem:[%s12086_s26 + $0xb0] sm:$0xff]  ;;  %v279_v54 = vmax.f32 %v247_v51, 0.0 }
  0x1d   : > { %224 = vst.msk [vmem:[#allocation2 + $0x198] sm:$0xff] %vm171_vm0, %v14685_v2  ;;  %225 = vst.msk [vmem:[#allocation2 + $0x1a0] sm:$0xff] %vm171_vm0, %v14685_v2  ;;  %v280_v55 = vmax.f32 %v248_v52, 0.0  ;;  %v281_v56 = vmax.f32 %v249_v53, 0.0  ;;  %v250_v57 = vld [vmem:[%s12086_s26 + $0xb8] sm:$0xff]  ;;  %v251_v58 = vld [vmem:[%s12086_s26 + $0xc0] sm:$0xff] }
  0x1e   : > { %178 = vst.msk [vmem:[#allocation2 + $0x28] sm:$0x3] %vm174_vm1, %v14685_v2  ;;  %175 = vst.msk [vmem:[#allocation2 + $0x10] sm:$0x3] %vm174_vm1, %v14685_v2  ;;  %v252_v59 = vld [vmem:[%s12086_s26 + $0xc8] sm:$0xff]  ;;  %v282_v63 = vmax.f32 %v250_v57, 0.0 }
  0x1f   : > { %181 = vst.msk [vmem:[#allocation2 + $0x40] sm:$0x3] %vm174_vm1, %v14685_v2  ;;  %184 = vst.msk [vmem:[#allocation2 + $0x58] sm:$0x3] %vm174_vm1, %v14685_v2  ;;  %v283_v0 = vmax.f32 %v251_v58, 0.0  ;;  %v284_v1 = vmax.f32 %v252_v59, 0.0 }
  0x20   : > { %187 = vst.msk [vmem:[#allocation2 + $0x70] sm:$0x3] %vm174_vm1, %v14685_v2  ;;  %190 = vst.msk [vmem:[#allocation2 + $0x88] sm:$0x3] %vm174_vm1, %v14685_v2  ;;  %v254_v23 = vld [vmem:[%s12086_s26 + $0xd8] sm:$0xff]  ;;  %v255_v27 = vld [vmem:[%s12086_s26 + $0xe0] sm:$0xff] }
  0x21   : > { %193 = vst.msk [vmem:[#allocation2 + $0xa0] sm:$0x3] %vm174_vm1, %v14685_v2  ;;  %196 = vst.msk [vmem:[#allocation2 + $0xb8] sm:$0x3] %vm174_vm1, %v14685_v2  ;;  %v256_v28 = vld [vmem:[%s12086_s26 + $0xe8] sm:$0xff]  ;;  %v257_v46 = vld [vmem:[%s12086_s26 + $0xf0] sm:$0xff] }
  0x22   : > { %199 = vst.msk [vmem:[#allocation2 + $0xd0] sm:$0x3] %vm174_vm1, %v14685_v2  ;;  %202 = vst.msk [vmem:[#allocation2 + $0xe8] sm:$0x3] %vm174_vm1, %v14685_v2  ;;  %v258_v47 = vld [vmem:[%s12086_s26 + $0xf8] sm:$0xff] }
  0x23   : > { %205 = vst.msk [vmem:[#allocation2 + $0x100] sm:$0x3] %vm174_vm1, %v14685_v2  ;;  %208 = vst.msk [vmem:[#allocation2 + $0x118] sm:$0x3] %vm174_vm1, %v14685_v2 }
  0x24   : > { %211 = vst.msk [vmem:[#allocation2 + $0x130] sm:$0x3] %vm174_vm1, %v14685_v2  ;;  %214 = vst.msk [vmem:[#allocation2 + $0x148] sm:$0x3] %vm174_vm1, %v14685_v2 }
  0x25   : > { %217 = vst.msk [vmem:[#allocation2 + $0x160] sm:$0x3] %vm174_vm1, %v14685_v2  ;;  %220 = vst.msk [vmem:[#allocation2 + $0x178] sm:$0x3] %vm174_vm1, %v14685_v2  ;;  %v808_v22 = vld [vmem:[#allocation2 + $0x9] sm:$0xff] }
  0x26   : > { %223 = vst.msk [vmem:[#allocation2 + $0x190] sm:$0x3] %vm174_vm1, %v14685_v2  ;;  %226 = vst.msk [vmem:[#allocation2 + $0x1a8] sm:$0x3] %vm174_vm1, %v14685_v2  ;;  %10920 = vmatmul.mubr.msk.f32.vlgmr.msra.gmra.mxu1 %vm171_vm0, %v808_v22  ;;  %v253_v22 = vld [vmem:[%s12086_s26 + $0xd0] sm:$0xff] }
  0x27   : > { %292 = vst.msk [vmem:[#allocation2 + $0x19] sm:$0xff] %vm171_vm0, %v259_v8  ;;  %293 = vst.msk [vmem:[#allocation2 + $0x21] sm:$0xff] %vm171_vm0, %v260_v9  ;;  %11018 = vmatpush3.msra.mxu1 %v9641_v4 }
  0x28   : > { %294 = vst.msk [vmem:[#allocation2 + $0x31] sm:$0xff] %vm171_vm0, %v261_v10  ;;  %295 = vst.msk [vmem:[#allocation2 + $0x39] sm:$0xff] %vm171_vm0, %v262_v19  ;;  %11117 = vmatprep.subr.mxu1 %v12102_v15 }
  0x29   : > { %296 = vst.msk [vmem:[#allocation2 + $0x49] sm:$0xff] %vm171_vm0, %v263_v20  ;;  %297 = vst.msk [vmem:[#allocation2 + $0x51] sm:$0xff] %vm171_vm0, %v264_v21 }
  0x2a   : > { %298 = vst.msk [vmem:[#allocation2 + $0x61] sm:$0xff] %vm171_vm0, %v265_v25  ;;  %299 = vst.msk [vmem:[#allocation2 + $0x69] sm:$0xff] %vm171_vm0, %v266_v26  ;;  %v285_v25 = vmax.f32 %v253_v22, 0.0  ;;  %v286_v26 = vmax.f32 %v254_v23, 0.0 }
  0x2b   : > { %300 = vst.msk [vmem:[#allocation2 + $0x79] sm:$0xff] %vm171_vm0, %v267_v30  ;;  %301 = vst.msk [vmem:[#allocation2 + $0x81] sm:$0xff] %vm171_vm0, %v268_v31  ;;  %v287_v30 = vmax.f32 %v255_v27, 0.0  ;;  %v288_v31 = vmax.f32 %v256_v28, 0.0 }
  0x2c   : > { %302 = vst.msk [vmem:[#allocation2 + $0x91] sm:$0xff] %vm171_vm0, %v269_v32  ;;  %303 = vst.msk [vmem:[#allocation2 + $0x99] sm:$0xff] %vm171_vm0, %v270_v36 }
  0x2d   : > { %304 = vst.msk [vmem:[#allocation2 + $0xa9] sm:$0xff] %vm171_vm0, %v271_v37  ;;  %305 = vst.msk [vmem:[#allocation2 + $0xb1] sm:$0xff] %vm171_vm0, %v272_v38 }
  0x2e   : > { %306 = vst.msk [vmem:[#allocation2 + $0xc1] sm:$0xff] %vm171_vm0, %v273_v42  ;;  %307 = vst.msk [vmem:[#allocation2 + $0xc9] sm:$0xff] %vm171_vm0, %v274_v43  ;;  %v12148_v60 = vld [vmem:[#allocation2 + $0x18] sm:$0xff]  ;;  %v12150_v61 = vld [vmem:[#allocation2 + $0x20] sm:$0xff] }
  0x2f   : > { %308 = vst.msk [vmem:[#allocation2 + $0xd9] sm:$0xff] %vm171_vm0, %v275_v44  ;;  %v12152_v62 = vld [vmem:[#allocation2 + $0x30] sm:$0xff]  ;;  %309 = vst.msk [vmem:[#allocation2 + $0xe1] sm:$0xff] %vm171_vm0, %v276_v48  ;;  %10872 = vmatprep.mubr.msk.f32.mxu0 %vm171_vm0, %v12148_v60  ;;  %v12164_v3 = vld [vmem:[#allocation2 + $0x19] sm:$0xff] }
  0x30   : > { %310 = vst.msk [vmem:[#allocation2 + $0xf1] sm:$0xff] %vm171_vm0, %v277_v49  ;;  %311 = vst.msk [vmem:[#allocation2 + $0xf9] sm:$0xff] %vm171_vm0, %v278_v50  ;;  %10873 = vmatmul.mubr.msk.f32.gmra.mxu0 %vm171_vm0, %v12150_v61  ;;  %v12166_v4 = vld [vmem:[#allocation2 + $0x21] sm:$0xff]  ;;  %v12168_v5 = vld [vmem:[#allocation2 + $0x31] sm:$0xff]  ;;  %10922 = vmatprep.mubr.msk.f32.mxu1 %vm171_vm0, %v12164_v3  ;;  %v289_v49 = vmax.f32 %v257_v46, 0.0  ;;  %v290_v50 = vmax.f32 %v258_v47, 0.0 }
  0x31   : > { %312 = vst.msk [vmem:[#allocation2 + $0x109] sm:$0xff] %vm171_vm0, %v279_v54  ;;  %313 = vst.msk [vmem:[#allocation2 + $0x111] sm:$0xff] %vm171_vm0, %v280_v55  ;;  %10875 = vmatprep.mubr.msk.f32.mxu0 %vm171_vm0, %v12152_v62  ;;  %v12175_v6 = vld [vmem:[#allocation2 + $0x38] sm:$0xff]  ;;  %v12179_v7 = vld [vmem:[#allocation2 + $0x48] sm:$0xff]  ;;  %10923 = vmatmul.mubr.msk.f32.gmra.mxu1 %vm171_vm0, %v12166_v4 }
  0x32   : > { %314 = vst.msk [vmem:[#allocation2 + $0x121] sm:$0xff] %vm171_vm0, %v281_v56  ;;  %315 = vst.msk [vmem:[#allocation2 + $0x129] sm:$0xff] %vm171_vm0, %v282_v63  ;;  %10925 = vmatprep.mubr.msk.f32.mxu1 %vm171_vm0, %v12168_v5  ;;  %v12185_v8 = vld [vmem:[#allocation2 + $0x39] sm:$0xff]  ;;  %v12189_v9 = vld [vmem:[#allocation2 + $0x49] sm:$0xff] }
  0x33   : > { %316 = vst.msk [vmem:[#allocation2 + $0x139] sm:$0xff] %vm171_vm0, %v283_v0  ;;  %317 = vst.msk [vmem:[#allocation2 + $0x141] sm:$0xff] %vm171_vm0, %v284_v1  ;;  %v12193_v10 = vld [vmem:[#allocation2 + $0x50] sm:$0xff]  ;;  %v12195_v11 = vld [vmem:[#allocation2 + $0x60] sm:$0xff] }
  0x34   : > { %14737 = vst [vmem:[#allocation4_spill] sm:$0xff] %v12175_v6  ;;  %14738 = vst [vmem:[#allocation5_spill] sm:$0xff] %v12179_v7  ;;  %10876 = vmatmul.mubr.msk.f32.gmra.mxu0 %vm171_vm0, %v12175_v6  ;;  %v12201_v12 = vld [vmem:[#allocation2 + $0x51] sm:$0xff]  ;;  %v12205_v13 = vld [vmem:[#allocation2 + $0x61] sm:$0xff] }
  0x35   : > { %10878 = vmatprep.mubr.msk.f32.mxu0 %vm171_vm0, %v12179_v7  ;;  %14739 = vst [vmem:[#allocation6_spill] sm:$0xff] %v12193_v10  ;;  %14740 = vst [vmem:[#allocation7_spill] sm:$0xff] %v12195_v11  ;;  %10926 = vmatmul.mubr.msk.f32.gmra.mxu1 %vm171_vm0, %v12185_v8  ;;  %v12209_v16 = vld [vmem:[#allocation2 + $0x68] sm:$0xff]  ;;  %v12211_v17 = vld [vmem:[#allocation2 + $0x78] sm:$0xff] }
  0x36   : > { %10928 = vmatprep.mubr.msk.f32.mxu1 %vm171_vm0, %v12189_v9  ;;  %v12217_v18 = vld [vmem:[#allocation2 + $0x69] sm:$0xff]  ;;  %v12221_v19 = vld [vmem:[#allocation2 + $0x79] sm:$0xff]  ;;  %v12235_v24 = vld [vmem:[#allocation2 + $0x81] sm:$0xff]  ;;  %318 = vst.msk [vmem:[#allocation2 + $0x151] sm:$0xff] %vm171_vm0, %v285_v25 }
  0x37   : > { %v12225_v20 = vld [vmem:[#allocation2 + $0x80] sm:$0xff]  ;;  %v12227_v21 = vld [vmem:[#allocation2 + $0x90] sm:$0xff]  ;;  %v12245_v32 = vld [vmem:[#allocation2 + $0x98] sm:$0xff]  ;;  %319 = vst.msk [vmem:[#allocation2 + $0x159] sm:$0xff] %vm171_vm0, %v286_v26 }
  0x38   : > { %10879 = vmatmul.mubr.msk.f32.gmra.mxu0 %vm171_vm0, %v12193_v10  ;;  %v12241_v29 = vld [vmem:[#allocation2 + $0x91] sm:$0xff]  ;;  %v12249_v33 = vld [vmem:[#allocation2 + $0xa8] sm:$0xff]  ;;  %320 = vst.msk [vmem:[#allocation2 + $0x169] sm:$0xff] %vm171_vm0, %v287_v30  ;;  %321 = vst.msk [vmem:[#allocation2 + $0x171] sm:$0xff] %vm171_vm0, %v288_v31 }
  0x39   : > { %10881 = vmatprep.mubr.msk.f32.mxu0 %vm171_vm0, %v12195_v11  ;;  %10929 = vmatmul.mubr.msk.f32.gmra.mxu1 %vm171_vm0, %v12201_v12  ;;  %v12257_v34 = vld [vmem:[#allocation2 + $0x99] sm:$0xff]  ;;  %v12261_v35 = vld [vmem:[#allocation2 + $0xa9] sm:$0xff]  ;;  %v12273_v38 = vld [vmem:[#allocation2 + $0xb1] sm:$0xff]  ;;  %322 = vst.msk [vmem:[#allocation2 + $0x181] sm:$0xff] %vm171_vm0, %v289_v49 }
  0x3a   : > { %10931 = vmatprep.mubr.msk.f32.mxu1 %vm171_vm0, %v12205_v13  ;;  %v12265_v36 = vld [vmem:[#allocation2 + $0xb0] sm:$0xff]  ;;  %v12267_v37 = vld [vmem:[#allocation2 + $0xc0] sm:$0xff]  ;;  %v12281_v40 = vld [vmem:[#allocation2 + $0xc8] sm:$0xff]  ;;  %323 = vst.msk [vmem:[#allocation2 + $0x189] sm:$0xff] %vm171_vm0, %v290_v50 }
  0x3b   : > { %v12277_v39 = vld [vmem:[#allocation2 + $0xc1] sm:$0xff]  ;;  %v12283_v41 = vld [vmem:[#allocation2 + $0xd8] sm:$0xff]  ;;  %v12289_v42 = vld [vmem:[#allocation2 + $0xc9] sm:$0xff]  ;;  %326 = vst.msk [vmem:[#allocation3 + $0x8] sm:$0xff] %vm324_vm2, %v14685_v2 }
  0x3c   : > { %10882 = vmatmul.mubr.msk.f32.gmra.mxu0 %vm171_vm0, %v12209_v16  ;;  %v12293_v43 = vld [vmem:[#allocation2 + $0xd9] sm:$0xff]  ;;  %v12299_v45 = vld [vmem:[#allocation2 + $0xf0] sm:$0xff]  ;;  %v12307_v48 = vld [vmem:[#allocation2 + $0xe1] sm:$0xff]  ;;  %325 = vst.msk [vmem:[#allocation3] sm:$0xff] %vm324_vm2, %v14685_v2 }
  0x3d   : > { %10884 = vmatprep.mubr.msk.f32.mxu0 %vm171_vm0, %v12211_v17  ;;  %10932 = vmatmul.mubr.msk.f32.gmra.mxu1 %vm171_vm0, %v12217_v18  ;;  %v12297_v44 = vld [vmem:[#allocation2 + $0xe0] sm:$0xff]  ;;  %v12311_v51 = vld [vmem:[#allocation2 + $0xf1] sm:$0xff]  ;;  %v12319_v53 = vld [vmem:[#allocation2 + $0x108] sm:$0xff]  ;;  %327 = vst.msk [vmem:[#allocation3 + $0x10] sm:$0xff] %vm324_vm2, %v14685_v2 }
  0x3e   : > { %10934 = vmatprep.mubr.msk.f32.mxu1 %vm171_vm0, %v12221_v19  ;;  %v12315_v52 = vld [vmem:[#allocation2 + $0xf8] sm:$0xff]  ;;  %v12329_v55 = vld [vmem:[#allocation2 + $0x109] sm:$0xff]  ;;  %v12335_v57 = vld [vmem:[#allocation2 + $0x120] sm:$0xff]  ;;  %328 = vst.msk [vmem:[#allocation3 + $0x18] sm:$0xff] %vm324_vm2, %v14685_v2 }
  0x3f   : > { %v12325_v54 = vld [vmem:[#allocation2 + $0xf9] sm:$0xff]  ;;  %v12333_v56 = vld [vmem:[#allocation2 + $0x110] sm:$0xff]  ;;  %v12345_v59 = vld [vmem:[#allocation2 + $0x121] sm:$0xff]  ;;  %329 = vst.msk [vmem:[#allocation3 + $0x20] sm:$0xff] %vm324_vm2, %v14685_v2 }
  0x40   : > { %10885 = vmatmul.mubr.msk.f32.gmra.mxu0 %vm171_vm0, %v12225_v20  ;;  %v12341_v58 = vld [vmem:[#allocation2 + $0x111] sm:$0xff]  ;;  %v12349_v63 = vld [vmem:[#allocation2 + $0x128] sm:$0xff]  ;;  %v12361_v22 = vld [vmem:[#allocation2 + $0x139] sm:$0xff]  ;;  %330 = vst.msk [vmem:[#allocation3 + $0x28] sm:$0xff] %vm324_vm2, %v14685_v2 }
  0x41   : > { %10887 = vmatprep.mubr.msk.f32.mxu0 %vm171_vm0, %v12227_v21  ;;  %10935 = vmatmul.mubr.msk.f32.gmra.mxu1 %vm171_vm0, %v12235_v24  ;;  %v12351_v0 = vld [vmem:[#allocation2 + $0x138] sm:$0xff]  ;;  %v12357_v1 = vld [vmem:[#allocation2 + $0x129] sm:$0xff]  ;;  %v12365_v23 = vld [vmem:[#allocation2 + $0x140] sm:$0xff]  ;;  %331 = vst.msk [vmem:[#allocation3 + $0x30] sm:$0xff] %vm324_vm2, %v14685_v2 }
  0x42   : > { %10937 = vmatprep.mubr.msk.f32.mxu1 %vm171_vm0, %v12241_v29  ;;  %v12367_v25 = vld [vmem:[#allocation2 + $0x150] sm:$0xff]  ;;  %v12373_v26 = vld [vmem:[#allocation2 + $0x141] sm:$0xff]  ;;  %v12381_v28 = vld [vmem:[#allocation2 + $0x158] sm:$0xff]  ;;  %332 = vst.msk [vmem:[#allocation3 + $0x38] sm:$0xff] %vm324_vm2, %v14685_v2 }
  0x43   : > { %14741 = vst [vmem:[#allocation8_spill] sm:$0xff] %v12373_v26  ;;  %v12377_v27 = vld [vmem:[#allocation2 + $0x151] sm:$0xff]  ;;  %v12383_v30 = vld [vmem:[#allocation2 + $0x168] sm:$0xff]  ;;  %v12389_v31 = vld [vmem:[#allocation2 + $0x159] sm:$0xff] }
  0x44   : > { %10888 = vmatmul.mubr.msk.f32.gmra.mxu0 %vm171_vm0, %v12245_v32  ;;  %14742 = vst [vmem:[#allocation9_spill] sm:$0xff] %v12377_v27  ;;  %v12393_v46 = vld [vmem:[#allocation2 + $0x169] sm:$0xff]  ;;  %333 = vst.msk [vmem:[#allocation3 + $0x40] sm:$0xff] %vm324_vm2, %v14685_v2  ;;  %v12467_v50 = vld [vmem:[#allocation2 + $0x171] sm:$0xff] }
  0x45   : > { %10890 = vmatprep.mubr.msk.f32.mxu0 %vm171_vm0, %v12249_v33  ;;  %10938 = vmatmul.mubr.msk.f32.gmra.mxu1 %vm171_vm0, %v12257_v34  ;;  %v12397_v47 = vld [vmem:[#allocation2 + $0x170] sm:$0xff]  ;;  %334 = vst.msk [vmem:[#allocation3 + $0x48] sm:$0xff] %vm324_vm2, %v14685_v2  ;;  %335 = vst.msk [vmem:[#allocation3 + $0x50] sm:$0xff] %vm324_vm2, %v14685_v2  ;;  %v1258_v49 = vld [vmem:[#allocation2 + $0x2] sm:$0xff] }
  0x46   : > { %10940 = vmatprep.mubr.msk.f32.mxu1 %vm171_vm0, %v12261_v35  ;;  %336 = vst.msk [vmem:[#allocation3 + $0x58] sm:$0xff] %vm324_vm2, %v14685_v2  ;;  %337 = vst.msk [vmem:[#allocation3 + $0x60] sm:$0xff] %vm324_vm2, %v14685_v2 }
  0x47   : > { %338 = vst.msk [vmem:[#allocation3 + $0x68] sm:$0xff] %vm324_vm2, %v14685_v2  ;;  %339 = vst.msk [vmem:[#allocation3 + $0x70] sm:$0xff] %vm324_vm2, %v14685_v2 }
  0x48   : > { %10891 = vmatmul.mubr.msk.f32.gmra.mxu0 %vm171_vm0, %v12265_v36  ;;  %340 = vst.msk [vmem:[#allocation3 + $0x78] sm:$0xff] %vm324_vm2, %v14685_v2  ;;  %341 = vst.msk [vmem:[#allocation3 + $0x80] sm:$0xff] %vm324_vm2, %v14685_v2 }
  0x49   : > { %10893 = vmatprep.mubr.msk.f32.mxu0 %vm171_vm0, %v12267_v37  ;;  %10941 = vmatmul.mubr.msk.f32.gmra.mxu1 %vm171_vm0, %v12273_v38  ;;  %342 = vst.msk [vmem:[#allocation3 + $0x88] sm:$0xff] %vm324_vm2, %v14685_v2  ;;  %343 = vst.msk [vmem:[#allocation3 + $0x90] sm:$0xff] %vm324_vm2, %v14685_v2 }
  0x4a   : > { %10943 = vmatprep.mubr.msk.f32.mxu1 %vm171_vm0, %v12277_v39  ;;  %344 = vst.msk [vmem:[#allocation3 + $0x98] sm:$0xff] %vm324_vm2, %v14685_v2  ;;  %345 = vst.msk [vmem:[#allocation3 + $0xa0] sm:$0xff] %vm324_vm2, %v14685_v2 }
  0x4b   : > { %346 = vst.msk [vmem:[#allocation3 + $0xa8] sm:$0xff] %vm324_vm2, %v14685_v2  ;;  %347 = vst.msk [vmem:[#allocation3 + $0xb0] sm:$0xff] %vm324_vm2, %v14685_v2 }
  0x4c   : > { %10894 = vmatmul.mubr.msk.f32.gmra.mxu0 %vm171_vm0, %v12281_v40  ;;  %348 = vst.msk [vmem:[#allocation3 + $0xb8] sm:$0xff] %vm324_vm2, %v14685_v2  ;;  %349 = vst.msk [vmem:[#allocation3 + $0xc0] sm:$0xff] %vm324_vm2, %v14685_v2 }
  0x4d   : > { %10896 = vmatprep.mubr.msk.f32.mxu0 %vm171_vm0, %v12283_v41  ;;  %10944 = vmatmul.mubr.msk.f32.gmra.mxu1 %vm171_vm0, %v12289_v42  ;;  %350 = vst.msk [vmem:[#allocation3 + $0xc8] sm:$0xff] %vm324_vm2, %v14685_v2  ;;  %351 = vst.msk [vmem:[#allocation3 + $0xd0] sm:$0xff] %vm324_vm2, %v14685_v2 }
  0x4e   : > { %10946 = vmatprep.mubr.msk.f32.mxu1 %vm171_vm0, %v12293_v43  ;;  %352 = vst.msk [vmem:[#allocation3 + $0xd8] sm:$0xff] %vm324_vm2, %v14685_v2  ;;  %353 = vst.msk [vmem:[#allocation3 + $0xe0] sm:$0xff] %vm324_vm2, %v14685_v2 }
  0x4f   : > { %354 = vst.msk [vmem:[#allocation3 + $0xe8] sm:$0xff] %vm324_vm2, %v14685_v2  ;;  %355 = vst.msk [vmem:[#allocation3 + $0xf0] sm:$0xff] %vm324_vm2, %v14685_v2 }
  0x50   : > { %10897 = vmatmul.mubr.msk.f32.gmra.mxu0 %vm171_vm0, %v12297_v44  ;;  %356 = vst.msk [vmem:[#allocation3 + $0xf8] sm:$0xff] %vm324_vm2, %v14685_v2  ;;  %14743 = vst [vmem:[#allocation10_spill] sm:$0xff] %v12467_v50  ;;  %v12481_v2 = vld [vmem:[%s14680_s1 + $0x30] sm:$0xff] }
  0x51   : > { %10899 = vmatprep.mubr.msk.f32.mxu0 %vm171_vm0, %v12299_v45  ;;  %10947 = vmatmul.mubr.msk.f32.gmra.mxu1 %vm171_vm0, %v12307_v48 }
  0x52   : > { %10949 = vmatprep.mubr.msk.f32.mxu1 %vm171_vm0, %v12311_v51 }
  0x54   : > { %10900 = vmatmul.mubr.msk.f32.gmra.mxu0 %vm171_vm0, %v12315_v52 }
  0x55   : > { %10902 = vmatprep.mubr.msk.f32.mxu0 %vm171_vm0, %v12319_v53  ;;  %10950 = vmatmul.mubr.msk.f32.gmra.mxu1 %vm171_vm0, %v12325_v54 }
  0x56   : > { %10952 = vmatprep.mubr.msk.f32.mxu1 %vm171_vm0, %v12329_v55 }
  0x58   : > { %10903 = vmatmul.mubr.msk.f32.gmra.mxu0 %vm171_vm0, %v12333_v56 }
  0x59   : > { %10905 = vmatprep.mubr.msk.f32.mxu0 %vm171_vm0, %v12335_v57  ;;  %10953 = vmatmul.mubr.msk.f32.gmra.mxu1 %vm171_vm0, %v12341_v58 }
  0x5a   : > { %10955 = vmatprep.mubr.msk.f32.mxu1 %vm171_vm0, %v12345_v59 }
  0x5c   : > { %10906 = vmatmul.mubr.msk.f32.gmra.mxu0 %vm171_vm0, %v12349_v63 }
  0x5d   : > { %10908 = vmatprep.mubr.msk.f32.mxu0 %vm171_vm0, %v12351_v0  ;;  %10956 = vmatmul.mubr.msk.f32.gmra.mxu1 %vm171_vm0, %v12357_v1 }
  0x5e   : > { %10958 = vmatprep.mubr.msk.f32.mxu1 %vm171_vm0, %v12361_v22 }
  0x60   : > { %10909 = vmatmul.mubr.msk.f32.gmra.mxu0 %vm171_vm0, %v12365_v23 }
  0x61   : > { %10911 = vmatprep.mubr.msk.f32.mxu0 %vm171_vm0, %v12367_v25  ;;  %10959 = vmatmul.mubr.msk.f32.gmra.mxu1 %vm171_vm0, %v12373_v26  ;;  %v12472_v26 = vld [vmem:[#allocation2 + $0x1a] sm:$0xff] }
  0x62   : > { %10961 = vmatprep.mubr.msk.f32.mxu1 %vm171_vm0, %v12377_v27  ;;  %v1259_v27 = vld [vmem:[#allocation2 + $0xa] sm:$0xff] }
  0x64   : > { %10912 = vmatmul.mubr.msk.f32.gmra.mxu0 %vm171_vm0, %v12381_v28 }
  0x65   : > { %10914 = vmatprep.mubr.msk.f32.mxu0 %vm171_vm0, %v12383_v30  ;;  %10962 = vmatmul.mubr.msk.f32.gmra.mxu1 %vm171_vm0, %v12389_v31 }
  0x66   : > { %10964 = vmatprep.mubr.msk.f32.mxu1 %vm171_vm0, %v12393_v46 }
  0x68   : > { %10915 = vmatmul.mubr.msk.f32.gmra.mxu0 %vm171_vm0, %v12397_v47 }
  0x69   : > { %10969 = vmatprep.mubr.msk.f32.mxu0 %vm171_vm0, %v1258_v49  ;;  %10965 = vmatmul.mubr.msk.f32.gmra.mxu1 %vm171_vm0, %v12467_v50  ;;  %v12487_v49 = vld [vmem:[#allocation2 + $0x22] sm:$0xff]  ;;  %v12492_v50 = vld [vmem:[%s14680_s1 + $0x38] sm:$0xff] }
  0x6a   : > { %11019 = vmatprep.mubr.msk.f32.mxu1 %vm171_vm0, %v12148_v60  ;;  %v12494_v60 = vld [vmem:[#allocation2 + $0x32] sm:$0xff] }
  0x6c   : > { %10970 = vmatmul.mubr.msk.f32.vlgmr.msra.gmra.mxu0 %vm171_vm0, %v1259_v27  ;;  %v12509_v27 = vld [vmem:[#allocation2 + $0x4a] sm:$0xff] }
  0x6d   : > { %11068 = vmatpush3.msra.mxu0 %v12097_v14  ;;  %10972 = vmatprep.mubr.msk.f32.mxu0 %vm171_vm0, %v12472_v26  ;;  %v12507_v14 = vld [vmem:[#allocation2 + $0x3a] sm:$0xff] }
  0x6e   : > { %11020 = vmatmul.mubr.msk.f32.vlgmr.msra.gmra.mxu1 %vm171_vm0, %v12150_v61  ;;  %11167 = vmatprep.subr.mxu0 %v12481_v2  ;;  %v12521_v61 = vld [vmem:[#allocation2 + $0x62] sm:$0xff] }
  0x6f   : > { %11022 = vmatprep.mubr.msk.f32.mxu1 %vm171_vm0, %v12152_v62  ;;  %11118 = vmatpush3.msra.mxu1 %v12102_v15  ;;  %v12519_v15 = vld [vmem:[#allocation2 + $0x52] sm:$0xff] }
  0x70   : > { %10973 = vmatmul.mubr.msk.f32.gmra.mxu0 %vm171_vm0, %v12487_v49  ;;  %11217 = vmatprep.subr.mxu1 %v12492_v50 }
  0x71   : > { %10975 = vmatprep.mubr.msk.f32.mxu0 %vm171_vm0, %v12494_v60 }
  0x72   : > { %11023 = vmatmul.mubr.msk.f32.gmra.mxu1 %vm171_vm0, %v12175_v6  ;;  %v12533_v6 = vld [vmem:[#allocation2 + $0x7a] sm:$0xff] }
  0x73   : > { %11025 = vmatprep.mubr.msk.f32.mxu1 %vm171_vm0, %v12179_v7  ;;  %v12531_v7 = vld [vmem:[#allocation2 + $0x6a] sm:$0xff] }
  0x74   : > { %10976 = vmatmul.mubr.msk.f32.gmra.mxu0 %vm171_vm0, %v12507_v14 }
  0x75   : > { %10978 = vmatprep.mubr.msk.f32.mxu0 %vm171_vm0, %v12509_v27 }
  0x76   : > { %11026 = vmatmul.mubr.msk.f32.gmra.mxu1 %vm171_vm0, %v12193_v10  ;;  %v12545_v10 = vld [vmem:[#allocation2 + $0x92] sm:$0xff] }
  0x77   : > { %11028 = vmatprep.mubr.msk.f32.mxu1 %vm171_vm0, %v12195_v11  ;;  %v12543_v11 = vld [vmem:[#allocation2 + $0x82] sm:$0xff] }
  0x78   : > { %10979 = vmatmul.mubr.msk.f32.gmra.mxu0 %vm171_vm0, %v12519_v15 }
  0x79   : > { %10981 = vmatprep.mubr.msk.f32.mxu0 %vm171_vm0, %v12521_v61 }
  0x7a   : > { %11029 = vmatmul.mubr.msk.f32.gmra.mxu1 %vm171_vm0, %v12209_v16  ;;  %v12555_v16 = vld [vmem:[#allocation2 + $0x9a] sm:$0xff] }
  0x7b   : > { %11031 = vmatprep.mubr.msk.f32.mxu1 %vm171_vm0, %v12211_v17  ;;  %v12557_v17 = vld [vmem:[#allocation2 + $0xaa] sm:$0xff] }
  0x7c   : > { %10982 = vmatmul.mubr.msk.f32.gmra.mxu0 %vm171_vm0, %v12531_v7 }
  0x7d   : > { %10984 = vmatprep.mubr.msk.f32.mxu0 %vm171_vm0, %v12533_v6 }
  0x7e   : > { %11032 = vmatmul.mubr.msk.f32.gmra.mxu1 %vm171_vm0, %v12225_v20  ;;  %v12567_v20 = vld [vmem:[#allocation2 + $0xb2] sm:$0xff] }
  0x7f   : > { %11034 = vmatprep.mubr.msk.f32.mxu1 %vm171_vm0, %v12227_v21  ;;  %v12569_v21 = vld [vmem:[#allocation2 + $0xc2] sm:$0xff] }
  0x80   : > { %10985 = vmatmul.mubr.msk.f32.gmra.mxu0 %vm171_vm0, %v12543_v11 }
  0x81   : > { %10987 = vmatprep.mubr.msk.f32.mxu0 %vm171_vm0, %v12545_v10 }
  0x82   : > { %11035 = vmatmul.mubr.msk.f32.gmra.mxu1 %vm171_vm0, %v12245_v32  ;;  %v12579_v32 = vld [vmem:[#allocation2 + $0xca] sm:$0xff] }
  0x83   : > { %11037 = vmatprep.mubr.msk.f32.mxu1 %vm171_vm0, %v12249_v33  ;;  %v12581_v33 = vld [vmem:[#allocation2 + $0xda] sm:$0xff] }
  0x84   : > { %10988 = vmatmul.mubr.msk.f32.gmra.mxu0 %vm171_vm0, %v12555_v16 }
  0x85   : > { %10990 = vmatprep.mubr.msk.f32.mxu0 %vm171_vm0, %v12557_v17 }
  0x86   : > { %11038 = vmatmul.mubr.msk.f32.gmra.mxu1 %vm171_vm0, %v12265_v36  ;;  %v12591_v36 = vld [vmem:[#allocation2 + $0xe2] sm:$0xff] }
  0x87   : > { %11040 = vmatprep.mubr.msk.f32.mxu1 %vm171_vm0, %v12267_v37  ;;  %v12593_v37 = vld [vmem:[#allocation2 + $0xf2] sm:$0xff] }
  0x88   : > { %10991 = vmatmul.mubr.msk.f32.gmra.mxu0 %vm171_vm0, %v12567_v20 }
  0x89   : > { %10993 = vmatprep.mubr.msk.f32.mxu0 %vm171_vm0, %v12569_v21 }
  0x8a   : > { %11041 = vmatmul.mubr.msk.f32.gmra.mxu1 %vm171_vm0, %v12281_v40  ;;  %v12603_v40 = vld [vmem:[#allocation2 + $0xfa] sm:$0xff] }
  0x8b   : > { %11043 = vmatprep.mubr.msk.f32.mxu1 %vm171_vm0, %v12283_v41  ;;  %v12605_v41 = vld [vmem:[#allocation2 + $0x10a] sm:$0xff] }
  0x8c   : > { %10994 = vmatmul.mubr.msk.f32.gmra.mxu0 %vm171_vm0, %v12579_v32 }
  0x8d   : > { %10996 = vmatprep.mubr.msk.f32.mxu0 %vm171_vm0, %v12581_v33 }
  0x8e   : > { %11044 = vmatmul.mubr.msk.f32.gmra.mxu1 %vm171_vm0, %v12297_v44  ;;  %v12615_v44 = vld [vmem:[#allocation2 + $0x112] sm:$0xff] }
  0x8f   : > { %11046 = vmatprep.mubr.msk.f32.mxu1 %vm171_vm0, %v12299_v45  ;;  %v12617_v45 = vld [vmem:[#allocation2 + $0x122] sm:$0xff] }
  0x90   : > { %10997 = vmatmul.mubr.msk.f32.gmra.mxu0 %vm171_vm0, %v12591_v36 }
  0x91   : > { %10999 = vmatprep.mubr.msk.f32.mxu0 %vm171_vm0, %v12593_v37 }
  0x92   : > { %11047 = vmatmul.mubr.msk.f32.gmra.mxu1 %vm171_vm0, %v12315_v52  ;;  %v12627_v52 = vld [vmem:[#allocation2 + $0x12a] sm:$0xff] }
  0x93   : > { %11049 = vmatprep.mubr.msk.f32.mxu1 %vm171_vm0, %v12319_v53  ;;  %v12629_v53 = vld [vmem:[#allocation2 + $0x13a] sm:$0xff] }
  0x94   : > { %11000 = vmatmul.mubr.msk.f32.gmra.mxu0 %vm171_vm0, %v12603_v40 }
  0x95   : > { %11002 = vmatprep.mubr.msk.f32.mxu0 %vm171_vm0, %v12605_v41 }
  0x96   : > { %11050 = vmatmul.mubr.msk.f32.gmra.mxu1 %vm171_vm0, %v12333_v56  ;;  %v12639_v56 = vld [vmem:[#allocation2 + $0x142] sm:$0xff] }
  0x97   : > { %11052 = vmatprep.mubr.msk.f32.mxu1 %vm171_vm0, %v12335_v57  ;;  %v12641_v57 = vld [vmem:[#allocation2 + $0x152] sm:$0xff] }
  0x98   : > { %11003 = vmatmul.mubr.msk.f32.gmra.mxu0 %vm171_vm0, %v12615_v44 }
  0x99   : > { %11005 = vmatprep.mubr.msk.f32.mxu0 %vm171_vm0, %v12617_v45 }
  0x9a   : > { %11053 = vmatmul.mubr.msk.f32.gmra.mxu1 %vm171_vm0, %v12349_v63  ;;  %v12651_v63 = vld [vmem:[#allocation2 + $0x15a] sm:$0xff] }
  0x9b   : > { %11055 = vmatprep.mubr.msk.f32.mxu1 %vm171_vm0, %v12351_v0  ;;  %v12653_v0 = vld [vmem:[#allocation2 + $0x16a] sm:$0xff] }
  0x9c   : > { %11006 = vmatmul.mubr.msk.f32.gmra.mxu0 %vm171_vm0, %v12627_v52 }
  0x9d   : > { %11008 = vmatprep.mubr.msk.f32.mxu0 %vm171_vm0, %v12629_v53 }
  0x9e   : > { %11056 = vmatmul.mubr.msk.f32.gmra.mxu1 %vm171_vm0, %v12365_v23  ;;  %v12661_v23 = vld [vmem:[#allocation2 + $0x180] sm:$0xff] }
  0x9f   : > { %11058 = vmatprep.mubr.msk.f32.mxu1 %vm171_vm0, %v12367_v25  ;;  %v12665_v25 = vld [vmem:[#allocation2 + $0x172] sm:$0xff] }
  0xa0   : > { %11009 = vmatmul.mubr.msk.f32.gmra.mxu0 %vm171_vm0, %v12639_v56 }
  0xa1   : > { %11011 = vmatprep.mubr.msk.f32.mxu0 %vm171_vm0, %v12641_v57 }
  0xa2   : > { %11059 = vmatmul.mubr.msk.f32.gmra.mxu1 %vm171_vm0, %v12381_v28  ;;  %v12671_v28 = vld [vmem:[#allocation2 + $0x188] sm:$0xff] }
  0xa3   : > { %11061 = vmatprep.mubr.msk.f32.mxu1 %vm171_vm0, %v12383_v30  ;;  %v12684_v30 = vld [vmem:[%s14680_s1 + $0x40] sm:$0xff] }
  0xa4   : > { %11012 = vmatmul.mubr.msk.f32.gmra.mxu0 %vm171_vm0, %v12651_v63 }
  0xa5   : > { %11014 = vmatprep.mubr.msk.f32.mxu0 %vm171_vm0, %v12653_v0 }
  0xa6   : > { %11062 = vmatmul.mubr.msk.f32.gmra.mxu1 %vm171_vm0, %v12397_v47 }
  0xa7   : > { %11064 = vmatprep.mubr.msk.f32.mxu1 %vm171_vm0, %v12661_v23 }
  0xa8   : > { %11015 = vmatmul.mubr.msk.f32.gmra.mxu0 %vm171_vm0, %v12665_v25 }
  0xa9   : > { %11069 = vmatprep.mubr.msk.f32.mxu0 %vm171_vm0, %v12164_v3  ;;  %v14745_v3 = vld [vmem:[#allocation9_spill] sm:$0xff] }
  0xaa   : > { %11065 = vmatmul.mubr.msk.f32.gmra.mxu1 %vm171_vm0, %v12671_v28 }
  0xab   : > { %11119 = vmatprep.mubr.msk.f32.mxu1 %vm171_vm0, %v12472_v26 }
  0xac   : > { %11070 = vmatmul.mubr.msk.f32.vlgmr.msra.gmra.mxu0 %vm171_vm0, %v12166_v4  ;;  %v12797_v4 = vld [vmem:[#allocation2 + $0x181] sm:$0xff] }
  0xad   : > { %11168 = vmatpush3.msra.mxu0 %v12481_v2  ;;  %11072 = vmatprep.mubr.msk.f32.mxu0 %vm171_vm0, %v12168_v5  ;;  %v14744_v2 = vld [vmem:[#allocation8_spill] sm:$0xff]  ;;  %v14746_v5 = vld [vmem:[#allocation10_spill] sm:$0xff] }
  0xae   : > { %11120 = vmatmul.mubr.msk.f32.vlgmr.msra.gmra.mxu1 %vm171_vm0, %v12487_v49  ;;  %11267 = vmatprep.subr.mxu0 %v12684_v30  ;;  %v3519_v49 = vld [vmem:[#allocation2 + $0x69] sm:$0xff] }
  0xaf   : > { %11122 = vmatprep.mubr.msk.f32.mxu1 %vm171_vm0, %v12494_v60  ;;  %11218 = vmatpush3.msra.mxu1 %v12492_v50 }
  0xb0   : > { %11073 = vmatmul.mubr.msk.f32.gmra.mxu0 %vm171_vm0, %v12185_v8  ;;  %v390_v8 = vld [vmem:[#allocation3 + $0x8] sm:$0xff] }
  0xb1   : > { %11075 = vmatprep.mubr.msk.f32.mxu0 %vm171_vm0, %v12189_v9  ;;  %v2642_v9 = vld [vmem:[#allocation2 + $0x18a] sm:$0xff] }
  0xb2   : > { %11123 = vmatmul.mubr.msk.f32.gmra.mxu1 %vm171_vm0, %v12507_v14  ;;  %v393_v14 = vld [vmem:[#allocation3 + $0x20] sm:$0xff] }
  0xb3   : > { %11125 = vmatprep.mubr.msk.f32.mxu1 %vm171_vm0, %v12509_v27 }
  0xb4   : > { %11076 = vmatmul.mubr.msk.f32.gmra.mxu0 %vm171_vm0, %v12201_v12  ;;  %v3514_v12 = vld [vmem:[#allocation2 + $0x31] sm:$0xff] }
  0xb5   : > { %11078 = vmatprep.mubr.msk.f32.mxu0 %vm171_vm0, %v12205_v13 }
  0xb6   : > { %11126 = vmatmul.mubr.msk.f32.gmra.mxu1 %vm171_vm0, %v12519_v15 }
  0xb7   : > { %11128 = vmatprep.mubr.msk.f32.mxu1 %vm171_vm0, %v12521_v61  ;;  %v3520_v61 = vld [vmem:[#allocation2 + $0x79] sm:$0xff] }
  0xb8   : > { %11079 = vmatmul.mubr.msk.f32.gmra.mxu0 %vm171_vm0, %v12217_v18 }
  0xb9   : > { %11081 = vmatprep.mubr.msk.f32.mxu0 %vm171_vm0, %v12221_v19 }
  0xba   : > { %11129 = vmatmul.mubr.msk.f32.gmra.mxu1 %vm171_vm0, %v12531_v7  ;;  %v12807_v7 = vld [vmem:[#allocation2 + $0x189] sm:$0xff] }
  0xbb   : > { %11131 = vmatprep.mubr.msk.f32.mxu1 %vm171_vm0, %v12533_v6  ;;  %v2641_v6 = vld [vmem:[#allocation2 + $0x182] sm:$0xff] }
  0xbc   : > { %11082 = vmatmul.mubr.msk.f32.gmra.mxu0 %vm171_vm0, %v12235_v24  ;;  %v3515_v24 = vld [vmem:[#allocation2 + $0x39] sm:$0xff] }
  0xbd   : > { %11084 = vmatprep.mubr.msk.f32.mxu0 %vm171_vm0, %v12241_v29  ;;  %v14747_v29 = vld [vmem:[#allocation4_spill] sm:$0xff] }
  0xbe   : > { %11132 = vmatmul.mubr.msk.f32.gmra.mxu1 %vm171_vm0, %v12543_v11  ;;  %v389_v11 = vld [vmem:[#allocation3] sm:$0xff] }
  0xbf   : > { %11134 = vmatprep.mubr.msk.f32.mxu1 %vm171_vm0, %v12545_v10 }
  0xc0   : > { %11085 = vmatmul.mubr.msk.f32.gmra.mxu0 %vm171_vm0, %v12257_v34 }
  0xc1   : > { %11087 = vmatprep.mubr.msk.f32.mxu0 %vm171_vm0, %v12261_v35  ;;  %v3516_v35 = vld [vmem:[#allocation2 + $0x49] sm:$0xff] }
  0xc2   : > { %11135 = vmatmul.mubr.msk.f32.gmra.mxu1 %vm171_vm0, %v12555_v16 }
  0xc3   : > { %11137 = vmatprep.mubr.msk.f32.mxu1 %vm171_vm0, %v12557_v17 }
  0xc4   : > { %11088 = vmatmul.mubr.msk.f32.gmra.mxu0 %vm171_vm0, %v12273_v38  ;;  %v14748_v38 = vld [vmem:[#allocation5_spill] sm:$0xff] }
  0xc5   : > { %11090 = vmatprep.mubr.msk.f32.mxu0 %vm171_vm0, %v12277_v39  ;;  %v3517_v39 = vld [vmem:[#allocation2 + $0x51] sm:$0xff] }
  0xc6   : > { %11138 = vmatmul.mubr.msk.f32.gmra.mxu1 %vm171_vm0, %v12567_v20  ;;  %v3070_v20 = vld [vmem:[#allocation2 + $0x80] sm:$0xff] }
  0xc7   : > { %11140 = vmatprep.mubr.msk.f32.mxu1 %vm171_vm0, %v12569_v21 }
  0xc8   : > { %11091 = vmatmul.mubr.msk.f32.gmra.mxu0 %vm171_vm0, %v12289_v42 }
  0xc9   : > { %11093 = vmatprep.mubr.msk.f32.mxu0 %vm171_vm0, %v12293_v43  ;;  %v14749_v43 = vld [vmem:[#allocation6_spill] sm:$0xff] }
  0xca   : > { %11141 = vmatmul.mubr.msk.f32.gmra.mxu1 %vm171_vm0, %v12579_v32  ;;  %v396_v32 = vld [vmem:[#allocation3 + $0x38] sm:$0xff] }
  0xcb   : > { %11143 = vmatprep.mubr.msk.f32.mxu1 %vm171_vm0, %v12581_v33  ;;  %v3071_v33 = vld [vmem:[#allocation2 + $0x90] sm:$0xff] }
  0xcc   : > { %11094 = vmatmul.mubr.msk.f32.gmra.mxu0 %vm171_vm0, %v12307_v48  ;;  %v391_v48 = vld [vmem:[#allocation3 + $0x10] sm:$0xff] }
  0xcd   : > { %11096 = vmatprep.mubr.msk.f32.mxu0 %vm171_vm0, %v12311_v51 }
  0xce   : > { %11144 = vmatmul.mubr.msk.f32.gmra.mxu1 %vm171_vm0, %v12591_v36 }
  0xcf   : > { %11146 = vmatprep.mubr.msk.f32.mxu1 %vm171_vm0, %v12593_v37 }
  0xd0   : > { %11097 = vmatmul.mubr.msk.f32.gmra.mxu0 %vm171_vm0, %v12325_v54  ;;  %v3518_v54 = vld [vmem:[#allocation2 + $0x61] sm:$0xff] }
  0xd1   : > { %11099 = vmatprep.mubr.msk.f32.mxu0 %vm171_vm0, %v12329_v55 }
  0xd2   : > { %11147 = vmatmul.mubr.msk.f32.gmra.mxu1 %vm171_vm0, %v12603_v40  ;;  %v3521_v40 = vld [vmem:[#allocation2 + $0x81] sm:$0xff] }
  0xd3   : > { %11149 = vmatprep.mubr.msk.f32.mxu1 %vm171_vm0, %v12605_v41 }
  0xd4   : > { %11100 = vmatmul.mubr.msk.f32.gmra.mxu0 %vm171_vm0, %v12341_v58  ;;  %v14750_v58 = vld [vmem:[#allocation7_spill] sm:$0xff] }
  0xd5   : > { %11102 = vmatprep.mubr.msk.f32.mxu0 %vm171_vm0, %v12345_v59  ;;  %v10871_v10 = vpop.f32.mrf.mxu0  ;;  %v3068_v59 = vld [vmem:[#allocation2 + $0x68] sm:$0xff] }
  0xd6   : > { %11150 = vmatmul.mubr.msk.f32.gmra.mxu1 %vm171_vm0, %v12615_v44  ;;  %v744_v13 = vadd.f32 %v10871_v10, %v390_v8  ;;  %v395_v44 = vld [vmem:[#allocation3 + $0x30] sm:$0xff] }
  0xd7   : > { %11152 = vmatprep.mubr.msk.f32.mxu1 %vm171_vm0, %v12617_v45  ;;  %v584_v18 = vpop.f32.mrf.mxu0 }
  0xd8   : > { %11103 = vmatmul.mubr.msk.f32.gmra.mxu0 %vm171_vm0, %v12357_v1  ;;  %776 = vst.msk [vmem:[#allocation3 + $0x8] sm:$0xff] %vm324_vm2, %v744_v13  ;;  %v743_v19 = vadd.f32 %v584_v18, %v389_v11  ;;  %v3524_v11 = vld [vmem:[#allocation2 + $0xa9] sm:$0xff] }
  0xd9   : > { %11105 = vmatprep.mubr.msk.f32.mxu0 %vm171_vm0, %v12361_v22  ;;  %v394_v22 = vld [vmem:[#allocation3 + $0x28] sm:$0xff]  ;;  %v3074_v18 = vld [vmem:[#allocation2 + $0xb0] sm:$0xff] }
  0xda   : > { %11153 = vmatmul.mubr.msk.f32.gmra.mxu1 %vm171_vm0, %v12627_v52  ;;  %775 = vst.msk [vmem:[#allocation3] sm:$0xff] %vm324_vm2, %v743_v19  ;;  %v3522_v52 = vld [vmem:[#allocation2 + $0x91] sm:$0xff] }
  0xdb   : > { %11155 = vmatprep.mubr.msk.f32.mxu1 %vm171_vm0, %v12629_v53 }
  0xdc   : > { %11106 = vmatmul.mubr.msk.f32.gmra.mxu0 %vm171_vm0, %v14744_v2 }
  0xdd   : > { %11108 = vmatprep.mubr.msk.f32.mxu0 %vm171_vm0, %v14745_v3 }
  0xde   : > { %11156 = vmatmul.mubr.msk.f32.gmra.mxu1 %vm171_vm0, %v12639_v56  ;;  %v3072_v56 = vld [vmem:[#allocation2 + $0x98] sm:$0xff] }
  0xdf   : > { %11158 = vmatprep.mubr.msk.f32.mxu1 %vm171_vm0, %v12641_v57  ;;  %v840_v26 = vld [vmem:[#allocation3 + $0x8] sm:$0xff] }
  0xe0   : > { %11109 = vmatmul.mubr.msk.f32.gmra.mxu0 %vm171_vm0, %v12389_v31  ;;  %v3069_v31 = vld [vmem:[#allocation2 + $0x78] sm:$0xff] }
  0xe1   : > { %11111 = vmatprep.mubr.msk.f32.mxu0 %vm171_vm0, %v12393_v46  ;;  %v839_v27 = vld [vmem:[#allocation3] sm:$0xff] }
  0xe2   : > { %11159 = vmatmul.mubr.msk.f32.gmra.mxu1 %vm171_vm0, %v12651_v63 }
  0xe3   : > { %11161 = vmatprep.mubr.msk.f32.mxu1 %vm171_vm0, %v12653_v0  ;;  %v398_v0 = vld [vmem:[#allocation3 + $0x48] sm:$0xff] }
  0xe4   : > { %11112 = vmatmul.mubr.msk.f32.gmra.mxu0 %vm171_vm0, %v14746_v5  ;;  %v3523_v5 = vld [vmem:[#allocation2 + $0x99] sm:$0xff] }
  0xe5   : > { %11114 = vmatprep.mubr.msk.f32.mxu0 %vm171_vm0, %v12797_v4 }
  0xe6   : > { %11162 = vmatmul.mubr.msk.f32.gmra.mxu1 %vm171_vm0, %v12665_v25  ;;  %v10921_v34 = vpop.f32.mrf.mxu1  ;;  %v3073_v25 = vld [vmem:[#allocation2 + $0xa8] sm:$0xff] }
  0xe7   : > { %11164 = vmatprep.mubr.msk.f32.mxu1 %vm171_vm0, %v2641_v6  ;;  %v1195_v50 = vadd.f32 %v10921_v34, %v840_v26  ;;  %v3075_v34 = vld [vmem:[#allocation2 + $0xc0] sm:$0xff]  ;;  %v402_v26 = vld [vmem:[#allocation3 + $0x68] sm:$0xff] }
  0xe8   : > { %11115 = vmatmul.mubr.msk.f32.gmra.mxu0 %vm171_vm0, %v12807_v7  ;;  %v1035_v51 = vpop.f32.mrf.mxu1 }
  0xe9   : > { %11169 = vmatprep.mubr.msk.f32.mxu0 %vm171_vm0, %v12152_v62  ;;  %v392_v62 = vld [vmem:[#allocation3 + $0x18] sm:$0xff]  ;;  %1227 = vst.msk [vmem:[#allocation3 + $0x8] sm:$0xff] %vm324_vm2, %v1195_v50  ;;  %v1194_v17 = vadd.f32 %v1035_v51, %v839_v27  ;;  %v401_v27 = vld [vmem:[#allocation3 + $0x60] sm:$0xff] }
  0xea   : > { %11165 = vmatmul.mubr.msk.f32.gmra.mxu1 %vm171_vm0, %v2642_v9  ;;  %v397_v9 = vld [vmem:[#allocation3 + $0x40] sm:$0xff] }
  0xeb   : > { %11219 = vmatprep.mubr.msk.f32.mxu1 %vm171_vm0, %v3514_v12  ;;  %1226 = vst.msk [vmem:[#allocation3] sm:$0xff] %vm324_vm2, %v1194_v17 }
  0xec   : > { %11170 = vmatmul.mubr.msk.f32.vlgmr.msra.gmra.mxu0 %vm171_vm0, %v14747_v29  ;;  %v400_v29 = vld [vmem:[#allocation3 + $0x58] sm:$0xff] }
  0xed   : > { %11268 = vmatpush3.msra.mxu0 %v12684_v30  ;;  %11172 = vmatprep.mubr.msk.f32.mxu0 %vm171_vm0, %v14748_v38 }
  0xee   : > { %11220 = vmatmul.mubr.msk.f32.vlgmr.msra.gmra.mxu1 %vm171_vm0, %v3515_v24 }
  0xef   : > { %11222 = vmatprep.mubr.msk.f32.mxu1 %vm171_vm0, %v3516_v35 }
  0xf0   : > { %v10874_v42 = vpop.f32.mrf.mxu0  ;;  %11173 = vmatmul.mubr.msk.f32.gmra.mxu0 %vm171_vm0, %v14749_v43 }
  0xf1   : > { %v746_v55 = vadd.f32 %v10874_v42, %v392_v62  ;;  %11175 = vmatprep.mubr.msk.f32.mxu0 %vm171_vm0, %v14750_v58  ;;  %v10924_v46 = vpop.f32.mrf.mxu1 }
  0xf2   : > { %v594_v1 = vpop.f32.mrf.mxu0  ;;  %11223 = vmatmul.mubr.msk.f32.gmra.mxu1 %vm171_vm0, %v3517_v39  ;;  %v3525_v39 = vld [vmem:[#allocation2 + $0xb1] sm:$0xff] }
  0xf3   : > { %778 = vst.msk [vmem:[#allocation3 + $0x18] sm:$0xff] %vm324_vm2, %v746_v55  ;;  %v745_v47 = vadd.f32 %v594_v1, %v391_v48  ;;  %11225 = vmatprep.mubr.msk.f32.mxu1 %vm171_vm0, %v3518_v54  ;;  %v1045_v15 = vpop.f32.mrf.mxu1  ;;  %v399_v48 = vld [vmem:[#allocation3 + $0x50] sm:$0xff] }
  0xf4   : > { %v10877_v60 = vpop.f32.mrf.mxu0  ;;  %11176 = vmatmul.mubr.msk.f32.gmra.mxu0 %vm171_vm0, %v3068_v59  ;;  %v3526_v54 = vld [vmem:[#allocation2 + $0xc1] sm:$0xff] }
  0xf5   : > { %777 = vst.msk [vmem:[#allocation3 + $0x10] sm:$0xff] %vm324_vm2, %v745_v47  ;;  %v748_v16 = vadd.f32 %v10877_v60, %v394_v22  ;;  %11178 = vmatprep.mubr.msk.f32.mxu0 %vm171_vm0, %v3069_v31  ;;  %v10927_v36 = vpop.f32.mrf.mxu1  ;;  %v3076_v59 = vld [vmem:[#allocation2 + $0xc8] sm:$0xff]  ;;  %v3077_v31 = vld [vmem:[#allocation2 + $0xd8] sm:$0xff] }
  0xf6   : > { %v604_v21 = vpop.f32.mrf.mxu0  ;;  %11226 = vmatmul.mubr.msk.f32.gmra.mxu1 %vm171_vm0, %v3519_v49  ;;  %v3527_v49 = vld [vmem:[#allocation2 + $0xc9] sm:$0xff] }
  0xf7   : > { %780 = vst.msk [vmem:[#allocation3 + $0x28] sm:$0xff] %vm324_vm2, %v748_v16  ;;  %v747_v37 = vadd.f32 %v604_v21, %v393_v14  ;;  %11228 = vmatprep.mubr.msk.f32.mxu1 %vm171_vm0, %v3520_v61  ;;  %v1055_v45 = vpop.f32.mrf.mxu1  ;;  %v3528_v61 = vld [vmem:[#allocation2 + $0xd9] sm:$0xff] }
  0xf8   : > { %v10880_v41 = vpop.f32.mrf.mxu0  ;;  %11179 = vmatmul.mubr.msk.f32.gmra.mxu0 %vm171_vm0, %v3070_v20  ;;  %v3078_v20 = vld [vmem:[#allocation2 + $0xe0] sm:$0xff] }
  0xf9   : > { %779 = vst.msk [vmem:[#allocation3 + $0x20] sm:$0xff] %vm324_vm2, %v747_v37  ;;  %v750_v53 = vadd.f32 %v10880_v41, %v396_v32  ;;  %11181 = vmatprep.mubr.msk.f32.mxu0 %vm171_vm0, %v3071_v33  ;;  %v10930_v30 = vpop.f32.mrf.mxu1  ;;  %v404_v33 = vld [vmem:[#allocation3 + $0x78] sm:$0xff] }
  0xfa   : > { %v614_v57 = vpop.f32.mrf.mxu0  ;;  %v842_v63 = vld [vmem:[#allocation3 + $0x18] sm:$0xff]  ;;  %11229 = vmatmul.mubr.msk.f32.gmra.mxu1 %vm171_vm0, %v3521_v40 }
  0xfb   : > { %782 = vst.msk [vmem:[#allocation3 + $0x38] sm:$0xff] %vm324_vm2, %v750_v53  ;;  %v749_v2 = vadd.f32 %v614_v57, %v395_v44  ;;  %v1197_v3 = vadd.f32 %v10924_v46, %v842_v63  ;;  %11231 = vmatprep.mubr.msk.f32.mxu1 %vm171_vm0, %v3522_v52  ;;  %v1065_v10 = vpop.f32.mrf.mxu1  ;;  %v3529_v44 = vld [vmem:[#allocation2 + $0xe1] sm:$0xff]  ;;  %v3530_v57 = vld [vmem:[#allocation2 + $0xf1] sm:$0xff] }
  0xfc   : > { %v10883_v6 = vpop.f32.mrf.mxu0  ;;  %v841_v8 = vld [vmem:[#allocation3 + $0x10] sm:$0xff]  ;;  %11182 = vmatmul.mubr.msk.f32.gmra.mxu0 %vm171_vm0, %v3072_v56 }
  0xfd   : > { %781 = vst.msk [vmem:[#allocation3 + $0x30] sm:$0xff] %vm324_vm2, %v749_v2  ;;  %1229 = vst.msk [vmem:[#allocation3 + $0x18] sm:$0xff] %vm324_vm2, %v1197_v3  ;;  %v752_v12 = vadd.f32 %v10883_v6, %v398_v0  ;;  %v1196_v13 = vadd.f32 %v1045_v15, %v841_v8  ;;  %11184 = vmatprep.mubr.msk.f32.mxu0 %vm171_vm0, %v3073_v25  ;;  %v10933_v35 = vpop.f32.mrf.mxu1  ;;  %v403_v53 = vld [vmem:[#allocation3 + $0x70] sm:$0xff]  ;;  %v3080_v25 = vld [vmem:[#allocation2 + $0xf8] sm:$0xff] }
  0xfe   : > { %v624_v19 = vpop.f32.mrf.mxu0  ;;  %v844_v24 = vld [vmem:[#allocation3 + $0x28] sm:$0xff]  ;;  %11232 = vmatmul.mubr.msk.f32.gmra.mxu1 %vm171_vm0, %v3523_v5  ;;  %v3081_v5 = vld [vmem:[#allocation2 + $0x108] sm:$0xff] }
  0xff   : > { %784 = vst.msk [vmem:[#allocation3 + $0x48] sm:$0xff] %vm324_vm2, %v752_v12  ;;  %1228 = vst.msk [vmem:[#allocation3 + $0x10] sm:$0xff] %vm324_vm2, %v1196_v13  ;;  %v751_v38 = vadd.f32 %v624_v19, %v397_v9  ;;  %v1199_v62 = vadd.f32 %v10927_v36, %v844_v24  ;;  %11234 = vmatprep.mubr.msk.f32.mxu1 %vm171_vm0, %v3524_v11  ;;  %v1075_v51 = vpop.f32.mrf.mxu1  ;;  %v3079_v36 = vld [vmem:[#allocation2 + $0xf0] sm:$0xff]  ;;  %v406_v3 = vld [vmem:[#allocation3 + $0x88] sm:$0xff] }
 0x100   : > { %v10886_v42 = vpop.f32.mrf.mxu0  ;;  %v843_v43 = vld [vmem:[#allocation3 + $0x20] sm:$0xff]  ;;  %11185 = vmatmul.mubr.msk.f32.gmra.mxu0 %vm171_vm0, %v3074_v18 }
 0x101   : > { %783 = vst.msk [vmem:[#allocation3 + $0x40] sm:$0xff] %vm324_vm2, %v751_v38  ;;  %1231 = vst.msk [vmem:[#allocation3 + $0x28] sm:$0xff] %vm324_vm2, %v1199_v62  ;;  %v754_v55 = vadd.f32 %v10886_v42, %v400_v29  ;;  %v1198_v58 = vadd.f32 %v1055_v45, %v843_v43  ;;  %11187 = vmatprep.mubr.msk.f32.mxu0 %vm171_vm0, %v3075_v34  ;;  %v10936_v46 = vpop.f32.mrf.mxu1  ;;  %v405_v13 = vld [vmem:[#allocation3 + $0x80] sm:$0xff]  ;;  %v408_v62 = vld [vmem:[#allocation3 + $0x98] sm:$0xff] }
 0x102   : > { %v634_v1 = vpop.f32.mrf.mxu0  ;;  %v846_v22 = vld [vmem:[#allocation3 + $0x38] sm:$0xff]  ;;  %11235 = vmatmul.mubr.msk.f32.gmra.mxu1 %vm171_vm0, %v3525_v39  ;;  %v3082_v34 = vld [vmem:[#allocation2 + $0x110] sm:$0xff]  ;;  %v3083_v39 = vld [vmem:[#allocation2 + $0x120] sm:$0xff] }
 0x103   : > { %786 = vst.msk [vmem:[#allocation3 + $0x58] sm:$0xff] %vm324_vm2, %v754_v55  ;;  %1230 = vst.msk [vmem:[#allocation3 + $0x20] sm:$0xff] %vm324_vm2, %v1198_v58  ;;  %v753_v47 = vadd.f32 %v634_v1, %v399_v48  ;;  %v1201_v50 = vadd.f32 %v10930_v30, %v846_v22  ;;  %11237 = vmatprep.mubr.msk.f32.mxu1 %vm171_vm0, %v3526_v54  ;;  %v1085_v15 = vpop.f32.mrf.mxu1  ;;  %v3532_v19 = vld [vmem:[#allocation2 + $0x109] sm:$0xff]  ;;  %v407_v58 = vld [vmem:[#allocation3 + $0x90] sm:$0xff] }
 0x104   : > { %v10889_v60 = vpop.f32.mrf.mxu0  ;;  %v845_v14 = vld [vmem:[#allocation3 + $0x30] sm:$0xff]  ;;  %11188 = vmatmul.mubr.msk.f32.gmra.mxu0 %vm171_vm0, %v3076_v59 }
 0x105   : > { %785 = vst.msk [vmem:[#allocation3 + $0x50] sm:$0xff] %vm324_vm2, %v753_v47  ;;  %1233 = vst.msk [vmem:[#allocation3 + $0x38] sm:$0xff] %vm324_vm2, %v1201_v50  ;;  %v756_v16 = vadd.f32 %v10889_v60, %v402_v26  ;;  %v1200_v17 = vadd.f32 %v1065_v10, %v845_v14  ;;  %11190 = vmatprep.mubr.msk.f32.mxu0 %vm171_vm0, %v3077_v31  ;;  %v10939_v37 = vpop.f32.mrf.mxu1  ;;  %v3531_v10 = vld [vmem:[#allocation2 + $0xf9] sm:$0xff]  ;;  %v3534_v1 = vld [vmem:[#allocation2 + $0x121] sm:$0xff] }
 0x106   : > { %v644_v21 = vpop.f32.mrf.mxu0  ;;  %v848_v32 = vld [vmem:[#allocation3 + $0x48] sm:$0xff]  ;;  %11238 = vmatmul.mubr.msk.f32.gmra.mxu1 %vm171_vm0, %v3527_v49  ;;  %v3084_v31 = vld [vmem:[#allocation2 + $0x128] sm:$0xff] }
 0x107   : > { %788 = vst.msk [vmem:[#allocation3 + $0x68] sm:$0xff] %vm324_vm2, %v756_v16  ;;  %1232 = vst.msk [vmem:[#allocation3 + $0x30] sm:$0xff] %vm324_vm2, %v1200_v17  ;;  %v755_v40 = vadd.f32 %v644_v21, %v401_v27  ;;  %v1203_v41 = vadd.f32 %v10933_v35, %v848_v32  ;;  %11240 = vmatprep.mubr.msk.f32.mxu1 %vm171_vm0, %v3528_v61  ;;  %v1095_v56 = vpop.f32.mrf.mxu1  ;;  %v410_v50 = vld [vmem:[#allocation3 + $0xa8] sm:$0xff]  ;;  %v409_v17 = vld [vmem:[#allocation3 + $0xa0] sm:$0xff] }
 0x108   : > { %v10892_v45 = vpop.f32.mrf.mxu0  ;;  %v847_v52 = vld [vmem:[#allocation3 + $0x40] sm:$0xff]  ;;  %11191 = vmatmul.mubr.msk.f32.gmra.mxu0 %vm171_vm0, %v3078_v20  ;;  %v3085_v49 = vld [vmem:[#allocation2 + $0x138] sm:$0xff] }
 0x109   : > { %787 = vst.msk [vmem:[#allocation3 + $0x60] sm:$0xff] %vm324_vm2, %v755_v40  ;;  %1235 = vst.msk [vmem:[#allocation3 + $0x48] sm:$0xff] %vm324_vm2, %v1203_v41  ;;  %v758_v63 = vadd.f32 %v10892_v45, %v404_v33  ;;  %v1202_v0 = vadd.f32 %v1075_v51, %v847_v52  ;;  %11193 = vmatprep.mubr.msk.f32.mxu0 %vm171_vm0, %v3079_v36  ;;  %v10942_v6 = vpop.f32.mrf.mxu1  ;;  %v3533_v51 = vld [vmem:[#allocation2 + $0x111] sm:$0xff]  ;;  %v3536_v21 = vld [vmem:[#allocation2 + $0x139] sm:$0xff] }
 0x10a   : > { %v654_v30 = vpop.f32.mrf.mxu0  ;;  %v850_v2 = vld [vmem:[#allocation3 + $0x58] sm:$0xff]  ;;  %11241 = vmatmul.mubr.msk.f32.gmra.mxu1 %vm171_vm0, %v3529_v44  ;;  %v3086_v36 = vld [vmem:[#allocation2 + $0x140] sm:$0xff]  ;;  %v3087_v44 = vld [vmem:[#allocation2 + $0x150] sm:$0xff] }
 0x10b   : > { %790 = vst.msk [vmem:[#allocation3 + $0x78] sm:$0xff] %vm324_vm2, %v758_v63  ;;  %1234 = vst.msk [vmem:[#allocation3 + $0x40] sm:$0xff] %vm324_vm2, %v1202_v0  ;;  %v757_v8 = vadd.f32 %v654_v30, %v403_v53  ;;  %v1205_v9 = vadd.f32 %v10936_v46, %v850_v2  ;;  %11243 = vmatprep.mubr.msk.f32.mxu1 %vm171_vm0, %v3530_v57  ;;  %v1105_v18 = vpop.f32.mrf.mxu1  ;;  %v412_v41 = vld [vmem:[#allocation3 + $0xb8] sm:$0xff]  ;;  %v411_v0 = vld [vmem:[#allocation3 + $0xb0] sm:$0xff] }
 0x10c   : > { %v10895_v11 = vpop.f32.mrf.mxu0  ;;  %v849_v12 = vld [vmem:[#allocation3 + $0x50] sm:$0xff]  ;;  %11194 = vmatmul.mubr.msk.f32.gmra.mxu0 %vm171_vm0, %v3080_v25  ;;  %v3538_v30 = vld [vmem:[#allocation2 + $0x151] sm:$0xff] }
 0x10d   : > { %789 = vst.msk [vmem:[#allocation3 + $0x70] sm:$0xff] %vm324_vm2, %v757_v8  ;;  %1237 = vst.msk [vmem:[#allocation3 + $0x58] sm:$0xff] %vm324_vm2, %v1205_v9  ;;  %v760_v24 = vadd.f32 %v10895_v11, %v406_v3  ;;  %v1204_v29 = vadd.f32 %v1085_v15, %v849_v12  ;;  %11196 = vmatprep.mubr.msk.f32.mxu0 %vm171_vm0, %v3081_v5  ;;  %v10945_v42 = vpop.f32.mrf.mxu1  ;;  %v3535_v15 = vld [vmem:[#allocation2 + $0x129] sm:$0xff]  ;;  %v3088_v5 = vld [vmem:[#allocation2 + $0x158] sm:$0xff] }
 0x10e   : > { %v664_v35 = vpop.f32.mrf.mxu0  ;;  %v852_v38 = vld [vmem:[#allocation3 + $0x68] sm:$0xff]  ;;  %11244 = vmatmul.mubr.msk.f32.gmra.mxu1 %vm171_vm0, %v3531_v10  ;;  %v3089_v10 = vld [vmem:[#allocation2 + $0x168] sm:$0xff] }
 0x10f   : > { %792 = vst.msk [vmem:[#allocation3 + $0x88] sm:$0xff] %vm324_vm2, %v760_v24  ;;  %1236 = vst.msk [vmem:[#allocation3 + $0x50] sm:$0xff] %vm324_vm2, %v1204_v29  ;;  %v759_v43 = vadd.f32 %v664_v35, %v405_v13  ;;  %v1207_v48 = vadd.f32 %v10939_v37, %v852_v38  ;;  %11246 = vmatprep.mubr.msk.f32.mxu1 %vm171_vm0, %v3532_v19  ;;  %v1115_v59 = vpop.f32.mrf.mxu1  ;;  %v414_v9 = vld [vmem:[#allocation3 + $0xc8] sm:$0xff]  ;;  %v413_v29 = vld [vmem:[#allocation3 + $0xc0] sm:$0xff] }
 0x110   : > { %v10898_v54 = vpop.f32.mrf.mxu0  ;;  %v851_v55 = vld [vmem:[#allocation3 + $0x60] sm:$0xff]  ;;  %11197 = vmatmul.mubr.msk.f32.gmra.mxu0 %vm171_vm0, %v3082_v34 }
 0x111   : > { %791 = vst.msk [vmem:[#allocation3 + $0x80] sm:$0xff] %vm324_vm2, %v759_v43  ;;  %1239 = vst.msk [vmem:[#allocation3 + $0x68] sm:$0xff] %vm324_vm2, %v1207_v48  ;;  %v762_v22 = vadd.f32 %v10898_v54, %v408_v62  ;;  %v1206_v26 = vadd.f32 %v1095_v56, %v851_v55  ;;  %11199 = vmatprep.mubr.msk.f32.mxu0 %vm171_vm0, %v3083_v39  ;;  %v10948_v60 = vpop.f32.mrf.mxu1  ;;  %v3537_v56 = vld [vmem:[#allocation2 + $0x141] sm:$0xff]  ;;  %v3540_v35 = vld [vmem:[#allocation2 + $0x169] sm:$0xff] }
 0x112   : > { %v674_v46 = vpop.f32.mrf.mxu0  ;;  %v854_v47 = vld [vmem:[#allocation3 + $0x78] sm:$0xff]  ;;  %11247 = vmatmul.mubr.msk.f32.gmra.mxu1 %vm171_vm0, %v3533_v51  ;;  %v3090_v39 = vld [vmem:[#allocation2 + $0x170] sm:$0xff] }
 0x113   : > { %794 = vst.msk [vmem:[#allocation3 + $0x98] sm:$0xff] %vm324_vm2, %v762_v22  ;;  %1238 = vst.msk [vmem:[#allocation3 + $0x60] sm:$0xff] %vm324_vm2, %v1206_v26  ;;  %v761_v14 = vadd.f32 %v674_v46, %v407_v58  ;;  %v1209_v27 = vadd.f32 %v10942_v6, %v854_v47  ;;  %11249 = vmatprep.mubr.msk.f32.mxu1 %vm171_vm0, %v3534_v1  ;;  %v1125_v20 = vpop.f32.mrf.mxu1  ;;  %v416_v48 = vld [vmem:[#allocation3 + $0xd8] sm:$0xff]  ;;  %v3541_v58 = vld [vmem:[#allocation2 + $0x171] sm:$0xff] }
 0x114   : > { %v10901_v61 = vpop.f32.mrf.mxu0  ;;  %v853_v16 = vld [vmem:[#allocation3 + $0x70] sm:$0xff]  ;;  %11200 = vmatmul.mubr.msk.f32.gmra.mxu0 %vm171_vm0, %v3084_v31 }
 0x115   : > { %793 = vst.msk [vmem:[#allocation3 + $0x90] sm:$0xff] %vm324_vm2, %v761_v14  ;;  %1241 = vst.msk [vmem:[#allocation3 + $0x78] sm:$0xff] %vm324_vm2, %v1209_v27  ;;  %v764_v32 = vadd.f32 %v10901_v61, %v410_v50  ;;  %v1208_v33 = vadd.f32 %v1105_v18, %v853_v16  ;;  %11202 = vmatprep.mubr.msk.f32.mxu0 %vm171_vm0, %v3085_v49  ;;  %v10951_v45 = vpop.f32.mrf.mxu1  ;;  %v3539_v18 = vld [vmem:[#allocation2 + $0x159] sm:$0xff] }
 0x116   : > { %v684_v37 = vpop.f32.mrf.mxu0  ;;  %v856_v40 = vld [vmem:[#allocation3 + $0x88] sm:$0xff]  ;;  %11250 = vmatmul.mubr.msk.f32.gmra.mxu1 %vm171_vm0, %v3535_v15  ;;  %v415_v22 = vld [vmem:[#allocation3 + $0xd0] sm:$0xff] }
 0x117   : > { %796 = vst.msk [vmem:[#allocation3 + $0xa8] sm:$0xff] %vm324_vm2, %v764_v32  ;;  %1240 = vst.msk [vmem:[#allocation3 + $0x70] sm:$0xff] %vm324_vm2, %v1208_v33  ;;  %v763_v52 = vadd.f32 %v684_v37, %v409_v17  ;;  %v1211_v53 = vadd.f32 %v10945_v42, %v856_v40  ;;  %11252 = vmatprep.mubr.msk.f32.mxu1 %vm171_vm0, %v3536_v21  ;;  %v1135_v25 = vpop.f32.mrf.mxu1  ;;  %v418_v49 = vld [vmem:[#allocation3 + $0xe8] sm:$0xff]  ;;  %v3094_v33 = vld [vmem:[#allocation2 + $0x1a0] sm:$0xff] }
 0x118   : > { %v10904_v57 = vpop.f32.mrf.mxu0  ;;  %v855_v63 = vld [vmem:[#allocation3 + $0x80] sm:$0xff]  ;;  %11203 = vmatmul.mubr.msk.f32.gmra.mxu0 %vm171_vm0, %v3086_v36 }
 0x119   : > { %795 = vst.msk [vmem:[#allocation3 + $0xa0] sm:$0xff] %vm324_vm2, %v763_v52  ;;  %1243 = vst.msk [vmem:[#allocation3 + $0x88] sm:$0xff] %vm324_vm2, %v1211_v53  ;;  %v766_v2 = vadd.f32 %v10904_v57, %v412_v41  ;;  %v1210_v3 = vadd.f32 %v1115_v59, %v855_v63  ;;  %11205 = vmatprep.mubr.msk.f32.mxu0 %vm171_vm0, %v3087_v44  ;;  %v10954_v11 = vpop.f32.mrf.mxu1  ;;  %v3965_v40 = vld [vmem:[#allocation2 + $0x32] sm:$0xff] }
 0x11a   : > { %v694_v6 = vpop.f32.mrf.mxu0  ;;  %v858_v8 = vld [vmem:[#allocation3 + $0x98] sm:$0xff]  ;;  %11253 = vmatmul.mubr.msk.f32.gmra.mxu1 %vm171_vm0, %v3537_v56  ;;  %v419_v56 = vld [vmem:[#allocation3 + $0xf0] sm:$0xff] }
 0x11b   : > { %798 = vst.msk [vmem:[#allocation3 + $0xb8] sm:$0xff] %vm324_vm2, %v766_v2  ;;  %1242 = vst.msk [vmem:[#allocation3 + $0x80] sm:$0xff] %vm324_vm2, %v1210_v3  ;;  %v765_v12 = vadd.f32 %v694_v6, %v411_v0  ;;  %v1213_v13 = vadd.f32 %v10948_v60, %v858_v8  ;;  %11255 = vmatprep.mubr.msk.f32.mxu1 %vm171_vm0, %v3538_v30  ;;  %v1145_v34 = vpop.f32.mrf.mxu1  ;;  %v3093_v60 = vld [vmem:[#allocation2 + $0x198] sm:$0xff]  ;;  %v3967_v2 = vld [vmem:[#allocation2 + $0x4a] sm:$0xff] }
 0x11c   : > { %v10907_v19 = vpop.f32.mrf.mxu0  ;;  %v857_v24 = vld [vmem:[#allocation3 + $0x90] sm:$0xff]  ;;  %11206 = vmatmul.mubr.msk.f32.gmra.mxu0 %vm171_vm0, %v3088_v5 }
 0x11d   : > { %797 = vst.msk [vmem:[#allocation3 + $0xb0] sm:$0xff] %vm324_vm2, %v765_v12  ;;  %1245 = vst.msk [vmem:[#allocation3 + $0x98] sm:$0xff] %vm324_vm2, %v1213_v13  ;;  %v768_v38 = vadd.f32 %v10907_v19, %v414_v9  ;;  %v1212_v62 = vadd.f32 %v1125_v20, %v857_v24  ;;  %11208 = vmatprep.mubr.msk.f32.mxu0 %vm171_vm0, %v3089_v10  ;;  %v10957_v51 = vpop.f32.mrf.mxu1  ;;  %v3544_v20 = vld [vmem:[#allocation2 + $0x199] sm:$0xff]  ;;  %v1290_v24 = vld [vmem:[#allocation3] sm:$0xff] }
 0x11e   : > { %v704_v42 = vpop.f32.mrf.mxu0  ;;  %v860_v43 = vld [vmem:[#allocation3 + $0xa8] sm:$0xff]  ;;  %11256 = vmatmul.mubr.msk.f32.gmra.mxu1 %vm171_vm0, %v3539_v18 }
 0x11f   : > { %800 = vst.msk [vmem:[#allocation3 + $0xc8] sm:$0xff] %vm324_vm2, %v768_v38  ;;  %1244 = vst.msk [vmem:[#allocation3 + $0x90] sm:$0xff] %vm324_vm2, %v1212_v62  ;;  %v767_v54 = vadd.f32 %v704_v42, %v413_v29  ;;  %v1215_v55 = vadd.f32 %v10951_v45, %v860_v43  ;;  %11258 = vmatprep.mubr.msk.f32.mxu1 %vm171_vm0, %v3540_v35  ;;  %v1155_v26 = vpop.f32.mrf.mxu1  ;;  %v3545_v45 = vld [vmem:[#allocation2 + $0x1a1] sm:$0xff]  ;;  %v1291_v9 = vld [vmem:[#allocation3 + $0x8] sm:$0xff] }
 0x120   : > { %v10910_v59 = vpop.f32.mrf.mxu0  ;;  %v859_v1 = vld [vmem:[#allocation3 + $0xa0] sm:$0xff]  ;;  %11209 = vmatmul.mubr.msk.f32.gmra.mxu0 %vm171_vm0, %v3090_v39  ;;  %v3966_v0 = vld [vmem:[#allocation2 + $0x3a] sm:$0xff]  ;;  %v1293_v42 = vld [vmem:[#allocation3 + $0x18] sm:$0xff] }
 0x121   : > { %799 = vst.msk [vmem:[#allocation3 + $0xc0] sm:$0xff] %vm324_vm2, %v767_v54  ;;  %1247 = vst.msk [vmem:[#allocation3 + $0xa8] sm:$0xff] %vm324_vm2, %v1215_v55  ;;  %v770_v31 = vadd.f32 %v10910_v59, %v416_v48  ;;  %v1214_v46 = vadd.f32 %v1135_v25, %v859_v1  ;;  %11211 = vmatprep.mubr.msk.f32.mxu0 %vm171_vm0, %v12661_v23  ;;  %v10960_v14 = vpop.f32.mrf.mxu1  ;;  %v417_v23 = vld [vmem:[#allocation3 + $0xe0] sm:$0xff]  ;;  %v1292_v59 = vld [vmem:[#allocation3 + $0x10] sm:$0xff] }
 0x122   : > { %v714_v47 = vpop.f32.mrf.mxu0  ;;  %v862_v50 = vld [vmem:[#allocation3 + $0xb8] sm:$0xff]  ;;  %11259 = vmatmul.mubr.msk.f32.gmra.mxu1 %vm171_vm0, %v3541_v58  ;;  %v3968_v18 = vld [vmem:[#allocation2 + $0x52] sm:$0xff] }
 0x123   : > { %802 = vst.msk [vmem:[#allocation3 + $0xd8] sm:$0xff] %vm324_vm2, %v770_v31  ;;  %1246 = vst.msk [vmem:[#allocation3 + $0xa0] sm:$0xff] %vm324_vm2, %v1214_v46  ;;  %v769_v27 = vadd.f32 %v714_v47, %v415_v22  ;;  %v1217_v15 = vadd.f32 %v10954_v11, %v862_v50  ;;  %11261 = vmatprep.mubr.msk.f32.mxu1 %vm171_vm0, %v12797_v4  ;;  %v1165_v17 = vpop.f32.mrf.mxu1  ;;  %v420_v4 = vld [vmem:[#allocation3 + $0xf8] sm:$0xff]  ;;  %v3971_v22 = vld [vmem:[#allocation2 + $0x7a] sm:$0xff] }
 0x124   : > { %v10913_v61 = vpop.f32.mrf.mxu0  ;;  %v861_v16 = vld [vmem:[#allocation3 + $0xb0] sm:$0xff]  ;;  %11212 = vmatmul.mubr.msk.f32.gmra.mxu0 %vm171_vm0, %v12671_v28  ;;  %v3970_v55 = vld [vmem:[#allocation2 + $0x6a] sm:$0xff]  ;;  %v1295_v50 = vld [vmem:[#allocation3 + $0x28] sm:$0xff] }
 0x125   : > { %801 = vst.msk [vmem:[#allocation3 + $0xd0] sm:$0xff] %vm324_vm2, %v769_v27  ;;  %1249 = vst.msk [vmem:[#allocation3 + $0xb8] sm:$0xff] %vm324_vm2, %v1217_v15  ;;  %v772_v21 = vadd.f32 %v10913_v61, %v418_v49  ;;  %v1216_v32 = vadd.f32 %v1145_v34, %v861_v16  ;;  %11214 = vmatprep.mubr.msk.f32.mxu0 %vm171_vm0, %v3093_v60  ;;  %v10963_v41 = vpop.f32.mrf.mxu1  ;;  %v3969_v34 = vld [vmem:[#allocation2 + $0x62] sm:$0xff]  ;;  %v1294_v61 = vld [vmem:[#allocation3 + $0x20] sm:$0xff] }
 0x126   : > { %v724_v36 = vpop.f32.mrf.mxu0  ;;  %v864_v37 = vld [vmem:[#allocation3 + $0xc8] sm:$0xff]  ;;  %11262 = vmatmul.mubr.msk.f32.gmra.mxu1 %vm171_vm0, %v12807_v7  ;;  %v3972_v15 = vld [vmem:[#allocation2 + $0x82] sm:$0xff] }
 0x127   : > { %804 = vst.msk [vmem:[#allocation3 + $0xe8] sm:$0xff] %vm324_vm2, %v772_v21  ;;  %1248 = vst.msk [vmem:[#allocation3 + $0xb0] sm:$0xff] %vm324_vm2, %v1216_v32  ;;  %v771_v28 = vadd.f32 %v724_v36, %v417_v23  ;;  %v1219_v44 = vadd.f32 %v10957_v51, %v864_v37  ;;  %11264 = vmatprep.mubr.msk.f32.mxu1 %vm171_vm0, %v3544_v20  ;;  %v1175_v57 = vpop.f32.mrf.mxu1 }
 0x128   : > { %v10916_v52 = vpop.f32.mrf.mxu0  ;;  %v863_v53 = vld [vmem:[#allocation3 + $0xc0] sm:$0xff]  ;;  %11215 = vmatmul.mubr.msk.f32.gmra.mxu0 %vm171_vm0, %v3094_v33  ;;  %v1297_v33 = vld [vmem:[#allocation3 + $0x38] sm:$0xff] }
 0x129   : > { %803 = vst.msk [vmem:[#allocation3 + $0xe0] sm:$0xff] %vm324_vm2, %v771_v28  ;;  %1251 = vst.msk [vmem:[#allocation3 + $0xc8] sm:$0xff] %vm324_vm2, %v1219_v44  ;;  %v774_v7 = vadd.f32 %v10916_v52, %v420_v4  ;;  %v1218_v63 = vadd.f32 %v1155_v26, %v863_v53  ;;  %11269 = vmatprep.mubr.msk.f32.mxu0 %vm171_vm0, %v3965_v40  ;;  %v10966_v3 = vpop.f32.mrf.mxu1  ;;  %v3974_v28 = vld [vmem:[#allocation2 + $0x9a] sm:$0xff]  ;;  %v3975_v53 = vld [vmem:[#allocation2 + $0xaa] sm:$0xff] }
 0x12a   : > { %v734_v25 = vpop.f32.mrf.mxu0  ;;  %v866_v30 = vld [vmem:[#allocation3 + $0xd8] sm:$0xff]  ;;  %11265 = vmatmul.mubr.msk.f32.gmra.mxu1 %vm171_vm0, %v3545_v45  ;;  %v1296_v44 = vld [vmem:[#allocation3 + $0x30] sm:$0xff] }
 0x12b   : > { %806 = vst.msk [vmem:[#allocation3 + $0xf8] sm:$0xff] %vm324_vm2, %v774_v7  ;;  %1250 = vst.msk [vmem:[#allocation3 + $0xc0] sm:$0xff] %vm324_vm2, %v1218_v63  ;;  %v773_v5 = vadd.f32 %v734_v25, %v419_v56  ;;  %v1221_v6 = vadd.f32 %v10960_v14, %v866_v30  ;;  %v1185_v11 = vpop.f32.mrf.mxu1  ;;  %v1299_v63 = vld [vmem:[#allocation3 + $0x48] sm:$0xff] }
 0x12c   : > { %v865_v8 = vld [vmem:[#allocation3 + $0xd0] sm:$0xff]  ;;  %v10971_v10 = vpop.f32.mrf.mxu0  ;;  %11270 = vmatmul.mubr.msk.f32.vlgmr.msra.gmra.mxu0 %vm171_vm0, %v3966_v0 }
 0x12d   : > { %805 = vst.msk [vmem:[#allocation3 + $0xf0] sm:$0xff] %vm324_vm2, %v773_v5  ;;  %1253 = vst.msk [vmem:[#allocation3 + $0xd8] sm:$0xff] %vm324_vm2, %v1221_v6  ;;  %v1220_v12 = vadd.f32 %v1165_v17, %v865_v8  ;;  %v1646_v13 = vadd.f32 %v10971_v10, %v1291_v9  ;;  %11272 = vmatprep.mubr.msk.f32.mxu0 %vm171_vm0, %v3967_v2  ;;  %v3973_v17 = vld [vmem:[#allocation2 + $0x92] sm:$0xff]  ;;  %v4480_v6 = vld [vmem:[%s14681_s2] sm:$0xf] }
 0x12e   : > { %v868_v19 = vld [vmem:[#allocation3 + $0xe8] sm:$0xff]  ;;  %v1486_v29 = vpop.f32.mrf.mxu0  ;;  %v11021_v35 = vpop.f32.mrf.mxu1  ;;  %v1298_v8 = vld [vmem:[#allocation3 + $0x40] sm:$0xff]  ;;  %11317 = vmatprep.subr.msk.mxu1 %vm4577_vm3, %v4480_v6 }
 0x12f   : > { %1252 = vst.msk [vmem:[#allocation3 + $0xd0] sm:$0xff] %vm324_vm2, %v1220_v12  ;;  %1678 = vst.msk [vmem:[#allocation3 + $0x8] sm:$0xff] %vm324_vm2, %v1646_v13  ;;  %v1223_v38 = vadd.f32 %v10963_v41, %v868_v19  ;;  %v1645_v62 = vadd.f32 %v1486_v29, %v1290_v24  ;;  %v3976_v5 = vld [vmem:[#allocation2 + $0xb2] sm:$0xff]  ;;  %11318 = vmatpush3.msk.msra.mxu1 %vm4577_vm3, %v4480_v6  ;;  %v1301_v19 = vld [vmem:[#allocation3 + $0x58] sm:$0xff] }
 0x130   : > { %v867_v39 = vld [vmem:[#allocation3 + $0xe0] sm:$0xff]  ;;  %v10974_v43 = vpop.f32.mrf.mxu0  ;;  %11273 = vmatmul.mubr.msk.f32.gmra.mxu0 %vm171_vm0, %v3968_v18  ;;  %v1937_v48 = vpop.f32.mrf.mxu1  ;;  %v1309_v6 = vld [vmem:[#allocation3 + $0x98] sm:$0xff] }
 0x131   : > { %1255 = vst.msk [vmem:[#allocation3 + $0xe8] sm:$0xff] %vm324_vm2, %v1223_v38  ;;  %1677 = vst.msk [vmem:[#allocation3] sm:$0xff] %vm324_vm2, %v1645_v62  ;;  %v1222_v51 = vadd.f32 %v1175_v57, %v867_v39  ;;  %v1648_v54 = vadd.f32 %v10974_v43, %v1293_v42  ;;  %11275 = vmatprep.mubr.msk.f32.mxu0 %vm171_vm0, %v3969_v34  ;;  %v3978_v62 = vld [vmem:[#allocation2 + $0xca] sm:$0xff]  ;;  %v1300_v39 = vld [vmem:[#allocation3 + $0x50] sm:$0xff] }
 0x132   : > { %v870_v58 = vld [vmem:[#allocation3 + $0xf8] sm:$0xff]  ;;  %v1496_v1 = vpop.f32.mrf.mxu0  ;;  %v11024_v26 = vpop.f32.mrf.mxu1 }
 0x133   : > { %1254 = vst.msk [vmem:[#allocation3 + $0xe0] sm:$0xff] %vm324_vm2, %v1222_v51  ;;  %1680 = vst.msk [vmem:[#allocation3 + $0x18] sm:$0xff] %vm324_vm2, %v1648_v54  ;;  %v1225_v31 = vadd.f32 %v10966_v3, %v870_v58  ;;  %v1647_v46 = vadd.f32 %v1496_v1, %v1292_v59  ;;  %v1303_v58 = vld [vmem:[#allocation3 + $0x68] sm:$0xff] }
 0x134   : > { %v869_v47 = vld [vmem:[#allocation3 + $0xf0] sm:$0xff]  ;;  %v10977_v49 = vpop.f32.mrf.mxu0  ;;  %11276 = vmatmul.mubr.msk.f32.gmra.mxu0 %vm171_vm0, %v3970_v55  ;;  %v1947_v60 = vpop.f32.mrf.mxu1 }
 0x135   : > { %1257 = vst.msk [vmem:[#allocation3 + $0xf8] sm:$0xff] %vm324_vm2, %v1225_v31  ;;  %1679 = vst.msk [vmem:[#allocation3 + $0x10] sm:$0xff] %vm324_vm2, %v1647_v46  ;;  %v1224_v14 = vadd.f32 %v1185_v11, %v869_v47  ;;  %v1650_v27 = vadd.f32 %v10977_v49, %v1295_v50  ;;  %11278 = vmatprep.mubr.msk.f32.mxu0 %vm171_vm0, %v3971_v22  ;;  %v3977_v11 = vld [vmem:[#allocation2 + $0xc2] sm:$0xff]  ;;  %v1302_v47 = vld [vmem:[#allocation3 + $0x60] sm:$0xff] }
 0x136   : > { %v1506_v16 = vpop.f32.mrf.mxu0  ;;  %v1742_v23 = vld [vmem:[#allocation3 + $0x8] sm:$0xff]  ;;  %v11027_v20 = vpop.f32.mrf.mxu1  ;;  %v3980_v46 = vld [vmem:[#allocation2 + $0xe2] sm:$0xff] }
 0x137   : > { %1256 = vst.msk [vmem:[#allocation3 + $0xf0] sm:$0xff] %vm324_vm2, %v1224_v14  ;;  %1682 = vst.msk [vmem:[#allocation3 + $0x28] sm:$0xff] %vm324_vm2, %v1650_v27  ;;  %v1649_v21 = vadd.f32 %v1506_v16, %v1294_v61  ;;  %v2097_v32 = vadd.f32 %v11021_v35, %v1742_v23  ;;  %v1305_v61 = vld [vmem:[#allocation3 + $0x78] sm:$0xff] }
 0x138   : > { %v10980_v36 = vpop.f32.mrf.mxu0  ;;  %v1741_v37 = vld [vmem:[#allocation3] sm:$0xff]  ;;  %11279 = vmatmul.mubr.msk.f32.gmra.mxu0 %vm171_vm0, %v3972_v15  ;;  %v1957_v4 = vpop.f32.mrf.mxu1 }
 0x139   : > { %1681 = vst.msk [vmem:[#allocation3 + $0x20] sm:$0xff] %vm324_vm2, %v1649_v21  ;;  %2129 = vst.msk [vmem:[#allocation3 + $0x8] sm:$0xff] %vm324_vm2, %v2097_v32  ;;  %v1652_v40 = vadd.f32 %v10980_v36, %v1297_v33  ;;  %v2096_v41 = vadd.f32 %v1937_v48, %v1741_v37  ;;  %11281 = vmatprep.mubr.msk.f32.mxu0 %vm171_vm0, %v3973_v17  ;;  %v3979_v48 = vld [vmem:[#allocation2 + $0xda] sm:$0xff] }
 0x13a   : > { %v1516_v45 = vpop.f32.mrf.mxu0  ;;  %v1744_v52 = vld [vmem:[#allocation3 + $0x18] sm:$0xff]  ;;  %v11030_v56 = vpop.f32.mrf.mxu1  ;;  %v3982_v32 = vld [vmem:[#allocation2 + $0xfa] sm:$0xff] }
 0x13b   : > { %1684 = vst.msk [vmem:[#allocation3 + $0x38] sm:$0xff] %vm324_vm2, %v1652_v40  ;;  %2128 = vst.msk [vmem:[#allocation3] sm:$0xff] %vm324_vm2, %v2096_v41  ;;  %v1651_v57 = vadd.f32 %v1516_v45, %v1296_v44  ;;  %v2099_v7 = vadd.f32 %v11024_v26, %v1744_v52  ;;  %v1304_v33 = vld [vmem:[#allocation3 + $0x70] sm:$0xff]  ;;  %v1307_v44 = vld [vmem:[#allocation3 + $0x88] sm:$0xff] }
 0x13c   : > { %v10983_v0 = vpop.f32.mrf.mxu0  ;;  %v1743_v25 = vld [vmem:[#allocation3 + $0x10] sm:$0xff]  ;;  %11282 = vmatmul.mubr.msk.f32.gmra.mxu0 %vm171_vm0, %v3974_v28  ;;  %v1967_v30 = vpop.f32.mrf.mxu1 }
 0x13d   : > { %1683 = vst.msk [vmem:[#allocation3 + $0x30] sm:$0xff] %vm324_vm2, %v1651_v57  ;;  %2131 = vst.msk [vmem:[#allocation3 + $0x18] sm:$0xff] %vm324_vm2, %v2099_v7  ;;  %v1654_v2 = vadd.f32 %v10983_v0, %v1299_v63  ;;  %v2098_v3 = vadd.f32 %v1947_v60, %v1743_v25  ;;  %11284 = vmatprep.mubr.msk.f32.mxu0 %vm171_vm0, %v3975_v53  ;;  %v3981_v60 = vld [vmem:[#allocation2 + $0xf2] sm:$0xff] }
 0x13e   : > { %v1526_v9 = vpop.f32.mrf.mxu0  ;;  %v1746_v10 = vld [vmem:[#allocation3 + $0x28] sm:$0xff]  ;;  %v11033_v12 = vpop.f32.mrf.mxu1  ;;  %v1306_v63 = vld [vmem:[#allocation3 + $0x80] sm:$0xff] }
 0x13f   : > { %1686 = vst.msk [vmem:[#allocation3 + $0x48] sm:$0xff] %vm324_vm2, %v1654_v2  ;;  %2130 = vst.msk [vmem:[#allocation3 + $0x10] sm:$0xff] %vm324_vm2, %v2098_v3  ;;  %v1653_v13 = vadd.f32 %v1526_v9, %v1298_v8  ;;  %v2101_v18 = vadd.f32 %v11027_v20, %v1746_v10  ;;  %v3984_v7 = vld [vmem:[#allocation2 + $0x112] sm:$0xff] }
 0x140   : > { %v10986_v24 = vpop.f32.mrf.mxu0  ;;  %v1745_v29 = vld [vmem:[#allocation3 + $0x20] sm:$0xff]  ;;  %11285 = vmatmul.mubr.msk.f32.gmra.mxu0 %vm171_vm0, %v3976_v5  ;;  %v1977_v34 = vpop.f32.mrf.mxu1 }
 0x141   : > { %1685 = vst.msk [vmem:[#allocation3 + $0x40] sm:$0xff] %vm324_vm2, %v1653_v13  ;;  %2133 = vst.msk [vmem:[#allocation3 + $0x28] sm:$0xff] %vm324_vm2, %v2101_v18  ;;  %v1656_v35 = vadd.f32 %v10986_v24, %v1301_v19  ;;  %v2100_v38 = vadd.f32 %v1957_v4, %v1745_v29  ;;  %11287 = vmatprep.mubr.msk.f32.mxu0 %vm171_vm0, %v3977_v11  ;;  %v3983_v4 = vld [vmem:[#allocation2 + $0x10a] sm:$0xff]  ;;  %v1308_v18 = vld [vmem:[#allocation3 + $0x90] sm:$0xff] }
 0x142   : > { %v1536_v42 = vpop.f32.mrf.mxu0  ;;  %v1748_v43 = vld [vmem:[#allocation3 + $0x38] sm:$0xff]  ;;  %v11036_v51 = vpop.f32.mrf.mxu1  ;;  %v3987_v29 = vld [vmem:[#allocation2 + $0x13a] sm:$0xff] }
 0x143   : > { %1688 = vst.msk [vmem:[#allocation3 + $0x58] sm:$0xff] %vm324_vm2, %v1656_v35  ;;  %2132 = vst.msk [vmem:[#allocation3 + $0x20] sm:$0xff] %vm324_vm2, %v2100_v38  ;;  %v1655_v54 = vadd.f32 %v1536_v42, %v1300_v39  ;;  %v2103_v55 = vadd.f32 %v11030_v56, %v1748_v43  ;;  %v3986_v13 = vld [vmem:[#allocation2 + $0x12a] sm:$0xff] }
 0x144   : > { %v10989_v59 = vpop.f32.mrf.mxu0  ;;  %v1747_v1 = vld [vmem:[#allocation3 + $0x30] sm:$0xff]  ;;  %11288 = vmatmul.mubr.msk.f32.gmra.mxu0 %vm171_vm0, %v3978_v62  ;;  %v1987_v22 = vpop.f32.mrf.mxu1  ;;  %v1311_v62 = vld [vmem:[#allocation3 + $0xa8] sm:$0xff] }
 0x145   : > { %1687 = vst.msk [vmem:[#allocation3 + $0x50] sm:$0xff] %vm324_vm2, %v1655_v54  ;;  %2135 = vst.msk [vmem:[#allocation3 + $0x38] sm:$0xff] %vm324_vm2, %v2103_v55  ;;  %v1658_v26 = vadd.f32 %v10989_v59, %v1303_v58  ;;  %v2102_v31 = vadd.f32 %v1967_v30, %v1747_v1  ;;  %11290 = vmatprep.mubr.msk.f32.mxu0 %vm171_vm0, %v3979_v48  ;;  %v3985_v30 = vld [vmem:[#allocation2 + $0x122] sm:$0xff]  ;;  %v1310_v55 = vld [vmem:[#allocation3 + $0xa0] sm:$0xff] }
 0x146   : > { %v1546_v50 = vpop.f32.mrf.mxu0  ;;  %v1750_v49 = vld [vmem:[#allocation3 + $0x48] sm:$0xff]  ;;  %v11039_v14 = vpop.f32.mrf.mxu1  ;;  %v3988_v54 = vld [vmem:[#allocation2 + $0x142] sm:$0xff] }
 0x147   : > { %1690 = vst.msk [vmem:[#allocation3 + $0x68] sm:$0xff] %vm324_vm2, %v1658_v26  ;;  %2134 = vst.msk [vmem:[#allocation3 + $0x30] sm:$0xff] %vm324_vm2, %v2102_v31  ;;  %v1657_v27 = vadd.f32 %v1546_v50, %v1302_v47  ;;  %v2105_v15 = vadd.f32 %v11033_v12, %v1750_v49  ;;  %v3989_v1 = vld [vmem:[#allocation2 + $0x152] sm:$0xff] }
 0x148   : > { %v10992_v16 = vpop.f32.mrf.mxu0  ;;  %v1749_v23 = vld [vmem:[#allocation3 + $0x40] sm:$0xff]  ;;  %11291 = vmatmul.mubr.msk.f32.gmra.mxu0 %vm171_vm0, %v3980_v46  ;;  %v1997_v17 = vpop.f32.mrf.mxu1  ;;  %v1313_v46 = vld [vmem:[#allocation3 + $0xb8] sm:$0xff] }
 0x149   : > { %1689 = vst.msk [vmem:[#allocation3 + $0x60] sm:$0xff] %vm324_vm2, %v1657_v27  ;;  %2137 = vst.msk [vmem:[#allocation3 + $0x48] sm:$0xff] %vm324_vm2, %v2105_v15  ;;  %v1660_v20 = vadd.f32 %v10992_v16, %v1305_v61  ;;  %v2104_v21 = vadd.f32 %v1977_v34, %v1749_v23  ;;  %11293 = vmatprep.mubr.msk.f32.mxu0 %vm171_vm0, %v3981_v60  ;;  %v3990_v27 = vld [vmem:[#allocation2 + $0x15a] sm:$0xff]  ;;  %v3991_v23 = vld [vmem:[#allocation2 + $0x16a] sm:$0xff] }
 0x14a   : > { %v1556_v36 = vpop.f32.mrf.mxu0  ;;  %v1752_v37 = vld [vmem:[#allocation3 + $0x58] sm:$0xff]  ;;  %v11042_v40 = vpop.f32.mrf.mxu1  ;;  %v1312_v15 = vld [vmem:[#allocation3 + $0xb0] sm:$0xff] }
 0x14b   : > { %1692 = vst.msk [vmem:[#allocation3 + $0x78] sm:$0xff] %vm324_vm2, %v1660_v20  ;;  %2136 = vst.msk [vmem:[#allocation3 + $0x40] sm:$0xff] %vm324_vm2, %v2104_v21  ;;  %v1659_v41 = vadd.f32 %v1556_v36, %v1304_v33  ;;  %v2107_v28 = vadd.f32 %v11036_v51, %v1752_v37 }
 0x14c   : > { %v10995_v45 = vpop.f32.mrf.mxu0  ;;  %v1751_v52 = vld [vmem:[#allocation3 + $0x50] sm:$0xff]  ;;  %11294 = vmatmul.mubr.msk.f32.gmra.mxu0 %vm171_vm0, %v3982_v32  ;;  %v2007_v53 = vpop.f32.mrf.mxu1  ;;  %v1315_v32 = vld [vmem:[#allocation3 + $0xc8] sm:$0xff] }
 0x14d   : > { %1691 = vst.msk [vmem:[#allocation3 + $0x70] sm:$0xff] %vm324_vm2, %v1659_v41  ;;  %2139 = vst.msk [vmem:[#allocation3 + $0x58] sm:$0xff] %vm324_vm2, %v2107_v28  ;;  %v1662_v56 = vadd.f32 %v10995_v45, %v1307_v44  ;;  %v2106_v57 = vadd.f32 %v1987_v22, %v1751_v52  ;;  %11296 = vmatprep.mubr.msk.f32.mxu0 %vm171_vm0, %v3983_v4  ;;  %v3992_v41 = vld [vmem:[#allocation2 + $0x172] sm:$0xff]  ;;  %v3993_v52 = vld [vmem:[#allocation2 + $0x182] sm:$0xff] }
 0x14e   : > { %v1566_v0 = vpop.f32.mrf.mxu0  ;;  %v1754_v25 = vld [vmem:[#allocation3 + $0x68] sm:$0xff]  ;;  %v11045_v2 = vpop.f32.mrf.mxu1  ;;  %v1314_v28 = vld [vmem:[#allocation3 + $0xc0] sm:$0xff] }
 0x14f   : > { %1694 = vst.msk [vmem:[#allocation3 + $0x88] sm:$0xff] %vm324_vm2, %v1662_v56  ;;  %2138 = vst.msk [vmem:[#allocation3 + $0x50] sm:$0xff] %vm324_vm2, %v2106_v57  ;;  %v1661_v3 = vadd.f32 %v1566_v0, %v1306_v63  ;;  %v2109_v5 = vadd.f32 %v11039_v14, %v1754_v25 }
 0x150   : > { %v10998_v8 = vpop.f32.mrf.mxu0  ;;  %v1753_v9 = vld [vmem:[#allocation3 + $0x60] sm:$0xff]  ;;  %11297 = vmatmul.mubr.msk.f32.gmra.mxu0 %vm171_vm0, %v3984_v7  ;;  %v2017_v10 = vpop.f32.mrf.mxu1  ;;  %v1317_v7 = vld [vmem:[#allocation3 + $0xd8] sm:$0xff] }
 0x151   : > { %1693 = vst.msk [vmem:[#allocation3 + $0x80] sm:$0xff] %vm324_vm2, %v1661_v3  ;;  %2141 = vst.msk [vmem:[#allocation3 + $0x68] sm:$0xff] %vm324_vm2, %v2109_v5  ;;  %v1664_v11 = vadd.f32 %v10998_v8, %v1309_v6  ;;  %v2108_v12 = vadd.f32 %v1997_v17, %v1753_v9  ;;  %11299 = vmatprep.mubr.msk.f32.mxu0 %vm171_vm0, %v3985_v30  ;;  %v3994_v3 = vld [vmem:[#allocation2 + $0x18a] sm:$0xff]  ;;  %v1316_v5 = vld [vmem:[#allocation3 + $0xd0] sm:$0xff] }
 0x152   : > { %v1576_v19 = vpop.f32.mrf.mxu0  ;;  %v1756_v24 = vld [vmem:[#allocation3 + $0x78] sm:$0xff]  ;;  %v11048_v34 = vpop.f32.mrf.mxu1  ;;  %v3995_v9 = vld [vmem:[#allocation2 + $0x19a] sm:$0xff] }
 0x153   : > { %1696 = vst.msk [vmem:[#allocation3 + $0x98] sm:$0xff] %vm324_vm2, %v1664_v11  ;;  %2140 = vst.msk [vmem:[#allocation3 + $0x60] sm:$0xff] %vm324_vm2, %v2108_v12  ;;  %v1663_v35 = vadd.f32 %v1576_v19, %v1308_v18  ;;  %v2111_v38 = vadd.f32 %v11042_v40, %v1756_v24 }
 0x154   : > { %v11001_v39 = vpop.f32.mrf.mxu0  ;;  %v1755_v42 = vld [vmem:[#allocation3 + $0x70] sm:$0xff]  ;;  %11300 = vmatmul.mubr.msk.f32.gmra.mxu0 %vm171_vm0, %v3986_v13  ;;  %v2027_v43 = vpop.f32.mrf.mxu1  ;;  %v1319_v13 = vld [vmem:[#allocation3 + $0xe8] sm:$0xff] }
 0x155   : > { %1695 = vst.msk [vmem:[#allocation3 + $0x90] sm:$0xff] %vm324_vm2, %v1663_v35  ;;  %2143 = vst.msk [vmem:[#allocation3 + $0x78] sm:$0xff] %vm324_vm2, %v2111_v38  ;;  %v1666_v48 = vadd.f32 %v11001_v39, %v1311_v62  ;;  %v2110_v51 = vadd.f32 %v2007_v53, %v1755_v42  ;;  %11302 = vmatprep.mubr.msk.f32.mxu0 %vm171_vm0, %v3987_v29  ;;  %v3996_v35 = vld [vmem:[#allocation2 + $0x1a2] sm:$0xff]  ;;  %v1318_v38 = vld [vmem:[#allocation3 + $0xe0] sm:$0xff] }
 0x156   : > { %v1586_v58 = vpop.f32.mrf.mxu0  ;;  %v1758_v59 = vld [vmem:[#allocation3 + $0x88] sm:$0xff]  ;;  %v11051_v22 = vpop.f32.mrf.mxu1 }
 0x157   : > { %1698 = vst.msk [vmem:[#allocation3 + $0xa8] sm:$0xff] %vm324_vm2, %v1666_v48  ;;  %2142 = vst.msk [vmem:[#allocation3 + $0x70] sm:$0xff] %vm324_vm2, %v2110_v51  ;;  %v1665_v26 = vadd.f32 %v1586_v58, %v1310_v55  ;;  %v2113_v31 = vadd.f32 %v11045_v2, %v1758_v59  ;;  %v1321_v51 = vld [vmem:[#allocation3 + $0xf8] sm:$0xff] }
 0x158   : > { %v11004_v47 = vpop.f32.mrf.mxu0  ;;  %v1757_v50 = vld [vmem:[#allocation3 + $0x80] sm:$0xff]  ;;  %11303 = vmatmul.mubr.msk.f32.gmra.mxu0 %vm171_vm0, %v3988_v54  ;;  %v2037_v49 = vpop.f32.mrf.mxu1 }
 0x159   : > { %1697 = vst.msk [vmem:[#allocation3 + $0xa0] sm:$0xff] %vm324_vm2, %v1665_v26  ;;  %2145 = vst.msk [vmem:[#allocation3 + $0x88] sm:$0xff] %vm324_vm2, %v2113_v31  ;;  %v1668_v60 = vadd.f32 %v11004_v47, %v1313_v46  ;;  %v2112_v14 = vadd.f32 %v2017_v10, %v1757_v50  ;;  %11305 = vmatprep.mubr.msk.f32.mxu0 %vm171_vm0, %v3989_v1 }
 0x15a   : > { %v1596_v61 = vpop.f32.mrf.mxu0  ;;  %v1760_v16 = vld [vmem:[#allocation3 + $0x98] sm:$0xff]  ;;  %v11054_v17 = vpop.f32.mrf.mxu1 }
 0x15b   : > { %1700 = vst.msk [vmem:[#allocation3 + $0xb8] sm:$0xff] %vm324_vm2, %v1668_v60  ;;  %2144 = vst.msk [vmem:[#allocation3 + $0x80] sm:$0xff] %vm324_vm2, %v2112_v14  ;;  %v1667_v20 = vadd.f32 %v1596_v61, %v1312_v15  ;;  %v2115_v21 = vadd.f32 %v11048_v34, %v1760_v16  ;;  %v2193_v60 = vld [vmem:[#allocation3 + $0x8] sm:$0xff] }
 0x15c   : > { %v11007_v33 = vpop.f32.mrf.mxu0  ;;  %v1759_v36 = vld [vmem:[#allocation3 + $0x90] sm:$0xff]  ;;  %11306 = vmatmul.mubr.msk.f32.gmra.mxu0 %vm171_vm0, %v3990_v27  ;;  %v2047_v37 = vpop.f32.mrf.mxu1 }
 0x15d   : > { %1699 = vst.msk [vmem:[#allocation3 + $0xb0] sm:$0xff] %vm324_vm2, %v1667_v20  ;;  %2147 = vst.msk [vmem:[#allocation3 + $0x98] sm:$0xff] %vm324_vm2, %v2115_v21  ;;  %v1670_v4 = vadd.f32 %v11007_v33, %v1315_v32  ;;  %v2114_v40 = vadd.f32 %v2027_v43, %v1759_v36  ;;  %11308 = vmatprep.mubr.msk.f32.mxu0 %vm171_vm0, %v3991_v23  ;;  %v2192_v23 = vld [vmem:[#allocation3] sm:$0xff]  ;;  %v2195_v36 = vld [vmem:[#allocation3 + $0x18] sm:$0xff] }
 0x15e   : > { %v1606_v44 = vpop.f32.mrf.mxu0  ;;  %v1762_v45 = vld [vmem:[#allocation3 + $0xa8] sm:$0xff]  ;;  %v11057_v53 = vpop.f32.mrf.mxu1 }
 0x15f   : > { %1702 = vst.msk [vmem:[#allocation3 + $0xc8] sm:$0xff] %vm324_vm2, %v1670_v4  ;;  %2146 = vst.msk [vmem:[#allocation3 + $0x90] sm:$0xff] %vm324_vm2, %v2114_v40  ;;  %v1669_v56 = vadd.f32 %v1606_v44, %v1314_v28  ;;  %v2117_v57 = vadd.f32 %v11051_v22, %v1762_v45  ;;  %v1320_v22 = vld [vmem:[#allocation3 + $0xf0] sm:$0xff] }
 0x160   : > { %v11010_v63 = vpop.f32.mrf.mxu0  ;;  %v1761_v0 = vld [vmem:[#allocation3 + $0xa0] sm:$0xff]  ;;  %11309 = vmatmul.mubr.msk.f32.gmra.mxu0 %vm171_vm0, %v3992_v41  ;;  %v2057_v25 = vpop.f32.mrf.mxu1  ;;  %v2194_v44 = vld [vmem:[#allocation3 + $0x10] sm:$0xff] }
 0x161   : > { %1701 = vst.msk [vmem:[#allocation3 + $0xc0] sm:$0xff] %vm324_vm2, %v1669_v56  ;;  %2149 = vst.msk [vmem:[#allocation3 + $0xa8] sm:$0xff] %vm324_vm2, %v2117_v57  ;;  %v1672_v30 = vadd.f32 %v11010_v63, %v1317_v7  ;;  %v2116_v2 = vadd.f32 %v2037_v49, %v1761_v0  ;;  %11311 = vmatprep.mubr.msk.f32.mxu0 %vm171_vm0, %v3993_v52  ;;  %v2197_v7 = vld [vmem:[#allocation3 + $0x28] sm:$0xff] }
 0x162   : > { %v1616_v6 = vpop.f32.mrf.mxu0  ;;  %v1764_v8 = vld [vmem:[#allocation3 + $0xb8] sm:$0xff]  ;;  %v11060_v10 = vpop.f32.mrf.mxu1 }
 0x163   : > { %1704 = vst.msk [vmem:[#allocation3 + $0xd8] sm:$0xff] %vm324_vm2, %v1672_v30  ;;  %2148 = vst.msk [vmem:[#allocation3 + $0xa0] sm:$0xff] %vm324_vm2, %v2116_v2  ;;  %v1671_v11 = vadd.f32 %v1616_v6, %v1316_v5  ;;  %v2119_v12 = vadd.f32 %v11054_v17, %v1764_v8  ;;  %v2196_v2 = vld [vmem:[#allocation3 + $0x20] sm:$0xff] }
 0x164   : > { %v11013_v18 = vpop.f32.mrf.mxu0  ;;  %v1763_v19 = vld [vmem:[#allocation3 + $0xb0] sm:$0xff]  ;;  %11312 = vmatmul.mubr.msk.f32.gmra.mxu0 %vm171_vm0, %v3994_v3  ;;  %v2067_v24 = vpop.f32.mrf.mxu1 }
 0x165   : > { %1703 = vst.msk [vmem:[#allocation3 + $0xd0] sm:$0xff] %vm324_vm2, %v1671_v11  ;;  %2151 = vst.msk [vmem:[#allocation3 + $0xb8] sm:$0xff] %vm324_vm2, %v2119_v12  ;;  %v1674_v29 = vadd.f32 %v11013_v18, %v1319_v13  ;;  %v2118_v34 = vadd.f32 %v2047_v37, %v1763_v19  ;;  %11314 = vmatprep.mubr.msk.f32.mxu0 %vm171_vm0, %v3995_v9 }
 0x166   : > { %v1626_v62 = vpop.f32.mrf.mxu0  ;;  %v1766_v39 = vld [vmem:[#allocation3 + $0xc8] sm:$0xff]  ;;  %v11063_v42 = vpop.f32.mrf.mxu1 }
 0x167   : > { %1706 = vst.msk [vmem:[#allocation3 + $0xe8] sm:$0xff] %vm324_vm2, %v1674_v29  ;;  %2150 = vst.msk [vmem:[#allocation3 + $0xb0] sm:$0xff] %vm324_vm2, %v2118_v34  ;;  %v1673_v43 = vadd.f32 %v1626_v62, %v1318_v38  ;;  %v2121_v48 = vadd.f32 %v11057_v53, %v1766_v39  ;;  %v2201_v39 = vld [vmem:[#allocation3 + $0x48] sm:$0xff] }
 0x168   : > { %v11016_v54 = vpop.f32.mrf.mxu0  ;;  %v1765_v55 = vld [vmem:[#allocation3 + $0xc0] sm:$0xff]  ;;  %11315 = vmatmul.mubr.msk.f32.gmra.mxu0 %vm171_vm0, %v3996_v35  ;;  %v2077_v58 = vpop.f32.mrf.mxu1 }
 0x169   : > { %1705 = vst.msk [vmem:[#allocation3 + $0xe0] sm:$0xff] %vm324_vm2, %v1673_v43  ;;  %2153 = vst.msk [vmem:[#allocation3 + $0xc8] sm:$0xff] %vm324_vm2, %v2121_v48  ;;  %v1676_v59 = vadd.f32 %v11016_v54, %v1321_v51  ;;  %v2120_v1 = vadd.f32 %v2057_v25, %v1765_v55  ;;  %v2200_v55 = vld [vmem:[#allocation3 + $0x40] sm:$0xff] }
 0x16a   : > { %v1636_v26 = vpop.f32.mrf.mxu0  ;;  %v1768_v31 = vld [vmem:[#allocation3 + $0xd8] sm:$0xff]  ;;  %v11066_v46 = vpop.f32.mrf.mxu1 }
 0x16b   : > { %1708 = vst.msk [vmem:[#allocation3 + $0xf8] sm:$0xff] %vm324_vm2, %v1676_v59  ;;  %2152 = vst.msk [vmem:[#allocation3 + $0xc0] sm:$0xff] %vm324_vm2, %v2120_v1  ;;  %v1675_v47 = vadd.f32 %v1636_v26, %v1320_v22  ;;  %v2123_v50 = vadd.f32 %v11060_v10, %v1768_v31  ;;  %v2199_v10 = vld [vmem:[#allocation3 + $0x38] sm:$0xff] }
 0x16c   : > { %v1767_v49 = vld [vmem:[#allocation3 + $0xd0] sm:$0xff]  ;;  %v11071_v14 = vpop.f32.mrf.mxu0  ;;  %v2087_v27 = vpop.f32.mrf.mxu1  ;;  %v2203_v31 = vld [vmem:[#allocation3 + $0x58] sm:$0xff] }
 0x16d   : > { %1707 = vst.msk [vmem:[#allocation3 + $0xf0] sm:$0xff] %vm324_vm2, %v1675_v47  ;;  %2155 = vst.msk [vmem:[#allocation3 + $0xd8] sm:$0xff] %vm324_vm2, %v2123_v50  ;;  %v2122_v15 = vadd.f32 %v2067_v24, %v1767_v49  ;;  %v2548_v61 = vadd.f32 %v11071_v14, %v2193_v60  ;;  %v2198_v24 = vld [vmem:[#allocation3 + $0x30] sm:$0xff] }
 0x16e   : > { %v1770_v16 = vld [vmem:[#allocation3 + $0xe8] sm:$0xff]  ;;  %v2388_v17 = vpop.f32.mrf.mxu0  ;;  %v11121_v20 = vpop.f32.mrf.mxu1  ;;  %v2202_v14 = vld [vmem:[#allocation3 + $0x50] sm:$0xff] }
 0x16f   : > { %2154 = vst.msk [vmem:[#allocation3 + $0xd0] sm:$0xff] %vm324_vm2, %v2122_v15  ;;  %2580 = vst.msk [vmem:[#allocation3 + $0x8] sm:$0xff] %vm324_vm2, %v2548_v61  ;;  %v2125_v21 = vadd.f32 %v11063_v42, %v1770_v16  ;;  %v2547_v32 = vadd.f32 %v2388_v17, %v2192_v23  ;;  %v2205_v17 = vld [vmem:[#allocation3 + $0x68] sm:$0xff] }
 0x170   : > { %v1769_v33 = vld [vmem:[#allocation3 + $0xe0] sm:$0xff]  ;;  %v11074_v37 = vpop.f32.mrf.mxu0  ;;  %v2839_v4 = vpop.f32.mrf.mxu1 }
 0x171   : > { %2157 = vst.msk [vmem:[#allocation3 + $0xe8] sm:$0xff] %vm324_vm2, %v2125_v21  ;;  %2579 = vst.msk [vmem:[#allocation3] sm:$0xff] %vm324_vm2, %v2547_v32  ;;  %v2124_v40 = vadd.f32 %v2077_v58, %v1769_v33  ;;  %v2550_v41 = vadd.f32 %v11074_v37, %v2195_v36  ;;  %v2204_v37 = vld [vmem:[#allocation3 + $0x60] sm:$0xff] }
 0x172   : > { %v1772_v28 = vld [vmem:[#allocation3 + $0xf8] sm:$0xff]  ;;  %v2398_v45 = vpop.f32.mrf.mxu0  ;;  %v11124_v52 = vpop.f32.mrf.mxu1 }
 0x173   : > { %2156 = vst.msk [vmem:[#allocation3 + $0xe0] sm:$0xff] %vm324_vm2, %v2124_v40  ;;  %2582 = vst.msk [vmem:[#allocation3 + $0x18] sm:$0xff] %vm324_vm2, %v2550_v41  ;;  %v2127_v53 = vadd.f32 %v11066_v46, %v1772_v28  ;;  %v2549_v56 = vadd.f32 %v2398_v45, %v2194_v44  ;;  %v2207_v45 = vld [vmem:[#allocation3 + $0x78] sm:$0xff] }
 0x174   : > { %v1771_v57 = vld [vmem:[#allocation3 + $0xf0] sm:$0xff]  ;;  %v11077_v63 = vpop.f32.mrf.mxu0  ;;  %v2849_v0 = vpop.f32.mrf.mxu1 }
 0x175   : > { %2159 = vst.msk [vmem:[#allocation3 + $0xf8] sm:$0xff] %vm324_vm2, %v2127_v53  ;;  %2581 = vst.msk [vmem:[#allocation3 + $0x10] sm:$0xff] %vm324_vm2, %v2549_v56  ;;  %v2126_v25 = vadd.f32 %v2087_v27, %v1771_v57  ;;  %v2552_v30 = vadd.f32 %v11077_v63, %v2197_v7  ;;  %v2206_v63 = vld [vmem:[#allocation3 + $0x70] sm:$0xff] }
 0x176   : > { %v2408_v3 = vpop.f32.mrf.mxu0  ;;  %v2644_v5 = vld [vmem:[#allocation3 + $0x8] sm:$0xff]  ;;  %v11127_v6 = vpop.f32.mrf.mxu1 }
 0x177   : > { %2158 = vst.msk [vmem:[#allocation3 + $0xf0] sm:$0xff] %vm324_vm2, %v2126_v25  ;;  %2584 = vst.msk [vmem:[#allocation3 + $0x28] sm:$0xff] %vm324_vm2, %v2552_v30  ;;  %v2551_v8 = vadd.f32 %v2408_v3, %v2196_v2  ;;  %v2999_v9 = vadd.f32 %v11121_v20, %v2644_v5  ;;  %v2209_v5 = vld [vmem:[#allocation3 + $0x88] sm:$0xff] }
 0x178   : > { %v11080_v11 = vpop.f32.mrf.mxu0  ;;  %v2643_v12 = vld [vmem:[#allocation3] sm:$0xff]  ;;  %v2859_v13 = vpop.f32.mrf.mxu1 }
 0x179   : > { %2583 = vst.msk [vmem:[#allocation3 + $0x20] sm:$0xff] %vm324_vm2, %v2551_v8  ;;  %3031 = vst.msk [vmem:[#allocation3 + $0x8] sm:$0xff] %vm324_vm2, %v2999_v9  ;;  %v2554_v18 = vadd.f32 %v11080_v11, %v2199_v10  ;;  %v2998_v19 = vadd.f32 %v2839_v4, %v2643_v12  ;;  %v2208_v12 = vld [vmem:[#allocation3 + $0x80] sm:$0xff] }
 0x17a   : > { %v2418_v29 = vpop.f32.mrf.mxu0  ;;  %v2646_v34 = vld [vmem:[#allocation3 + $0x18] sm:$0xff]  ;;  %v11130_v35 = vpop.f32.mrf.mxu1 }
 0x17b   : > { %2586 = vst.msk [vmem:[#allocation3 + $0x38] sm:$0xff] %vm324_vm2, %v2554_v18  ;;  %3030 = vst.msk [vmem:[#allocation3] sm:$0xff] %vm324_vm2, %v2998_v19  ;;  %v2553_v38 = vadd.f32 %v2418_v29, %v2198_v24  ;;  %v3001_v62 = vadd.f32 %v11124_v52, %v2646_v34  ;;  %v2211_v34 = vld [vmem:[#allocation3 + $0x98] sm:$0xff] }
 0x17c   : > { %v11083_v42 = vpop.f32.mrf.mxu0  ;;  %v2645_v43 = vld [vmem:[#allocation3 + $0x10] sm:$0xff]  ;;  %v2869_v48 = vpop.f32.mrf.mxu1 }
 0x17d   : > { %2585 = vst.msk [vmem:[#allocation3 + $0x30] sm:$0xff] %vm324_vm2, %v2553_v38  ;;  %3033 = vst.msk [vmem:[#allocation3 + $0x18] sm:$0xff] %vm324_vm2, %v3001_v62  ;;  %v2556_v51 = vadd.f32 %v11083_v42, %v2201_v39  ;;  %v3000_v54 = vadd.f32 %v2849_v0, %v2645_v43  ;;  %v2210_v43 = vld [vmem:[#allocation3 + $0x90] sm:$0xff] }
 0x17e   : > { %v2428_v58 = vpop.f32.mrf.mxu0  ;;  %v2648_v59 = vld [vmem:[#allocation3 + $0x28] sm:$0xff]  ;;  %v11133_v1 = vpop.f32.mrf.mxu1 }
 0x17f   : > { %2588 = vst.msk [vmem:[#allocation3 + $0x48] sm:$0xff] %vm324_vm2, %v2556_v51  ;;  %3032 = vst.msk [vmem:[#allocation3 + $0x10] sm:$0xff] %vm324_vm2, %v3000_v54  ;;  %v2555_v22 = vadd.f32 %v2428_v58, %v2200_v55  ;;  %v3003_v26 = vadd.f32 %v11127_v6, %v2648_v59  ;;  %v2213_v59 = vld [vmem:[#allocation3 + $0xa8] sm:$0xff] }
 0x180   : > { %v11086_v46 = vpop.f32.mrf.mxu0  ;;  %v2647_v47 = vld [vmem:[#allocation3 + $0x20] sm:$0xff]  ;;  %v2879_v50 = vpop.f32.mrf.mxu1 }
 0x181   : > { %2587 = vst.msk [vmem:[#allocation3 + $0x40] sm:$0xff] %vm324_vm2, %v2555_v22  ;;  %3035 = vst.msk [vmem:[#allocation3 + $0x28] sm:$0xff] %vm324_vm2, %v3003_v26  ;;  %v2558_v49 = vadd.f32 %v11086_v46, %v2203_v31  ;;  %v3002_v60 = vadd.f32 %v2859_v13, %v2647_v47  ;;  %v2212_v47 = vld [vmem:[#allocation3 + $0xa0] sm:$0xff] }
 0x182   : > { %v2438_v27 = vpop.f32.mrf.mxu0  ;;  %v2650_v15 = vld [vmem:[#allocation3 + $0x38] sm:$0xff]  ;;  %v11136_v61 = vpop.f32.mrf.mxu1 }
 0x183   : > { %2590 = vst.msk [vmem:[#allocation3 + $0x58] sm:$0xff] %vm324_vm2, %v2558_v49  ;;  %3034 = vst.msk [vmem:[#allocation3 + $0x20] sm:$0xff] %vm324_vm2, %v3002_v60  ;;  %v2557_v16 = vadd.f32 %v2438_v27, %v2202_v14  ;;  %v3005_v23 = vadd.f32 %v11130_v35, %v2650_v15  ;;  %v2215_v15 = vld [vmem:[#allocation3 + $0xb8] sm:$0xff] }
 0x184   : > { %v11089_v20 = vpop.f32.mrf.mxu0  ;;  %v2649_v21 = vld [vmem:[#allocation3 + $0x30] sm:$0xff]  ;;  %v2889_v32 = vpop.f32.mrf.mxu1 }
 0x185   : > { %2589 = vst.msk [vmem:[#allocation3 + $0x50] sm:$0xff] %vm324_vm2, %v2557_v16  ;;  %3037 = vst.msk [vmem:[#allocation3 + $0x38] sm:$0xff] %vm324_vm2, %v3005_v23  ;;  %v2560_v33 = vadd.f32 %v11089_v20, %v2205_v17  ;;  %v3004_v36 = vadd.f32 %v2869_v48, %v2649_v21  ;;  %v2214_v21 = vld [vmem:[#allocation3 + $0xb0] sm:$0xff] }
 0x186   : > { %v2448_v4 = vpop.f32.mrf.mxu0  ;;  %v2652_v40 = vld [vmem:[#allocation3 + $0x48] sm:$0xff]  ;;  %v11139_v41 = vpop.f32.mrf.mxu1 }
 0x187   : > { %2592 = vst.msk [vmem:[#allocation3 + $0x68] sm:$0xff] %vm324_vm2, %v2560_v33  ;;  %3036 = vst.msk [vmem:[#allocation3 + $0x30] sm:$0xff] %vm324_vm2, %v3004_v36  ;;  %v2559_v28 = vadd.f32 %v2448_v4, %v2204_v37  ;;  %v3007_v44 = vadd.f32 %v11133_v1, %v2652_v40  ;;  %v2217_v40 = vld [vmem:[#allocation3 + $0xc8] sm:$0xff] }
 0x188   : > { %v11092_v52 = vpop.f32.mrf.mxu0  ;;  %v2651_v53 = vld [vmem:[#allocation3 + $0x40] sm:$0xff]  ;;  %v2899_v56 = vpop.f32.mrf.mxu1 }
 0x189   : > { %2591 = vst.msk [vmem:[#allocation3 + $0x60] sm:$0xff] %vm324_vm2, %v2559_v28  ;;  %3039 = vst.msk [vmem:[#allocation3 + $0x48] sm:$0xff] %vm324_vm2, %v3007_v44  ;;  %v2562_v57 = vadd.f32 %v11092_v52, %v2207_v45  ;;  %v3006_v7 = vadd.f32 %v2879_v50, %v2651_v53  ;;  %v2216_v53 = vld [vmem:[#allocation3 + $0xc0] sm:$0xff] }
 0x18a   : > { %v2458_v0 = vpop.f32.mrf.mxu0  ;;  %v2654_v25 = vld [vmem:[#allocation3 + $0x58] sm:$0xff]  ;;  %v11142_v30 = vpop.f32.mrf.mxu1 }
 0x18b   : > { %2594 = vst.msk [vmem:[#allocation3 + $0x78] sm:$0xff] %vm324_vm2, %v2562_v57  ;;  %3038 = vst.msk [vmem:[#allocation3 + $0x40] sm:$0xff] %vm324_vm2, %v3006_v7  ;;  %v2561_v2 = vadd.f32 %v2458_v0, %v2206_v63  ;;  %v3009_v3 = vadd.f32 %v11136_v61, %v2654_v25  ;;  %v2219_v25 = vld [vmem:[#allocation3 + $0xd8] sm:$0xff] }
 0x18c   : > { %v11095_v6 = vpop.f32.mrf.mxu0  ;;  %v2653_v8 = vld [vmem:[#allocation3 + $0x50] sm:$0xff]  ;;  %v2909_v9 = vpop.f32.mrf.mxu1 }
 0x18d   : > { %2593 = vst.msk [vmem:[#allocation3 + $0x70] sm:$0xff] %vm324_vm2, %v2561_v2  ;;  %3041 = vst.msk [vmem:[#allocation3 + $0x58] sm:$0xff] %vm324_vm2, %v3009_v3  ;;  %v2564_v10 = vadd.f32 %v11095_v6, %v2209_v5  ;;  %v3008_v11 = vadd.f32 %v2889_v32, %v2653_v8  ;;  %v2218_v8 = vld [vmem:[#allocation3 + $0xd0] sm:$0xff] }
 0x18e   : > { %v2468_v13 = vpop.f32.mrf.mxu0  ;;  %v2656_v18 = vld [vmem:[#allocation3 + $0x68] sm:$0xff]  ;;  %v11145_v19 = vpop.f32.mrf.mxu1 }
 0x18f   : > { %2596 = vst.msk [vmem:[#allocation3 + $0x88] sm:$0xff] %vm324_vm2, %v2564_v10  ;;  %3040 = vst.msk [vmem:[#allocation3 + $0x50] sm:$0xff] %vm324_vm2, %v3008_v11  ;;  %v2563_v24 = vadd.f32 %v2468_v13, %v2208_v12  ;;  %v3011_v29 = vadd.f32 %v11139_v41, %v2656_v18  ;;  %v2221_v18 = vld [vmem:[#allocation3 + $0xe8] sm:$0xff] }
 0x190   : > { %v11098_v35 = vpop.f32.mrf.mxu0  ;;  %v2655_v38 = vld [vmem:[#allocation3 + $0x60] sm:$0xff]  ;;  %v2919_v62 = vpop.f32.mrf.mxu1 }
 0x191   : > { %2595 = vst.msk [vmem:[#allocation3 + $0x80] sm:$0xff] %vm324_vm2, %v2563_v24  ;;  %3043 = vst.msk [vmem:[#allocation3 + $0x68] sm:$0xff] %vm324_vm2, %v3011_v29  ;;  %v2566_v39 = vadd.f32 %v11098_v35, %v2211_v34  ;;  %v3010_v42 = vadd.f32 %v2899_v56, %v2655_v38  ;;  %v2220_v38 = vld [vmem:[#allocation3 + $0xe0] sm:$0xff] }
 0x192   : > { %v2478_v48 = vpop.f32.mrf.mxu0  ;;  %v2658_v51 = vld [vmem:[#allocation3 + $0x78] sm:$0xff]  ;;  %v11148_v54 = vpop.f32.mrf.mxu1 }
 0x193   : > { %2598 = vst.msk [vmem:[#allocation3 + $0x98] sm:$0xff] %vm324_vm2, %v2566_v39  ;;  %3042 = vst.msk [vmem:[#allocation3 + $0x60] sm:$0xff] %vm324_vm2, %v3010_v42  ;;  %v2565_v55 = vadd.f32 %v2478_v48, %v2210_v43  ;;  %v3013_v58 = vadd.f32 %v11142_v30, %v2658_v51  ;;  %v2223_v51 = vld [vmem:[#allocation3 + $0xf8] sm:$0xff] }
 0x194   : > { %v11101_v1 = vpop.f32.mrf.mxu0  ;;  %v2657_v22 = vld [vmem:[#allocation3 + $0x70] sm:$0xff]  ;;  %v2929_v26 = vpop.f32.mrf.mxu1 }
 0x195   : > { %2597 = vst.msk [vmem:[#allocation3 + $0x90] sm:$0xff] %vm324_vm2, %v2565_v55  ;;  %3045 = vst.msk [vmem:[#allocation3 + $0x78] sm:$0xff] %vm324_vm2, %v3013_v58  ;;  %v2568_v31 = vadd.f32 %v11101_v1, %v2213_v59  ;;  %v3012_v46 = vadd.f32 %v2909_v9, %v2657_v22  ;;  %v2222_v22 = vld [vmem:[#allocation3 + $0xf0] sm:$0xff] }
 0x196   : > { %v2488_v50 = vpop.f32.mrf.mxu0  ;;  %v2660_v49 = vld [vmem:[#allocation3 + $0x88] sm:$0xff]  ;;  %v11151_v60 = vpop.f32.mrf.mxu1 }
 0x197   : > { %2600 = vst.msk [vmem:[#allocation3 + $0xa8] sm:$0xff] %vm324_vm2, %v2568_v31  ;;  %3044 = vst.msk [vmem:[#allocation3 + $0x70] sm:$0xff] %vm324_vm2, %v3012_v46  ;;  %v2567_v14 = vadd.f32 %v2488_v50, %v2212_v47  ;;  %v3015_v27 = vadd.f32 %v11145_v19, %v2660_v49 }
 0x198   : > { %v11104_v61 = vpop.f32.mrf.mxu0  ;;  %v2659_v16 = vld [vmem:[#allocation3 + $0x80] sm:$0xff]  ;;  %v2939_v23 = vpop.f32.mrf.mxu1 }
 0x199   : > { %2599 = vst.msk [vmem:[#allocation3 + $0xa0] sm:$0xff] %vm324_vm2, %v2567_v14  ;;  %3047 = vst.msk [vmem:[#allocation3 + $0x88] sm:$0xff] %vm324_vm2, %v3015_v27  ;;  %v2570_v17 = vadd.f32 %v11104_v61, %v2215_v15  ;;  %v3014_v20 = vadd.f32 %v2919_v62, %v2659_v16 }
 0x19a   : > { %v2498_v32 = vpop.f32.mrf.mxu0  ;;  %v2662_v33 = vld [vmem:[#allocation3 + $0x98] sm:$0xff]  ;;  %v11154_v36 = vpop.f32.mrf.mxu1 }
 0x19b   : > { %2602 = vst.msk [vmem:[#allocation3 + $0xb8] sm:$0xff] %vm324_vm2, %v2570_v17  ;;  %3046 = vst.msk [vmem:[#allocation3 + $0x80] sm:$0xff] %vm324_vm2, %v3014_v20  ;;  %v2569_v37 = vadd.f32 %v2498_v32, %v2214_v21  ;;  %v3017_v4 = vadd.f32 %v11148_v54, %v2662_v33 }
 0x19c   : > { %v11107_v41 = vpop.f32.mrf.mxu0  ;;  %v2661_v28 = vld [vmem:[#allocation3 + $0x90] sm:$0xff]  ;;  %v2949_v44 = vpop.f32.mrf.mxu1 }
 0x19d   : > { %2601 = vst.msk [vmem:[#allocation3 + $0xb0] sm:$0xff] %vm324_vm2, %v2569_v37  ;;  %3049 = vst.msk [vmem:[#allocation3 + $0x98] sm:$0xff] %vm324_vm2, %v3017_v4  ;;  %v2572_v45 = vadd.f32 %v11107_v41, %v2217_v40  ;;  %v3016_v52 = vadd.f32 %v2929_v26, %v2661_v28 }
 0x19e   : > { %v2508_v56 = vpop.f32.mrf.mxu0  ;;  %v2664_v57 = vld [vmem:[#allocation3 + $0xa8] sm:$0xff]  ;;  %v11157_v7 = vpop.f32.mrf.mxu1 }
 0x19f   : > { %2604 = vst.msk [vmem:[#allocation3 + $0xc8] sm:$0xff] %vm324_vm2, %v2572_v45  ;;  %3048 = vst.msk [vmem:[#allocation3 + $0x90] sm:$0xff] %vm324_vm2, %v3016_v52  ;;  %v2571_v63 = vadd.f32 %v2508_v56, %v2216_v53  ;;  %v3019_v0 = vadd.f32 %v11151_v60, %v2664_v57  ;;  %v3096_v60 = vld [vmem:[#allocation3 + $0x8] sm:$0xff] }
 0x1a0   : > { %v11110_v30 = vpop.f32.mrf.mxu0  ;;  %v2663_v2 = vld [vmem:[#allocation3 + $0xa0] sm:$0xff]  ;;  %v2959_v3 = vpop.f32.mrf.mxu1 }
 0x1a1   : > { %2603 = vst.msk [vmem:[#allocation3 + $0xc0] sm:$0xff] %vm324_vm2, %v2571_v63  ;;  %3051 = vst.msk [vmem:[#allocation3 + $0xa8] sm:$0xff] %vm324_vm2, %v3019_v0  ;;  %v2574_v5 = vadd.f32 %v11110_v30, %v2219_v25  ;;  %v3018_v6 = vadd.f32 %v2939_v23, %v2663_v2  ;;  %v3095_v23 = vld [vmem:[#allocation3] sm:$0xff] }
 0x1a2   : > { %v2518_v9 = vpop.f32.mrf.mxu0  ;;  %v2666_v10 = vld [vmem:[#allocation3 + $0xb8] sm:$0xff]  ;;  %v11160_v11 = vpop.f32.mrf.mxu1  ;;  %v3099_v2 = vld [vmem:[#allocation3 + $0x20] sm:$0xff] }
 0x1a3   : > { %2606 = vst.msk [vmem:[#allocation3 + $0xd8] sm:$0xff] %vm324_vm2, %v2574_v5  ;;  %3050 = vst.msk [vmem:[#allocation3 + $0xa0] sm:$0xff] %vm324_vm2, %v3018_v6  ;;  %v2573_v12 = vadd.f32 %v2518_v9, %v2218_v8  ;;  %v3021_v13 = vadd.f32 %v11154_v36, %v2666_v10  ;;  %v3098_v36 = vld [vmem:[#allocation3 + $0x18] sm:$0xff] }
 0x1a4   : > { %v11113_v19 = vpop.f32.mrf.mxu0  ;;  %v2665_v24 = vld [vmem:[#allocation3 + $0xb0] sm:$0xff]  ;;  %v2969_v29 = vpop.f32.mrf.mxu1  ;;  %v3102_v10 = vld [vmem:[#allocation3 + $0x38] sm:$0xff] }
 0x1a5   : > { %2605 = vst.msk [vmem:[#allocation3 + $0xd0] sm:$0xff] %vm324_vm2, %v2573_v12  ;;  %3053 = vst.msk [vmem:[#allocation3 + $0xb8] sm:$0xff] %vm324_vm2, %v3021_v13  ;;  %v2576_v34 = vadd.f32 %v11113_v19, %v2221_v18  ;;  %v3020_v35 = vadd.f32 %v2949_v44, %v2665_v24  ;;  %v3097_v44 = vld [vmem:[#allocation3 + $0x10] sm:$0xff]  ;;  %v9872_v18 = vld [vmem:[%s14680_s1 + $0x48] sm:$0xff] }
 0x1a6   : > { %v2528_v62 = vpop.f32.mrf.mxu0  ;;  %v2668_v39 = vld [vmem:[#allocation3 + $0xc8] sm:$0xff]  ;;  %v11163_v42 = vpop.f32.mrf.mxu1  ;;  %11367 = vmatprep.subr.mxu0 %v9872_v18 }
 0x1a7   : > { %2608 = vst.msk [vmem:[#allocation3 + $0xe8] sm:$0xff] %vm324_vm2, %v2576_v34  ;;  %3052 = vst.msk [vmem:[#allocation3 + $0xb0] sm:$0xff] %vm324_vm2, %v3020_v35  ;;  %v2575_v43 = vadd.f32 %v2528_v62, %v2220_v38  ;;  %v3023_v48 = vadd.f32 %v11157_v7, %v2668_v39  ;;  %v3100_v7 = vld [vmem:[#allocation3 + $0x28] sm:$0xff]  ;;  %11368 = vmatpush3.msra.mxu0 %v9872_v18 }
 0x1a8   : > { %v11116_v54 = vpop.f32.mrf.mxu0  ;;  %v2667_v55 = vld [vmem:[#allocation3 + $0xc0] sm:$0xff]  ;;  %v2979_v58 = vpop.f32.mrf.mxu1 }
 0x1a9   : > { %2607 = vst.msk [vmem:[#allocation3 + $0xe0] sm:$0xff] %vm324_vm2, %v2575_v43  ;;  %3055 = vst.msk [vmem:[#allocation3 + $0xc8] sm:$0xff] %vm324_vm2, %v3023_v48  ;;  %v2578_v59 = vadd.f32 %v11116_v54, %v2223_v51  ;;  %v3022_v1 = vadd.f32 %v2959_v3, %v2667_v55 }
 0x1aa   : > { %v2538_v26 = vpop.f32.mrf.mxu0  ;;  %v2670_v31 = vld [vmem:[#allocation3 + $0xd8] sm:$0xff]  ;;  %v11166_v46 = vpop.f32.mrf.mxu1 }
 0x1ab   : > { %2610 = vst.msk [vmem:[#allocation3 + $0xf8] sm:$0xff] %vm324_vm2, %v2578_v59  ;;  %3054 = vst.msk [vmem:[#allocation3 + $0xc0] sm:$0xff] %vm324_vm2, %v3022_v1  ;;  %v2577_v47 = vadd.f32 %v2538_v26, %v2222_v22  ;;  %v3025_v50 = vadd.f32 %v11160_v11, %v2670_v31 }
 0x1ac   : > { %v2669_v49 = vld [vmem:[#allocation3 + $0xd0] sm:$0xff]  ;;  %v11171_v14 = vpop.f32.mrf.mxu0  ;;  %v2989_v27 = vpop.f32.mrf.mxu1 }
 0x1ad   : > { %2609 = vst.msk [vmem:[#allocation3 + $0xf0] sm:$0xff] %vm324_vm2, %v2577_v47  ;;  %3057 = vst.msk [vmem:[#allocation3 + $0xd8] sm:$0xff] %vm324_vm2, %v3025_v50  ;;  %v3024_v15 = vadd.f32 %v2969_v29, %v2669_v49  ;;  %v3451_v61 = vadd.f32 %v11171_v14, %v3096_v60  ;;  %v3101_v29 = vld [vmem:[#allocation3 + $0x30] sm:$0xff] }
 0x1ae   : > { %v2672_v16 = vld [vmem:[#allocation3 + $0xe8] sm:$0xff]  ;;  %v3291_v17 = vpop.f32.mrf.mxu0  ;;  %v11221_v20 = vpop.f32.mrf.mxu1 }
 0x1af   : > { %3056 = vst.msk [vmem:[#allocation3 + $0xd0] sm:$0xff] %vm324_vm2, %v3024_v15  ;;  %3483 = vst.msk [vmem:[#allocation3 + $0x8] sm:$0xff] %vm324_vm2, %v3451_v61  ;;  %v3027_v21 = vadd.f32 %v11163_v42, %v2672_v16  ;;  %v3450_v32 = vadd.f32 %v3291_v17, %v3095_v23  ;;  %v3104_v42 = vld [vmem:[#allocation3 + $0x48] sm:$0xff] }
 0x1b0   : > { %v2671_v33 = vld [vmem:[#allocation3 + $0xe0] sm:$0xff]  ;;  %v11174_v37 = vpop.f32.mrf.mxu0  ;;  %v3742_v4 = vpop.f32.mrf.mxu1 }
 0x1b1   : > { %3059 = vst.msk [vmem:[#allocation3 + $0xe8] sm:$0xff] %vm324_vm2, %v3027_v21  ;;  %3482 = vst.msk [vmem:[#allocation3] sm:$0xff] %vm324_vm2, %v3450_v32  ;;  %v3026_v40 = vadd.f32 %v2979_v58, %v2671_v33  ;;  %v3453_v41 = vadd.f32 %v11174_v37, %v3098_v36  ;;  %v3103_v58 = vld [vmem:[#allocation3 + $0x40] sm:$0xff] }
 0x1b2   : > { %v2674_v28 = vld [vmem:[#allocation3 + $0xf8] sm:$0xff]  ;;  %v3301_v45 = vpop.f32.mrf.mxu0  ;;  %v11224_v52 = vpop.f32.mrf.mxu1 }
 0x1b3   : > { %3058 = vst.msk [vmem:[#allocation3 + $0xe0] sm:$0xff] %vm324_vm2, %v3026_v40  ;;  %3485 = vst.msk [vmem:[#allocation3 + $0x18] sm:$0xff] %vm324_vm2, %v3453_v41  ;;  %v3029_v53 = vadd.f32 %v11166_v46, %v2674_v28  ;;  %v3452_v56 = vadd.f32 %v3301_v45, %v3097_v44  ;;  %v3106_v46 = vld [vmem:[#allocation3 + $0x58] sm:$0xff] }
 0x1b4   : > { %v2673_v57 = vld [vmem:[#allocation3 + $0xf0] sm:$0xff]  ;;  %v11177_v63 = vpop.f32.mrf.mxu0  ;;  %v3752_v0 = vpop.f32.mrf.mxu1 }
 0x1b5   : > { %3061 = vst.msk [vmem:[#allocation3 + $0xf8] sm:$0xff] %vm324_vm2, %v3029_v53  ;;  %3484 = vst.msk [vmem:[#allocation3 + $0x10] sm:$0xff] %vm324_vm2, %v3452_v56  ;;  %v3028_v25 = vadd.f32 %v2989_v27, %v2673_v57  ;;  %v3455_v30 = vadd.f32 %v11177_v63, %v3100_v7  ;;  %v3105_v27 = vld [vmem:[#allocation3 + $0x50] sm:$0xff] }
 0x1b6   : > { %v3311_v3 = vpop.f32.mrf.mxu0  ;;  %v3547_v5 = vld [vmem:[#allocation3 + $0x8] sm:$0xff]  ;;  %v11227_v6 = vpop.f32.mrf.mxu1 }
 0x1b7   : > { %3060 = vst.msk [vmem:[#allocation3 + $0xf0] sm:$0xff] %vm324_vm2, %v3028_v25  ;;  %3487 = vst.msk [vmem:[#allocation3 + $0x28] sm:$0xff] %vm324_vm2, %v3455_v30  ;;  %v3454_v8 = vadd.f32 %v3311_v3, %v3099_v2  ;;  %v3902_v9 = vadd.f32 %v11221_v20, %v3547_v5  ;;  %v3108_v20 = vld [vmem:[#allocation3 + $0x68] sm:$0xff] }
 0x1b8   : > { %v11180_v11 = vpop.f32.mrf.mxu0  ;;  %v3546_v12 = vld [vmem:[#allocation3] sm:$0xff]  ;;  %v3762_v13 = vpop.f32.mrf.mxu1 }
 0x1b9   : > { %3486 = vst.msk [vmem:[#allocation3 + $0x20] sm:$0xff] %vm324_vm2, %v3454_v8  ;;  %3934 = vst.msk [vmem:[#allocation3 + $0x8] sm:$0xff] %vm324_vm2, %v3902_v9  ;;  %v3457_v19 = vadd.f32 %v11180_v11, %v3102_v10  ;;  %v3901_v24 = vadd.f32 %v3742_v4, %v3546_v12  ;;  %v3107_v4 = vld [vmem:[#allocation3 + $0x60] sm:$0xff] }
 0x1ba   : > { %v3321_v34 = vpop.f32.mrf.mxu0  ;;  %v3549_v35 = vld [vmem:[#allocation3 + $0x18] sm:$0xff]  ;;  %v11230_v38 = vpop.f32.mrf.mxu1 }
 0x1bb   : > { %3489 = vst.msk [vmem:[#allocation3 + $0x38] sm:$0xff] %vm324_vm2, %v3457_v19  ;;  %3933 = vst.msk [vmem:[#allocation3] sm:$0xff] %vm324_vm2, %v3901_v24  ;;  %v3456_v62 = vadd.f32 %v3321_v34, %v3101_v29  ;;  %v3904_v39 = vadd.f32 %v11224_v52, %v3549_v35  ;;  %v3110_v52 = vld [vmem:[#allocation3 + $0x78] sm:$0xff] }
 0x1bc   : > { %v11183_v43 = vpop.f32.mrf.mxu0  ;;  %v3548_v48 = vld [vmem:[#allocation3 + $0x10] sm:$0xff]  ;;  %v3772_v51 = vpop.f32.mrf.mxu1  ;;  %v3114_v35 = vld [vmem:[#allocation3 + $0x98] sm:$0xff] }
 0x1bd   : > { %3488 = vst.msk [vmem:[#allocation3 + $0x30] sm:$0xff] %vm324_vm2, %v3456_v62  ;;  %3936 = vst.msk [vmem:[#allocation3 + $0x18] sm:$0xff] %vm324_vm2, %v3904_v39  ;;  %v3459_v54 = vadd.f32 %v11183_v43, %v3104_v42  ;;  %v3903_v55 = vadd.f32 %v3752_v0, %v3548_v48  ;;  %v3109_v0 = vld [vmem:[#allocation3 + $0x70] sm:$0xff] }
 0x1be   : > { %v3331_v59 = vpop.f32.mrf.mxu0  ;;  %v3551_v1 = vld [vmem:[#allocation3 + $0x28] sm:$0xff]  ;;  %v11233_v22 = vpop.f32.mrf.mxu1  ;;  %v3113_v48 = vld [vmem:[#allocation3 + $0x90] sm:$0xff] }
 0x1bf   : > { %3491 = vst.msk [vmem:[#allocation3 + $0x48] sm:$0xff] %vm324_vm2, %v3459_v54  ;;  %3935 = vst.msk [vmem:[#allocation3 + $0x10] sm:$0xff] %vm324_vm2, %v3903_v55  ;;  %v3458_v26 = vadd.f32 %v3331_v59, %v3103_v58  ;;  %v3906_v31 = vadd.f32 %v11227_v6, %v3551_v1  ;;  %v3112_v6 = vld [vmem:[#allocation3 + $0x88] sm:$0xff] }
 0x1c0   : > { %v11186_v47 = vpop.f32.mrf.mxu0  ;;  %v3550_v50 = vld [vmem:[#allocation3 + $0x20] sm:$0xff]  ;;  %v3782_v49 = vpop.f32.mrf.mxu1  ;;  %v3116_v1 = vld [vmem:[#allocation3 + $0xa8] sm:$0xff] }
 0x1c1   : > { %3490 = vst.msk [vmem:[#allocation3 + $0x40] sm:$0xff] %vm324_vm2, %v3458_v26  ;;  %3938 = vst.msk [vmem:[#allocation3 + $0x28] sm:$0xff] %vm324_vm2, %v3906_v31  ;;  %v3461_v60 = vadd.f32 %v11186_v47, %v3106_v46  ;;  %v3905_v14 = vadd.f32 %v3762_v13, %v3550_v50  ;;  %v3111_v13 = vld [vmem:[#allocation3 + $0x80] sm:$0xff] }
 0x1c2   : > { %v3341_v15 = vpop.f32.mrf.mxu0  ;;  %v3553_v61 = vld [vmem:[#allocation3 + $0x38] sm:$0xff]  ;;  %v11236_v16 = vpop.f32.mrf.mxu1  ;;  %v3115_v50 = vld [vmem:[#allocation3 + $0xa0] sm:$0xff] }
 0x1c3   : > { %3493 = vst.msk [vmem:[#allocation3 + $0x58] sm:$0xff] %vm324_vm2, %v3461_v60  ;;  %3937 = vst.msk [vmem:[#allocation3 + $0x20] sm:$0xff] %vm324_vm2, %v3905_v14  ;;  %v3460_v23 = vadd.f32 %v3341_v15, %v3105_v27  ;;  %v3908_v17 = vadd.f32 %v11230_v38, %v3553_v61  ;;  %v3118_v61 = vld [vmem:[#allocation3 + $0xb8] sm:$0xff] }
 0x1c4   : > { %v11189_v21 = vpop.f32.mrf.mxu0  ;;  %v3552_v32 = vld [vmem:[#allocation3 + $0x30] sm:$0xff]  ;;  %v3792_v33 = vpop.f32.mrf.mxu1 }
 0x1c5   : > { %3492 = vst.msk [vmem:[#allocation3 + $0x50] sm:$0xff] %vm324_vm2, %v3460_v23  ;;  %3940 = vst.msk [vmem:[#allocation3 + $0x38] sm:$0xff] %vm324_vm2, %v3908_v17  ;;  %v3463_v36 = vadd.f32 %v11189_v21, %v3108_v20  ;;  %v3907_v37 = vadd.f32 %v3772_v51, %v3552_v32  ;;  %v3117_v32 = vld [vmem:[#allocation3 + $0xb0] sm:$0xff] }
 0x1c6   : > { %v3351_v40 = vpop.f32.mrf.mxu0  ;;  %v3555_v41 = vld [vmem:[#allocation3 + $0x48] sm:$0xff]  ;;  %v11239_v28 = vpop.f32.mrf.mxu1 }
 0x1c7   : > { %3495 = vst.msk [vmem:[#allocation3 + $0x68] sm:$0xff] %vm324_vm2, %v3463_v36  ;;  %3939 = vst.msk [vmem:[#allocation3 + $0x30] sm:$0xff] %vm324_vm2, %v3907_v37  ;;  %v3462_v44 = vadd.f32 %v3351_v40, %v3107_v4  ;;  %v3910_v45 = vadd.f32 %v11233_v22, %v3555_v41  ;;  %v3120_v41 = vld [vmem:[#allocation3 + $0xc8] sm:$0xff] }
 0x1c8   : > { %v11192_v53 = vpop.f32.mrf.mxu0  ;;  %v3554_v56 = vld [vmem:[#allocation3 + $0x40] sm:$0xff]  ;;  %v3802_v57 = vpop.f32.mrf.mxu1 }
 0x1c9   : > { %3494 = vst.msk [vmem:[#allocation3 + $0x60] sm:$0xff] %vm324_vm2, %v3462_v44  ;;  %3942 = vst.msk [vmem:[#allocation3 + $0x48] sm:$0xff] %vm324_vm2, %v3910_v45  ;;  %v3465_v7 = vadd.f32 %v11192_v53, %v3110_v52  ;;  %v3909_v63 = vadd.f32 %v3782_v49, %v3554_v56  ;;  %v3119_v56 = vld [vmem:[#allocation3 + $0xc0] sm:$0xff] }
 0x1ca   : > { %v3361_v25 = vpop.f32.mrf.mxu0  ;;  %v3557_v30 = vld [vmem:[#allocation3 + $0x58] sm:$0xff]  ;;  %v11242_v2 = vpop.f32.mrf.mxu1 }
 0x1cb   : > { %3497 = vst.msk [vmem:[#allocation3 + $0x78] sm:$0xff] %vm324_vm2, %v3465_v7  ;;  %3941 = vst.msk [vmem:[#allocation3 + $0x40] sm:$0xff] %vm324_vm2, %v3909_v63  ;;  %v3464_v3 = vadd.f32 %v3361_v25, %v3109_v0  ;;  %v3912_v5 = vadd.f32 %v11236_v16, %v3557_v30  ;;  %v3122_v30 = vld [vmem:[#allocation3 + $0xd8] sm:$0xff] }
 0x1cc   : > { %v11195_v8 = vpop.f32.mrf.mxu0  ;;  %v3556_v9 = vld [vmem:[#allocation3 + $0x50] sm:$0xff]  ;;  %v3812_v10 = vpop.f32.mrf.mxu1 }
 0x1cd   : > { %3496 = vst.msk [vmem:[#allocation3 + $0x70] sm:$0xff] %vm324_vm2, %v3464_v3  ;;  %3944 = vst.msk [vmem:[#allocation3 + $0x58] sm:$0xff] %vm324_vm2, %v3912_v5  ;;  %v3467_v11 = vadd.f32 %v11195_v8, %v3112_v6  ;;  %v3911_v12 = vadd.f32 %v3792_v33, %v3556_v9  ;;  %v3121_v9 = vld [vmem:[#allocation3 + $0xd0] sm:$0xff] }
 0x1ce   : > { %v3371_v18 = vpop.f32.mrf.mxu0  ;;  %v3559_v19 = vld [vmem:[#allocation3 + $0x68] sm:$0xff]  ;;  %v11245_v24 = vpop.f32.mrf.mxu1 }
 0x1cf   : > { %3499 = vst.msk [vmem:[#allocation3 + $0x88] sm:$0xff] %vm324_vm2, %v3467_v11  ;;  %3943 = vst.msk [vmem:[#allocation3 + $0x50] sm:$0xff] %vm324_vm2, %v3911_v12  ;;  %v3466_v29 = vadd.f32 %v3371_v18, %v3111_v13  ;;  %v3914_v34 = vadd.f32 %v11239_v28, %v3559_v19  ;;  %v3124_v19 = vld [vmem:[#allocation3 + $0xe8] sm:$0xff] }
 0x1d0   : > { %v11198_v38 = vpop.f32.mrf.mxu0  ;;  %v3558_v62 = vld [vmem:[#allocation3 + $0x60] sm:$0xff]  ;;  %v3822_v39 = vpop.f32.mrf.mxu1 }
 0x1d1   : > { %3498 = vst.msk [vmem:[#allocation3 + $0x80] sm:$0xff] %vm324_vm2, %v3466_v29  ;;  %3946 = vst.msk [vmem:[#allocation3 + $0x68] sm:$0xff] %vm324_vm2, %v3914_v34  ;;  %v3469_v42 = vadd.f32 %v11198_v38, %v3114_v35  ;;  %v3913_v43 = vadd.f32 %v3802_v57, %v3558_v62  ;;  %v3123_v62 = vld [vmem:[#allocation3 + $0xe0] sm:$0xff] }
 0x1d2   : > { %v3381_v51 = vpop.f32.mrf.mxu0  ;;  %v3561_v54 = vld [vmem:[#allocation3 + $0x78] sm:$0xff]  ;;  %v11248_v55 = vpop.f32.mrf.mxu1 }
 0x1d3   : > { %3501 = vst.msk [vmem:[#allocation3 + $0x98] sm:$0xff] %vm324_vm2, %v3469_v42  ;;  %3945 = vst.msk [vmem:[#allocation3 + $0x60] sm:$0xff] %vm324_vm2, %v3913_v43  ;;  %v3468_v58 = vadd.f32 %v3381_v51, %v3113_v48  ;;  %v3916_v59 = vadd.f32 %v11242_v2, %v3561_v54  ;;  %v3126_v54 = vld [vmem:[#allocation3 + $0xf8] sm:$0xff] }
 0x1d4   : > { %v11201_v22 = vpop.f32.mrf.mxu0  ;;  %v3560_v26 = vld [vmem:[#allocation3 + $0x70] sm:$0xff]  ;;  %v3832_v31 = vpop.f32.mrf.mxu1 }
 0x1d5   : > { %3500 = vst.msk [vmem:[#allocation3 + $0x90] sm:$0xff] %vm324_vm2, %v3468_v58  ;;  %3948 = vst.msk [vmem:[#allocation3 + $0x78] sm:$0xff] %vm324_vm2, %v3916_v59  ;;  %v3471_v46 = vadd.f32 %v11201_v22, %v3116_v1  ;;  %v3915_v47 = vadd.f32 %v3812_v10, %v3560_v26  ;;  %v3125_v22 = vld [vmem:[#allocation3 + $0xf0] sm:$0xff] }
 0x1d6   : > { %v3391_v49 = vpop.f32.mrf.mxu0  ;;  %v3563_v60 = vld [vmem:[#allocation3 + $0x88] sm:$0xff]  ;;  %v11251_v14 = vpop.f32.mrf.mxu1 }
 0x1d7   : > { %3503 = vst.msk [vmem:[#allocation3 + $0xa8] sm:$0xff] %vm324_vm2, %v3471_v46  ;;  %3947 = vst.msk [vmem:[#allocation3 + $0x70] sm:$0xff] %vm324_vm2, %v3915_v47  ;;  %v3470_v27 = vadd.f32 %v3391_v49, %v3115_v50  ;;  %v3918_v15 = vadd.f32 %v11245_v24, %v3563_v60  ;;  %v3998_v60 = vld [vmem:[#allocation3 + $0x8] sm:$0xff] }
 0x1d8   : > { %v11204_v16 = vpop.f32.mrf.mxu0  ;;  %v3562_v23 = vld [vmem:[#allocation3 + $0x80] sm:$0xff]  ;;  %v3842_v17 = vpop.f32.mrf.mxu1 }
 0x1d9   : > { %3502 = vst.msk [vmem:[#allocation3 + $0xa0] sm:$0xff] %vm324_vm2, %v3470_v27  ;;  %3950 = vst.msk [vmem:[#allocation3 + $0x88] sm:$0xff] %vm324_vm2, %v3918_v15  ;;  %v3473_v20 = vadd.f32 %v11204_v16, %v3118_v61  ;;  %v3917_v21 = vadd.f32 %v3822_v39, %v3562_v23  ;;  %v3997_v16 = vld [vmem:[#allocation3] sm:$0xff] }
 0x1da   : > { %v3401_v33 = vpop.f32.mrf.mxu0  ;;  %v3565_v36 = vld [vmem:[#allocation3 + $0x98] sm:$0xff]  ;;  %v11254_v37 = vpop.f32.mrf.mxu1 }
 0x1db   : > { %3505 = vst.msk [vmem:[#allocation3 + $0xb8] sm:$0xff] %vm324_vm2, %v3473_v20  ;;  %3949 = vst.msk [vmem:[#allocation3 + $0x80] sm:$0xff] %vm324_vm2, %v3917_v21  ;;  %v3472_v4 = vadd.f32 %v3401_v33, %v3117_v32  ;;  %v3920_v40 = vadd.f32 %v11248_v55, %v3565_v36  ;;  %v4000_v33 = vld [vmem:[#allocation3 + $0x18] sm:$0xff] }
 0x1dc   : > { %v11207_v28 = vpop.f32.mrf.mxu0  ;;  %v3564_v44 = vld [vmem:[#allocation3 + $0x90] sm:$0xff]  ;;  %v3852_v45 = vpop.f32.mrf.mxu1 }
 0x1dd   : > { %3504 = vst.msk [vmem:[#allocation3 + $0xb0] sm:$0xff] %vm324_vm2, %v3472_v4  ;;  %3952 = vst.msk [vmem:[#allocation3 + $0x98] sm:$0xff] %vm324_vm2, %v3920_v40  ;;  %v3475_v52 = vadd.f32 %v11207_v28, %v3120_v41  ;;  %v3919_v53 = vadd.f32 %v3832_v31, %v3564_v44  ;;  %v3999_v41 = vld [vmem:[#allocation3 + $0x10] sm:$0xff] }
 0x1de   : > { %v3411_v57 = vpop.f32.mrf.mxu0  ;;  %v3567_v7 = vld [vmem:[#allocation3 + $0xa8] sm:$0xff]  ;;  %v11257_v63 = vpop.f32.mrf.mxu1 }
 0x1df   : > { %3507 = vst.msk [vmem:[#allocation3 + $0xc8] sm:$0xff] %vm324_vm2, %v3475_v52  ;;  %3951 = vst.msk [vmem:[#allocation3 + $0x90] sm:$0xff] %vm324_vm2, %v3919_v53  ;;  %v3474_v0 = vadd.f32 %v3411_v57, %v3119_v56  ;;  %v3922_v25 = vadd.f32 %v11251_v14, %v3567_v7  ;;  %v4002_v56 = vld [vmem:[#allocation3 + $0x28] sm:$0xff] }
 0x1e0   : > { %v11210_v2 = vpop.f32.mrf.mxu0  ;;  %v3566_v3 = vld [vmem:[#allocation3 + $0xa0] sm:$0xff]  ;;  %v3862_v5 = vpop.f32.mrf.mxu1 }
 0x1e1   : > { %3506 = vst.msk [vmem:[#allocation3 + $0xc0] sm:$0xff] %vm324_vm2, %v3474_v0  ;;  %3954 = vst.msk [vmem:[#allocation3 + $0xa8] sm:$0xff] %vm324_vm2, %v3922_v25  ;;  %v3477_v6 = vadd.f32 %v11210_v2, %v3122_v30  ;;  %v3921_v8 = vadd.f32 %v3842_v17, %v3566_v3  ;;  %v4001_v0 = vld [vmem:[#allocation3 + $0x20] sm:$0xff]  ;;  %v14751_v3 = vmov 0.0  }
 0x1e2   : > { %v3421_v10 = vpop.f32.mrf.mxu0  ;;  %v3569_v11 = vld [vmem:[#allocation3 + $0xb8] sm:$0xff]  ;;  %v11260_v12 = vpop.f32.mrf.mxu1 }
 0x1e3   : > { %3509 = vst.msk [vmem:[#allocation3 + $0xd8] sm:$0xff] %vm324_vm2, %v3477_v6  ;;  %3953 = vst.msk [vmem:[#allocation3 + $0xa0] sm:$0xff] %vm324_vm2, %v3921_v8  ;;  %v3476_v13 = vadd.f32 %v3421_v10, %v3121_v9  ;;  %v3924_v18 = vadd.f32 %v11254_v37, %v3569_v11  ;;  %v4003_v11 = vld [vmem:[#allocation3 + $0x30] sm:$0xff] }
 0x1e4   : > { %v11213_v24 = vpop.f32.mrf.mxu0  ;;  %v3568_v29 = vld [vmem:[#allocation3 + $0xb0] sm:$0xff]  ;;  %v3872_v34 = vpop.f32.mrf.mxu1 }
 0x1e5   : > { %3508 = vst.msk [vmem:[#allocation3 + $0xd0] sm:$0xff] %vm324_vm2, %v3476_v13  ;;  %3956 = vst.msk [vmem:[#allocation3 + $0xb8] sm:$0xff] %vm324_vm2, %v3924_v18  ;;  %v3479_v35 = vadd.f32 %v11213_v24, %v3124_v19  ;;  %v3923_v38 = vadd.f32 %v3852_v45, %v3568_v29  ;;  %v4006_v24 = vld [vmem:[#allocation3 + $0x48] sm:$0xff] }
 0x1e6   : > { %v3431_v39 = vpop.f32.mrf.mxu0  ;;  %v3571_v42 = vld [vmem:[#allocation3 + $0xc8] sm:$0xff]  ;;  %v11263_v43 = vpop.f32.mrf.mxu1 }
 0x1e7   : > { %3511 = vst.msk [vmem:[#allocation3 + $0xe8] sm:$0xff] %vm324_vm2, %v3479_v35  ;;  %3955 = vst.msk [vmem:[#allocation3 + $0xb0] sm:$0xff] %vm324_vm2, %v3923_v38  ;;  %v3478_v48 = vadd.f32 %v3431_v39, %v3123_v62  ;;  %v3926_v51 = vadd.f32 %v11257_v63, %v3571_v42  ;;  %v4005_v62 = vld [vmem:[#allocation3 + $0x40] sm:$0xff] }
 0x1e8   : > { %v11216_v55 = vpop.f32.mrf.mxu0  ;;  %v3570_v58 = vld [vmem:[#allocation3 + $0xc0] sm:$0xff]  ;;  %v3882_v46 = vpop.f32.mrf.mxu1 }
 0x1e9   : > { %3510 = vst.msk [vmem:[#allocation3 + $0xe0] sm:$0xff] %vm324_vm2, %v3478_v48  ;;  %3958 = vst.msk [vmem:[#allocation3 + $0xc8] sm:$0xff] %vm324_vm2, %v3926_v51  ;;  %v3481_v59 = vadd.f32 %v11216_v55, %v3126_v54  ;;  %v3925_v1 = vadd.f32 %v3862_v5, %v3570_v58  ;;  %v4004_v5 = vld [vmem:[#allocation3 + $0x38] sm:$0xff] }
 0x1ea   : > { %v3441_v26 = vpop.f32.mrf.mxu0  ;;  %v3573_v31 = vld [vmem:[#allocation3 + $0xd8] sm:$0xff]  ;;  %v11266_v17 = vpop.f32.mrf.mxu1 }
 0x1eb   : > { %3513 = vst.msk [vmem:[#allocation3 + $0xf8] sm:$0xff] %vm324_vm2, %v3481_v59  ;;  %3957 = vst.msk [vmem:[#allocation3 + $0xc0] sm:$0xff] %vm324_vm2, %v3925_v1  ;;  %v3480_v47 = vadd.f32 %v3441_v26, %v3125_v22  ;;  %v3928_v50 = vadd.f32 %v11260_v12, %v3573_v31  ;;  %v4008_v51 = vld [vmem:[#allocation3 + $0x58] sm:$0xff]  ;;  %v4007_v1 = vld [vmem:[#allocation3 + $0x50] sm:$0xff] }
 0x1ec   : > { %v3572_v49 = vld [vmem:[#allocation3 + $0xd0] sm:$0xff]  ;;  %v11271_v14 = vpop.f32.mrf.mxu0  ;;  %v3892_v44 = vpop.f32.mrf.mxu1 }
 0x1ed   : > { %3512 = vst.msk [vmem:[#allocation3 + $0xf0] sm:$0xff] %vm324_vm2, %v3480_v47  ;;  %3960 = vst.msk [vmem:[#allocation3 + $0xd8] sm:$0xff] %vm324_vm2, %v3928_v50  ;;  %v3927_v27 = vadd.f32 %v3872_v34, %v3572_v49  ;;  %v4353_v15 = vadd.f32 %v11271_v14, %v3998_v60  ;;  %v4010_v47 = vld [vmem:[#allocation3 + $0x68] sm:$0xff] }
 0x1ee   : > { %v3575_v61 = vld [vmem:[#allocation3 + $0xe8] sm:$0xff]  ;;  %v4193_v23 = vpop.f32.mrf.mxu0 }
 0x1ef   : > { %3959 = vst.msk [vmem:[#allocation3 + $0xd0] sm:$0xff] %vm324_vm2, %v3927_v27  ;;  %4385 = vst.msk [vmem:[#allocation3 + $0x8] sm:$0xff] %vm324_vm2, %v4353_v15  ;;  %v3930_v20 = vadd.f32 %v11263_v43, %v3575_v61  ;;  %v4352_v21 = vadd.f32 %v4193_v23, %v3997_v16  ;;  %v4009_v27 = vld [vmem:[#allocation3 + $0x60] sm:$0xff] }
 0x1f0   : > { %v3574_v32 = vld [vmem:[#allocation3 + $0xe0] sm:$0xff]  ;;  %v11274_v36 = vpop.f32.mrf.mxu0 }
 0x1f1   : > { %3962 = vst.msk [vmem:[#allocation3 + $0xe8] sm:$0xff] %vm324_vm2, %v3930_v20  ;;  %4384 = vst.msk [vmem:[#allocation3] sm:$0xff] %vm324_vm2, %v4352_v21  ;;  %v3929_v37 = vadd.f32 %v3882_v46, %v3574_v32  ;;  %v4355_v4 = vadd.f32 %v11274_v36, %v4000_v33  ;;  %v4011_v36 = vld [vmem:[#allocation3 + $0x70] sm:$0xff] }
 0x1f2   : > { %v3577_v40 = vld [vmem:[#allocation3 + $0xf8] sm:$0xff]  ;;  %v4203_v28 = vpop.f32.mrf.mxu0 }
 0x1f3   : > { %3961 = vst.msk [vmem:[#allocation3 + $0xe0] sm:$0xff] %vm324_vm2, %v3929_v37  ;;  %4387 = vst.msk [vmem:[#allocation3 + $0x18] sm:$0xff] %vm324_vm2, %v4355_v4  ;;  %v3932_v45 = vadd.f32 %v11266_v17, %v3577_v40  ;;  %v4354_v52 = vadd.f32 %v4203_v28, %v3999_v41  ;;  %v4012_v17 = vld [vmem:[#allocation3 + $0x78] sm:$0xff]  ;;  %v4014_v28 = vld [vmem:[#allocation3 + $0x88] sm:$0xff] }
 0x1f4   : > { %v3576_v53 = vld [vmem:[#allocation3 + $0xf0] sm:$0xff]  ;;  %v11277_v57 = vpop.f32.mrf.mxu0 }
 0x1f5   : > { %3964 = vst.msk [vmem:[#allocation3 + $0xf8] sm:$0xff] %vm324_vm2, %v3932_v45  ;;  %4386 = vst.msk [vmem:[#allocation3 + $0x10] sm:$0xff] %vm324_vm2, %v4354_v52  ;;  %v3931_v7 = vadd.f32 %v3892_v44, %v3576_v53  ;;  %v4357_v63 = vadd.f32 %v11277_v57, %v4002_v56  ;;  %v4013_v56 = vld [vmem:[#allocation3 + $0x80] sm:$0xff] }
 0x1f6   : > { %v4213_v25 = vpop.f32.mrf.mxu0  ;;  %v4417_v30 = vld [vmem:[#allocation3 + $0x8] sm:$0xff] }
 0x1f7   : > { %3963 = vst.msk [vmem:[#allocation3 + $0xf0] sm:$0xff] %vm324_vm2, %v3931_v7  ;;  %4389 = vst.msk [vmem:[#allocation3 + $0x28] sm:$0xff] %vm324_vm2, %v4357_v63  ;;  %v4356_v2 = vadd.f32 %v4213_v25, %v4001_v0  ;;  %v4449_v13 = vmax.f32 %v4417_v30, 0.0  ;;  %v4016_v25 = vld [vmem:[#allocation3 + $0x98] sm:$0xff] }
 0x1f8   : > { %4903 = vst.msk [vmem:[#allocation3 + $0x8] sm:$0xff] %vm324_vm2, %v14751_v3  ;;  %v11280_v6 = vpop.f32.mrf.mxu0  ;;  %v4416_v8 = vld [vmem:[#allocation3] sm:$0xff] }
 0x1f9   : > { %4388 = vst.msk [vmem:[#allocation3 + $0x20] sm:$0xff] %vm324_vm2, %v4356_v2  ;;  %v4359_v9 = vadd.f32 %v11280_v6, %v4004_v5  ;;  %v4448_v10 = vmax.f32 %v4416_v8, 0.0  ;;  %4902 = vst.msk [vmem:[#allocation3] sm:$0xff] %vm324_vm2, %v14751_v3  ;;  %v4015_v8 = vld [vmem:[#allocation3 + $0x90] sm:$0xff] }
 0x1fa   : > { %v4223_v12 = vpop.f32.mrf.mxu0  ;;  %v4419_v18 = vld [vmem:[#allocation3 + $0x18] sm:$0xff] }
 0x1fb   : > { %4391 = vst.msk [vmem:[#allocation3 + $0x38] sm:$0xff] %vm324_vm2, %v4359_v9  ;;  %v4358_v19 = vadd.f32 %v4223_v12, %v4003_v11  ;;  %11319 = vmatprep.mubr.msk.f32.mxu1 %vm324_vm2, %v4448_v10  ;;  %4905 = vst.msk [vmem:[#allocation3 + $0x18] sm:$0xff] %vm324_vm2, %v14751_v3  ;;  %v4451_v42 = vmax.f32 %v4419_v18, 0.0 }
 0x1fc   : > { %v11283_v29 = vpop.f32.mrf.mxu0  ;;  %11320 = vmatmul.mubr.msk.f32.vlgmr.msra.gmra.mxu1 %vm324_vm2, %v4449_v13  ;;  %v4418_v34 = vld [vmem:[#allocation3 + $0x10] sm:$0xff]  ;;  %v4018_v13 = vld [vmem:[#allocation3 + $0xa8] sm:$0xff] }
 0x1fd   : > { %4390 = vst.msk [vmem:[#allocation3 + $0x30] sm:$0xff] %vm324_vm2, %v4358_v19  ;;  %v4361_v35 = vadd.f32 %v11283_v29, %v4006_v24  ;;  %v4450_v38 = vmax.f32 %v4418_v34, 0.0  ;;  %4904 = vst.msk [vmem:[#allocation3 + $0x10] sm:$0xff] %vm324_vm2, %v14751_v3  ;;  %v4017_v34 = vld [vmem:[#allocation3 + $0xa0] sm:$0xff] }
 0x1fe   : > { %v4233_v39 = vpop.f32.mrf.mxu0  ;;  %v4421_v43 = vld [vmem:[#allocation3 + $0x28] sm:$0xff] }
 0x1ff   : > { %4393 = vst.msk [vmem:[#allocation3 + $0x48] sm:$0xff] %vm324_vm2, %v4361_v35  ;;  %v4360_v48 = vadd.f32 %v4233_v39, %v4005_v62  ;;  %11322 = vmatprep.mubr.msk.f32.mxu1 %vm324_vm2, %v4450_v38  ;;  %4907 = vst.msk [vmem:[#allocation3 + $0x28] sm:$0xff] %vm324_vm2, %v14751_v3  ;;  %v4453_v26 = vmax.f32 %v4421_v43, 0.0 }
 0x200   : > { %v11286_v54 = vpop.f32.mrf.mxu0  ;;  %11323 = vmatmul.mubr.msk.f32.gmra.mxu1 %vm324_vm2, %v4451_v42  ;;  %v4420_v55 = vld [vmem:[#allocation3 + $0x20] sm:$0xff]  ;;  %v4020_v42 = vld [vmem:[#allocation3 + $0xb8] sm:$0xff] }
 0x201   : > { %4392 = vst.msk [vmem:[#allocation3 + $0x40] sm:$0xff] %vm324_vm2, %v4360_v48  ;;  %v4363_v58 = vadd.f32 %v11286_v54, %v4008_v51  ;;  %v4452_v59 = vmax.f32 %v4420_v55, 0.0  ;;  %4906 = vst.msk [vmem:[#allocation3 + $0x20] sm:$0xff] %vm324_vm2, %v14751_v3  ;;  %v4019_v55 = vld [vmem:[#allocation3 + $0xb0] sm:$0xff] }
 0x202   : > { %v4243_v22 = vpop.f32.mrf.mxu0  ;;  %v4423_v31 = vld [vmem:[#allocation3 + $0x38] sm:$0xff] }
 0x203   : > { %4395 = vst.msk [vmem:[#allocation3 + $0x58] sm:$0xff] %vm324_vm2, %v4363_v58  ;;  %v4362_v46 = vadd.f32 %v4243_v22, %v4007_v1  ;;  %11325 = vmatprep.mubr.msk.f32.mxu1 %vm324_vm2, %v4452_v59  ;;  %4909 = vst.msk [vmem:[#allocation3 + $0x38] sm:$0xff] %vm324_vm2, %v14751_v3  ;;  %v4455_v61 = vmax.f32 %v4423_v31, 0.0 }
 0x204   : > { %v11289_v50 = vpop.f32.mrf.mxu0  ;;  %11326 = vmatmul.mubr.msk.f32.gmra.mxu1 %vm324_vm2, %v4453_v26  ;;  %v4422_v49 = vld [vmem:[#allocation3 + $0x30] sm:$0xff]  ;;  %v4022_v26 = vld [vmem:[#allocation3 + $0xc8] sm:$0xff] }
 0x205   : > { %4394 = vst.msk [vmem:[#allocation3 + $0x50] sm:$0xff] %vm324_vm2, %v4362_v46  ;;  %v4365_v60 = vadd.f32 %v11289_v50, %v4010_v47  ;;  %v4454_v14 = vmax.f32 %v4422_v49, 0.0  ;;  %4908 = vst.msk [vmem:[#allocation3 + $0x30] sm:$0xff] %vm324_vm2, %v14751_v3  ;;  %v4021_v49 = vld [vmem:[#allocation3 + $0xc0] sm:$0xff] }
 0x206   : > { %v4253_v15 = vpop.f32.mrf.mxu0  ;;  %v4425_v16 = vld [vmem:[#allocation3 + $0x48] sm:$0xff] }
 0x207   : > { %4397 = vst.msk [vmem:[#allocation3 + $0x68] sm:$0xff] %vm324_vm2, %v4365_v60  ;;  %v4364_v23 = vadd.f32 %v4253_v15, %v4009_v27  ;;  %11328 = vmatprep.mubr.msk.f32.mxu1 %vm324_vm2, %v4454_v14  ;;  %4911 = vst.msk [vmem:[#allocation3 + $0x48] sm:$0xff] %vm324_vm2, %v14751_v3  ;;  %v4457_v4 = vmax.f32 %v4425_v16, 0.0 }
 0x208   : > { %v11292_v20 = vpop.f32.mrf.mxu0  ;;  %11329 = vmatmul.mubr.msk.f32.gmra.mxu1 %vm324_vm2, %v4455_v61  ;;  %v4424_v21 = vld [vmem:[#allocation3 + $0x40] sm:$0xff]  ;;  %v4024_v61 = vld [vmem:[#allocation3 + $0xd8] sm:$0xff] }
 0x209   : > { %4396 = vst.msk [vmem:[#allocation3 + $0x60] sm:$0xff] %vm324_vm2, %v4364_v23  ;;  %v4367_v32 = vadd.f32 %v11292_v20, %v4012_v17  ;;  %v4456_v33 = vmax.f32 %v4424_v21, 0.0  ;;  %4910 = vst.msk [vmem:[#allocation3 + $0x40] sm:$0xff] %vm324_vm2, %v14751_v3  ;;  %v4023_v21 = vld [vmem:[#allocation3 + $0xd0] sm:$0xff] }
 0x20a   : > { %v4263_v37 = vpop.f32.mrf.mxu0  ;;  %v4427_v40 = vld [vmem:[#allocation3 + $0x58] sm:$0xff] }
 0x20b   : > { %4399 = vst.msk [vmem:[#allocation3 + $0x78] sm:$0xff] %vm324_vm2, %v4367_v32  ;;  %v4366_v41 = vadd.f32 %v4263_v37, %v4011_v36  ;;  %11331 = vmatprep.mubr.msk.f32.mxu1 %vm324_vm2, %v4456_v33  ;;  %4913 = vst.msk [vmem:[#allocation3 + $0x58] sm:$0xff] %vm324_vm2, %v14751_v3  ;;  %v4459_v7 = vmax.f32 %v4427_v40, 0.0 }
 0x20c   : > { %v11295_v44 = vpop.f32.mrf.mxu0  ;;  %11332 = vmatmul.mubr.msk.f32.gmra.mxu1 %vm324_vm2, %v4457_v4  ;;  %v4426_v45 = vld [vmem:[#allocation3 + $0x50] sm:$0xff]  ;;  %v4026_v4 = vld [vmem:[#allocation3 + $0xe8] sm:$0xff] }
 0x20d   : > { %4398 = vst.msk [vmem:[#allocation3 + $0x70] sm:$0xff] %vm324_vm2, %v4366_v41  ;;  %v4369_v52 = vadd.f32 %v11295_v44, %v4014_v28  ;;  %v4458_v53 = vmax.f32 %v4426_v45, 0.0  ;;  %4912 = vst.msk [vmem:[#allocation3 + $0x50] sm:$0xff] %vm324_vm2, %v14751_v3  ;;  %v4025_v45 = vld [vmem:[#allocation3 + $0xe0] sm:$0xff] }
 0x20e   : > { %v4273_v57 = vpop.f32.mrf.mxu0  ;;  %v4429_v63 = vld [vmem:[#allocation3 + $0x68] sm:$0xff] }
 0x20f   : > { %4401 = vst.msk [vmem:[#allocation3 + $0x88] sm:$0xff] %vm324_vm2, %v4369_v52  ;;  %v4368_v0 = vadd.f32 %v4273_v57, %v4013_v56  ;;  %11334 = vmatprep.mubr.msk.f32.mxu1 %vm324_vm2, %v4458_v53  ;;  %4915 = vst.msk [vmem:[#allocation3 + $0x68] sm:$0xff] %vm324_vm2, %v14751_v3  ;;  %v4461_v10 = vmax.f32 %v4429_v63, 0.0 }
 0x210   : > { %v11298_v30 = vpop.f32.mrf.mxu0  ;;  %11335 = vmatmul.mubr.msk.f32.gmra.mxu1 %vm324_vm2, %v4459_v7  ;;  %v4428_v2 = vld [vmem:[#allocation3 + $0x60] sm:$0xff]  ;;  %v4028_v7 = vld [vmem:[#allocation3 + $0xf8] sm:$0xff] }
 0x211   : > { %4400 = vst.msk [vmem:[#allocation3 + $0x80] sm:$0xff] %vm324_vm2, %v4368_v0  ;;  %v4371_v5 = vadd.f32 %v11298_v30, %v4016_v25  ;;  %v4460_v6 = vmax.f32 %v4428_v2, 0.0  ;;  %4914 = vst.msk [vmem:[#allocation3 + $0x60] sm:$0xff] %vm324_vm2, %v14751_v3  ;;  %v4027_v2 = vld [vmem:[#allocation3 + $0xf0] sm:$0xff] }
 0x212   : > { %v4283_v9 = vpop.f32.mrf.mxu0  ;;  %v4431_v11 = vld [vmem:[#allocation3 + $0x78] sm:$0xff] }
 0x213   : > { %4403 = vst.msk [vmem:[#allocation3 + $0x98] sm:$0xff] %vm324_vm2, %v4371_v5  ;;  %v4370_v12 = vadd.f32 %v4283_v9, %v4015_v8  ;;  %11337 = vmatprep.mubr.msk.f32.mxu1 %vm324_vm2, %v4460_v6  ;;  %4917 = vst.msk [vmem:[#allocation3 + $0x78] sm:$0xff] %vm324_vm2, %v14751_v3  ;;  %v4463_v38 = vmax.f32 %v4431_v11, 0.0 }
 0x214   : > { %v11301_v18 = vpop.f32.mrf.mxu0  ;;  %11338 = vmatmul.mubr.msk.f32.gmra.mxu1 %vm324_vm2, %v4461_v10  ;;  %v4430_v19 = vld [vmem:[#allocation3 + $0x70] sm:$0xff] }
 0x215   : > { %4402 = vst.msk [vmem:[#allocation3 + $0x90] sm:$0xff] %vm324_vm2, %v4370_v12  ;;  %v4373_v24 = vadd.f32 %v11301_v18, %v4018_v13  ;;  %v4462_v29 = vmax.f32 %v4430_v19, 0.0  ;;  %4916 = vst.msk [vmem:[#allocation3 + $0x70] sm:$0xff] %vm324_vm2, %v14751_v3 }
 0x216   : > { %v4293_v35 = vpop.f32.mrf.mxu0  ;;  %v4433_v62 = vld [vmem:[#allocation3 + $0x88] sm:$0xff] }
 0x217   : > { %4405 = vst.msk [vmem:[#allocation3 + $0xa8] sm:$0xff] %vm324_vm2, %v4373_v24  ;;  %v4372_v39 = vadd.f32 %v4293_v35, %v4017_v34  ;;  %11340 = vmatprep.mubr.msk.f32.mxu1 %vm324_vm2, %v4462_v29  ;;  %4919 = vst.msk [vmem:[#allocation3 + $0x88] sm:$0xff] %vm324_vm2, %v14751_v3  ;;  %v4465_v59 = vmax.f32 %v4433_v62, 0.0  ;;  %v9905_v62 = vld [vmem:[%s14680_s1 + $0x50] sm:$0xff] }
 0x218   : > { %v11304_v43 = vpop.f32.mrf.mxu0  ;;  %11341 = vmatmul.mubr.msk.f32.gmra.mxu1 %vm324_vm2, %v4463_v38  ;;  %v4432_v48 = vld [vmem:[#allocation3 + $0x80] sm:$0xff]  ;;  %11417 = vmatprep.subr.mxu1 %v9905_v62 }
 0x219   : > { %4404 = vst.msk [vmem:[#allocation3 + $0xa0] sm:$0xff] %vm324_vm2, %v4372_v39  ;;  %v4375_v51 = vadd.f32 %v11304_v43, %v4020_v42  ;;  %v4464_v54 = vmax.f32 %v4432_v48, 0.0  ;;  %4918 = vst.msk [vmem:[#allocation3 + $0x80] sm:$0xff] %vm324_vm2, %v14751_v3  ;;  %11418 = vmatpush3.msra.mxu1 %v9905_v62  ;;  %v4934_v39 = vld [vmem:[#allocation2] sm:$0xff]  ;;  %v4935_v42 = vld [vmem:[#allocation2 + $0x8] sm:$0xff] }
 0x21a   : > { %v4303_v58 = vpop.f32.mrf.mxu0  ;;  %v4435_v1 = vld [vmem:[#allocation3 + $0x98] sm:$0xff]  ;;  %11369 = vmatprep.mubr.msk.f32.mxu0 %vm171_vm0, %v4934_v39  ;;  %v9938_v48 = vld [vmem:[%s14680_s1 + $0x58] sm:$0xff]  ;;  %v11887_v39 = vld [vmem:[%s12086_s26 + $0x50] sm:$0xff] }
 0x21b   : > { %4407 = vst.msk [vmem:[#allocation3 + $0xb8] sm:$0xff] %vm324_vm2, %v4375_v51  ;;  %v4374_v22 = vadd.f32 %v4303_v58, %v4019_v55  ;;  %11343 = vmatprep.mubr.msk.f32.mxu1 %vm324_vm2, %v4464_v54  ;;  %4921 = vst.msk [vmem:[#allocation3 + $0x98] sm:$0xff] %vm324_vm2, %v14751_v3  ;;  %v4467_v14 = vmax.f32 %v4435_v1, 0.0  ;;  %11370 = vmatmul.mubr.msk.f32.vlgmr.msra.gmra.mxu0 %vm171_vm0, %v4935_v42  ;;  %v5385_v43 = vld [vmem:[#allocation2 + $0x1] sm:$0xff]  ;;  %v13338_v1 = vld [vmem:[%s14680_s1 + $0x70] sm:$0xff] }
 0x21c   : > { %v11307_v31 = vpop.f32.mrf.mxu0  ;;  %11344 = vmatmul.mubr.msk.f32.gmra.mxu1 %vm324_vm2, %v4465_v59  ;;  %v4434_v46 = vld [vmem:[#allocation3 + $0x90] sm:$0xff]  ;;  %11467 = vmatprep.subr.mxu0 %v9938_v48  ;;  %v13329_v54 = vld [vmem:[%s14680_s1 + $0x68] sm:$0xff] }
 0x21d   : > { %4406 = vst.msk [vmem:[#allocation3 + $0xb0] sm:$0xff] %vm324_vm2, %v4374_v22  ;;  %v4377_v47 = vadd.f32 %v11307_v31, %v4022_v26  ;;  %v4466_v50 = vmax.f32 %v4434_v46, 0.0  ;;  %4920 = vst.msk [vmem:[#allocation3 + $0x90] sm:$0xff] %vm324_vm2, %v14751_v3  ;;  %11468 = vmatpush3.msra.mxu0 %v9938_v48  ;;  %v9971_v51 = vld [vmem:[%s14680_s1 + $0x60] sm:$0xff]  ;;  %v11876_v58 = vld [vmem:[%s12086_s26 + $0x8] sm:$0xff] }
 0x21e   : > { %v4313_v60 = vpop.f32.mrf.mxu0  ;;  %v4437_v27 = vld [vmem:[#allocation3 + $0xa8] sm:$0xff]  ;;  %11517 = vmatprep.subr.mxu1 %v9971_v51  ;;  %11567 = vmatprep.subr.mxu0 %v13329_v54  ;;  %v11877_v31 = vld [vmem:[%s12086_s26] sm:$0xff] }
 0x21f   : > { %4409 = vst.msk [vmem:[#allocation3 + $0xc8] sm:$0xff] %vm324_vm2, %v4377_v47  ;;  %v4376_v15 = vadd.f32 %v4313_v60, %v4021_v49  ;;  %11346 = vmatprep.mubr.msk.f32.mxu1 %vm324_vm2, %v4466_v50  ;;  %4923 = vst.msk [vmem:[#allocation3 + $0xa8] sm:$0xff] %vm324_vm2, %v14751_v3  ;;  %v4469_v33 = vmax.f32 %v4437_v27, 0.0  ;;  %v11878_v49 = vld [vmem:[%s12086_s26 + $0x18] sm:$0xff] }
 0x220   : > { %v11310_v16 = vpop.f32.mrf.mxu0  ;;  %11347 = vmatmul.mubr.msk.f32.gmra.mxu1 %vm324_vm2, %v4467_v14  ;;  %v4436_v23 = vld [vmem:[#allocation3 + $0xa0] sm:$0xff] }
 0x221   : > { %4408 = vst.msk [vmem:[#allocation3 + $0xc0] sm:$0xff] %vm324_vm2, %v4376_v15  ;;  %v4379_v17 = vadd.f32 %v11310_v16, %v4024_v61  ;;  %v4468_v20 = vmax.f32 %v4436_v23, 0.0  ;;  %4922 = vst.msk [vmem:[#allocation3 + $0xa0] sm:$0xff] %vm324_vm2, %v14751_v3  ;;  %v11879_v15 = vld [vmem:[%s12086_s26 + $0x10] sm:$0xff] }
 0x222   : > { %v4323_v32 = vpop.f32.mrf.mxu0  ;;  %v4439_v36 = vld [vmem:[#allocation3 + $0xb8] sm:$0xff] }
 0x223   : > { %4411 = vst.msk [vmem:[#allocation3 + $0xd8] sm:$0xff] %vm324_vm2, %v4379_v17  ;;  %v4378_v37 = vadd.f32 %v4323_v32, %v4023_v21  ;;  %11349 = vmatprep.mubr.msk.f32.mxu1 %vm324_vm2, %v4468_v20  ;;  %4925 = vst.msk [vmem:[#allocation3 + $0xb8] sm:$0xff] %vm324_vm2, %v14751_v3  ;;  %v4471_v53 = vmax.f32 %v4439_v36, 0.0  ;;  %v11880_v17 = vld [vmem:[%s12086_s26 + $0x28] sm:$0xff] }
 0x224   : > { %v11313_v40 = vpop.f32.mrf.mxu0  ;;  %11350 = vmatmul.mubr.msk.f32.gmra.mxu1 %vm324_vm2, %v4469_v33  ;;  %v4438_v41 = vld [vmem:[#allocation3 + $0xb0] sm:$0xff] }
 0x225   : > { %4410 = vst.msk [vmem:[#allocation3 + $0xd0] sm:$0xff] %vm324_vm2, %v4378_v37  ;;  %v4381_v28 = vadd.f32 %v11313_v40, %v4026_v4  ;;  %v4470_v44 = vmax.f32 %v4438_v41, 0.0  ;;  %4924 = vst.msk [vmem:[#allocation3 + $0xb0] sm:$0xff] %vm324_vm2, %v14751_v3  ;;  %v11881_v33 = vld [vmem:[%s12086_s26 + $0x20] sm:$0xff]  ;;  %v11882_v40 = vld [vmem:[%s12086_s26 + $0x38] sm:$0xff] }
 0x226   : > { %v4333_v52 = vpop.f32.mrf.mxu0  ;;  %v4441_v56 = vld [vmem:[#allocation3 + $0xc8] sm:$0xff] }
 0x227   : > { %4413 = vst.msk [vmem:[#allocation3 + $0xe8] sm:$0xff] %vm324_vm2, %v4381_v28  ;;  %v4380_v57 = vadd.f32 %v4333_v52, %v4025_v45  ;;  %11352 = vmatprep.mubr.msk.f32.mxu1 %vm324_vm2, %v4470_v44  ;;  %4927 = vst.msk [vmem:[#allocation3 + $0xc8] sm:$0xff] %vm324_vm2, %v14751_v3  ;;  %v4473_v6 = vmax.f32 %v4441_v56, 0.0  ;;  %v11883_v56 = vld [vmem:[%s12086_s26 + $0x30] sm:$0xff] }
 0x228   : > { %v11316_v63 = vpop.f32.mrf.mxu0  ;;  %11353 = vmatmul.mubr.msk.f32.gmra.mxu1 %vm324_vm2, %v4471_v53  ;;  %v4440_v0 = vld [vmem:[#allocation3 + $0xc0] sm:$0xff] }
 0x229   : > { %4412 = vst.msk [vmem:[#allocation3 + $0xe0] sm:$0xff] %vm324_vm2, %v4380_v57  ;;  %v4383_v25 = vadd.f32 %v11316_v63, %v4028_v7  ;;  %v4472_v30 = vmax.f32 %v4440_v0, 0.0  ;;  %4926 = vst.msk [vmem:[#allocation3 + $0xc0] sm:$0xff] %vm324_vm2, %v14751_v3 }
 0x22a   : > { %v4343_v5 = vpop.f32.mrf.mxu0  ;;  %v4443_v8 = vld [vmem:[#allocation3 + $0xd8] sm:$0xff] }
 0x22b   : > { %4415 = vst.msk [vmem:[#allocation3 + $0xf8] sm:$0xff] %vm324_vm2, %v4383_v25  ;;  %v4382_v9 = vadd.f32 %v4343_v5, %v4027_v2  ;;  %11355 = vmatprep.mubr.msk.f32.mxu1 %vm324_vm2, %v4472_v30  ;;  %4929 = vst.msk [vmem:[#allocation3 + $0xd8] sm:$0xff] %vm324_vm2, %v14751_v3  ;;  %v4475_v12 = vmax.f32 %v4443_v8, 0.0  ;;  %v11884_v25 = vld [vmem:[%s12086_s26 + $0x48] sm:$0xff] }
 0x22c   : > { %11356 = vmatmul.mubr.msk.f32.gmra.mxu1 %vm324_vm2, %v4473_v6  ;;  %v4442_v10 = vld [vmem:[#allocation3 + $0xd0] sm:$0xff] }
 0x22d   : > { %4414 = vst.msk [vmem:[#allocation3 + $0xf0] sm:$0xff] %vm324_vm2, %v4382_v9  ;;  %v4474_v11 = vmax.f32 %v4442_v10, 0.0  ;;  %4928 = vst.msk [vmem:[#allocation3 + $0xd0] sm:$0xff] %vm324_vm2, %v14751_v3  ;;  %v11885_v10 = vld [vmem:[%s12086_s26 + $0x40] sm:$0xff] }
 0x22e   : > { %v4445_v13 = vld [vmem:[#allocation3 + $0xe8] sm:$0xff] }
 0x22f   : > { %11358 = vmatprep.mubr.msk.f32.mxu1 %vm324_vm2, %v4474_v11  ;;  %4931 = vst.msk [vmem:[#allocation3 + $0xe8] sm:$0xff] %vm324_vm2, %v14751_v3  ;;  %v4477_v24 = vmax.f32 %v4445_v13, 0.0 }
 0x230   : > { %11359 = vmatmul.mubr.msk.f32.gmra.mxu1 %vm324_vm2, %v4475_v12  ;;  %v4444_v18 = vld [vmem:[#allocation3 + $0xe0] sm:$0xff] }
 0x231   : > { %v4476_v19 = vmax.f32 %v4444_v18, 0.0  ;;  %4930 = vst.msk [vmem:[#allocation3 + $0xe0] sm:$0xff] %vm324_vm2, %v14751_v3 }
 0x232   : > { %v4447_v29 = vld [vmem:[#allocation3 + $0xf8] sm:$0xff] }
 0x233   : > { %11361 = vmatprep.mubr.msk.f32.mxu1 %vm324_vm2, %v4476_v19  ;;  %4933 = vst.msk [vmem:[#allocation3 + $0xf8] sm:$0xff] %vm324_vm2, %v14751_v3  ;;  %v4479_v38 = vmax.f32 %v4447_v29, 0.0  ;;  %v11886_v19 = vld [vmem:[%s12086_s26 + $0x58] sm:$0xff] }
 0x234   : > { %11362 = vmatmul.mubr.msk.f32.gmra.mxu1 %vm324_vm2, %v4477_v24  ;;  %v4446_v34 = vld [vmem:[#allocation3 + $0xf0] sm:$0xff] }
 0x235   : > { %v4478_v35 = vmax.f32 %v4446_v34, 0.0  ;;  %4932 = vst.msk [vmem:[#allocation3 + $0xf0] sm:$0xff] %vm324_vm2, %v14751_v3  ;;  %v5386_v3 = vld [vmem:[#allocation2 + $0x9] sm:$0xff] }
 0x237   : > { %11364 = vmatprep.mubr.msk.f32.mxu1 %vm324_vm2, %v4478_v35 }
 0x238   : > { %11365 = vmatmul.mubr.msk.f32.gmra.mxu1 %vm324_vm2, %v4479_v38 }
 0x239   : > { %11419 = vmatprep.mubr.msk.f32.mxu1 %vm171_vm0, %v5385_v43 }
 0x23c   : > { %11420 = vmatmul.mubr.msk.f32.vlgmr.msra.gmra.mxu1 %vm171_vm0, %v5386_v3 }
 0x23d   : > { %11518 = vmatpush3.msra.mxu1 %v9971_v51  ;;  %v11888_v51 = vld [vmem:[%s12086_s26 + $0x68] sm:$0xff] }
 0x23e   : > { %11617 = vmatprep.subr.mxu1 %v13338_v1 }
 0x2bc   : > { %v11321_v55 = vpop.f32.mrf.mxu1 }
 0x2bd   : > { %v13333_v59 = vadd.f32 %v11876_v58, %v11321_v55 }
 0x2be   : > { %v4647_v22 = vpop.f32.mrf.mxu1 }
 0x2bf   : > { %14752 = vst [vmem:[#allocation8_spill] sm:$0xff] %v13333_v59  ;;  %v4839_v26 = vmax.f32 %v13333_v59, 0.0  ;;  %v13343_v46 = vadd.f32 %v11877_v31, %v4647_v22  ;;  %v5837_v59 = vld [vmem:[#allocation2 + $0xa] sm:$0xff] }
 0x2c0   : > { %v11324_v47 = vpop.f32.mrf.mxu1 }
 0x2c1   : > { %14753 = vst [vmem:[#allocation9_spill] sm:$0xff] %v13343_v46  ;;  %4871 = vst.msk [vmem:[#allocation2 + $0x21] sm:$0xff] %vm171_vm0, %v4839_v26  ;;  %v4838_v50 = vmax.f32 %v13343_v46, 0.0  ;;  %v13348_v60 = vadd.f32 %v11878_v49, %v11324_v47 }
 0x2c2   : > { %v4657_v14 = vpop.f32.mrf.mxu1 }
 0x2c3   : > { %14754 = vst [vmem:[#allocation10_spill] sm:$0xff] %v13348_v60  ;;  %4870 = vst.msk [vmem:[#allocation2 + $0x19] sm:$0xff] %vm171_vm0, %v4838_v50  ;;  %v4841_v27 = vmax.f32 %v13348_v60, 0.0  ;;  %v13353_v61 = vadd.f32 %v11879_v15, %v4657_v14  ;;  %v11889_v50 = vld [vmem:[%s12086_s26 + $0x60] sm:$0xff]  ;;  %v11907_v60 = vld [vmem:[%s12086_s26 + $0xf0] sm:$0xff] }
 0x2c4   : > { %v11327_v16 = vpop.f32.mrf.mxu1 }
 0x2c5   : > { %14755 = vst [vmem:[#allocation4_spill] sm:$0xff] %v13353_v61  ;;  %4873 = vst.msk [vmem:[#allocation2 + $0x39] sm:$0xff] %vm171_vm0, %v4841_v27  ;;  %v4840_v23 = vmax.f32 %v13353_v61, 0.0  ;;  %v13358_v20 = vadd.f32 %v11880_v17, %v11327_v16  ;;  %v11890_v16 = vld [vmem:[%s12086_s26 + $0x78] sm:$0xff] }
 0x2c6   : > { %v4667_v21 = vpop.f32.mrf.mxu1 }
 0x2c7   : > { %14756 = vst [vmem:[#allocation5_spill] sm:$0xff] %v13358_v20  ;;  %4872 = vst.msk [vmem:[#allocation2 + $0x31] sm:$0xff] %vm171_vm0, %v4840_v23  ;;  %v4843_v32 = vmax.f32 %v13358_v20, 0.0  ;;  %v13363_v36 = vadd.f32 %v11881_v33, %v4667_v21 }
 0x2c8   : > { %v11330_v37 = vpop.f32.mrf.mxu1  ;;  %v13385_v7 = vld [vmem:[#allocation2 + $0x21] sm:$0xff] }
 0x2c9   : > { %14757 = vst [vmem:[#allocation6_spill] sm:$0xff] %v13363_v36  ;;  %4875 = vst.msk [vmem:[#allocation2 + $0x51] sm:$0xff] %vm171_vm0, %v4843_v32  ;;  %v4842_v4 = vmax.f32 %v13363_v36, 0.0  ;;  %v13368_v41 = vadd.f32 %v11882_v40, %v11330_v37 }
 0x2ca   : > { %v4677_v28 = vpop.f32.mrf.mxu1  ;;  %v13370_v44 = vld [vmem:[#allocation2 + $0x18] sm:$0xff]  ;;  %v13374_v52 = vld [vmem:[#allocation2 + $0x20] sm:$0xff] }
 0x2cb   : > { %14758 = vst [vmem:[#allocation7_spill] sm:$0xff] %v13368_v41  ;;  %v13372_v45 = vld [vmem:[#allocation2 + $0x19] sm:$0xff]  ;;  %4874 = vst.msk [vmem:[#allocation2 + $0x49] sm:$0xff] %vm171_vm0, %v4842_v4  ;;  %v4845_v53 = vmax.f32 %v13368_v41, 0.0  ;;  %v13379_v57 = vadd.f32 %v11883_v56, %v4677_v28  ;;  %11372 = vmatprep.mubr.msk.f32.mxu0 %vm171_vm0, %v13370_v44  ;;  %v11891_v4 = vld [vmem:[%s12086_s26 + $0x70] sm:$0xff] }
 0x2cc   : > { %11422 = vmatprep.mubr.msk.f32.mxu1 %vm171_vm0, %v13372_v45  ;;  %v11333_v63 = vpop.f32.mrf.mxu1  ;;  %11373 = vmatmul.mubr.msk.f32.gmra.mxu0 %vm171_vm0, %v13374_v52  ;;  %v13411_v12 = vld [vmem:[#allocation2 + $0x39] sm:$0xff] }
 0x2cd   : > { %14759 = vst [vmem:[#allocation11_spill] sm:$0xff] %v13379_v57  ;;  %11423 = vmatmul.mubr.msk.f32.gmra.mxu1 %vm171_vm0, %v13385_v7  ;;  %4877 = vst.msk [vmem:[#allocation2 + $0x69] sm:$0xff] %vm171_vm0, %v4845_v53  ;;  %v4844_v0 = vmax.f32 %v13379_v57, 0.0  ;;  %v13394_v30 = vadd.f32 %v11884_v25, %v11333_v63  ;;  %v11892_v63 = vld [vmem:[%s12086_s26 + $0x88] sm:$0xff]  ;;  %v11905_v41 = vld [vmem:[%s12086_s26 + $0xe0] sm:$0xff] }
 0x2ce   : > { %v4687_v2 = vpop.f32.mrf.mxu1  ;;  %v13396_v5 = vld [vmem:[#allocation2 + $0x30] sm:$0xff]  ;;  %v13400_v8 = vld [vmem:[#allocation2 + $0x38] sm:$0xff] }
 0x2cf   : > { %14760 = vst [vmem:[#allocation12_spill] sm:$0xff] %v13394_v30  ;;  %v13398_v6 = vld [vmem:[#allocation2 + $0x31] sm:$0xff]  ;;  %14761 = vst [vmem:[#allocation13_spill] sm:$0xff] %v13400_v8  ;;  %v4847_v9 = vmax.f32 %v13394_v30, 0.0  ;;  %v13405_v11 = vadd.f32 %v11885_v10, %v4687_v2  ;;  %11375 = vmatprep.mubr.msk.f32.mxu0 %vm171_vm0, %v13396_v5 }
 0x2d0   : > { %4876 = vst.msk [vmem:[#allocation2 + $0x61] sm:$0xff] %vm171_vm0, %v4844_v0  ;;  %11425 = vmatprep.mubr.msk.f32.mxu1 %vm171_vm0, %v13398_v6  ;;  %v11336_v13 = vpop.f32.mrf.mxu1  ;;  %11376 = vmatmul.mubr.msk.f32.gmra.mxu0 %vm171_vm0, %v13400_v8  ;;  %v13437_v43 = vld [vmem:[#allocation2 + $0x51] sm:$0xff] }
 0x2d1   : > { %14762 = vst [vmem:[#allocation14_spill] sm:$0xff] %v13405_v11  ;;  %11426 = vmatmul.mubr.msk.f32.gmra.mxu1 %vm171_vm0, %v13411_v12  ;;  %4879 = vst.msk [vmem:[#allocation2 + $0x81] sm:$0xff] %vm171_vm0, %v4847_v9  ;;  %v4846_v18 = vmax.f32 %v13405_v11, 0.0  ;;  %v13420_v24 = vadd.f32 %v11886_v19, %v11336_v13 }
 0x2d2   : > { %v4697_v29 = vpop.f32.mrf.mxu1  ;;  %v13422_v34 = vld [vmem:[#allocation2 + $0x48] sm:$0xff]  ;;  %v13426_v38 = vld [vmem:[#allocation2 + $0x50] sm:$0xff] }
 0x2d3   : > { %14763 = vst [vmem:[#allocation15_spill] sm:$0xff] %v13420_v24  ;;  %14764 = vst [vmem:[#allocation16_spill] sm:$0xff] %v13422_v34  ;;  %v13424_v35 = vld [vmem:[#allocation2 + $0x49] sm:$0xff]  ;;  %v4849_v62 = vmax.f32 %v13420_v24, 0.0  ;;  %v13431_v42 = vadd.f32 %v11887_v39, %v4697_v29  ;;  %11378 = vmatprep.mubr.msk.f32.mxu0 %vm171_vm0, %v13422_v34 }
 0x2d4   : > { %14765 = vst [vmem:[#allocation17_spill] sm:$0xff] %v13426_v38  ;;  %4878 = vst.msk [vmem:[#allocation2 + $0x79] sm:$0xff] %vm171_vm0, %v4846_v18  ;;  %11428 = vmatprep.mubr.msk.f32.mxu1 %vm171_vm0, %v13424_v35  ;;  %v11339_v3 = vpop.f32.mrf.mxu1  ;;  %11379 = vmatmul.mubr.msk.f32.gmra.mxu0 %vm171_vm0, %v13426_v38  ;;  %v13463_v14 = vld [vmem:[#allocation2 + $0x69] sm:$0xff]  ;;  %v11893_v18 = vld [vmem:[%s12086_s26 + $0x80] sm:$0xff] }
 0x2d5   : > { %14766 = vst [vmem:[#allocation18_spill] sm:$0xff] %v13431_v42  ;;  %11429 = vmatmul.mubr.msk.f32.gmra.mxu1 %vm171_vm0, %v13437_v43  ;;  %4881 = vst.msk [vmem:[#allocation2 + $0x99] sm:$0xff] %vm171_vm0, %v4849_v62  ;;  %v4848_v48 = vmax.f32 %v13431_v42, 0.0  ;;  %v13446_v55 = vadd.f32 %v11888_v51, %v11339_v3  ;;  %v11894_v3 = vld [vmem:[%s12086_s26 + $0x98] sm:$0xff]  ;;  %v11903_v24 = vld [vmem:[%s12086_s26 + $0xd0] sm:$0xff] }
 0x2d6   : > { %v4707_v58 = vpop.f32.mrf.mxu1 }
 0x2d7   : > { %14767 = vst [vmem:[#allocation19_spill] sm:$0xff] %v13446_v55  ;;  %v13448_v22 = vld [vmem:[#allocation2 + $0x60] sm:$0xff]  ;;  %v13452_v31 = vld [vmem:[#allocation2 + $0x68] sm:$0xff]  ;;  %4880 = vst.msk [vmem:[#allocation2 + $0x91] sm:$0xff] %vm171_vm0, %v4848_v48  ;;  %v4851_v47 = vmax.f32 %v13446_v55, 0.0  ;;  %v13457_v49 = vadd.f32 %v11889_v50, %v4707_v58 }
 0x2d8   : > { %v13450_v26 = vld [vmem:[#allocation2 + $0x61] sm:$0xff]  ;;  %11381 = vmatprep.mubr.msk.f32.mxu0 %vm171_vm0, %v13448_v22  ;;  %v11342_v27 = vpop.f32.mrf.mxu1 }
 0x2d9   : > { %14768 = vst [vmem:[#allocation20_spill] sm:$0xff] %v13457_v49  ;;  %11431 = vmatprep.mubr.msk.f32.mxu1 %vm171_vm0, %v13450_v26  ;;  %11382 = vmatmul.mubr.msk.f32.gmra.mxu0 %vm171_vm0, %v13452_v31  ;;  %4883 = vst.msk [vmem:[#allocation2 + $0xb1] sm:$0xff] %vm171_vm0, %v4851_v47  ;;  %v4850_v15 = vmax.f32 %v13457_v49, 0.0  ;;  %v13472_v23 = vadd.f32 %v11890_v16, %v11342_v27  ;;  %v13489_v28 = vld [vmem:[#allocation2 + $0x81] sm:$0xff] }
 0x2da   : > { %11432 = vmatmul.mubr.msk.f32.gmra.mxu1 %vm171_vm0, %v13463_v14  ;;  %v4717_v17 = vpop.f32.mrf.mxu1 }
 0x2db   : > { %14769 = vst [vmem:[#allocation21_spill] sm:$0xff] %v13472_v23  ;;  %v13474_v21 = vld [vmem:[#allocation2 + $0x78] sm:$0xff]  ;;  %v13478_v33 = vld [vmem:[#allocation2 + $0x80] sm:$0xff]  ;;  %4882 = vst.msk [vmem:[#allocation2 + $0xa9] sm:$0xff] %vm171_vm0, %v4850_v15  ;;  %v4853_v37 = vmax.f32 %v13472_v23, 0.0  ;;  %v13483_v40 = vadd.f32 %v11891_v4, %v4717_v17 }
 0x2dc   : > { %v13476_v32 = vld [vmem:[#allocation2 + $0x79] sm:$0xff]  ;;  %11384 = vmatprep.mubr.msk.f32.mxu0 %vm171_vm0, %v13474_v21  ;;  %v11345_v53 = vpop.f32.mrf.mxu1  ;;  %v11895_v15 = vld [vmem:[%s12086_s26 + $0x90] sm:$0xff] }
 0x2dd   : > { %14770 = vst [vmem:[#allocation22_spill] sm:$0xff] %v13483_v40  ;;  %11434 = vmatprep.mubr.msk.f32.mxu1 %vm171_vm0, %v13476_v32  ;;  %11385 = vmatmul.mubr.msk.f32.gmra.mxu0 %vm171_vm0, %v13478_v33  ;;  %4885 = vst.msk [vmem:[#allocation2 + $0xc9] sm:$0xff] %vm171_vm0, %v4853_v37  ;;  %v4852_v56 = vmax.f32 %v13483_v40, 0.0  ;;  %v13498_v0 = vadd.f32 %v11892_v63, %v11345_v53  ;;  %v13515_v29 = vld [vmem:[#allocation2 + $0x99] sm:$0xff]  ;;  %v11896_v53 = vld [vmem:[%s12086_s26 + $0xa8] sm:$0xff] }
 0x2de   : > { %11435 = vmatmul.mubr.msk.f32.gmra.mxu1 %vm171_vm0, %v13489_v28  ;;  %v4727_v25 = vpop.f32.mrf.mxu1  ;;  %v13500_v2 = vld [vmem:[#allocation2 + $0x90] sm:$0xff]  ;;  %v13504_v10 = vld [vmem:[#allocation2 + $0x98] sm:$0xff]  ;;  %v11901_v23 = vld [vmem:[%s12086_s26 + $0xc0] sm:$0xff] }
 0x2df   : > { %14771 = vst [vmem:[#allocation23_spill] sm:$0xff] %v13498_v0  ;;  %14772 = vst [vmem:[#allocation24_spill] sm:$0xff] %v13500_v2  ;;  %v13502_v9 = vld [vmem:[#allocation2 + $0x91] sm:$0xff]  ;;  %v4855_v13 = vmax.f32 %v13498_v0, 0.0  ;;  %v13509_v19 = vadd.f32 %v11893_v18, %v4727_v25  ;;  %11387 = vmatprep.mubr.msk.f32.mxu0 %vm171_vm0, %v13500_v2 }
 0x2e0   : > { %14773 = vst [vmem:[#allocation25_spill] sm:$0xff] %v13504_v10  ;;  %4884 = vst.msk [vmem:[#allocation2 + $0xc1] sm:$0xff] %vm171_vm0, %v4852_v56  ;;  %11437 = vmatprep.mubr.msk.f32.mxu1 %vm171_vm0, %v13502_v9  ;;  %v11348_v62 = vpop.f32.mrf.mxu1  ;;  %v13541_v17 = vld [vmem:[#allocation2 + $0xb1] sm:$0xff] }
 0x2e1   : > { %14774 = vst [vmem:[#allocation26_spill] sm:$0xff] %v13509_v19  ;;  %11388 = vmatmul.mubr.msk.f32.gmra.mxu0 %vm171_vm0, %v13504_v10  ;;  %4887 = vst.msk [vmem:[#allocation2 + $0xe1] sm:$0xff] %vm171_vm0, %v4855_v13  ;;  %v4854_v39 = vmax.f32 %v13509_v19, 0.0  ;;  %v13524_v48 = vadd.f32 %v11894_v3, %v11348_v62 }
 0x2e2   : > { %11438 = vmatmul.mubr.msk.f32.gmra.mxu1 %vm171_vm0, %v13515_v29  ;;  %v4737_v51 = vpop.f32.mrf.mxu1  ;;  %v13526_v58 = vld [vmem:[#allocation2 + $0xa8] sm:$0xff]  ;;  %v13530_v50 = vld [vmem:[#allocation2 + $0xb0] sm:$0xff] }
 0x2e3   : > { %14775 = vst [vmem:[#allocation27_spill] sm:$0xff] %v13524_v48  ;;  %14776 = vst [vmem:[#allocation28_spill] sm:$0xff] %v13526_v58  ;;  %v13528_v47 = vld [vmem:[#allocation2 + $0xa9] sm:$0xff]  ;;  %v4857_v27 = vmax.f32 %v13524_v48, 0.0  ;;  %v13535_v16 = vadd.f32 %v11895_v15, %v4737_v51  ;;  %11390 = vmatprep.mubr.msk.f32.mxu0 %vm171_vm0, %v13526_v58 }
 0x2e4   : > { %4886 = vst.msk [vmem:[#allocation2 + $0xd9] sm:$0xff] %vm171_vm0, %v4854_v39  ;;  %11440 = vmatprep.mubr.msk.f32.mxu1 %vm171_vm0, %v13528_v47  ;;  %v11351_v37 = vpop.f32.mrf.mxu1  ;;  %v11897_v39 = vld [vmem:[%s12086_s26 + $0xa0] sm:$0xff]  ;;  %v13567_v51 = vld [vmem:[#allocation2 + $0xc9] sm:$0xff] }
 0x2e5   : > { %14777 = vst [vmem:[#allocation29_spill] sm:$0xff] %v13535_v16  ;;  %11391 = vmatmul.mubr.msk.f32.gmra.mxu0 %vm171_vm0, %v13530_v50  ;;  %4889 = vst.msk [vmem:[#allocation2 + $0xf9] sm:$0xff] %vm171_vm0, %v4857_v27  ;;  %v4856_v4 = vmax.f32 %v13535_v16, 0.0  ;;  %v13550_v56 = vadd.f32 %v11896_v53, %v11351_v37  ;;  %v11898_v37 = vld [vmem:[%s12086_s26 + $0xb8] sm:$0xff]  ;;  %v11899_v48 = vld [vmem:[%s12086_s26 + $0xb0] sm:$0xff] }
 0x2e6   : > { %11441 = vmatmul.mubr.msk.f32.gmra.mxu1 %vm171_vm0, %v13541_v17  ;;  %v4747_v63 = vpop.f32.mrf.mxu1 }
 0x2e7   : > { %14778 = vst [vmem:[#allocation30_spill] sm:$0xff] %v13550_v56  ;;  %v13552_v25 = vld [vmem:[#allocation2 + $0xc0] sm:$0xff]  ;;  %v13556_v18 = vld [vmem:[#allocation2 + $0xc8] sm:$0xff]  ;;  %4888 = vst.msk [vmem:[#allocation2 + $0xf1] sm:$0xff] %vm171_vm0, %v4856_v4  ;;  %v4859_v62 = vmax.f32 %v13550_v56, 0.0  ;;  %v13561_v3 = vadd.f32 %v11897_v39, %v4747_v63 }
 0x2e8   : > { %v13554_v13 = vld [vmem:[#allocation2 + $0xc1] sm:$0xff]  ;;  %11393 = vmatprep.mubr.msk.f32.mxu0 %vm171_vm0, %v13552_v25  ;;  %v11354_v27 = vpop.f32.mrf.mxu1 }
 0x2e9   : > { %14779 = vst [vmem:[#allocation31_spill] sm:$0xff] %v13561_v3  ;;  %11443 = vmatprep.mubr.msk.f32.mxu1 %vm171_vm0, %v13554_v13  ;;  %11394 = vmatmul.mubr.msk.f32.gmra.mxu0 %vm171_vm0, %v13556_v18  ;;  %4891 = vst.msk [vmem:[#allocation2 + $0x111] sm:$0xff] %vm171_vm0, %v4859_v62  ;;  %v4858_v15 = vmax.f32 %v13561_v3, 0.0  ;;  %v13576_v4 = vadd.f32 %v11898_v37, %v11354_v27  ;;  %v13593_v62 = vld [vmem:[#allocation2 + $0xe1] sm:$0xff] }
 0x2ea   : > { %11444 = vmatmul.mubr.msk.f32.gmra.mxu1 %vm171_vm0, %v13567_v51  ;;  %v4757_v53 = vpop.f32.mrf.mxu1 }
 0x2eb   : > { %14780 = vst [vmem:[#allocation32_spill] sm:$0xff] %v13576_v4  ;;  %v13578_v63 = vld [vmem:[#allocation2 + $0xd8] sm:$0xff]  ;;  %v13582_v56 = vld [vmem:[#allocation2 + $0xe0] sm:$0xff]  ;;  %4890 = vst.msk [vmem:[#allocation2 + $0x109] sm:$0xff] %vm171_vm0, %v4858_v15  ;;  %v4861_v16 = vmax.f32 %v13576_v4, 0.0  ;;  %v13587_v19 = vadd.f32 %v11899_v48, %v4757_v53 }
 0x2ec   : > { %v13580_v39 = vld [vmem:[#allocation2 + $0xd9] sm:$0xff]  ;;  %11396 = vmatprep.mubr.msk.f32.mxu0 %vm171_vm0, %v13578_v63  ;;  %v11357_v27 = vpop.f32.mrf.mxu1  ;;  %v11900_v15 = vld [vmem:[%s12086_s26 + $0xc8] sm:$0xff] }
 0x2ed   : > { %14781 = vst [vmem:[#allocation33_spill] sm:$0xff] %v13587_v19  ;;  %11446 = vmatprep.mubr.msk.f32.mxu1 %vm171_vm0, %v13580_v39  ;;  %11397 = vmatmul.mubr.msk.f32.gmra.mxu0 %vm171_vm0, %v13582_v56  ;;  %4893 = vst.msk [vmem:[#allocation2 + $0x129] sm:$0xff] %vm171_vm0, %v4861_v16  ;;  %v4860_v48 = vmax.f32 %v13587_v19, 0.0  ;;  %v13602_v37 = vadd.f32 %v11900_v15, %v11357_v27  ;;  %v13619_v16 = vld [vmem:[#allocation2 + $0xf9] sm:$0xff] }
 0x2ee   : > { %11447 = vmatmul.mubr.msk.f32.gmra.mxu1 %vm171_vm0, %v13593_v62  ;;  %v4767_v53 = vpop.f32.mrf.mxu1  ;;  %v13604_v4 = vld [vmem:[#allocation2 + $0xf0] sm:$0xff]  ;;  %v13608_v0 = vld [vmem:[#allocation2 + $0xf8] sm:$0xff] }
 0x2ef   : > { %14782 = vst [vmem:[#allocation34_spill] sm:$0xff] %v13602_v37  ;;  %v13606_v3 = vld [vmem:[#allocation2 + $0xf1] sm:$0xff]  ;;  %4892 = vst.msk [vmem:[#allocation2 + $0x121] sm:$0xff] %vm171_vm0, %v4860_v48  ;;  %v4863_v40 = vmax.f32 %v13602_v37, 0.0  ;;  %v13613_v49 = vadd.f32 %v11901_v23, %v4767_v53  ;;  %11399 = vmatprep.mubr.msk.f32.mxu0 %vm171_vm0, %v13604_v4 }
 0x2f0   : > { %11449 = vmatprep.mubr.msk.f32.mxu1 %vm171_vm0, %v13606_v3  ;;  %v11360_v27 = vpop.f32.mrf.mxu1  ;;  %v11902_v48 = vld [vmem:[%s12086_s26 + $0xd8] sm:$0xff] }
 0x2f1   : > { %14783 = vst [vmem:[#allocation35_spill] sm:$0xff] %v13613_v49  ;;  %11400 = vmatmul.mubr.msk.f32.gmra.mxu0 %vm171_vm0, %v13608_v0  ;;  %4895 = vst.msk [vmem:[#allocation2 + $0x141] sm:$0xff] %vm171_vm0, %v4863_v40  ;;  %v4862_v23 = vmax.f32 %v13613_v49, 0.0  ;;  %v13628_v15 = vadd.f32 %v11902_v48, %v11360_v27  ;;  %v13645_v40 = vld [vmem:[#allocation2 + $0x111] sm:$0xff] }
 0x2f2   : > { %11450 = vmatmul.mubr.msk.f32.gmra.mxu1 %vm171_vm0, %v13619_v16  ;;  %v4777_v53 = vpop.f32.mrf.mxu1  ;;  %v13630_v37 = vld [vmem:[#allocation2 + $0x108] sm:$0xff]  ;;  %v13634_v55 = vld [vmem:[#allocation2 + $0x110] sm:$0xff] }
 0x2f3   : > { %14784 = vst [vmem:[#allocation36_spill] sm:$0xff] %v13628_v15  ;;  %v13632_v19 = vld [vmem:[#allocation2 + $0x109] sm:$0xff]  ;;  %4894 = vst.msk [vmem:[#allocation2 + $0x139] sm:$0xff] %vm171_vm0, %v4862_v23  ;;  %v4865_v42 = vmax.f32 %v13628_v15, 0.0  ;;  %v13639_v11 = vadd.f32 %v11903_v24, %v4777_v53  ;;  %11402 = vmatprep.mubr.msk.f32.mxu0 %vm171_vm0, %v13630_v37 }
 0x2f4   : > { %11452 = vmatprep.mubr.msk.f32.mxu1 %vm171_vm0, %v13632_v19  ;;  %v11363_v27 = vpop.f32.mrf.mxu1  ;;  %v11904_v23 = vld [vmem:[%s12086_s26 + $0xe8] sm:$0xff] }
 0x2f5   : > { %14785 = vst [vmem:[#allocation37_spill] sm:$0xff] %v13639_v11  ;;  %11403 = vmatmul.mubr.msk.f32.gmra.mxu0 %vm171_vm0, %v13634_v55  ;;  %4897 = vst.msk [vmem:[#allocation2 + $0x159] sm:$0xff] %vm171_vm0, %v4865_v42  ;;  %v4864_v24 = vmax.f32 %v13639_v11, 0.0  ;;  %v13654_v48 = vadd.f32 %v11904_v23, %v11363_v27  ;;  %v13671_v42 = vld [vmem:[#allocation2 + $0x129] sm:$0xff] }
 0x2f6   : > { %11453 = vmatmul.mubr.msk.f32.gmra.mxu1 %vm171_vm0, %v13645_v40  ;;  %v4787_v53 = vpop.f32.mrf.mxu1  ;;  %v13656_v15 = vld [vmem:[#allocation2 + $0x120] sm:$0xff]  ;;  %v13660_v30 = vld [vmem:[#allocation2 + $0x128] sm:$0xff] }
 0x2f7   : > { %14786 = vst [vmem:[#allocation38_spill] sm:$0xff] %v13654_v48  ;;  %v13658_v49 = vld [vmem:[#allocation2 + $0x121] sm:$0xff]  ;;  %4896 = vst.msk [vmem:[#allocation2 + $0x151] sm:$0xff] %vm171_vm0, %v4864_v24  ;;  %v4867_v57 = vmax.f32 %v13654_v48, 0.0  ;;  %v13665_v36 = vadd.f32 %v11905_v41, %v4787_v53  ;;  %11405 = vmatprep.mubr.msk.f32.mxu0 %vm171_vm0, %v13656_v15  ;;  %v11906_v24 = vld [vmem:[%s12086_s26 + $0xf8] sm:$0xff] }
 0x2f8   : > { %11455 = vmatprep.mubr.msk.f32.mxu1 %vm171_vm0, %v13658_v49  ;;  %v11366_v27 = vpop.f32.mrf.mxu1 }
 0x2f9   : > { %14787 = vst [vmem:[#allocation39_spill] sm:$0xff] %v13665_v36  ;;  %11406 = vmatmul.mubr.msk.f32.gmra.mxu0 %vm171_vm0, %v13660_v30  ;;  %4899 = vst.msk [vmem:[#allocation2 + $0x171] sm:$0xff] %vm171_vm0, %v4867_v57  ;;  %v4866_v41 = vmax.f32 %v13665_v36, 0.0  ;;  %v13680_v23 = vadd.f32 %v11906_v24, %v11366_v27  ;;  %v13697_v57 = vld [vmem:[#allocation2 + $0x141] sm:$0xff] }
 0x2fa   : > { %11456 = vmatmul.mubr.msk.f32.gmra.mxu1 %vm171_vm0, %v13671_v42  ;;  %v4797_v53 = vpop.f32.mrf.mxu1  ;;  %v13682_v48 = vld [vmem:[#allocation2 + $0x138] sm:$0xff]  ;;  %v13686_v20 = vld [vmem:[#allocation2 + $0x140] sm:$0xff]  ;;  %14791 = vst [vmem:[#allocation43_spill] sm:$0xff] %v13697_v57 }
 0x2fb   : > { %14788 = vst [vmem:[#allocation40_spill] sm:$0xff] %v13680_v23  ;;  %v13684_v11 = vld [vmem:[#allocation2 + $0x139] sm:$0xff]  ;;  %4898 = vst.msk [vmem:[#allocation2 + $0x169] sm:$0xff] %vm171_vm0, %v4866_v41  ;;  %v4869_v61 = vmax.f32 %v13680_v23, 0.0  ;;  %v13691_v46 = vadd.f32 %v11907_v60, %v4797_v53  ;;  %11408 = vmatprep.mubr.msk.f32.mxu0 %vm171_vm0, %v13682_v48 }
 0x2fc   : > { %14789 = vst [vmem:[#allocation41_spill] sm:$0xff] %v13684_v11  ;;  %11458 = vmatprep.mubr.msk.f32.mxu1 %vm171_vm0, %v13684_v11  ;;  %v13716_v53 = vld [vmem:[#allocation2 + $0x159] sm:$0xff] }
 0x2fd   : > { %14790 = vst [vmem:[#allocation42_spill] sm:$0xff] %v13691_v46  ;;  %11409 = vmatmul.mubr.msk.f32.gmra.mxu0 %vm171_vm0, %v13686_v20  ;;  %4901 = vst.msk [vmem:[#allocation2 + $0x189] sm:$0xff] %vm171_vm0, %v4869_v61  ;;  %v4868_v27 = vmax.f32 %v13691_v46, 0.0  ;;  %v5836_v61 = vld [vmem:[#allocation2 + $0x2] sm:$0xff] }
 0x2fe   : > { %11459 = vmatmul.mubr.msk.f32.gmra.mxu1 %vm171_vm0, %v13697_v57  ;;  %v13705_v60 = vld [vmem:[#allocation2 + $0x150] sm:$0xff]  ;;  %v13709_v24 = vld [vmem:[#allocation2 + $0x158] sm:$0xff]  ;;  %14793 = vst [vmem:[#allocation45_spill] sm:$0xff] %v13716_v53 }
 0x2ff   : > { %v13707_v41 = vld [vmem:[#allocation2 + $0x151] sm:$0xff]  ;;  %4900 = vst.msk [vmem:[#allocation2 + $0x181] sm:$0xff] %vm171_vm0, %v4868_v27  ;;  %11411 = vmatprep.mubr.msk.f32.mxu0 %vm171_vm0, %v13705_v60 }
 0x300   : > { %14792 = vst [vmem:[#allocation44_spill] sm:$0xff] %v13707_v41  ;;  %11461 = vmatprep.mubr.msk.f32.mxu1 %vm171_vm0, %v13707_v41  ;;  %v13732_v36 = vld [vmem:[#allocation2 + $0x171] sm:$0xff]  ;;  %v11371_v41 = vpop.f32.mrf.mxu0 }
 0x301   : > { %11412 = vmatmul.mubr.msk.f32.gmra.mxu0 %vm171_vm0, %v13709_v24  ;;  %14795 = vst [vmem:[#allocation47_spill] sm:$0xff] %v13732_v36  ;;  %v4966_v57 = vld [vmem:[#allocation3] sm:$0xff] }
 0x302   : > { %11462 = vmatmul.mubr.msk.f32.gmra.mxu1 %vm171_vm0, %v13716_v53  ;;  %v13722_v46 = vld [vmem:[#allocation2 + $0x168] sm:$0xff]  ;;  %v13726_v27 = vld [vmem:[#allocation2 + $0x170] sm:$0xff]  ;;  %v4967_v53 = vld [vmem:[#allocation3 + $0x8] sm:$0xff] }
 0x303   : > { %v13724_v23 = vld [vmem:[#allocation2 + $0x169] sm:$0xff]  ;;  %11414 = vmatprep.mubr.msk.f32.mxu0 %vm171_vm0, %v13722_v46  ;;  %v5322_v11 = vadd.f32 %v11371_v41, %v4967_v53 }
 0x304   : > { %14794 = vst [vmem:[#allocation46_spill] sm:$0xff] %v13724_v23  ;;  %11464 = vmatprep.mubr.msk.f32.mxu1 %vm171_vm0, %v13724_v23  ;;  %v13744_v23 = vld [vmem:[#allocation2 + $0x1a] sm:$0xff] }
 0x305   : > { %11415 = vmatmul.mubr.msk.f32.gmra.mxu0 %vm171_vm0, %v13726_v27  ;;  %5354 = vst.msk [vmem:[#allocation3 + $0x8] sm:$0xff] %vm324_vm2, %v5322_v11  ;;  %v13778_v11 = vld [vmem:[#allocation2 + $0x3a] sm:$0xff] }
 0x306   : > { %11465 = vmatmul.mubr.msk.f32.gmra.mxu1 %vm171_vm0, %v13732_v36  ;;  %11469 = vmatprep.mubr.msk.f32.mxu0 %vm171_vm0, %v5836_v61  ;;  %v13749_v36 = vld [vmem:[%s14680_s1 + $0x78] sm:$0xff]  ;;  %v5162_v61 = vpop.f32.mrf.mxu0 }
 0x307   : > { %11519 = vmatprep.mubr.msk.f32.mxu1 %vm171_vm0, %v13370_v44  ;;  %v13754_v44 = vld [vmem:[%s14680_s1 + $0x80] sm:$0xff] }
 0x309   : > { %11470 = vmatmul.mubr.msk.f32.vlgmr.msra.gmra.mxu0 %vm171_vm0, %v5837_v59  ;;  %v5321_v59 = vadd.f32 %v5162_v61, %v4966_v57  ;;  %v13784_v57 = vld [vmem:[#allocation2 + $0x4a] sm:$0xff] }
 0x30a   : > { %11520 = vmatmul.mubr.msk.f32.vlgmr.msra.gmra.mxu1 %vm171_vm0, %v13374_v52  ;;  %11568 = vmatpush3.msra.mxu0 %v13329_v54  ;;  %v13763_v52 = vld [vmem:[#allocation2 + $0x22] sm:$0xff]  ;;  %v13772_v54 = vld [vmem:[#allocation2 + $0x32] sm:$0xff] }
 0x30b   : > { %11472 = vmatprep.mubr.msk.f32.mxu0 %vm171_vm0, %v13744_v23  ;;  %11522 = vmatprep.mubr.msk.f32.mxu1 %vm171_vm0, %v13396_v5  ;;  %5353 = vst.msk [vmem:[#allocation3] sm:$0xff] %vm324_vm2, %v5321_v59 }
 0x30c   : > { %11618 = vmatpush3.msra.mxu1 %v13338_v1  ;;  %11667 = vmatprep.subr.mxu0 %v13749_v36  ;;  %v11421_v1 = vpop.f32.mrf.mxu1  ;;  %v5418_v41 = vld [vmem:[#allocation3 + $0x8] sm:$0xff] }
 0x30d   : > { %11717 = vmatprep.subr.mxu1 %v13754_v44  ;;  %11473 = vmatmul.mubr.msk.f32.gmra.mxu0 %vm171_vm0, %v13763_v52  ;;  %v5773_v53 = vadd.f32 %v11421_v1, %v5418_v41  ;;  %v13804_v1 = vld [vmem:[#allocation2 + $0x6a] sm:$0xff]  ;;  %v13810_v41 = vld [vmem:[#allocation2 + $0x7a] sm:$0xff] }
 0x30e   : > { %11523 = vmatmul.mubr.msk.f32.gmra.mxu1 %vm171_vm0, %v13400_v8  ;;  %11475 = vmatprep.mubr.msk.f32.mxu0 %vm171_vm0, %v13772_v54  ;;  %v5613_v59 = vpop.f32.mrf.mxu1 }
 0x30f   : > { %11525 = vmatprep.mubr.msk.f32.mxu1 %vm171_vm0, %v13422_v34  ;;  %v13790_v34 = vld [vmem:[#allocation2 + $0x52] sm:$0xff]  ;;  %5805 = vst.msk [vmem:[#allocation3 + $0x8] sm:$0xff] %vm324_vm2, %v5773_v53  ;;  %v13816_v53 = vld [vmem:[#allocation2 + $0x82] sm:$0xff] }
 0x311   : > { %11476 = vmatmul.mubr.msk.f32.gmra.mxu0 %vm171_vm0, %v13778_v11 }
 0x312   : > { %11526 = vmatmul.mubr.msk.f32.gmra.mxu1 %vm171_vm0, %v13426_v38  ;;  %11478 = vmatprep.mubr.msk.f32.mxu0 %vm171_vm0, %v13784_v57  ;;  %v5417_v61 = vld [vmem:[#allocation3] sm:$0xff]  ;;  %v13797_v38 = vld [vmem:[#allocation2 + $0x62] sm:$0xff] }
 0x313   : > { %11528 = vmatprep.mubr.msk.f32.mxu1 %vm171_vm0, %v13448_v22  ;;  %v5772_v8 = vadd.f32 %v5613_v59, %v5417_v61  ;;  %v13828_v61 = vld [vmem:[#allocation2 + $0x9a] sm:$0xff]  ;;  %v13834_v59 = vld [vmem:[#allocation2 + $0xaa] sm:$0xff] }
 0x315   : > { %11479 = vmatmul.mubr.msk.f32.gmra.mxu0 %vm171_vm0, %v13790_v34  ;;  %5804 = vst.msk [vmem:[#allocation3] sm:$0xff] %vm324_vm2, %v5772_v8  ;;  %v13822_v8 = vld [vmem:[#allocation2 + $0x92] sm:$0xff] }
 0x316   : > { %11529 = vmatmul.mubr.msk.f32.gmra.mxu1 %vm171_vm0, %v13452_v31  ;;  %11481 = vmatprep.mubr.msk.f32.mxu0 %vm171_vm0, %v13797_v38 }
 0x317   : > { %11531 = vmatprep.mubr.msk.f32.mxu1 %vm171_vm0, %v13474_v21 }
 0x319   : > { %11482 = vmatmul.mubr.msk.f32.gmra.mxu0 %vm171_vm0, %v13804_v1 }
 0x31a   : > { %11532 = vmatmul.mubr.msk.f32.gmra.mxu1 %vm171_vm0, %v13478_v33  ;;  %11484 = vmatprep.mubr.msk.f32.mxu0 %vm171_vm0, %v13810_v41 }
 0x31b   : > { %11534 = vmatprep.mubr.msk.f32.mxu1 %vm171_vm0, %v13500_v2  ;;  %v13932_v2 = vld [vmem:[#allocation2 + $0x180] sm:$0xff] }
 0x31d   : > { %11485 = vmatmul.mubr.msk.f32.gmra.mxu0 %vm171_vm0, %v13816_v53 }
 0x31e   : > { %11535 = vmatmul.mubr.msk.f32.gmra.mxu1 %vm171_vm0, %v13504_v10  ;;  %11487 = vmatprep.mubr.msk.f32.mxu0 %vm171_vm0, %v13822_v8  ;;  %v13840_v10 = vld [vmem:[#allocation2 + $0xb2] sm:$0xff] }
 0x31f   : > { %11537 = vmatprep.mubr.msk.f32.mxu1 %vm171_vm0, %v13526_v58  ;;  %v13846_v58 = vld [vmem:[#allocation2 + $0xc2] sm:$0xff] }
 0x321   : > { %11488 = vmatmul.mubr.msk.f32.gmra.mxu0 %vm171_vm0, %v13828_v61 }
 0x322   : > { %11538 = vmatmul.mubr.msk.f32.gmra.mxu1 %vm171_vm0, %v13530_v50  ;;  %11490 = vmatprep.mubr.msk.f32.mxu0 %vm171_vm0, %v13834_v59  ;;  %v13852_v50 = vld [vmem:[#allocation2 + $0xca] sm:$0xff] }
 0x323   : > { %11540 = vmatprep.mubr.msk.f32.mxu1 %vm171_vm0, %v13552_v25  ;;  %v13858_v25 = vld [vmem:[#allocation2 + $0xda] sm:$0xff] }
 0x325   : > { %11491 = vmatmul.mubr.msk.f32.gmra.mxu0 %vm171_vm0, %v13840_v10 }
 0x326   : > { %11541 = vmatmul.mubr.msk.f32.gmra.mxu1 %vm171_vm0, %v13556_v18  ;;  %11493 = vmatprep.mubr.msk.f32.mxu0 %vm171_vm0, %v13846_v58  ;;  %v13864_v18 = vld [vmem:[#allocation2 + $0xe2] sm:$0xff] }
 0x327   : > { %11543 = vmatprep.mubr.msk.f32.mxu1 %vm171_vm0, %v13578_v63  ;;  %v13870_v63 = vld [vmem:[#allocation2 + $0xf2] sm:$0xff] }
 0x329   : > { %11494 = vmatmul.mubr.msk.f32.gmra.mxu0 %vm171_vm0, %v13852_v50 }
 0x32a   : > { %11544 = vmatmul.mubr.msk.f32.gmra.mxu1 %vm171_vm0, %v13582_v56  ;;  %11496 = vmatprep.mubr.msk.f32.mxu0 %vm171_vm0, %v13858_v25  ;;  %v13876_v56 = vld [vmem:[#allocation2 + $0xfa] sm:$0xff] }
 0x32b   : > { %11546 = vmatprep.mubr.msk.f32.mxu1 %vm171_vm0, %v13604_v4  ;;  %v13882_v4 = vld [vmem:[#allocation2 + $0x10a] sm:$0xff] }
 0x32d   : > { %11497 = vmatmul.mubr.msk.f32.gmra.mxu0 %vm171_vm0, %v13864_v18 }
 0x32e   : > { %11547 = vmatmul.mubr.msk.f32.gmra.mxu1 %vm171_vm0, %v13608_v0  ;;  %11499 = vmatprep.mubr.msk.f32.mxu0 %vm171_vm0, %v13870_v63  ;;  %v13888_v0 = vld [vmem:[#allocation2 + $0x112] sm:$0xff] }
 0x32f   : > { %11549 = vmatprep.mubr.msk.f32.mxu1 %vm171_vm0, %v13630_v37  ;;  %v13894_v37 = vld [vmem:[#allocation2 + $0x122] sm:$0xff] }
 0x331   : > { %11500 = vmatmul.mubr.msk.f32.gmra.mxu0 %vm171_vm0, %v13876_v56 }
 0x332   : > { %11550 = vmatmul.mubr.msk.f32.gmra.mxu1 %vm171_vm0, %v13634_v55  ;;  %11502 = vmatprep.mubr.msk.f32.mxu0 %vm171_vm0, %v13882_v4  ;;  %v13900_v55 = vld [vmem:[#allocation2 + $0x12a] sm:$0xff] }
 0x333   : > { %11552 = vmatprep.mubr.msk.f32.mxu1 %vm171_vm0, %v13656_v15  ;;  %v13906_v15 = vld [vmem:[#allocation2 + $0x13a] sm:$0xff] }
 0x335   : > { %11503 = vmatmul.mubr.msk.f32.gmra.mxu0 %vm171_vm0, %v13888_v0 }
 0x336   : > { %11553 = vmatmul.mubr.msk.f32.gmra.mxu1 %vm171_vm0, %v13660_v30  ;;  %11505 = vmatprep.mubr.msk.f32.mxu0 %vm171_vm0, %v13894_v37  ;;  %v13912_v30 = vld [vmem:[#allocation2 + $0x142] sm:$0xff] }
 0x337   : > { %11555 = vmatprep.mubr.msk.f32.mxu1 %vm171_vm0, %v13682_v48  ;;  %v13918_v48 = vld [vmem:[#allocation2 + $0x152] sm:$0xff] }
 0x339   : > { %11506 = vmatmul.mubr.msk.f32.gmra.mxu0 %vm171_vm0, %v13900_v55 }
 0x33a   : > { %11556 = vmatmul.mubr.msk.f32.gmra.mxu1 %vm171_vm0, %v13686_v20  ;;  %11508 = vmatprep.mubr.msk.f32.mxu0 %vm171_vm0, %v13906_v15  ;;  %v13924_v20 = vld [vmem:[#allocation2 + $0x15a] sm:$0xff] }
 0x33b   : > { %11558 = vmatprep.mubr.msk.f32.mxu1 %vm171_vm0, %v13705_v60  ;;  %v13930_v60 = vld [vmem:[#allocation2 + $0x16a] sm:$0xff] }
 0x33d   : > { %11509 = vmatmul.mubr.msk.f32.gmra.mxu0 %vm171_vm0, %v13912_v30 }
 0x33e   : > { %11559 = vmatmul.mubr.msk.f32.gmra.mxu1 %vm171_vm0, %v13709_v24  ;;  %11511 = vmatprep.mubr.msk.f32.mxu0 %vm171_vm0, %v13918_v48  ;;  %v13938_v24 = vld [vmem:[#allocation2 + $0x172] sm:$0xff] }
 0x33f   : > { %11561 = vmatprep.mubr.msk.f32.mxu1 %vm171_vm0, %v13722_v46  ;;  %v13940_v46 = vld [vmem:[#allocation2 + $0x188] sm:$0xff] }
 0x341   : > { %11512 = vmatmul.mubr.msk.f32.gmra.mxu0 %vm171_vm0, %v13924_v20 }
 0x342   : > { %11562 = vmatmul.mubr.msk.f32.gmra.mxu1 %vm171_vm0, %v13726_v27  ;;  %11514 = vmatprep.mubr.msk.f32.mxu0 %vm171_vm0, %v13930_v60  ;;  %v13957_v27 = vld [vmem:[%s14680_s1 + $0x88] sm:$0xff] }
 0x343   : > { %11564 = vmatprep.mubr.msk.f32.mxu1 %vm171_vm0, %v13932_v2 }
 0x345   : > { %11515 = vmatmul.mubr.msk.f32.gmra.mxu0 %vm171_vm0, %v13938_v24 }
 0x346   : > { %11565 = vmatmul.mubr.msk.f32.gmra.mxu1 %vm171_vm0, %v13940_v46  ;;  %11569 = vmatprep.mubr.msk.f32.mxu0 %vm171_vm0, %v13372_v45  ;;  %v14797_v45 = vld [vmem:[#allocation43_spill] sm:$0xff] }
 0x347   : > { %11619 = vmatprep.mubr.msk.f32.mxu1 %vm171_vm0, %v13744_v23 }
 0x349   : > { %11570 = vmatmul.mubr.msk.f32.vlgmr.msra.gmra.mxu0 %vm171_vm0, %v13385_v7  ;;  %v14798_v7 = vld [vmem:[#allocation44_spill] sm:$0xff] }
 0x34a   : > { %11620 = vmatmul.mubr.msk.f32.vlgmr.msra.gmra.mxu1 %vm171_vm0, %v13763_v52  ;;  %11668 = vmatpush3.msra.mxu0 %v13749_v36  ;;  %v14796_v36 = vld [vmem:[#allocation41_spill] sm:$0xff] }
 0x34b   : > { %11572 = vmatprep.mubr.msk.f32.mxu0 %vm171_vm0, %v13398_v6  ;;  %11622 = vmatprep.mubr.msk.f32.mxu1 %vm171_vm0, %v13772_v54  ;;  %v4973_v54 = vld [vmem:[#allocation3 + $0x38] sm:$0xff] }
 0x34c   : > { %11718 = vmatpush3.msra.mxu1 %v13754_v44  ;;  %11767 = vmatprep.subr.mxu0 %v13957_v27 }
 0x34d   : > { %11573 = vmatmul.mubr.msk.f32.gmra.mxu0 %vm171_vm0, %v13411_v12 }
 0x34e   : > { %11623 = vmatmul.mubr.msk.f32.gmra.mxu1 %vm171_vm0, %v13778_v11  ;;  %11575 = vmatprep.mubr.msk.f32.mxu0 %vm171_vm0, %v13424_v35 }
 0x34f   : > { %11625 = vmatprep.mubr.msk.f32.mxu1 %vm171_vm0, %v13784_v57 }
 0x351   : > { %11576 = vmatmul.mubr.msk.f32.gmra.mxu0 %vm171_vm0, %v13437_v43 }
 0x352   : > { %11626 = vmatmul.mubr.msk.f32.gmra.mxu1 %vm171_vm0, %v13790_v34  ;;  %11578 = vmatprep.mubr.msk.f32.mxu0 %vm171_vm0, %v13450_v26  ;;  %v14799_v34 = vld [vmem:[#allocation45_spill] sm:$0xff] }
 0x353   : > { %11628 = vmatprep.mubr.msk.f32.mxu1 %vm171_vm0, %v13797_v38  ;;  %v14800_v38 = vld [vmem:[#allocation46_spill] sm:$0xff] }
 0x355   : > { %11579 = vmatmul.mubr.msk.f32.gmra.mxu0 %vm171_vm0, %v13463_v14 }
 0x356   : > { %11629 = vmatmul.mubr.msk.f32.gmra.mxu1 %vm171_vm0, %v13804_v1  ;;  %11581 = vmatprep.mubr.msk.f32.mxu0 %vm171_vm0, %v13476_v32  ;;  %v14805_v1 = vld [vmem:[#allocation24_spill] sm:$0xff] }
 0x357   : > { %11631 = vmatprep.mubr.msk.f32.mxu1 %vm171_vm0, %v13810_v41 }
 0x359   : > { %11582 = vmatmul.mubr.msk.f32.gmra.mxu0 %vm171_vm0, %v13489_v28 }
 0x35a   : > { %11632 = vmatmul.mubr.msk.f32.gmra.mxu1 %vm171_vm0, %v13816_v53  ;;  %11584 = vmatprep.mubr.msk.f32.mxu0 %vm171_vm0, %v13502_v9 }
 0x35b   : > { %11634 = vmatprep.mubr.msk.f32.mxu1 %vm171_vm0, %v13822_v8  ;;  %v4975_v8 = vld [vmem:[#allocation3 + $0x48] sm:$0xff] }
 0x35d   : > { %11585 = vmatmul.mubr.msk.f32.gmra.mxu0 %vm171_vm0, %v13515_v29 }
 0x35e   : > { %11635 = vmatmul.mubr.msk.f32.gmra.mxu1 %vm171_vm0, %v13828_v61  ;;  %11587 = vmatprep.mubr.msk.f32.mxu0 %vm171_vm0, %v13528_v47 }
 0x35f   : > { %11637 = vmatprep.mubr.msk.f32.mxu1 %vm171_vm0, %v13834_v59 }
 0x361   : > { %11588 = vmatmul.mubr.msk.f32.gmra.mxu0 %vm171_vm0, %v13541_v17  ;;  %v7220_v17 = vld [vmem:[#allocation2 + $0x18a] sm:$0xff] }
 0x362   : > { %11638 = vmatmul.mubr.msk.f32.gmra.mxu1 %vm171_vm0, %v13840_v10  ;;  %11590 = vmatprep.mubr.msk.f32.mxu0 %vm171_vm0, %v13554_v13  ;;  %v14074_v10 = vld [vmem:[#allocation2 + $0x181] sm:$0xff]  ;;  %v14802_v13 = vld [vmem:[#allocation13_spill] sm:$0xff] }
 0x363   : > { %11640 = vmatprep.mubr.msk.f32.mxu1 %vm171_vm0, %v13846_v58  ;;  %v14079_v58 = vld [vmem:[#allocation2 + $0x189] sm:$0xff] }
 0x365   : > { %11591 = vmatmul.mubr.msk.f32.gmra.mxu0 %vm171_vm0, %v13567_v51  ;;  %v4969_v51 = vld [vmem:[#allocation3 + $0x18] sm:$0xff] }
 0x366   : > { %11641 = vmatmul.mubr.msk.f32.gmra.mxu1 %vm171_vm0, %v13852_v50  ;;  %11593 = vmatprep.mubr.msk.f32.mxu0 %vm171_vm0, %v13580_v39 }
 0x367   : > { %11643 = vmatprep.mubr.msk.f32.mxu1 %vm171_vm0, %v13858_v25  ;;  %v14806_v25 = vld [vmem:[#allocation25_spill] sm:$0xff] }
 0x369   : > { %11594 = vmatmul.mubr.msk.f32.gmra.mxu0 %vm171_vm0, %v13593_v62  ;;  %v14804_v62 = vld [vmem:[#allocation17_spill] sm:$0xff] }
 0x36a   : > { %11644 = vmatmul.mubr.msk.f32.gmra.mxu1 %vm171_vm0, %v13864_v18  ;;  %11596 = vmatprep.mubr.msk.f32.mxu0 %vm171_vm0, %v13606_v3  ;;  %v14803_v3 = vld [vmem:[#allocation16_spill] sm:$0xff] }
 0x36b   : > { %11646 = vmatprep.mubr.msk.f32.mxu1 %vm171_vm0, %v13870_v63  ;;  %v4974_v18 = vld [vmem:[#allocation3 + $0x40] sm:$0xff] }
 0x36d   : > { %11597 = vmatmul.mubr.msk.f32.gmra.mxu0 %vm171_vm0, %v13619_v16 }
 0x36e   : > { %11647 = vmatmul.mubr.msk.f32.gmra.mxu1 %vm171_vm0, %v13876_v56  ;;  %11599 = vmatprep.mubr.msk.f32.mxu0 %vm171_vm0, %v13632_v19  ;;  %v7219_v19 = vld [vmem:[#allocation2 + $0x182] sm:$0xff]  ;;  %v14807_v56 = vld [vmem:[#allocation28_spill] sm:$0xff] }
 0x36f   : > { %11649 = vmatprep.mubr.msk.f32.mxu1 %vm171_vm0, %v13882_v4 }
 0x371   : > { %11600 = vmatmul.mubr.msk.f32.gmra.mxu0 %vm171_vm0, %v13645_v40 }
 0x372   : > { %11650 = vmatmul.mubr.msk.f32.gmra.mxu1 %vm171_vm0, %v13888_v0  ;;  %11602 = vmatprep.mubr.msk.f32.mxu0 %vm171_vm0, %v13658_v49  ;;  %v14801_v49 = vld [vmem:[#allocation47_spill] sm:$0xff] }
 0x373   : > { %11652 = vmatprep.mubr.msk.f32.mxu1 %vm171_vm0, %v13894_v37 }
 0x375   : > { %11603 = vmatmul.mubr.msk.f32.gmra.mxu0 %vm171_vm0, %v13671_v42 }
 0x376   : > { %11653 = vmatmul.mubr.msk.f32.gmra.mxu1 %vm171_vm0, %v13900_v55  ;;  %11605 = vmatprep.mubr.msk.f32.mxu0 %vm171_vm0, %v14796_v36  ;;  %v4977_v55 = vld [vmem:[#allocation3 + $0x58] sm:$0xff]  ;;  %v4976_v36 = vld [vmem:[#allocation3 + $0x50] sm:$0xff] }
 0x377   : > { %11655 = vmatprep.mubr.msk.f32.mxu1 %vm171_vm0, %v13906_v15 }
 0x379   : > { %11606 = vmatmul.mubr.msk.f32.gmra.mxu0 %vm171_vm0, %v14797_v45 }
 0x37a   : > { %11656 = vmatmul.mubr.msk.f32.gmra.mxu1 %vm171_vm0, %v13912_v30  ;;  %11608 = vmatprep.mubr.msk.f32.mxu0 %vm171_vm0, %v14798_v7  ;;  %v7651_v30 = vld [vmem:[#allocation2 + $0xb0] sm:$0xff] }
 0x37b   : > { %11658 = vmatprep.mubr.msk.f32.mxu1 %vm171_vm0, %v13918_v48  ;;  %v8102_v48 = vld [vmem:[#allocation2 + $0xb1] sm:$0xff] }
 0x37d   : > { %11609 = vmatmul.mubr.msk.f32.gmra.mxu0 %vm171_vm0, %v14799_v34 }
 0x37e   : > { %11659 = vmatmul.mubr.msk.f32.gmra.mxu1 %vm171_vm0, %v13924_v20  ;;  %11611 = vmatprep.mubr.msk.f32.mxu0 %vm171_vm0, %v14800_v38  ;;  %v7652_v20 = vld [vmem:[#allocation2 + $0xc0] sm:$0xff] }
 0x37f   : > { %11661 = vmatprep.mubr.msk.f32.mxu1 %vm171_vm0, %v13930_v60 }
 0x381   : > { %11612 = vmatmul.mubr.msk.f32.gmra.mxu0 %vm171_vm0, %v14801_v49 }
 0x382   : > { %11662 = vmatmul.mubr.msk.f32.gmra.mxu1 %vm171_vm0, %v13938_v24  ;;  %11614 = vmatprep.mubr.msk.f32.mxu0 %vm171_vm0, %v14074_v10 }
 0x383   : > { %11664 = vmatprep.mubr.msk.f32.mxu1 %vm171_vm0, %v7219_v19  ;;  %v4979_v19 = vld [vmem:[#allocation3 + $0x68] sm:$0xff] }
 0x385   : > { %11615 = vmatmul.mubr.msk.f32.gmra.mxu0 %vm171_vm0, %v14079_v58 }
 0x386   : > { %11665 = vmatmul.mubr.msk.f32.gmra.mxu1 %vm171_vm0, %v7220_v17  ;;  %11669 = vmatprep.mubr.msk.f32.mxu0 %vm171_vm0, %v13396_v5 }
 0x387   : > { %11719 = vmatprep.mubr.msk.f32.mxu1 %vm171_vm0, %v13398_v6  ;;  %v4968_v6 = vld [vmem:[#allocation3 + $0x10] sm:$0xff] }
 0x389   : > { %11670 = vmatmul.mubr.msk.f32.vlgmr.msra.gmra.mxu0 %vm171_vm0, %v14802_v13 }
 0x38a   : > { %11720 = vmatmul.mubr.msk.f32.vlgmr.msra.gmra.mxu1 %vm171_vm0, %v13411_v12  ;;  %11768 = vmatpush3.msra.mxu0 %v13957_v27 }
 0x38b   : > { %11672 = vmatprep.mubr.msk.f32.mxu0 %vm171_vm0, %v14803_v3  ;;  %11722 = vmatprep.mubr.msk.f32.mxu1 %vm171_vm0, %v13424_v35  ;;  %v4971_v35 = vld [vmem:[#allocation3 + $0x28] sm:$0xff]  ;;  %v7653_v3 = vld [vmem:[#allocation2 + $0xc8] sm:$0xff] }
 0x38c   : > { %v11374_v39 = vpop.f32.mrf.mxu0 }
 0x38d   : > { %v11424_v5 = vpop.f32.mrf.mxu1  ;;  %11673 = vmatmul.mubr.msk.f32.gmra.mxu0 %vm171_vm0, %v14804_v62  ;;  %v5324_v16 = vadd.f32 %v11374_v39, %v4969_v51  ;;  %v8104_v51 = vld [vmem:[#allocation2 + $0xc9] sm:$0xff]  ;;  %v7654_v39 = vld [vmem:[#allocation2 + $0xd8] sm:$0xff] }
 0x38e   : > { %11723 = vmatmul.mubr.msk.f32.gmra.mxu1 %vm171_vm0, %v13437_v43  ;;  %11675 = vmatprep.mubr.msk.f32.mxu0 %vm171_vm0, %v13448_v22  ;;  %v5172_v12 = vpop.f32.mrf.mxu0  ;;  %v4970_v43 = vld [vmem:[#allocation3 + $0x20] sm:$0xff] }
 0x38f   : > { %11725 = vmatprep.mubr.msk.f32.mxu1 %vm171_vm0, %v13450_v26  ;;  %v5623_v40 = vpop.f32.mrf.mxu1  ;;  %5356 = vst.msk [vmem:[#allocation3 + $0x18] sm:$0xff] %vm324_vm2, %v5324_v16  ;;  %v5323_v42 = vadd.f32 %v5172_v12, %v4968_v6  ;;  %v8105_v16 = vld [vmem:[#allocation2 + $0xd9] sm:$0xff]  ;;  %v4978_v12 = vld [vmem:[#allocation3 + $0x60] sm:$0xff] }
 0x390   : > { %v11377_v23 = vpop.f32.mrf.mxu0 }
 0x391   : > { %v11427_v44 = vpop.f32.mrf.mxu1  ;;  %11676 = vmatmul.mubr.msk.f32.gmra.mxu0 %vm171_vm0, %v13452_v31  ;;  %5355 = vst.msk [vmem:[#allocation3 + $0x10] sm:$0xff] %vm324_vm2, %v5323_v42  ;;  %v5326_v22 = vadd.f32 %v11377_v23, %v4971_v35 }
 0x392   : > { %11726 = vmatmul.mubr.msk.f32.gmra.mxu1 %vm171_vm0, %v13463_v14  ;;  %11678 = vmatprep.mubr.msk.f32.mxu0 %vm171_vm0, %v13474_v21  ;;  %v5182_v26 = vpop.f32.mrf.mxu0  ;;  %v4972_v14 = vld [vmem:[#allocation3 + $0x30] sm:$0xff] }
 0x393   : > { %11728 = vmatprep.mubr.msk.f32.mxu1 %vm171_vm0, %v13476_v32  ;;  %v5633_v52 = vpop.f32.mrf.mxu1  ;;  %5358 = vst.msk [vmem:[#allocation3 + $0x28] sm:$0xff] %vm324_vm2, %v5326_v22  ;;  %v5325_v11 = vadd.f32 %v5182_v26, %v4970_v43  ;;  %v4981_v43 = vld [vmem:[#allocation3 + $0x78] sm:$0xff] }
 0x394   : > { %v11380_v31 = vpop.f32.mrf.mxu0 }
 0x395   : > { %v11430_v57 = vpop.f32.mrf.mxu1  ;;  %11679 = vmatmul.mubr.msk.f32.gmra.mxu0 %vm171_vm0, %v13478_v33  ;;  %5357 = vst.msk [vmem:[#allocation3 + $0x20] sm:$0xff] %vm324_vm2, %v5325_v11  ;;  %v5328_v21 = vadd.f32 %v11380_v31, %v4973_v54  ;;  %v8106_v54 = vld [vmem:[#allocation2 + $0xe1] sm:$0xff]  ;;  %v7656_v11 = vld [vmem:[#allocation2 + $0xf0] sm:$0xff] }
 0x396   : > { %11729 = vmatmul.mubr.msk.f32.gmra.mxu1 %vm171_vm0, %v13489_v28  ;;  %11681 = vmatprep.mubr.msk.f32.mxu0 %vm171_vm0, %v14805_v1  ;;  %v5420_v32 = vld [vmem:[#allocation3 + $0x18] sm:$0xff]  ;;  %v5192_v41 = vpop.f32.mrf.mxu0  ;;  %v4980_v1 = vld [vmem:[#allocation3 + $0x70] sm:$0xff] }
 0x397   : > { %11731 = vmatprep.mubr.msk.f32.mxu1 %vm171_vm0, %v13502_v9  ;;  %v5643_v53 = vpop.f32.mrf.mxu1  ;;  %v5775_v61 = vadd.f32 %v11424_v5, %v5420_v32  ;;  %5360 = vst.msk [vmem:[#allocation3 + $0x38] sm:$0xff] %vm324_vm2, %v5328_v21  ;;  %v5327_v33 = vadd.f32 %v5192_v41, %v4972_v14  ;;  %v8107_v21 = vld [vmem:[#allocation2 + $0xf1] sm:$0xff] }
 0x398   : > { %v5419_v59 = vld [vmem:[#allocation3 + $0x10] sm:$0xff] }
 0x399   : > { %v11383_v28 = vpop.f32.mrf.mxu0  ;;  %11682 = vmatmul.mubr.msk.f32.gmra.mxu0 %vm171_vm0, %v14806_v25  ;;  %5807 = vst.msk [vmem:[#allocation3 + $0x18] sm:$0xff] %vm324_vm2, %v5775_v61  ;;  %v5774_v9 = vadd.f32 %v5623_v40, %v5419_v59  ;;  %5359 = vst.msk [vmem:[#allocation3 + $0x30] sm:$0xff] %vm324_vm2, %v5327_v33  ;;  %v4983_v33 = vld [vmem:[#allocation3 + $0x88] sm:$0xff] }
 0x39a   : > { %v14126_v50 = vpop.f32.mrf.mxu1  ;;  %11732 = vmatmul.mubr.msk.f32.gmra.mxu1 %vm171_vm0, %v13515_v29  ;;  %v5330_v63 = vadd.f32 %v11383_v28, %v4975_v8  ;;  %11684 = vmatprep.mubr.msk.f32.mxu0 %vm171_vm0, %v14807_v56  ;;  %v5422_v4 = vld [vmem:[#allocation3 + $0x28] sm:$0xff] }
 0x39b   : > { %11734 = vmatprep.mubr.msk.f32.mxu1 %vm171_vm0, %v13528_v47  ;;  %v5202_v0 = vpop.f32.mrf.mxu0  ;;  %5806 = vst.msk [vmem:[#allocation3 + $0x10] sm:$0xff] %vm324_vm2, %v5774_v9  ;;  %v5777_v29 = vadd.f32 %v11427_v44, %v5422_v4  ;;  %v8103_v47 = vld [vmem:[#allocation2 + $0xc1] sm:$0xff]  ;;  %v8108_v25 = vld [vmem:[#allocation2 + $0xf9] sm:$0xff]  ;;  %v8109_v4 = vld [vmem:[#allocation2 + $0x109] sm:$0xff] }
 0x39c   : > { %v14138_v37 = vpop.f32.mrf.mxu1  ;;  %5362 = vst.msk [vmem:[#allocation3 + $0x48] sm:$0xff] %vm324_vm2, %v5330_v63  ;;  %v5329_v15 = vadd.f32 %v5202_v0, %v4974_v18  ;;  %v5421_v60 = vld [vmem:[#allocation3 + $0x20] sm:$0xff]  ;;  %v7658_v18 = vld [vmem:[#allocation2 + $0x108] sm:$0xff] }
 0x39d   : > { %v11386_v24 = vpop.f32.mrf.mxu0  ;;  %11685 = vmatmul.mubr.msk.f32.gmra.mxu0 %vm171_vm0, %v7651_v30  ;;  %5809 = vst.msk [vmem:[#allocation3 + $0x28] sm:$0xff] %vm324_vm2, %v5777_v29  ;;  %v5776_v45 = vadd.f32 %v5633_v52, %v5421_v60  ;;  %v7655_v52 = vld [vmem:[#allocation2 + $0xe0] sm:$0xff]  ;;  %v4982_v0 = vld [vmem:[#allocation3 + $0x80] sm:$0xff] }
 0x39e   : > { %v14142_v27 = vpop.f32.mrf.mxu1  ;;  %11735 = vmatmul.mubr.msk.f32.gmra.mxu1 %vm171_vm0, %v8102_v48  ;;  %5361 = vst.msk [vmem:[#allocation3 + $0x40] sm:$0xff] %vm324_vm2, %v5329_v15  ;;  %v5332_v7 = vadd.f32 %v11386_v24, %v4977_v55  ;;  %11687 = vmatprep.mubr.msk.f32.mxu0 %vm171_vm0, %v7652_v20  ;;  %v5424_v34 = vld [vmem:[#allocation3 + $0x38] sm:$0xff]  ;;  %v7659_v24 = vld [vmem:[#allocation2 + $0x110] sm:$0xff] }
 0x39f   : > { %11737 = vmatprep.mubr.msk.f32.mxu1 %vm171_vm0, %v8103_v47  ;;  %v5212_v38 = vpop.f32.mrf.mxu0  ;;  %5808 = vst.msk [vmem:[#allocation3 + $0x20] sm:$0xff] %vm324_vm2, %v5776_v45  ;;  %v5779_v17 = vadd.f32 %v11430_v57, %v5424_v34  ;;  %v4985_v48 = vld [vmem:[#allocation3 + $0x98] sm:$0xff]  ;;  %v7660_v47 = vld [vmem:[#allocation2 + $0x120] sm:$0xff] }
 0x3a0   : > { %v14150_v49 = vpop.f32.mrf.mxu1  ;;  %5364 = vst.msk [vmem:[#allocation3 + $0x58] sm:$0xff] %vm324_vm2, %v5332_v7  ;;  %v5331_v13 = vadd.f32 %v5212_v38, %v4976_v36  ;;  %v5423_v5 = vld [vmem:[#allocation3 + $0x30] sm:$0xff] }
 0x3a1   : > { %v11389_v62 = vpop.f32.mrf.mxu0  ;;  %11688 = vmatmul.mubr.msk.f32.gmra.mxu0 %vm171_vm0, %v7653_v3  ;;  %5811 = vst.msk [vmem:[#allocation3 + $0x38] sm:$0xff] %vm324_vm2, %v5779_v17  ;;  %v5778_v40 = vadd.f32 %v5643_v53, %v5423_v5  ;;  %v8111_v34 = vld [vmem:[#allocation2 + $0x121] sm:$0xff] }
 0x3a2   : > { %v14154_v6 = vpop.f32.mrf.mxu1  ;;  %11738 = vmatmul.mubr.msk.f32.gmra.mxu1 %vm171_vm0, %v8104_v51  ;;  %5363 = vst.msk [vmem:[#allocation3 + $0x50] sm:$0xff] %vm324_vm2, %v5331_v13  ;;  %v5334_v35 = vadd.f32 %v11389_v62, %v4979_v19  ;;  %11690 = vmatprep.mubr.msk.f32.mxu0 %vm171_vm0, %v7654_v39  ;;  %v4984_v38 = vld [vmem:[#allocation3 + $0x90] sm:$0xff]  ;;  %v4987_v51 = vld [vmem:[#allocation3 + $0xa8] sm:$0xff]  ;;  %v7661_v62 = vld [vmem:[#allocation2 + $0x128] sm:$0xff] }
 0x3a3   : > { %11740 = vmatprep.mubr.msk.f32.mxu1 %vm171_vm0, %v8105_v16  ;;  %v5426_v42 = vld [vmem:[#allocation3 + $0x48] sm:$0xff]  ;;  %v5222_v23 = vpop.f32.mrf.mxu0  ;;  %5810 = vst.msk [vmem:[#allocation3 + $0x30] sm:$0xff] %vm324_vm2, %v5778_v40 }
 0x3a4   : > { %v14162_v44 = vpop.f32.mrf.mxu1  ;;  %v5781_v22 = vadd.f32 %v14126_v50, %v5426_v42  ;;  %5366 = vst.msk [vmem:[#allocation3 + $0x68] sm:$0xff] %vm324_vm2, %v5334_v35  ;;  %v5333_v26 = vadd.f32 %v5222_v23, %v4978_v12  ;;  %v7657_v50 = vld [vmem:[#allocation2 + $0xf8] sm:$0xff]  ;;  %v4986_v23 = vld [vmem:[#allocation3 + $0xa0] sm:$0xff] }
 0x3a5   : > { %v5425_v31 = vld [vmem:[#allocation3 + $0x40] sm:$0xff]  ;;  %v11392_v57 = vpop.f32.mrf.mxu0  ;;  %11691 = vmatmul.mubr.msk.f32.gmra.mxu0 %vm171_vm0, %v7655_v52  ;;  %v7662_v16 = vld [vmem:[#allocation2 + $0x138] sm:$0xff] }
 0x3a6   : > { %v14167_v14 = vpop.f32.mrf.mxu1  ;;  %11741 = vmatmul.mubr.msk.f32.gmra.mxu1 %vm171_vm0, %v8106_v54  ;;  %5813 = vst.msk [vmem:[#allocation3 + $0x48] sm:$0xff] %vm324_vm2, %v5781_v22  ;;  %v5780_v32 = vadd.f32 %v14138_v37, %v5425_v31  ;;  %5365 = vst.msk [vmem:[#allocation3 + $0x60] sm:$0xff] %vm324_vm2, %v5333_v26  ;;  %v5336_v41 = vadd.f32 %v11392_v57, %v4981_v43  ;;  %11693 = vmatprep.mubr.msk.f32.mxu0 %vm171_vm0, %v7656_v11  ;;  %v8113_v42 = vld [vmem:[#allocation2 + $0x139] sm:$0xff]  ;;  %v4989_v54 = vld [vmem:[#allocation3 + $0xb8] sm:$0xff] }
 0x3a7   : > { %11743 = vmatprep.mubr.msk.f32.mxu1 %vm171_vm0, %v8107_v21  ;;  %v5428_v53 = vld [vmem:[#allocation3 + $0x58] sm:$0xff]  ;;  %v5232_v8 = vpop.f32.mrf.mxu0  ;;  %v7663_v57 = vld [vmem:[#allocation2 + $0x140] sm:$0xff]  ;;  %v7664_v21 = vld [vmem:[#allocation2 + $0x150] sm:$0xff] }
 0x3a8   : > { %v14176_v61 = vpop.f32.mrf.mxu1  ;;  %5812 = vst.msk [vmem:[#allocation3 + $0x40] sm:$0xff] %vm324_vm2, %v5780_v32  ;;  %v5783_v59 = vadd.f32 %v14142_v27, %v5428_v53  ;;  %5368 = vst.msk [vmem:[#allocation3 + $0x78] sm:$0xff] %vm324_vm2, %v5336_v41  ;;  %v5335_v28 = vadd.f32 %v5232_v8, %v4980_v1  ;;  %v8110_v27 = vld [vmem:[#allocation2 + $0x111] sm:$0xff]  ;;  %v4988_v8 = vld [vmem:[#allocation3 + $0xb0] sm:$0xff] }
 0x3a9   : > { %v5427_v9 = vld [vmem:[#allocation3 + $0x50] sm:$0xff]  ;;  %v11395_v63 = vpop.f32.mrf.mxu0  ;;  %11694 = vmatmul.mubr.msk.f32.gmra.mxu0 %vm171_vm0, %v7657_v50  ;;  %v8115_v53 = vld [vmem:[#allocation2 + $0x151] sm:$0xff] }
 0x3aa   : > { %v14181_v56 = vpop.f32.mrf.mxu1  ;;  %11744 = vmatmul.mubr.msk.f32.gmra.mxu1 %vm171_vm0, %v8108_v25  ;;  %5815 = vst.msk [vmem:[#allocation3 + $0x58] sm:$0xff] %vm324_vm2, %v5783_v59  ;;  %v5782_v37 = vadd.f32 %v14150_v49, %v5427_v9  ;;  %5367 = vst.msk [vmem:[#allocation3 + $0x70] sm:$0xff] %vm324_vm2, %v5335_v28  ;;  %v5338_v55 = vadd.f32 %v11395_v63, %v4983_v33  ;;  %11696 = vmatprep.mubr.msk.f32.mxu0 %vm171_vm0, %v7658_v18  ;;  %v4991_v25 = vld [vmem:[#allocation3 + $0xc8] sm:$0xff] }
 0x3ab   : > { %11746 = vmatprep.mubr.msk.f32.mxu1 %vm171_vm0, %v8109_v4  ;;  %v5430_v29 = vld [vmem:[#allocation3 + $0x68] sm:$0xff]  ;;  %v5242_v15 = vpop.f32.mrf.mxu0  ;;  %v7666_v4 = vld [vmem:[#allocation2 + $0x168] sm:$0xff] }
 0x3ac   : > { %v14190_v30 = vpop.f32.mrf.mxu1  ;;  %5814 = vst.msk [vmem:[#allocation3 + $0x50] sm:$0xff] %vm324_vm2, %v5782_v37  ;;  %v5785_v20 = vadd.f32 %v14154_v6, %v5430_v29  ;;  %5370 = vst.msk [vmem:[#allocation3 + $0x88] sm:$0xff] %vm324_vm2, %v5338_v55  ;;  %v5337_v60 = vadd.f32 %v5242_v15, %v4982_v0  ;;  %v8112_v6 = vld [vmem:[#allocation2 + $0x129] sm:$0xff]  ;;  %v7665_v63 = vld [vmem:[#allocation2 + $0x158] sm:$0xff] }
 0x3ad   : > { %v5429_v36 = vld [vmem:[#allocation3 + $0x60] sm:$0xff]  ;;  %v11398_v45 = vpop.f32.mrf.mxu0  ;;  %11697 = vmatmul.mubr.msk.f32.gmra.mxu0 %vm171_vm0, %v7659_v24 }
 0x3ae   : > { %v14195_v7 = vpop.f32.mrf.mxu1  ;;  %11747 = vmatmul.mubr.msk.f32.gmra.mxu1 %vm171_vm0, %v8110_v27  ;;  %5817 = vst.msk [vmem:[#allocation3 + $0x68] sm:$0xff] %vm324_vm2, %v5785_v20  ;;  %v5784_v49 = vadd.f32 %v14162_v44, %v5429_v36  ;;  %5369 = vst.msk [vmem:[#allocation3 + $0x80] sm:$0xff] %vm324_vm2, %v5337_v60  ;;  %v5340_v19 = vadd.f32 %v11398_v45, %v4985_v48  ;;  %11699 = vmatprep.mubr.msk.f32.mxu0 %vm171_vm0, %v7660_v47  ;;  %v8117_v29 = vld [vmem:[#allocation2 + $0x169] sm:$0xff] }
 0x3af   : > { %11749 = vmatprep.mubr.msk.f32.mxu1 %vm171_vm0, %v8111_v34  ;;  %v5432_v17 = vld [vmem:[#allocation3 + $0x78] sm:$0xff]  ;;  %v5252_v13 = vpop.f32.mrf.mxu0  ;;  %v4990_v15 = vld [vmem:[#allocation3 + $0xc0] sm:$0xff] }
 0x3b0   : > { %v14204_v3 = vpop.f32.mrf.mxu1  ;;  %5816 = vst.msk [vmem:[#allocation3 + $0x60] sm:$0xff] %vm324_vm2, %v5784_v49  ;;  %v5787_v39 = vadd.f32 %v14167_v14, %v5432_v17  ;;  %5372 = vst.msk [vmem:[#allocation3 + $0x98] sm:$0xff] %vm324_vm2, %v5340_v19  ;;  %v5339_v5 = vadd.f32 %v5252_v13, %v4984_v38  ;;  %v8114_v14 = vld [vmem:[#allocation2 + $0x141] sm:$0xff]  ;;  %v7667_v45 = vld [vmem:[#allocation2 + $0x170] sm:$0xff] }
 0x3b1   : > { %v5431_v12 = vld [vmem:[#allocation3 + $0x70] sm:$0xff]  ;;  %v11401_v40 = vpop.f32.mrf.mxu0  ;;  %11700 = vmatmul.mubr.msk.f32.gmra.mxu0 %vm171_vm0, %v7661_v62  ;;  %v4993_v27 = vld [vmem:[#allocation3 + $0xd8] sm:$0xff]  ;;  %v7670_v62 = vld [vmem:[#allocation2 + $0x198] sm:$0xff] }
 0x3b2   : > { %v14209_v35 = vpop.f32.mrf.mxu1  ;;  %11750 = vmatmul.mubr.msk.f32.gmra.mxu1 %vm171_vm0, %v8112_v6  ;;  %5819 = vst.msk [vmem:[#allocation3 + $0x78] sm:$0xff] %vm324_vm2, %v5787_v39  ;;  %v5786_v44 = vadd.f32 %v14176_v61, %v5431_v12  ;;  %5371 = vst.msk [vmem:[#allocation3 + $0x90] sm:$0xff] %vm324_vm2, %v5339_v5  ;;  %v5342_v43 = vadd.f32 %v11401_v40, %v4987_v51  ;;  %11702 = vmatprep.mubr.msk.f32.mxu0 %vm171_vm0, %v7662_v16  ;;  %v4992_v19 = vld [vmem:[#allocation3 + $0xd0] sm:$0xff] }
 0x3b3   : > { %11752 = vmatprep.mubr.msk.f32.mxu1 %vm171_vm0, %v8113_v42  ;;  %v5434_v22 = vld [vmem:[#allocation3 + $0x88] sm:$0xff]  ;;  %v5262_v26 = vpop.f32.mrf.mxu0 }
 0x3b4   : > { %v14218_v52 = vpop.f32.mrf.mxu1  ;;  %5818 = vst.msk [vmem:[#allocation3 + $0x70] sm:$0xff] %vm324_vm2, %v5786_v44  ;;  %v5789_v11 = vadd.f32 %v14181_v56, %v5434_v22  ;;  %5374 = vst.msk [vmem:[#allocation3 + $0xa8] sm:$0xff] %vm324_vm2, %v5342_v43  ;;  %v5341_v31 = vadd.f32 %v5262_v26, %v4986_v23  ;;  %v8116_v56 = vld [vmem:[#allocation2 + $0x159] sm:$0xff]  ;;  %v8122_v43 = vld [vmem:[#allocation2 + $0x1a1] sm:$0xff] }
 0x3b5   : > { %v5433_v1 = vld [vmem:[#allocation3 + $0x80] sm:$0xff]  ;;  %v11404_v32 = vpop.f32.mrf.mxu0  ;;  %11703 = vmatmul.mubr.msk.f32.gmra.mxu0 %vm171_vm0, %v7663_v57  ;;  %v8121_v6 = vld [vmem:[#allocation2 + $0x199] sm:$0xff] }
 0x3b6   : > { %v14223_v41 = vpop.f32.mrf.mxu1  ;;  %11753 = vmatmul.mubr.msk.f32.gmra.mxu1 %vm171_vm0, %v8114_v14  ;;  %5821 = vst.msk [vmem:[#allocation3 + $0x88] sm:$0xff] %vm324_vm2, %v5789_v11  ;;  %v5788_v61 = vadd.f32 %v14190_v30, %v5433_v1  ;;  %5373 = vst.msk [vmem:[#allocation3 + $0xa0] sm:$0xff] %vm324_vm2, %v5341_v31  ;;  %v5344_v33 = vadd.f32 %v11404_v32, %v4989_v54  ;;  %11705 = vmatprep.mubr.msk.f32.mxu0 %vm171_vm0, %v7664_v21  ;;  %v7671_v44 = vld [vmem:[#allocation2 + $0x1a0] sm:$0xff]  ;;  %v8542_v14 = vld [vmem:[#allocation2 + $0x32] sm:$0xff] }
 0x3b7   : > { %11755 = vmatprep.mubr.msk.f32.mxu1 %vm171_vm0, %v8115_v53  ;;  %v5436_v59 = vld [vmem:[#allocation3 + $0x98] sm:$0xff]  ;;  %v5272_v28 = vpop.f32.mrf.mxu0  ;;  %v4996_v21 = vld [vmem:[#allocation3 + $0xf0] sm:$0xff] }
 0x3b8   : > { %v5723_v50 = vpop.f32.mrf.mxu1  ;;  %5820 = vst.msk [vmem:[#allocation3 + $0x80] sm:$0xff] %vm324_vm2, %v5788_v61  ;;  %v5791_v18 = vadd.f32 %v14195_v7, %v5436_v59  ;;  %5376 = vst.msk [vmem:[#allocation3 + $0xb8] sm:$0xff] %vm324_vm2, %v5344_v33  ;;  %v5343_v9 = vadd.f32 %v5272_v28, %v4988_v8  ;;  %v8118_v7 = vld [vmem:[#allocation2 + $0x171] sm:$0xff]  ;;  %v8543_v59 = vld [vmem:[#allocation2 + $0x3a] sm:$0xff] }
 0x3b9   : > { %v5435_v0 = vld [vmem:[#allocation3 + $0x90] sm:$0xff]  ;;  %v11407_v37 = vpop.f32.mrf.mxu0  ;;  %11706 = vmatmul.mubr.msk.f32.gmra.mxu0 %vm171_vm0, %v7665_v63 }
 0x3ba   : > { %v11457_v55 = vpop.f32.mrf.mxu1  ;;  %11756 = vmatmul.mubr.msk.f32.gmra.mxu1 %vm171_vm0, %v8116_v56  ;;  %5823 = vst.msk [vmem:[#allocation3 + $0x98] sm:$0xff] %vm324_vm2, %v5791_v18  ;;  %v5790_v30 = vadd.f32 %v14204_v3, %v5435_v0  ;;  %5375 = vst.msk [vmem:[#allocation3 + $0xb0] sm:$0xff] %vm324_vm2, %v5343_v9  ;;  %v5346_v48 = vadd.f32 %v11407_v37, %v4991_v25  ;;  %11708 = vmatprep.mubr.msk.f32.mxu0 %vm171_vm0, %v7666_v4  ;;  %v4995_v3 = vld [vmem:[#allocation3 + $0xe8] sm:$0xff]  ;;  %v8544_v9 = vld [vmem:[#allocation2 + $0x4a] sm:$0xff] }
 0x3bb   : > { %11758 = vmatprep.mubr.msk.f32.mxu1 %vm171_vm0, %v8117_v29  ;;  %v5438_v20 = vld [vmem:[#allocation3 + $0xa8] sm:$0xff]  ;;  %v5282_v60 = vpop.f32.mrf.mxu0  ;;  %v5868_v0 = vld [vmem:[#allocation3] sm:$0xff] }
 0x3bc   : > { %v5733_v24 = vpop.f32.mrf.mxu1  ;;  %5822 = vst.msk [vmem:[#allocation3 + $0x90] sm:$0xff] %vm324_vm2, %v5790_v30  ;;  %v5793_v47 = vadd.f32 %v14209_v35, %v5438_v20  ;;  %5378 = vst.msk [vmem:[#allocation3 + $0xc8] sm:$0xff] %vm324_vm2, %v5346_v48  ;;  %v5345_v36 = vadd.f32 %v5282_v60, %v4990_v15  ;;  %v8545_v30 = vld [vmem:[#allocation2 + $0x52] sm:$0xff]  ;;  %v5871_v20 = vld [vmem:[#allocation3 + $0x18] sm:$0xff] }
 0x3bd   : > { %v5437_v34 = vld [vmem:[#allocation3 + $0xa0] sm:$0xff]  ;;  %v11410_v38 = vpop.f32.mrf.mxu0  ;;  %11709 = vmatmul.mubr.msk.f32.gmra.mxu0 %vm171_vm0, %v7667_v45 }
 0x3be   : > { %v11460_v49 = vpop.f32.mrf.mxu1  ;;  %11759 = vmatmul.mubr.msk.f32.gmra.mxu1 %vm171_vm0, %v8118_v7  ;;  %5825 = vst.msk [vmem:[#allocation3 + $0xa8] sm:$0xff] %vm324_vm2, %v5793_v47  ;;  %v5792_v17 = vadd.f32 %v14218_v52, %v5437_v34  ;;  %5377 = vst.msk [vmem:[#allocation3 + $0xc0] sm:$0xff] %vm324_vm2, %v5345_v36  ;;  %v5348_v13 = vadd.f32 %v11410_v38, %v4993_v27  ;;  %11711 = vmatprep.mubr.msk.f32.mxu0 %vm171_vm0, %v13932_v2  ;;  %v4994_v2 = vld [vmem:[#allocation3 + $0xe0] sm:$0xff]  ;;  %v8546_v27 = vld [vmem:[#allocation2 + $0x62] sm:$0xff] }
 0x3bf   : > { %11761 = vmatprep.mubr.msk.f32.mxu1 %vm171_vm0, %v14074_v10  ;;  %v5440_v51 = vld [vmem:[#allocation3 + $0xb8] sm:$0xff]  ;;  %v5292_v39 = vpop.f32.mrf.mxu0  ;;  %v5870_v7 = vld [vmem:[#allocation3 + $0x10] sm:$0xff] }
 0x3c0   : > { %v5743_v5 = vpop.f32.mrf.mxu1  ;;  %5824 = vst.msk [vmem:[#allocation3 + $0xa0] sm:$0xff] %vm324_vm2, %v5792_v17  ;;  %v5795_v16 = vadd.f32 %v14223_v41, %v5440_v51  ;;  %5380 = vst.msk [vmem:[#allocation3 + $0xd8] sm:$0xff] %vm324_vm2, %v5348_v13  ;;  %v5347_v12 = vadd.f32 %v5292_v39, %v4992_v19  ;;  %v8547_v17 = vld [vmem:[#allocation2 + $0x6a] sm:$0xff] }
 0x3c1   : > { %v5439_v40 = vld [vmem:[#allocation3 + $0xb0] sm:$0xff]  ;;  %v11413_v35 = vpop.f32.mrf.mxu0  ;;  %11712 = vmatmul.mubr.msk.f32.gmra.mxu0 %vm171_vm0, %v13940_v46  ;;  %v4997_v46 = vld [vmem:[#allocation3 + $0xf8] sm:$0xff] }
 0x3c2   : > { %v11463_v42 = vpop.f32.mrf.mxu1  ;;  %11762 = vmatmul.mubr.msk.f32.gmra.mxu1 %vm171_vm0, %v14079_v58  ;;  %5827 = vst.msk [vmem:[#allocation3 + $0xb8] sm:$0xff] %vm324_vm2, %v5795_v16  ;;  %v5794_v10 = vadd.f32 %v5723_v50, %v5439_v40  ;;  %5379 = vst.msk [vmem:[#allocation3 + $0xd0] sm:$0xff] %vm324_vm2, %v5347_v12  ;;  %v5350_v23 = vadd.f32 %v11413_v35, %v4995_v3  ;;  %11714 = vmatprep.mubr.msk.f32.mxu0 %vm171_vm0, %v7670_v62  ;;  %v5869_v50 = vld [vmem:[#allocation3 + $0x8] sm:$0xff]  ;;  %v5872_v12 = vld [vmem:[#allocation3 + $0x20] sm:$0xff] }
 0x3c3   : > { %11764 = vmatprep.mubr.msk.f32.mxu1 %vm171_vm0, %v8121_v6  ;;  %v5442_v22 = vld [vmem:[#allocation3 + $0xc8] sm:$0xff]  ;;  %v5302_v26 = vpop.f32.mrf.mxu0 }
 0x3c4   : > { %v5753_v52 = vpop.f32.mrf.mxu1  ;;  %5826 = vst.msk [vmem:[#allocation3 + $0xb0] sm:$0xff] %vm324_vm2, %v5794_v10  ;;  %v5797_v58 = vadd.f32 %v11457_v55, %v5442_v22  ;;  %5382 = vst.msk [vmem:[#allocation3 + $0xe8] sm:$0xff] %vm324_vm2, %v5350_v23  ;;  %v5349_v54 = vadd.f32 %v5302_v26, %v4994_v2  ;;  %v5873_v3 = vld [vmem:[#allocation3 + $0x28] sm:$0xff]  ;;  %v8549_v10 = vld [vmem:[#allocation2 + $0x82] sm:$0xff] }
 0x3c5   : > { %v5441_v11 = vld [vmem:[#allocation3 + $0xc0] sm:$0xff]  ;;  %v11416_v31 = vpop.f32.mrf.mxu0  ;;  %11715 = vmatmul.mubr.msk.f32.gmra.mxu0 %vm171_vm0, %v7671_v44  ;;  %v5875_v44 = vld [vmem:[#allocation3 + $0x38] sm:$0xff] }
 0x3c6   : > { %v11466_v57 = vpop.f32.mrf.mxu1  ;;  %11765 = vmatmul.mubr.msk.f32.gmra.mxu1 %vm171_vm0, %v8122_v43  ;;  %5829 = vst.msk [vmem:[#allocation3 + $0xc8] sm:$0xff] %vm324_vm2, %v5797_v58  ;;  %v5796_v1 = vadd.f32 %v5733_v24, %v5441_v11  ;;  %5381 = vst.msk [vmem:[#allocation3 + $0xe0] sm:$0xff] %vm324_vm2, %v5349_v54  ;;  %v5352_v32 = vadd.f32 %v11416_v31, %v4997_v46  ;;  %11769 = vmatprep.mubr.msk.f32.mxu0 %vm171_vm0, %v8542_v14  ;;  %v8550_v26 = vld [vmem:[#allocation2 + $0x92] sm:$0xff]  ;;  %v5874_v54 = vld [vmem:[#allocation3 + $0x30] sm:$0xff] }
 0x3c7   : > { %v5444_v41 = vld [vmem:[#allocation3 + $0xd8] sm:$0xff]  ;;  %v5312_v53 = vpop.f32.mrf.mxu0 }
 0x3c8   : > { %v5763_v8 = vpop.f32.mrf.mxu1  ;;  %5828 = vst.msk [vmem:[#allocation3 + $0xc0] sm:$0xff] %vm324_vm2, %v5796_v1  ;;  %v5799_v61 = vadd.f32 %v11460_v49, %v5444_v41  ;;  %5384 = vst.msk [vmem:[#allocation3 + $0xf8] sm:$0xff] %vm324_vm2, %v5352_v32  ;;  %v5351_v33 = vadd.f32 %v5312_v53, %v4996_v21  ;;  %v8551_v21 = vld [vmem:[#allocation2 + $0x9a] sm:$0xff] }
 0x3c9   : > { %v5443_v28 = vld [vmem:[#allocation3 + $0xd0] sm:$0xff]  ;;  %v11471_v25 = vpop.f32.mrf.mxu0  ;;  %11770 = vmatmul.mubr.msk.f32.vlgmr.msra.gmra.mxu0 %vm171_vm0, %v8543_v59  ;;  %v5877_v32 = vld [vmem:[#allocation3 + $0x48] sm:$0xff] }
 0x3ca   : > { %v11521_v18 = vpop.f32.mrf.mxu1  ;;  %5831 = vst.msk [vmem:[#allocation3 + $0xd8] sm:$0xff] %vm324_vm2, %v5799_v61  ;;  %v5798_v63 = vadd.f32 %v5743_v5, %v5443_v28  ;;  %5383 = vst.msk [vmem:[#allocation3 + $0xf0] sm:$0xff] %vm324_vm2, %v5351_v33  ;;  %v6224_v56 = vadd.f32 %v11471_v25, %v5869_v50  ;;  %11772 = vmatprep.mubr.msk.f32.mxu0 %vm171_vm0, %v8544_v9  ;;  %v8548_v5 = vld [vmem:[#allocation2 + $0x7a] sm:$0xff]  ;;  %v5876_v28 = vld [vmem:[#allocation3 + $0x40] sm:$0xff] }
 0x3cb   : > { %v5446_v4 = vld [vmem:[#allocation3 + $0xe8] sm:$0xff]  ;;  %v6064_v37 = vpop.f32.mrf.mxu0 }
 0x3cc   : > { %v6515_v55 = vpop.f32.mrf.mxu1  ;;  %5830 = vst.msk [vmem:[#allocation3 + $0xd0] sm:$0xff] %vm324_vm2, %v5798_v63  ;;  %v5801_v29 = vadd.f32 %v11463_v42, %v5446_v4  ;;  %6256 = vst.msk [vmem:[#allocation3 + $0x8] sm:$0xff] %vm324_vm2, %v6224_v56  ;;  %v6223_v15 = vadd.f32 %v6064_v37, %v5868_v0  ;;  %v8553_v63 = vld [vmem:[#allocation2 + $0xb2] sm:$0xff]  ;;  %v5879_v4 = vld [vmem:[#allocation3 + $0x58] sm:$0xff] }
 0x3cd   : > { %v5445_v48 = vld [vmem:[#allocation3 + $0xe0] sm:$0xff]  ;;  %v11474_v60 = vpop.f32.mrf.mxu0  ;;  %11773 = vmatmul.mubr.msk.f32.gmra.mxu0 %vm171_vm0, %v8545_v30 }
 0x3ce   : > { %v11524_v24 = vpop.f32.mrf.mxu1  ;;  %5833 = vst.msk [vmem:[#allocation3 + $0xe8] sm:$0xff] %vm324_vm2, %v5801_v29  ;;  %v5800_v47 = vadd.f32 %v5753_v52, %v5445_v48  ;;  %6255 = vst.msk [vmem:[#allocation3] sm:$0xff] %vm324_vm2, %v6223_v15  ;;  %v6226_v36 = vadd.f32 %v11474_v60, %v5871_v20  ;;  %11775 = vmatprep.mubr.msk.f32.mxu0 %vm171_vm0, %v8546_v27  ;;  %v5878_v48 = vld [vmem:[#allocation3 + $0x50] sm:$0xff] }
 0x3cf   : > { %v5448_v45 = vld [vmem:[#allocation3 + $0xf8] sm:$0xff]  ;;  %v6074_v34 = vpop.f32.mrf.mxu0 }
 0x3d0   : > { %v6525_v38 = vpop.f32.mrf.mxu1  ;;  %5832 = vst.msk [vmem:[#allocation3 + $0xe0] sm:$0xff] %vm324_vm2, %v5800_v47  ;;  %v5803_v49 = vadd.f32 %v11466_v57, %v5448_v45  ;;  %6258 = vst.msk [vmem:[#allocation3 + $0x18] sm:$0xff] %vm324_vm2, %v6226_v36  ;;  %v6225_v19 = vadd.f32 %v6074_v34, %v5870_v7  ;;  %v8555_v47 = vld [vmem:[#allocation2 + $0xca] sm:$0xff]  ;;  %v5881_v45 = vld [vmem:[#allocation3 + $0x68] sm:$0xff] }
 0x3d1   : > { %v5447_v13 = vld [vmem:[#allocation3 + $0xf0] sm:$0xff]  ;;  %v11477_v51 = vpop.f32.mrf.mxu0  ;;  %11776 = vmatmul.mubr.msk.f32.gmra.mxu0 %vm171_vm0, %v8547_v17 }
 0x3d2   : > { %v11527_v39 = vpop.f32.mrf.mxu1  ;;  %5835 = vst.msk [vmem:[#allocation3 + $0xf8] sm:$0xff] %vm324_vm2, %v5803_v49  ;;  %v5802_v62 = vadd.f32 %v5763_v8, %v5447_v13  ;;  %6257 = vst.msk [vmem:[#allocation3 + $0x10] sm:$0xff] %vm324_vm2, %v6225_v19  ;;  %v6228_v6 = vadd.f32 %v11477_v51, %v5873_v3  ;;  %11778 = vmatprep.mubr.msk.f32.mxu0 %vm171_vm0, %v8548_v5  ;;  %v8552_v8 = vld [vmem:[#allocation2 + $0xaa] sm:$0xff] }
 0x3d3   : > { %v6320_v16 = vld [vmem:[#allocation3 + $0x8] sm:$0xff]  ;;  %v6084_v40 = vpop.f32.mrf.mxu0  ;;  %v5880_v13 = vld [vmem:[#allocation3 + $0x60] sm:$0xff] }
 0x3d4   : > { %v6535_v35 = vpop.f32.mrf.mxu1  ;;  %5834 = vst.msk [vmem:[#allocation3 + $0xf0] sm:$0xff] %vm324_vm2, %v5802_v62  ;;  %v6675_v42 = vadd.f32 %v11521_v18, %v6320_v16  ;;  %6260 = vst.msk [vmem:[#allocation3 + $0x28] sm:$0xff] %vm324_vm2, %v6228_v6  ;;  %v6227_v2 = vadd.f32 %v6084_v40, %v5872_v12  ;;  %v8557_v62 = vld [vmem:[#allocation2 + $0xe2] sm:$0xff] }
 0x3d5   : > { %v6319_v23 = vld [vmem:[#allocation3] sm:$0xff]  ;;  %v11480_v43 = vpop.f32.mrf.mxu0  ;;  %11779 = vmatmul.mubr.msk.f32.gmra.mxu0 %vm171_vm0, %v8549_v10  ;;  %v10169_v6 = vld [vmem:[%s14681_s2 + $0x4] sm:$0xf]  ;;  %v5883_v12 = vld [vmem:[#allocation3 + $0x78] sm:$0xff] }
 0x3d6   : > { %v11530_v22 = vpop.f32.mrf.mxu1  ;;  %6707 = vst.msk [vmem:[#allocation3 + $0x8] sm:$0xff] %vm324_vm2, %v6675_v42  ;;  %v6674_v52 = vadd.f32 %v6515_v55, %v6319_v23  ;;  %6259 = vst.msk [vmem:[#allocation3 + $0x20] sm:$0xff] %vm324_vm2, %v6227_v2  ;;  %v6230_v46 = vadd.f32 %v11480_v43, %v5875_v44  ;;  %11781 = vmatprep.mubr.msk.f32.mxu0 %vm171_vm0, %v8550_v26  ;;  %v8554_v55 = vld [vmem:[#allocation2 + $0xc2] sm:$0xff]  ;;  %v8558_v42 = vld [vmem:[#allocation2 + $0xf2] sm:$0xff]  ;;  %11817 = vmatprep.subr.msk.mxu1 %vm4577_vm3, %v10169_v6 }
 0x3d7   : > { %v6322_v58 = vld [vmem:[#allocation3 + $0x18] sm:$0xff]  ;;  %v6094_v11 = vpop.f32.mrf.mxu0  ;;  %11818 = vmatpush3.msk.msra.mxu1 %vm4577_vm3, %v10169_v6  ;;  %v5882_v44 = vld [vmem:[#allocation3 + $0x70] sm:$0xff] }
 0x3d8   : > { %v6545_v31 = vpop.f32.mrf.mxu1  ;;  %6706 = vst.msk [vmem:[#allocation3] sm:$0xff] %vm324_vm2, %v6674_v52  ;;  %v6677_v57 = vadd.f32 %v11524_v24, %v6322_v58  ;;  %6262 = vst.msk [vmem:[#allocation3 + $0x38] sm:$0xff] %vm324_vm2, %v6230_v46  ;;  %v6229_v14 = vadd.f32 %v6094_v11, %v5874_v54  ;;  %v8559_v46 = vld [vmem:[#allocation2 + $0xfa] sm:$0xff] }
 0x3d9   : > { %v6321_v1 = vld [vmem:[#allocation3 + $0x10] sm:$0xff]  ;;  %v11483_v41 = vpop.f32.mrf.mxu0  ;;  %11782 = vmatmul.mubr.msk.f32.gmra.mxu0 %vm171_vm0, %v8551_v21  ;;  %v5885_v54 = vld [vmem:[#allocation3 + $0x88] sm:$0xff] }
 0x3da   : > { %v11533_v53 = vpop.f32.mrf.mxu1  ;;  %6709 = vst.msk [vmem:[#allocation3 + $0x18] sm:$0xff] %vm324_vm2, %v6677_v57  ;;  %v6676_v61 = vadd.f32 %v6525_v38, %v6321_v1  ;;  %6261 = vst.msk [vmem:[#allocation3 + $0x30] sm:$0xff] %vm324_vm2, %v6229_v14  ;;  %v6232_v33 = vadd.f32 %v11483_v41, %v5877_v32  ;;  %11784 = vmatprep.mubr.msk.f32.mxu0 %vm171_vm0, %v8552_v8  ;;  %v8556_v38 = vld [vmem:[#allocation2 + $0xda] sm:$0xff]  ;;  %v8560_v57 = vld [vmem:[#allocation2 + $0x10a] sm:$0xff] }
 0x3db   : > { %v6324_v59 = vld [vmem:[#allocation3 + $0x28] sm:$0xff]  ;;  %v6104_v50 = vpop.f32.mrf.mxu0  ;;  %v5884_v32 = vld [vmem:[#allocation3 + $0x80] sm:$0xff] }
 0x3dc   : > { %v6555_v25 = vpop.f32.mrf.mxu1  ;;  %6708 = vst.msk [vmem:[#allocation3 + $0x10] sm:$0xff] %vm324_vm2, %v6676_v61  ;;  %v6679_v18 = vadd.f32 %v11527_v39, %v6324_v59  ;;  %6264 = vst.msk [vmem:[#allocation3 + $0x48] sm:$0xff] %vm324_vm2, %v6232_v33  ;;  %v6231_v9 = vadd.f32 %v6104_v50, %v5876_v28  ;;  %v8561_v33 = vld [vmem:[#allocation2 + $0x112] sm:$0xff]  ;;  %v5887_v28 = vld [vmem:[#allocation3 + $0x98] sm:$0xff] }
 0x3dd   : > { %v6323_v56 = vld [vmem:[#allocation3 + $0x20] sm:$0xff]  ;;  %v11486_v0 = vpop.f32.mrf.mxu0  ;;  %11785 = vmatmul.mubr.msk.f32.gmra.mxu0 %vm171_vm0, %v8553_v63 }
 0x3de   : > { %v11536_v37 = vpop.f32.mrf.mxu1  ;;  %6711 = vst.msk [vmem:[#allocation3 + $0x28] sm:$0xff] %vm324_vm2, %v6679_v18  ;;  %v6678_v29 = vadd.f32 %v6535_v35, %v6323_v56  ;;  %6263 = vst.msk [vmem:[#allocation3 + $0x40] sm:$0xff] %vm324_vm2, %v6231_v9  ;;  %v6234_v15 = vadd.f32 %v11486_v0, %v5879_v4  ;;  %11787 = vmatprep.mubr.msk.f32.mxu0 %vm171_vm0, %v8554_v55  ;;  %v8562_v18 = vld [vmem:[#allocation2 + $0x122] sm:$0xff] }
 0x3df   : > { %v6326_v30 = vld [vmem:[#allocation3 + $0x38] sm:$0xff]  ;;  %v6114_v20 = vpop.f32.mrf.mxu0  ;;  %v5886_v4 = vld [vmem:[#allocation3 + $0x90] sm:$0xff] }
 0x3e0   : > { %v6565_v60 = vpop.f32.mrf.mxu1  ;;  %6710 = vst.msk [vmem:[#allocation3 + $0x20] sm:$0xff] %vm324_vm2, %v6678_v29  ;;  %v6681_v24 = vadd.f32 %v11530_v22, %v6326_v30  ;;  %6266 = vst.msk [vmem:[#allocation3 + $0x58] sm:$0xff] %vm324_vm2, %v6234_v15  ;;  %v6233_v27 = vadd.f32 %v6114_v20, %v5878_v48  ;;  %v8563_v15 = vld [vmem:[#allocation2 + $0x12a] sm:$0xff]  ;;  %v5889_v48 = vld [vmem:[#allocation3 + $0xa8] sm:$0xff] }
 0x3e1   : > { %v6325_v36 = vld [vmem:[#allocation3 + $0x30] sm:$0xff]  ;;  %v11489_v7 = vpop.f32.mrf.mxu0  ;;  %11788 = vmatmul.mubr.msk.f32.gmra.mxu0 %vm171_vm0, %v8555_v47 }
 0x3e2   : > { %v11539_v34 = vpop.f32.mrf.mxu1  ;;  %6713 = vst.msk [vmem:[#allocation3 + $0x38] sm:$0xff] %vm324_vm2, %v6681_v24  ;;  %v6680_v49 = vadd.f32 %v6545_v31, %v6325_v36  ;;  %6265 = vst.msk [vmem:[#allocation3 + $0x50] sm:$0xff] %vm324_vm2, %v6233_v27  ;;  %v6236_v19 = vadd.f32 %v11489_v7, %v5881_v45  ;;  %11790 = vmatprep.mubr.msk.f32.mxu0 %vm171_vm0, %v8556_v38  ;;  %v8564_v24 = vld [vmem:[#allocation2 + $0x13a] sm:$0xff]  ;;  %v5888_v45 = vld [vmem:[#allocation3 + $0xa0] sm:$0xff] }
 0x3e3   : > { %v6328_v17 = vld [vmem:[#allocation3 + $0x48] sm:$0xff]  ;;  %v6124_v3 = vpop.f32.mrf.mxu0 }
 0x3e4   : > { %v6575_v51 = vpop.f32.mrf.mxu1  ;;  %6712 = vst.msk [vmem:[#allocation3 + $0x30] sm:$0xff] %vm324_vm2, %v6680_v49  ;;  %v6683_v39 = vadd.f32 %v11533_v53, %v6328_v17  ;;  %6268 = vst.msk [vmem:[#allocation3 + $0x68] sm:$0xff] %vm324_vm2, %v6236_v19  ;;  %v6235_v5 = vadd.f32 %v6124_v3, %v5880_v13  ;;  %v8565_v19 = vld [vmem:[#allocation2 + $0x142] sm:$0xff] }
 0x3e5   : > { %v6327_v16 = vld [vmem:[#allocation3 + $0x40] sm:$0xff]  ;;  %v11492_v40 = vpop.f32.mrf.mxu0  ;;  %11791 = vmatmul.mubr.msk.f32.gmra.mxu0 %vm171_vm0, %v8557_v62  ;;  %v5891_v13 = vld [vmem:[#allocation3 + $0xb8] sm:$0xff] }
 0x3e6   : > { %v11542_v35 = vpop.f32.mrf.mxu1  ;;  %6715 = vst.msk [vmem:[#allocation3 + $0x48] sm:$0xff] %vm324_vm2, %v6683_v39  ;;  %v6682_v2 = vadd.f32 %v6555_v25, %v6327_v16  ;;  %6267 = vst.msk [vmem:[#allocation3 + $0x60] sm:$0xff] %vm324_vm2, %v6235_v5  ;;  %v6238_v10 = vadd.f32 %v11492_v40, %v5883_v12  ;;  %11793 = vmatprep.mubr.msk.f32.mxu0 %vm171_vm0, %v8558_v42  ;;  %v8566_v39 = vld [vmem:[#allocation2 + $0x152] sm:$0xff]  ;;  %v5890_v16 = vld [vmem:[#allocation3 + $0xb0] sm:$0xff] }
 0x3e7   : > { %v6330_v23 = vld [vmem:[#allocation3 + $0x58] sm:$0xff]  ;;  %v6134_v43 = vpop.f32.mrf.mxu0 }
 0x3e8   : > { %v6585_v22 = vpop.f32.mrf.mxu1  ;;  %6714 = vst.msk [vmem:[#allocation3 + $0x40] sm:$0xff] %vm324_vm2, %v6682_v2  ;;  %v6685_v26 = vadd.f32 %v11536_v37, %v6330_v23  ;;  %6270 = vst.msk [vmem:[#allocation3 + $0x78] sm:$0xff] %vm324_vm2, %v6238_v10  ;;  %v6237_v52 = vadd.f32 %v6134_v43, %v5882_v44  ;;  %v8567_v2 = vld [vmem:[#allocation2 + $0x15a] sm:$0xff] }
 0x3e9   : > { %v6329_v58 = vld [vmem:[#allocation3 + $0x50] sm:$0xff]  ;;  %v11495_v11 = vpop.f32.mrf.mxu0  ;;  %11794 = vmatmul.mubr.msk.f32.gmra.mxu0 %vm171_vm0, %v8559_v46  ;;  %v5893_v23 = vld [vmem:[#allocation3 + $0xc8] sm:$0xff] }
 0x3ea   : > { %v11545_v31 = vpop.f32.mrf.mxu1  ;;  %6717 = vst.msk [vmem:[#allocation3 + $0x58] sm:$0xff] %vm324_vm2, %v6685_v26  ;;  %v6684_v14 = vadd.f32 %v6565_v60, %v6329_v58  ;;  %6269 = vst.msk [vmem:[#allocation3 + $0x70] sm:$0xff] %vm324_vm2, %v6237_v52  ;;  %v6240_v21 = vadd.f32 %v11495_v11, %v5885_v54  ;;  %11796 = vmatprep.mubr.msk.f32.mxu0 %vm171_vm0, %v8560_v57  ;;  %v5892_v58 = vld [vmem:[#allocation3 + $0xc0] sm:$0xff] }
 0x3eb   : > { %v6332_v1 = vld [vmem:[#allocation3 + $0x68] sm:$0xff]  ;;  %v6144_v41 = vpop.f32.mrf.mxu0 }
 0x3ec   : > { %v6595_v53 = vpop.f32.mrf.mxu1  ;;  %6716 = vst.msk [vmem:[#allocation3 + $0x50] sm:$0xff] %vm324_vm2, %v6684_v14  ;;  %v6687_v8 = vadd.f32 %v11539_v34, %v6332_v1  ;;  %6272 = vst.msk [vmem:[#allocation3 + $0x88] sm:$0xff] %vm324_vm2, %v6240_v21  ;;  %v6239_v61 = vadd.f32 %v6144_v41, %v5884_v32  ;;  %v8569_v14 = vld [vmem:[#allocation2 + $0x172] sm:$0xff]  ;;  %v5895_v1 = vld [vmem:[#allocation3 + $0xd8] sm:$0xff] }
 0x3ed   : > { %v6331_v59 = vld [vmem:[#allocation3 + $0x60] sm:$0xff]  ;;  %v11498_v50 = vpop.f32.mrf.mxu0  ;;  %11797 = vmatmul.mubr.msk.f32.gmra.mxu0 %vm171_vm0, %v8561_v33 }
 0x3ee   : > { %v11548_v25 = vpop.f32.mrf.mxu1  ;;  %6719 = vst.msk [vmem:[#allocation3 + $0x68] sm:$0xff] %vm324_vm2, %v6687_v8  ;;  %v6686_v9 = vadd.f32 %v6575_v51, %v6331_v59  ;;  %6271 = vst.msk [vmem:[#allocation3 + $0x80] sm:$0xff] %vm324_vm2, %v6239_v61  ;;  %v6242_v63 = vadd.f32 %v11498_v50, %v5887_v28  ;;  %11799 = vmatprep.mubr.msk.f32.mxu0 %vm171_vm0, %v8562_v18  ;;  %v5894_v59 = vld [vmem:[#allocation3 + $0xd0] sm:$0xff] }
 0x3ef   : > { %v6334_v56 = vld [vmem:[#allocation3 + $0x78] sm:$0xff]  ;;  %v6154_v0 = vpop.f32.mrf.mxu0 }
 0x3f0   : > { %v6605_v37 = vpop.f32.mrf.mxu1  ;;  %6718 = vst.msk [vmem:[#allocation3 + $0x60] sm:$0xff] %vm324_vm2, %v6686_v9  ;;  %v6689_v55 = vadd.f32 %v11542_v35, %v6334_v56  ;;  %6274 = vst.msk [vmem:[#allocation3 + $0x98] sm:$0xff] %vm324_vm2, %v6242_v63  ;;  %v6241_v29 = vadd.f32 %v6154_v0, %v5886_v4  ;;  %v8571_v63 = vld [vmem:[#allocation2 + $0x18a] sm:$0xff]  ;;  %v5897_v4 = vld [vmem:[#allocation3 + $0xe8] sm:$0xff] }
 0x3f1   : > { %v6333_v30 = vld [vmem:[#allocation3 + $0x70] sm:$0xff]  ;;  %v11501_v20 = vpop.f32.mrf.mxu0  ;;  %11800 = vmatmul.mubr.msk.f32.gmra.mxu0 %vm171_vm0, %v8563_v15 }
 0x3f2   : > { %v11551_v60 = vpop.f32.mrf.mxu1  ;;  %6721 = vst.msk [vmem:[#allocation3 + $0x78] sm:$0xff] %vm324_vm2, %v6689_v55  ;;  %v6688_v27 = vadd.f32 %v6585_v22, %v6333_v30  ;;  %6273 = vst.msk [vmem:[#allocation3 + $0x90] sm:$0xff] %vm324_vm2, %v6241_v29  ;;  %v6244_v47 = vadd.f32 %v11501_v20, %v5889_v48  ;;  %11802 = vmatprep.mubr.msk.f32.mxu0 %vm171_vm0, %v8564_v24  ;;  %v8568_v22 = vld [vmem:[#allocation2 + $0x16a] sm:$0xff]  ;;  %v8573_v15 = vld [vmem:[#allocation2 + $0x1a2] sm:$0xff] }
 0x3f3   : > { %v6336_v36 = vld [vmem:[#allocation3 + $0x88] sm:$0xff]  ;;  %v6164_v7 = vpop.f32.mrf.mxu0  ;;  %v5896_v48 = vld [vmem:[#allocation3 + $0xe0] sm:$0xff] }
 0x3f4   : > { %v6615_v34 = vpop.f32.mrf.mxu1  ;;  %6720 = vst.msk [vmem:[#allocation3 + $0x70] sm:$0xff] %vm324_vm2, %v6688_v27  ;;  %v6691_v38 = vadd.f32 %v11545_v31, %v6336_v36  ;;  %6276 = vst.msk [vmem:[#allocation3 + $0xa8] sm:$0xff] %vm324_vm2, %v6244_v47  ;;  %v6243_v49 = vadd.f32 %v6164_v7, %v5888_v45  ;;  %v5899_v36 = vld [vmem:[#allocation3 + $0xf8] sm:$0xff] }
 0x3f5   : > { %v6335_v17 = vld [vmem:[#allocation3 + $0x80] sm:$0xff]  ;;  %v11504_v3 = vpop.f32.mrf.mxu0  ;;  %11803 = vmatmul.mubr.msk.f32.gmra.mxu0 %vm171_vm0, %v8565_v19  ;;  %v5898_v19 = vld [vmem:[#allocation3 + $0xf0] sm:$0xff] }
 0x3f6   : > { %v11554_v51 = vpop.f32.mrf.mxu1  ;;  %6723 = vst.msk [vmem:[#allocation3 + $0x88] sm:$0xff] %vm324_vm2, %v6691_v38  ;;  %v6690_v5 = vadd.f32 %v6595_v53, %v6335_v17  ;;  %6275 = vst.msk [vmem:[#allocation3 + $0xa0] sm:$0xff] %vm324_vm2, %v6243_v49  ;;  %v6246_v62 = vadd.f32 %v11504_v3, %v5891_v13  ;;  %11805 = vmatprep.mubr.msk.f32.mxu0 %vm171_vm0, %v8566_v39  ;;  %v8570_v53 = vld [vmem:[#allocation2 + $0x182] sm:$0xff] }
 0x3f7   : > { %v6338_v6 = vld [vmem:[#allocation3 + $0x98] sm:$0xff]  ;;  %v6174_v12 = vpop.f32.mrf.mxu0 }
 0x3f8   : > { %v6625_v40 = vpop.f32.mrf.mxu1  ;;  %6722 = vst.msk [vmem:[#allocation3 + $0x80] sm:$0xff] %vm324_vm2, %v6690_v5  ;;  %v6693_v35 = vadd.f32 %v11548_v25, %v6338_v6  ;;  %6278 = vst.msk [vmem:[#allocation3 + $0xb8] sm:$0xff] %vm324_vm2, %v6246_v62  ;;  %v6245_v42 = vadd.f32 %v6174_v12, %v5890_v16  ;;  %v8572_v25 = vld [vmem:[#allocation2 + $0x19a] sm:$0xff] }
 0x3f9   : > { %v6337_v10 = vld [vmem:[#allocation3 + $0x90] sm:$0xff]  ;;  %v11507_v44 = vpop.f32.mrf.mxu0  ;;  %11806 = vmatmul.mubr.msk.f32.gmra.mxu0 %vm171_vm0, %v8567_v2  ;;  %v6771_v5 = vld [vmem:[#allocation3 + $0x8] sm:$0xff] }
 0x3fa   : > { %v11557_v43 = vpop.f32.mrf.mxu1  ;;  %6725 = vst.msk [vmem:[#allocation3 + $0x98] sm:$0xff] %vm324_vm2, %v6693_v35  ;;  %v6692_v26 = vadd.f32 %v6605_v37, %v6337_v10  ;;  %6277 = vst.msk [vmem:[#allocation3 + $0xb0] sm:$0xff] %vm324_vm2, %v6245_v42  ;;  %v6248_v52 = vadd.f32 %v11507_v44, %v5893_v23  ;;  %11808 = vmatprep.mubr.msk.f32.mxu0 %vm171_vm0, %v8568_v22  ;;  %v6770_v35 = vld [vmem:[#allocation3] sm:$0xff] }
 0x3fb   : > { %v6340_v46 = vld [vmem:[#allocation3 + $0xa8] sm:$0xff]  ;;  %v6184_v54 = vpop.f32.mrf.mxu0 }
 0x3fc   : > { %v6635_v11 = vpop.f32.mrf.mxu1  ;;  %6724 = vst.msk [vmem:[#allocation3 + $0x90] sm:$0xff] %vm324_vm2, %v6692_v26  ;;  %v6695_v31 = vadd.f32 %v11551_v60, %v6340_v46  ;;  %6280 = vst.msk [vmem:[#allocation3 + $0xc8] sm:$0xff] %vm324_vm2, %v6248_v52  ;;  %v6247_v57 = vadd.f32 %v6184_v54, %v5892_v58  ;;  %v6772_v54 = vld [vmem:[#allocation3 + $0x10] sm:$0xff] }
 0x3fd   : > { %v6339_v21 = vld [vmem:[#allocation3 + $0xa0] sm:$0xff]  ;;  %v11510_v32 = vpop.f32.mrf.mxu0  ;;  %11809 = vmatmul.mubr.msk.f32.gmra.mxu0 %vm171_vm0, %v8569_v14 }
 0x3fe   : > { %v11560_v41 = vpop.f32.mrf.mxu1  ;;  %6727 = vst.msk [vmem:[#allocation3 + $0xa8] sm:$0xff] %vm324_vm2, %v6695_v31  ;;  %v6694_v8 = vadd.f32 %v6615_v34, %v6339_v21  ;;  %6279 = vst.msk [vmem:[#allocation3 + $0xc0] sm:$0xff] %vm324_vm2, %v6247_v57  ;;  %v6250_v61 = vadd.f32 %v11510_v32, %v5895_v1  ;;  %11811 = vmatprep.mubr.msk.f32.mxu0 %vm171_vm0, %v8570_v53  ;;  %v6775_v1 = vld [vmem:[#allocation3 + $0x28] sm:$0xff] }
 0x3ff   : > { %v6342_v33 = vld [vmem:[#allocation3 + $0xb8] sm:$0xff]  ;;  %v6194_v28 = vpop.f32.mrf.mxu0 }
 0x400   : > { %v6645_v50 = vpop.f32.mrf.mxu1  ;;  %6726 = vst.msk [vmem:[#allocation3 + $0xa0] sm:$0xff] %vm324_vm2, %v6694_v8  ;;  %v6697_v18 = vadd.f32 %v11554_v51, %v6342_v33  ;;  %6282 = vst.msk [vmem:[#allocation3 + $0xd8] sm:$0xff] %vm324_vm2, %v6250_v61  ;;  %v6249_v9 = vadd.f32 %v6194_v28, %v5894_v59  ;;  %v6774_v33 = vld [vmem:[#allocation3 + $0x20] sm:$0xff] }
 0x401   : > { %v6341_v56 = vld [vmem:[#allocation3 + $0xb0] sm:$0xff]  ;;  %v11513_v0 = vpop.f32.mrf.mxu0  ;;  %11812 = vmatmul.mubr.msk.f32.gmra.mxu0 %vm171_vm0, %v8571_v63 }
 0x402   : > { %v11563_v37 = vpop.f32.mrf.mxu1  ;;  %6729 = vst.msk [vmem:[#allocation3 + $0xb8] sm:$0xff] %vm324_vm2, %v6697_v18  ;;  %v6696_v55 = vadd.f32 %v6625_v40, %v6341_v56  ;;  %6281 = vst.msk [vmem:[#allocation3 + $0xd0] sm:$0xff] %vm324_vm2, %v6249_v9  ;;  %v6252_v29 = vadd.f32 %v11513_v0, %v5897_v4  ;;  %11814 = vmatprep.mubr.msk.f32.mxu0 %vm171_vm0, %v8572_v25  ;;  %v6777_v9 = vld [vmem:[#allocation3 + $0x38] sm:$0xff] }
 0x403   : > { %v6344_v30 = vld [vmem:[#allocation3 + $0xc8] sm:$0xff]  ;;  %v6204_v20 = vpop.f32.mrf.mxu0 }
 0x404   : > { %v6655_v60 = vpop.f32.mrf.mxu1  ;;  %6728 = vst.msk [vmem:[#allocation3 + $0xb0] sm:$0xff] %vm324_vm2, %v6696_v55  ;;  %v6699_v24 = vadd.f32 %v11557_v43, %v6344_v30  ;;  %6284 = vst.msk [vmem:[#allocation3 + $0xe8] sm:$0xff] %vm324_vm2, %v6252_v29  ;;  %v6251_v27 = vadd.f32 %v6204_v20, %v5896_v48  ;;  %v6773_v43 = vld [vmem:[#allocation3 + $0x18] sm:$0xff]  ;;  %v6776_v55 = vld [vmem:[#allocation3 + $0x30] sm:$0xff] }
 0x405   : > { %v6343_v47 = vld [vmem:[#allocation3 + $0xc0] sm:$0xff]  ;;  %v11516_v45 = vpop.f32.mrf.mxu0  ;;  %11815 = vmatmul.mubr.msk.f32.gmra.mxu0 %vm171_vm0, %v8573_v15 }
 0x406   : > { %v11566_v7 = vpop.f32.mrf.mxu1  ;;  %6731 = vst.msk [vmem:[#allocation3 + $0xc8] sm:$0xff] %vm324_vm2, %v6699_v24  ;;  %v6698_v34 = vadd.f32 %v6635_v11, %v6343_v47  ;;  %6283 = vst.msk [vmem:[#allocation3 + $0xe0] sm:$0xff] %vm324_vm2, %v6251_v27  ;;  %v6254_v38 = vadd.f32 %v11516_v45, %v5899_v36 }
 0x407   : > { %v6346_v49 = vld [vmem:[#allocation3 + $0xd8] sm:$0xff]  ;;  %v6214_v17 = vpop.f32.mrf.mxu0 }
 0x408   : > { %v6665_v13 = vpop.f32.mrf.mxu1  ;;  %6730 = vst.msk [vmem:[#allocation3 + $0xc0] sm:$0xff] %vm324_vm2, %v6698_v34  ;;  %v6701_v3 = vadd.f32 %v11560_v41, %v6346_v49  ;;  %6286 = vst.msk [vmem:[#allocation3 + $0xf8] sm:$0xff] %vm324_vm2, %v6254_v38  ;;  %v6253_v51 = vadd.f32 %v6214_v17, %v5898_v19 }
 0x409   : > { %v6345_v39 = vld [vmem:[#allocation3 + $0xd0] sm:$0xff]  ;;  %v11571_v62 = vpop.f32.mrf.mxu0 }
 0x40a   : > { %v11621_v6 = vpop.f32.mrf.mxu1  ;;  %6733 = vst.msk [vmem:[#allocation3 + $0xd8] sm:$0xff] %vm324_vm2, %v6701_v3  ;;  %v6700_v16 = vadd.f32 %v6645_v50, %v6345_v39  ;;  %6285 = vst.msk [vmem:[#allocation3 + $0xf0] sm:$0xff] %vm324_vm2, %v6253_v51  ;;  %v7126_v12 = vadd.f32 %v11571_v62, %v6771_v5 }
 0x40b   : > { %v6348_v40 = vld [vmem:[#allocation3 + $0xe8] sm:$0xff]  ;;  %v6966_v42 = vpop.f32.mrf.mxu0 }
 0x40c   : > { %v7417_v2 = vpop.f32.mrf.mxu1  ;;  %6732 = vst.msk [vmem:[#allocation3 + $0xd0] sm:$0xff] %vm324_vm2, %v6700_v16  ;;  %v6703_v10 = vadd.f32 %v11563_v37, %v6348_v40  ;;  %7158 = vst.msk [vmem:[#allocation3 + $0x8] sm:$0xff] %vm324_vm2, %v7126_v12  ;;  %v7125_v23 = vadd.f32 %v6966_v42, %v6770_v35 }
 0x40d   : > { %v6347_v44 = vld [vmem:[#allocation3 + $0xe0] sm:$0xff]  ;;  %v11574_v22 = vpop.f32.mrf.mxu0 }
 0x40e   : > { %v11624_v26 = vpop.f32.mrf.mxu1  ;;  %6735 = vst.msk [vmem:[#allocation3 + $0xe8] sm:$0xff] %vm324_vm2, %v6703_v10  ;;  %v6702_v52 = vadd.f32 %v6655_v60, %v6347_v44  ;;  %7157 = vst.msk [vmem:[#allocation3] sm:$0xff] %vm324_vm2, %v7125_v23  ;;  %v7128_v46 = vadd.f32 %v11574_v22, %v6773_v43  ;;  %v6779_v60 = vld [vmem:[#allocation3 + $0x48] sm:$0xff] }
 0x40f   : > { %v6350_v58 = vld [vmem:[#allocation3 + $0xf8] sm:$0xff]  ;;  %v6976_v11 = vpop.f32.mrf.mxu0 }
 0x410   : > { %v7427_v31 = vpop.f32.mrf.mxu1  ;;  %6734 = vst.msk [vmem:[#allocation3 + $0xe0] sm:$0xff] %vm324_vm2, %v6702_v52  ;;  %v6705_v57 = vadd.f32 %v11566_v7, %v6350_v58  ;;  %7160 = vst.msk [vmem:[#allocation3 + $0x18] sm:$0xff] %vm324_vm2, %v7128_v46  ;;  %v7127_v14 = vadd.f32 %v6976_v11, %v6772_v54  ;;  %v6778_v7 = vld [vmem:[#allocation3 + $0x40] sm:$0xff] }
 0x411   : > { %v6349_v21 = vld [vmem:[#allocation3 + $0xf0] sm:$0xff]  ;;  %v11577_v32 = vpop.f32.mrf.mxu0 }
 0x412   : > { %v11627_v41 = vpop.f32.mrf.mxu1  ;;  %6737 = vst.msk [vmem:[#allocation3 + $0xf8] sm:$0xff] %vm324_vm2, %v6705_v57  ;;  %v6704_v53 = vadd.f32 %v6665_v13, %v6349_v21  ;;  %7159 = vst.msk [vmem:[#allocation3 + $0x10] sm:$0xff] %vm324_vm2, %v7127_v14  ;;  %v7130_v8 = vadd.f32 %v11577_v32, %v6775_v1  ;;  %v6781_v13 = vld [vmem:[#allocation3 + $0x58] sm:$0xff] }
 0x413   : > { %v7222_v61 = vld [vmem:[#allocation3 + $0x8] sm:$0xff]  ;;  %v6986_v59 = vpop.f32.mrf.mxu0 }
 0x414   : > { %v7437_v28 = vpop.f32.mrf.mxu1  ;;  %6736 = vst.msk [vmem:[#allocation3 + $0xf0] sm:$0xff] %vm324_vm2, %v6704_v53  ;;  %v7577_v50 = vadd.f32 %v11621_v6, %v7222_v61  ;;  %7162 = vst.msk [vmem:[#allocation3 + $0x28] sm:$0xff] %vm324_vm2, %v7130_v8  ;;  %v7129_v25 = vadd.f32 %v6986_v59, %v6774_v33  ;;  %v6780_v6 = vld [vmem:[#allocation3 + $0x50] sm:$0xff] }
 0x415   : > { %v7221_v18 = vld [vmem:[#allocation3] sm:$0xff]  ;;  %v11580_v63 = vpop.f32.mrf.mxu0 }
 0x416   : > { %v11630_v56 = vpop.f32.mrf.mxu1  ;;  %7609 = vst.msk [vmem:[#allocation3 + $0x8] sm:$0xff] %vm324_vm2, %v7577_v50  ;;  %v7576_v4 = vadd.f32 %v7417_v2, %v7221_v18  ;;  %7161 = vst.msk [vmem:[#allocation3 + $0x20] sm:$0xff] %vm324_vm2, %v7129_v25  ;;  %v7132_v0 = vadd.f32 %v11580_v63, %v6777_v9  ;;  %v6783_v2 = vld [vmem:[#allocation3 + $0x68] sm:$0xff] }
 0x417   : > { %v7224_v37 = vld [vmem:[#allocation3 + $0x18] sm:$0xff]  ;;  %v6996_v29 = vpop.f32.mrf.mxu0 }
 0x418   : > { %v7447_v15 = vpop.f32.mrf.mxu1  ;;  %7608 = vst.msk [vmem:[#allocation3] sm:$0xff] %vm324_vm2, %v7576_v4  ;;  %v7579_v30 = vadd.f32 %v11624_v26, %v7224_v37  ;;  %7164 = vst.msk [vmem:[#allocation3 + $0x38] sm:$0xff] %vm324_vm2, %v7132_v0  ;;  %v7131_v48 = vadd.f32 %v6996_v29, %v6776_v55  ;;  %v6782_v26 = vld [vmem:[#allocation3 + $0x60] sm:$0xff] }
 0x419   : > { %v7223_v20 = vld [vmem:[#allocation3 + $0x10] sm:$0xff]  ;;  %v11583_v24 = vpop.f32.mrf.mxu0 }
 0x41a   : > { %v11633_v27 = vpop.f32.mrf.mxu1  ;;  %7611 = vst.msk [vmem:[#allocation3 + $0x18] sm:$0xff] %vm324_vm2, %v7579_v30  ;;  %v7578_v47 = vadd.f32 %v7427_v31, %v7223_v20  ;;  %7163 = vst.msk [vmem:[#allocation3 + $0x30] sm:$0xff] %vm324_vm2, %v7131_v48  ;;  %v7134_v36 = vadd.f32 %v11583_v24, %v6779_v60  ;;  %v6785_v31 = vld [vmem:[#allocation3 + $0x78] sm:$0xff] }
 0x41b   : > { %v7226_v45 = vld [vmem:[#allocation3 + $0x28] sm:$0xff]  ;;  %v7006_v34 = vpop.f32.mrf.mxu0 }
 0x41c   : > { %v7457_v38 = vpop.f32.mrf.mxu1  ;;  %7610 = vst.msk [vmem:[#allocation3 + $0x10] sm:$0xff] %vm324_vm2, %v7578_v47  ;;  %v7581_v49 = vadd.f32 %v11627_v41, %v7226_v45  ;;  %7166 = vst.msk [vmem:[#allocation3 + $0x48] sm:$0xff] %vm324_vm2, %v7134_v36  ;;  %v7133_v19 = vadd.f32 %v7006_v34, %v6778_v7  ;;  %v6784_v41 = vld [vmem:[#allocation3 + $0x70] sm:$0xff] }
 0x41d   : > { %v7225_v17 = vld [vmem:[#allocation3 + $0x20] sm:$0xff]  ;;  %v11586_v3 = vpop.f32.mrf.mxu0 }
 0x41e   : > { %v11636_v51 = vpop.f32.mrf.mxu1  ;;  %7613 = vst.msk [vmem:[#allocation3 + $0x28] sm:$0xff] %vm324_vm2, %v7581_v49  ;;  %v7580_v39 = vadd.f32 %v7437_v28, %v7225_v17  ;;  %7165 = vst.msk [vmem:[#allocation3 + $0x40] sm:$0xff] %vm324_vm2, %v7133_v19  ;;  %v7136_v5 = vadd.f32 %v11586_v3, %v6781_v13  ;;  %v6787_v28 = vld [vmem:[#allocation3 + $0x88] sm:$0xff] }
 0x41f   : > { %v7228_v62 = vld [vmem:[#allocation3 + $0x38] sm:$0xff]  ;;  %v7016_v16 = vpop.f32.mrf.mxu0 }
 0x420   : > { %v7467_v12 = vpop.f32.mrf.mxu1  ;;  %7612 = vst.msk [vmem:[#allocation3 + $0x20] sm:$0xff] %vm324_vm2, %v7580_v39  ;;  %v7583_v40 = vadd.f32 %v11630_v56, %v7228_v62  ;;  %7168 = vst.msk [vmem:[#allocation3 + $0x58] sm:$0xff] %vm324_vm2, %v7136_v5  ;;  %v7135_v35 = vadd.f32 %v7016_v16, %v6780_v6  ;;  %v6786_v56 = vld [vmem:[#allocation3 + $0x80] sm:$0xff] }
 0x421   : > { %v7227_v42 = vld [vmem:[#allocation3 + $0x30] sm:$0xff]  ;;  %v11589_v10 = vpop.f32.mrf.mxu0 }
 0x422   : > { %v11639_v23 = vpop.f32.mrf.mxu1  ;;  %7615 = vst.msk [vmem:[#allocation3 + $0x38] sm:$0xff] %vm324_vm2, %v7583_v40  ;;  %v7582_v44 = vadd.f32 %v7447_v15, %v7227_v42  ;;  %7167 = vst.msk [vmem:[#allocation3 + $0x50] sm:$0xff] %vm324_vm2, %v7135_v35  ;;  %v7138_v43 = vadd.f32 %v11589_v10, %v6783_v2  ;;  %v6789_v15 = vld [vmem:[#allocation3 + $0x98] sm:$0xff] }
 0x423   : > { %v7230_v22 = vld [vmem:[#allocation3 + $0x48] sm:$0xff]  ;;  %v7026_v52 = vpop.f32.mrf.mxu0 }
 0x424   : > { %v7477_v46 = vpop.f32.mrf.mxu1  ;;  %7614 = vst.msk [vmem:[#allocation3 + $0x30] sm:$0xff] %vm324_vm2, %v7582_v44  ;;  %v7585_v58 = vadd.f32 %v11633_v27, %v7230_v22  ;;  %7170 = vst.msk [vmem:[#allocation3 + $0x68] sm:$0xff] %vm324_vm2, %v7138_v43  ;;  %v7137_v54 = vadd.f32 %v7026_v52, %v6782_v26  ;;  %v6788_v27 = vld [vmem:[#allocation3 + $0x90] sm:$0xff] }
 0x425   : > { %v7229_v11 = vld [vmem:[#allocation3 + $0x40] sm:$0xff]  ;;  %v11592_v57 = vpop.f32.mrf.mxu0 }
 0x426   : > { %v11642_v14 = vpop.f32.mrf.mxu1  ;;  %7617 = vst.msk [vmem:[#allocation3 + $0x48] sm:$0xff] %vm324_vm2, %v7585_v58  ;;  %v7584_v21 = vadd.f32 %v7457_v38, %v7229_v11  ;;  %7169 = vst.msk [vmem:[#allocation3 + $0x60] sm:$0xff] %vm324_vm2, %v7137_v54  ;;  %v7140_v1 = vadd.f32 %v11592_v57, %v6785_v31  ;;  %v6791_v38 = vld [vmem:[#allocation3 + $0xa8] sm:$0xff] }
 0x427   : > { %v7232_v32 = vld [vmem:[#allocation3 + $0x58] sm:$0xff]  ;;  %v7036_v53 = vpop.f32.mrf.mxu0 }
 0x428   : > { %v7487_v8 = vpop.f32.mrf.mxu1  ;;  %7616 = vst.msk [vmem:[#allocation3 + $0x40] sm:$0xff] %vm324_vm2, %v7584_v21  ;;  %v7587_v61 = vadd.f32 %v11636_v51, %v7232_v32  ;;  %7172 = vst.msk [vmem:[#allocation3 + $0x78] sm:$0xff] %vm324_vm2, %v7140_v1  ;;  %v7139_v33 = vadd.f32 %v7036_v53, %v6784_v41  ;;  %v6790_v51 = vld [vmem:[#allocation3 + $0xa0] sm:$0xff] }
 0x429   : > { %v7231_v59 = vld [vmem:[#allocation3 + $0x50] sm:$0xff]  ;;  %v11595_v50 = vpop.f32.mrf.mxu0 }
 0x42a   : > { %v11645_v25 = vpop.f32.mrf.mxu1  ;;  %7619 = vst.msk [vmem:[#allocation3 + $0x58] sm:$0xff] %vm324_vm2, %v7587_v61  ;;  %v7586_v18 = vadd.f32 %v7467_v12, %v7231_v59  ;;  %7171 = vst.msk [vmem:[#allocation3 + $0x70] sm:$0xff] %vm324_vm2, %v7139_v33  ;;  %v7142_v9 = vadd.f32 %v11595_v50, %v6787_v28  ;;  %v6793_v12 = vld [vmem:[#allocation3 + $0xb8] sm:$0xff] }
 0x42b   : > { %v7234_v63 = vld [vmem:[#allocation3 + $0x68] sm:$0xff]  ;;  %v7046_v4 = vpop.f32.mrf.mxu0 }
 0x42c   : > { %v7497_v0 = vpop.f32.mrf.mxu1  ;;  %7618 = vst.msk [vmem:[#allocation3 + $0x50] sm:$0xff] %vm324_vm2, %v7586_v18  ;;  %v7589_v37 = vadd.f32 %v11639_v23, %v7234_v63  ;;  %7174 = vst.msk [vmem:[#allocation3 + $0x88] sm:$0xff] %vm324_vm2, %v7142_v9  ;;  %v7141_v55 = vadd.f32 %v7046_v4, %v6786_v56  ;;  %v6792_v23 = vld [vmem:[#allocation3 + $0xb0] sm:$0xff] }
 0x42d   : > { %v7233_v29 = vld [vmem:[#allocation3 + $0x60] sm:$0xff]  ;;  %v11598_v30 = vpop.f32.mrf.mxu0 }
 0x42e   : > { %v11648_v48 = vpop.f32.mrf.mxu1  ;;  %7621 = vst.msk [vmem:[#allocation3 + $0x68] sm:$0xff] %vm324_vm2, %v7589_v37  ;;  %v7588_v20 = vadd.f32 %v7477_v46, %v7233_v29  ;;  %7173 = vst.msk [vmem:[#allocation3 + $0x80] sm:$0xff] %vm324_vm2, %v7141_v55  ;;  %v7144_v60 = vadd.f32 %v11598_v30, %v6789_v15  ;;  %v6795_v46 = vld [vmem:[#allocation3 + $0xc8] sm:$0xff] }
 0x42f   : > { %v7236_v24 = vld [vmem:[#allocation3 + $0x78] sm:$0xff]  ;;  %v7056_v47 = vpop.f32.mrf.mxu0 }
 0x430   : > { %v7507_v36 = vpop.f32.mrf.mxu1  ;;  %7620 = vst.msk [vmem:[#allocation3 + $0x60] sm:$0xff] %vm324_vm2, %v7588_v20  ;;  %v7591_v45 = vadd.f32 %v11642_v14, %v7236_v24  ;;  %7176 = vst.msk [vmem:[#allocation3 + $0x98] sm:$0xff] %vm324_vm2, %v7144_v60  ;;  %v7143_v7 = vadd.f32 %v7056_v47, %v6788_v27  ;;  %v6794_v14 = vld [vmem:[#allocation3 + $0xc0] sm:$0xff] }
 0x431   : > { %v7235_v34 = vld [vmem:[#allocation3 + $0x70] sm:$0xff]  ;;  %v11601_v49 = vpop.f32.mrf.mxu0 }
 0x432   : > { %v11651_v19 = vpop.f32.mrf.mxu1  ;;  %7623 = vst.msk [vmem:[#allocation3 + $0x78] sm:$0xff] %vm324_vm2, %v7591_v45  ;;  %v7590_v17 = vadd.f32 %v7487_v8, %v7235_v34  ;;  %7175 = vst.msk [vmem:[#allocation3 + $0x90] sm:$0xff] %vm324_vm2, %v7143_v7  ;;  %v7146_v13 = vadd.f32 %v11601_v49, %v6791_v38  ;;  %v6797_v8 = vld [vmem:[#allocation3 + $0xd8] sm:$0xff] }
 0x433   : > { %v7238_v3 = vld [vmem:[#allocation3 + $0x88] sm:$0xff]  ;;  %v7066_v39 = vpop.f32.mrf.mxu0 }
 0x434   : > { %v7517_v5 = vpop.f32.mrf.mxu1  ;;  %7622 = vst.msk [vmem:[#allocation3 + $0x70] sm:$0xff] %vm324_vm2, %v7590_v17  ;;  %v7593_v62 = vadd.f32 %v11645_v25, %v7238_v3  ;;  %7178 = vst.msk [vmem:[#allocation3 + $0xa8] sm:$0xff] %vm324_vm2, %v7146_v13  ;;  %v7145_v6 = vadd.f32 %v7066_v39, %v6790_v51  ;;  %v6796_v25 = vld [vmem:[#allocation3 + $0xd0] sm:$0xff] }
 0x435   : > { %v7237_v16 = vld [vmem:[#allocation3 + $0x80] sm:$0xff]  ;;  %v11604_v40 = vpop.f32.mrf.mxu0 }
 0x436   : > { %v11654_v35 = vpop.f32.mrf.mxu1  ;;  %7625 = vst.msk [vmem:[#allocation3 + $0x88] sm:$0xff] %vm324_vm2, %v7593_v62  ;;  %v7592_v42 = vadd.f32 %v7497_v0, %v7237_v16  ;;  %7177 = vst.msk [vmem:[#allocation3 + $0xa0] sm:$0xff] %vm324_vm2, %v7145_v6  ;;  %v7148_v2 = vadd.f32 %v11604_v40, %v6793_v12  ;;  %v6799_v0 = vld [vmem:[#allocation3 + $0xe8] sm:$0xff] }
 0x437   : > { %v7240_v10 = vld [vmem:[#allocation3 + $0x98] sm:$0xff]  ;;  %v7076_v44 = vpop.f32.mrf.mxu0 }
 0x438   : > { %v7527_v43 = vpop.f32.mrf.mxu1  ;;  %7624 = vst.msk [vmem:[#allocation3 + $0x80] sm:$0xff] %vm324_vm2, %v7592_v42  ;;  %v7595_v22 = vadd.f32 %v11648_v48, %v7240_v10  ;;  %7180 = vst.msk [vmem:[#allocation3 + $0xb8] sm:$0xff] %vm324_vm2, %v7148_v2  ;;  %v7147_v26 = vadd.f32 %v7076_v44, %v6792_v23  ;;  %v6798_v48 = vld [vmem:[#allocation3 + $0xe0] sm:$0xff] }
 0x439   : > { %v7239_v52 = vld [vmem:[#allocation3 + $0x90] sm:$0xff]  ;;  %v11607_v58 = vpop.f32.mrf.mxu0 }
 0x43a   : > { %v11657_v54 = vpop.f32.mrf.mxu1  ;;  %7627 = vst.msk [vmem:[#allocation3 + $0x98] sm:$0xff] %vm324_vm2, %v7595_v22  ;;  %v7594_v11 = vadd.f32 %v7507_v36, %v7239_v52  ;;  %7179 = vst.msk [vmem:[#allocation3 + $0xb0] sm:$0xff] %vm324_vm2, %v7147_v26  ;;  %v7150_v31 = vadd.f32 %v11607_v58, %v6795_v46  ;;  %v6801_v36 = vld [vmem:[#allocation3 + $0xf8] sm:$0xff] }
 0x43b   : > { %v7242_v57 = vld [vmem:[#allocation3 + $0xa8] sm:$0xff]  ;;  %v7086_v21 = vpop.f32.mrf.mxu0 }
 0x43c   : > { %v7537_v1 = vpop.f32.mrf.mxu1  ;;  %7626 = vst.msk [vmem:[#allocation3 + $0x90] sm:$0xff] %vm324_vm2, %v7594_v11  ;;  %v7597_v32 = vadd.f32 %v11651_v19, %v7242_v57  ;;  %7182 = vst.msk [vmem:[#allocation3 + $0xc8] sm:$0xff] %vm324_vm2, %v7150_v31  ;;  %v7149_v41 = vadd.f32 %v7086_v21, %v6794_v14  ;;  %v6800_v19 = vld [vmem:[#allocation3 + $0xf0] sm:$0xff] }
 0x43d   : > { %v7241_v53 = vld [vmem:[#allocation3 + $0xa0] sm:$0xff]  ;;  %v11610_v61 = vpop.f32.mrf.mxu0 }
 0x43e   : > { %v11660_v33 = vpop.f32.mrf.mxu1  ;;  %7629 = vst.msk [vmem:[#allocation3 + $0xa8] sm:$0xff] %vm324_vm2, %v7597_v32  ;;  %v7596_v59 = vadd.f32 %v7517_v5, %v7241_v53  ;;  %7181 = vst.msk [vmem:[#allocation3 + $0xc0] sm:$0xff] %vm324_vm2, %v7149_v41  ;;  %v7152_v28 = vadd.f32 %v11610_v61, %v6797_v8  ;;  %v7673_v5 = vld [vmem:[#allocation3 + $0x8] sm:$0xff] }
 0x43f   : > { %v7244_v50 = vld [vmem:[#allocation3 + $0xb8] sm:$0xff]  ;;  %v7096_v18 = vpop.f32.mrf.mxu0 }
 0x440   : > { %v7547_v9 = vpop.f32.mrf.mxu1  ;;  %7628 = vst.msk [vmem:[#allocation3 + $0xa0] sm:$0xff] %vm324_vm2, %v7596_v59  ;;  %v7599_v63 = vadd.f32 %v11654_v35, %v7244_v50  ;;  %7184 = vst.msk [vmem:[#allocation3 + $0xd8] sm:$0xff] %vm324_vm2, %v7152_v28  ;;  %v7151_v56 = vadd.f32 %v7096_v18, %v6796_v25  ;;  %v7672_v35 = vld [vmem:[#allocation3] sm:$0xff] }
 0x441   : > { %v7243_v4 = vld [vmem:[#allocation3 + $0xb0] sm:$0xff]  ;;  %v11613_v37 = vpop.f32.mrf.mxu0 }
 0x442   : > { %v11663_v55 = vpop.f32.mrf.mxu1  ;;  %7631 = vst.msk [vmem:[#allocation3 + $0xb8] sm:$0xff] %vm324_vm2, %v7599_v63  ;;  %v7598_v29 = vadd.f32 %v7527_v43, %v7243_v4  ;;  %7183 = vst.msk [vmem:[#allocation3 + $0xd0] sm:$0xff] %vm324_vm2, %v7151_v56  ;;  %v7154_v15 = vadd.f32 %v11613_v37, %v6799_v0  ;;  %v7675_v43 = vld [vmem:[#allocation3 + $0x18] sm:$0xff] }
 0x443   : > { %v7246_v30 = vld [vmem:[#allocation3 + $0xc8] sm:$0xff]  ;;  %v7106_v20 = vpop.f32.mrf.mxu0 }
 0x444   : > { %v7557_v60 = vpop.f32.mrf.mxu1  ;;  %7630 = vst.msk [vmem:[#allocation3 + $0xb0] sm:$0xff] %vm324_vm2, %v7598_v29  ;;  %v7601_v24 = vadd.f32 %v11657_v54, %v7246_v30  ;;  %7186 = vst.msk [vmem:[#allocation3 + $0xe8] sm:$0xff] %vm324_vm2, %v7154_v15  ;;  %v7153_v27 = vadd.f32 %v7106_v20, %v6798_v48  ;;  %v7674_v54 = vld [vmem:[#allocation3 + $0x10] sm:$0xff] }
 0x445   : > { %v7245_v47 = vld [vmem:[#allocation3 + $0xc0] sm:$0xff]  ;;  %v11616_v45 = vpop.f32.mrf.mxu0 }
 0x446   : > { %v11666_v7 = vpop.f32.mrf.mxu1  ;;  %7633 = vst.msk [vmem:[#allocation3 + $0xc8] sm:$0xff] %vm324_vm2, %v7601_v24  ;;  %v7600_v34 = vadd.f32 %v7537_v1, %v7245_v47  ;;  %7185 = vst.msk [vmem:[#allocation3 + $0xe0] sm:$0xff] %vm324_vm2, %v7153_v27  ;;  %v7156_v38 = vadd.f32 %v11616_v45, %v6801_v36  ;;  %v7677_v1 = vld [vmem:[#allocation3 + $0x28] sm:$0xff] }
 0x447   : > { %v7248_v49 = vld [vmem:[#allocation3 + $0xd8] sm:$0xff]  ;;  %v7116_v17 = vpop.f32.mrf.mxu0 }
 0x448   : > { %v7567_v13 = vpop.f32.mrf.mxu1  ;;  %7632 = vst.msk [vmem:[#allocation3 + $0xc0] sm:$0xff] %vm324_vm2, %v7600_v34  ;;  %v7603_v3 = vadd.f32 %v11660_v33, %v7248_v49  ;;  %7188 = vst.msk [vmem:[#allocation3 + $0xf8] sm:$0xff] %vm324_vm2, %v7156_v38  ;;  %v7155_v51 = vadd.f32 %v7116_v17, %v6800_v19  ;;  %v7676_v33 = vld [vmem:[#allocation3 + $0x20] sm:$0xff] }
 0x449   : > { %v7247_v39 = vld [vmem:[#allocation3 + $0xd0] sm:$0xff]  ;;  %v11671_v62 = vpop.f32.mrf.mxu0 }
 0x44a   : > { %v11721_v6 = vpop.f32.mrf.mxu1  ;;  %7635 = vst.msk [vmem:[#allocation3 + $0xd8] sm:$0xff] %vm324_vm2, %v7603_v3  ;;  %v7602_v16 = vadd.f32 %v7547_v9, %v7247_v39  ;;  %7187 = vst.msk [vmem:[#allocation3 + $0xf0] sm:$0xff] %vm324_vm2, %v7155_v51  ;;  %v8028_v12 = vadd.f32 %v11671_v62, %v7673_v5  ;;  %v7679_v9 = vld [vmem:[#allocation3 + $0x38] sm:$0xff] }
 0x44b   : > { %v7250_v40 = vld [vmem:[#allocation3 + $0xe8] sm:$0xff]  ;;  %v7868_v42 = vpop.f32.mrf.mxu0 }
 0x44c   : > { %v8319_v2 = vpop.f32.mrf.mxu1  ;;  %7634 = vst.msk [vmem:[#allocation3 + $0xd0] sm:$0xff] %vm324_vm2, %v7602_v16  ;;  %v7605_v10 = vadd.f32 %v11663_v55, %v7250_v40  ;;  %8060 = vst.msk [vmem:[#allocation3 + $0x8] sm:$0xff] %vm324_vm2, %v8028_v12  ;;  %v8027_v23 = vadd.f32 %v7868_v42, %v7672_v35  ;;  %v7678_v55 = vld [vmem:[#allocation3 + $0x30] sm:$0xff] }
 0x44d   : > { %v7249_v44 = vld [vmem:[#allocation3 + $0xe0] sm:$0xff]  ;;  %v11674_v22 = vpop.f32.mrf.mxu0 }
 0x44e   : > { %v11724_v26 = vpop.f32.mrf.mxu1  ;;  %7637 = vst.msk [vmem:[#allocation3 + $0xe8] sm:$0xff] %vm324_vm2, %v7605_v10  ;;  %v7604_v52 = vadd.f32 %v7557_v60, %v7249_v44  ;;  %8059 = vst.msk [vmem:[#allocation3] sm:$0xff] %vm324_vm2, %v8027_v23  ;;  %v8030_v46 = vadd.f32 %v11674_v22, %v7675_v43  ;;  %v7681_v60 = vld [vmem:[#allocation3 + $0x48] sm:$0xff] }
 0x44f   : > { %v7252_v58 = vld [vmem:[#allocation3 + $0xf8] sm:$0xff]  ;;  %v7878_v11 = vpop.f32.mrf.mxu0 }
 0x450   : > { %v8329_v31 = vpop.f32.mrf.mxu1  ;;  %7636 = vst.msk [vmem:[#allocation3 + $0xe0] sm:$0xff] %vm324_vm2, %v7604_v52  ;;  %v7607_v57 = vadd.f32 %v11666_v7, %v7252_v58  ;;  %8062 = vst.msk [vmem:[#allocation3 + $0x18] sm:$0xff] %vm324_vm2, %v8030_v46  ;;  %v8029_v14 = vadd.f32 %v7878_v11, %v7674_v54  ;;  %v7680_v7 = vld [vmem:[#allocation3 + $0x40] sm:$0xff] }
 0x451   : > { %v7251_v21 = vld [vmem:[#allocation3 + $0xf0] sm:$0xff]  ;;  %v11677_v32 = vpop.f32.mrf.mxu0 }
 0x452   : > { %v11727_v41 = vpop.f32.mrf.mxu1  ;;  %7639 = vst.msk [vmem:[#allocation3 + $0xf8] sm:$0xff] %vm324_vm2, %v7607_v57  ;;  %v7606_v53 = vadd.f32 %v7567_v13, %v7251_v21  ;;  %8061 = vst.msk [vmem:[#allocation3 + $0x10] sm:$0xff] %vm324_vm2, %v8029_v14  ;;  %v8032_v8 = vadd.f32 %v11677_v32, %v7677_v1  ;;  %v7683_v13 = vld [vmem:[#allocation3 + $0x58] sm:$0xff] }
 0x453   : > { %v8124_v61 = vld [vmem:[#allocation3 + $0x8] sm:$0xff]  ;;  %v7888_v59 = vpop.f32.mrf.mxu0 }
 0x454   : > { %v8339_v28 = vpop.f32.mrf.mxu1  ;;  %7638 = vst.msk [vmem:[#allocation3 + $0xf0] sm:$0xff] %vm324_vm2, %v7606_v53  ;;  %v8479_v50 = vadd.f32 %v11721_v6, %v8124_v61  ;;  %8064 = vst.msk [vmem:[#allocation3 + $0x28] sm:$0xff] %vm324_vm2, %v8032_v8  ;;  %v8031_v25 = vadd.f32 %v7888_v59, %v7676_v33  ;;  %v7682_v6 = vld [vmem:[#allocation3 + $0x50] sm:$0xff] }
 0x455   : > { %v8123_v18 = vld [vmem:[#allocation3] sm:$0xff]  ;;  %v11680_v63 = vpop.f32.mrf.mxu0 }
 0x456   : > { %v11730_v56 = vpop.f32.mrf.mxu1  ;;  %8511 = vst.msk [vmem:[#allocation3 + $0x8] sm:$0xff] %vm324_vm2, %v8479_v50  ;;  %v8478_v4 = vadd.f32 %v8319_v2, %v8123_v18  ;;  %8063 = vst.msk [vmem:[#allocation3 + $0x20] sm:$0xff] %vm324_vm2, %v8031_v25  ;;  %v8034_v0 = vadd.f32 %v11680_v63, %v7679_v9  ;;  %v7685_v2 = vld [vmem:[#allocation3 + $0x68] sm:$0xff] }
 0x457   : > { %v8126_v37 = vld [vmem:[#allocation3 + $0x18] sm:$0xff]  ;;  %v7898_v29 = vpop.f32.mrf.mxu0 }
 0x458   : > { %v8349_v15 = vpop.f32.mrf.mxu1  ;;  %8510 = vst.msk [vmem:[#allocation3] sm:$0xff] %vm324_vm2, %v8478_v4  ;;  %v8481_v30 = vadd.f32 %v11724_v26, %v8126_v37  ;;  %8066 = vst.msk [vmem:[#allocation3 + $0x38] sm:$0xff] %vm324_vm2, %v8034_v0  ;;  %v8033_v48 = vadd.f32 %v7898_v29, %v7678_v55  ;;  %v7684_v26 = vld [vmem:[#allocation3 + $0x60] sm:$0xff] }
 0x459   : > { %v8125_v20 = vld [vmem:[#allocation3 + $0x10] sm:$0xff]  ;;  %v11683_v24 = vpop.f32.mrf.mxu0 }
 0x45a   : > { %v11733_v27 = vpop.f32.mrf.mxu1  ;;  %8513 = vst.msk [vmem:[#allocation3 + $0x18] sm:$0xff] %vm324_vm2, %v8481_v30  ;;  %v8480_v47 = vadd.f32 %v8329_v31, %v8125_v20  ;;  %8065 = vst.msk [vmem:[#allocation3 + $0x30] sm:$0xff] %vm324_vm2, %v8033_v48  ;;  %v8036_v36 = vadd.f32 %v11683_v24, %v7681_v60  ;;  %v7687_v31 = vld [vmem:[#allocation3 + $0x78] sm:$0xff] }
 0x45b   : > { %v8128_v45 = vld [vmem:[#allocation3 + $0x28] sm:$0xff]  ;;  %v7908_v34 = vpop.f32.mrf.mxu0 }
 0x45c   : > { %v8359_v38 = vpop.f32.mrf.mxu1  ;;  %8512 = vst.msk [vmem:[#allocation3 + $0x10] sm:$0xff] %vm324_vm2, %v8480_v47  ;;  %v8483_v49 = vadd.f32 %v11727_v41, %v8128_v45  ;;  %8068 = vst.msk [vmem:[#allocation3 + $0x48] sm:$0xff] %vm324_vm2, %v8036_v36  ;;  %v8035_v19 = vadd.f32 %v7908_v34, %v7680_v7  ;;  %v7686_v41 = vld [vmem:[#allocation3 + $0x70] sm:$0xff] }
 0x45d   : > { %v8127_v17 = vld [vmem:[#allocation3 + $0x20] sm:$0xff]  ;;  %v11686_v3 = vpop.f32.mrf.mxu0 }
 0x45e   : > { %v11736_v51 = vpop.f32.mrf.mxu1  ;;  %8515 = vst.msk [vmem:[#allocation3 + $0x28] sm:$0xff] %vm324_vm2, %v8483_v49  ;;  %v8482_v39 = vadd.f32 %v8339_v28, %v8127_v17  ;;  %8067 = vst.msk [vmem:[#allocation3 + $0x40] sm:$0xff] %vm324_vm2, %v8035_v19  ;;  %v8038_v5 = vadd.f32 %v11686_v3, %v7683_v13  ;;  %v7689_v28 = vld [vmem:[#allocation3 + $0x88] sm:$0xff] }
 0x45f   : > { %v8130_v62 = vld [vmem:[#allocation3 + $0x38] sm:$0xff]  ;;  %v7918_v16 = vpop.f32.mrf.mxu0 }
 0x460   : > { %v8369_v12 = vpop.f32.mrf.mxu1  ;;  %8514 = vst.msk [vmem:[#allocation3 + $0x20] sm:$0xff] %vm324_vm2, %v8482_v39  ;;  %v8485_v40 = vadd.f32 %v11730_v56, %v8130_v62  ;;  %8070 = vst.msk [vmem:[#allocation3 + $0x58] sm:$0xff] %vm324_vm2, %v8038_v5  ;;  %v8037_v35 = vadd.f32 %v7918_v16, %v7682_v6  ;;  %v7688_v56 = vld [vmem:[#allocation3 + $0x80] sm:$0xff] }
 0x461   : > { %v8129_v42 = vld [vmem:[#allocation3 + $0x30] sm:$0xff]  ;;  %v11689_v10 = vpop.f32.mrf.mxu0 }
 0x462   : > { %v11739_v23 = vpop.f32.mrf.mxu1  ;;  %8517 = vst.msk [vmem:[#allocation3 + $0x38] sm:$0xff] %vm324_vm2, %v8485_v40  ;;  %v8484_v44 = vadd.f32 %v8349_v15, %v8129_v42  ;;  %8069 = vst.msk [vmem:[#allocation3 + $0x50] sm:$0xff] %vm324_vm2, %v8037_v35  ;;  %v8040_v43 = vadd.f32 %v11689_v10, %v7685_v2  ;;  %v7691_v15 = vld [vmem:[#allocation3 + $0x98] sm:$0xff] }
 0x463   : > { %v8132_v22 = vld [vmem:[#allocation3 + $0x48] sm:$0xff]  ;;  %v7928_v52 = vpop.f32.mrf.mxu0 }
 0x464   : > { %v8379_v46 = vpop.f32.mrf.mxu1  ;;  %8516 = vst.msk [vmem:[#allocation3 + $0x30] sm:$0xff] %vm324_vm2, %v8484_v44  ;;  %v8487_v58 = vadd.f32 %v11733_v27, %v8132_v22  ;;  %8072 = vst.msk [vmem:[#allocation3 + $0x68] sm:$0xff] %vm324_vm2, %v8040_v43  ;;  %v8039_v54 = vadd.f32 %v7928_v52, %v7684_v26  ;;  %v7690_v27 = vld [vmem:[#allocation3 + $0x90] sm:$0xff] }
 0x465   : > { %v8131_v11 = vld [vmem:[#allocation3 + $0x40] sm:$0xff]  ;;  %v11692_v57 = vpop.f32.mrf.mxu0 }
 0x466   : > { %v11742_v14 = vpop.f32.mrf.mxu1  ;;  %8519 = vst.msk [vmem:[#allocation3 + $0x48] sm:$0xff] %vm324_vm2, %v8487_v58  ;;  %v8486_v21 = vadd.f32 %v8359_v38, %v8131_v11  ;;  %8071 = vst.msk [vmem:[#allocation3 + $0x60] sm:$0xff] %vm324_vm2, %v8039_v54  ;;  %v8042_v1 = vadd.f32 %v11692_v57, %v7687_v31  ;;  %v7693_v38 = vld [vmem:[#allocation3 + $0xa8] sm:$0xff] }
 0x467   : > { %v8134_v32 = vld [vmem:[#allocation3 + $0x58] sm:$0xff]  ;;  %v7938_v53 = vpop.f32.mrf.mxu0 }
 0x468   : > { %v8389_v8 = vpop.f32.mrf.mxu1  ;;  %8518 = vst.msk [vmem:[#allocation3 + $0x40] sm:$0xff] %vm324_vm2, %v8486_v21  ;;  %v8489_v61 = vadd.f32 %v11736_v51, %v8134_v32  ;;  %8074 = vst.msk [vmem:[#allocation3 + $0x78] sm:$0xff] %vm324_vm2, %v8042_v1  ;;  %v8041_v33 = vadd.f32 %v7938_v53, %v7686_v41  ;;  %v7692_v51 = vld [vmem:[#allocation3 + $0xa0] sm:$0xff] }
 0x469   : > { %v8133_v59 = vld [vmem:[#allocation3 + $0x50] sm:$0xff]  ;;  %v11695_v50 = vpop.f32.mrf.mxu0 }
 0x46a   : > { %v11745_v25 = vpop.f32.mrf.mxu1  ;;  %8521 = vst.msk [vmem:[#allocation3 + $0x58] sm:$0xff] %vm324_vm2, %v8489_v61  ;;  %v8488_v18 = vadd.f32 %v8369_v12, %v8133_v59  ;;  %8073 = vst.msk [vmem:[#allocation3 + $0x70] sm:$0xff] %vm324_vm2, %v8041_v33  ;;  %v8044_v9 = vadd.f32 %v11695_v50, %v7689_v28  ;;  %v7695_v12 = vld [vmem:[#allocation3 + $0xb8] sm:$0xff] }
 0x46b   : > { %v8136_v63 = vld [vmem:[#allocation3 + $0x68] sm:$0xff]  ;;  %v7948_v4 = vpop.f32.mrf.mxu0 }
 0x46c   : > { %v8399_v0 = vpop.f32.mrf.mxu1  ;;  %8520 = vst.msk [vmem:[#allocation3 + $0x50] sm:$0xff] %vm324_vm2, %v8488_v18  ;;  %v8491_v37 = vadd.f32 %v11739_v23, %v8136_v63  ;;  %8076 = vst.msk [vmem:[#allocation3 + $0x88] sm:$0xff] %vm324_vm2, %v8044_v9  ;;  %v8043_v55 = vadd.f32 %v7948_v4, %v7688_v56  ;;  %v7694_v23 = vld [vmem:[#allocation3 + $0xb0] sm:$0xff] }
 0x46d   : > { %v8135_v29 = vld [vmem:[#allocation3 + $0x60] sm:$0xff]  ;;  %v11698_v30 = vpop.f32.mrf.mxu0 }
 0x46e   : > { %v11748_v48 = vpop.f32.mrf.mxu1  ;;  %8523 = vst.msk [vmem:[#allocation3 + $0x68] sm:$0xff] %vm324_vm2, %v8491_v37  ;;  %v8490_v20 = vadd.f32 %v8379_v46, %v8135_v29  ;;  %8075 = vst.msk [vmem:[#allocation3 + $0x80] sm:$0xff] %vm324_vm2, %v8043_v55  ;;  %v8046_v60 = vadd.f32 %v11698_v30, %v7691_v15  ;;  %v7697_v46 = vld [vmem:[#allocation3 + $0xc8] sm:$0xff]  ;;  %v7700_v30 = vld [vmem:[#allocation3 + $0xe0] sm:$0xff] }
 0x46f   : > { %v8138_v24 = vld [vmem:[#allocation3 + $0x78] sm:$0xff]  ;;  %v7958_v47 = vpop.f32.mrf.mxu0 }
 0x470   : > { %v8409_v36 = vpop.f32.mrf.mxu1  ;;  %8522 = vst.msk [vmem:[#allocation3 + $0x60] sm:$0xff] %vm324_vm2, %v8490_v20  ;;  %v8493_v45 = vadd.f32 %v11742_v14, %v8138_v24  ;;  %8078 = vst.msk [vmem:[#allocation3 + $0x98] sm:$0xff] %vm324_vm2, %v8046_v60  ;;  %v8045_v7 = vadd.f32 %v7958_v47, %v7690_v27  ;;  %v7696_v14 = vld [vmem:[#allocation3 + $0xc0] sm:$0xff]  ;;  %v7703_v47 = vld [vmem:[#allocation3 + $0xf8] sm:$0xff] }
 0x471   : > { %v8137_v34 = vld [vmem:[#allocation3 + $0x70] sm:$0xff]  ;;  %v11701_v49 = vpop.f32.mrf.mxu0 }
 0x472   : > { %v11751_v19 = vpop.f32.mrf.mxu1  ;;  %8525 = vst.msk [vmem:[#allocation3 + $0x78] sm:$0xff] %vm324_vm2, %v8493_v45  ;;  %v8492_v17 = vadd.f32 %v8389_v8, %v8137_v34  ;;  %8077 = vst.msk [vmem:[#allocation3 + $0x90] sm:$0xff] %vm324_vm2, %v8045_v7  ;;  %v8048_v13 = vadd.f32 %v11701_v49, %v7693_v38  ;;  %v7699_v8 = vld [vmem:[#allocation3 + $0xd8] sm:$0xff]  ;;  %v7702_v38 = vld [vmem:[#allocation3 + $0xf0] sm:$0xff] }
 0x473   : > { %v8140_v3 = vld [vmem:[#allocation3 + $0x88] sm:$0xff]  ;;  %v7968_v39 = vpop.f32.mrf.mxu0 }
 0x474   : > { %v8419_v5 = vpop.f32.mrf.mxu1  ;;  %8524 = vst.msk [vmem:[#allocation3 + $0x70] sm:$0xff] %vm324_vm2, %v8492_v17  ;;  %v8495_v62 = vadd.f32 %v11745_v25, %v8140_v3  ;;  %8080 = vst.msk [vmem:[#allocation3 + $0xa8] sm:$0xff] %vm324_vm2, %v8048_v13  ;;  %v8047_v6 = vadd.f32 %v7968_v39, %v7692_v51  ;;  %v7698_v25 = vld [vmem:[#allocation3 + $0xd0] sm:$0xff]  ;;  %v8575_v51 = vld [vmem:[#allocation3 + $0x8] sm:$0xff] }
 0x475   : > { %v8139_v16 = vld [vmem:[#allocation3 + $0x80] sm:$0xff]  ;;  %v11704_v40 = vpop.f32.mrf.mxu0 }
 0x476   : > { %v11754_v35 = vpop.f32.mrf.mxu1  ;;  %8527 = vst.msk [vmem:[#allocation3 + $0x88] sm:$0xff] %vm324_vm2, %v8495_v62  ;;  %v8494_v42 = vadd.f32 %v8399_v0, %v8139_v16  ;;  %8079 = vst.msk [vmem:[#allocation3 + $0xa0] sm:$0xff] %vm324_vm2, %v8047_v6  ;;  %v8050_v2 = vadd.f32 %v11704_v40, %v7695_v12  ;;  %v7701_v0 = vld [vmem:[#allocation3 + $0xe8] sm:$0xff]  ;;  %v8574_v16 = vld [vmem:[#allocation3] sm:$0xff] }
 0x477   : > { %v8142_v10 = vld [vmem:[#allocation3 + $0x98] sm:$0xff]  ;;  %v7978_v44 = vpop.f32.mrf.mxu0 }
 0x478   : > { %v8429_v43 = vpop.f32.mrf.mxu1  ;;  %8526 = vst.msk [vmem:[#allocation3 + $0x80] sm:$0xff] %vm324_vm2, %v8494_v42  ;;  %v8497_v22 = vadd.f32 %v11748_v48, %v8142_v10  ;;  %8082 = vst.msk [vmem:[#allocation3 + $0xb8] sm:$0xff] %vm324_vm2, %v8050_v2  ;;  %v8049_v26 = vadd.f32 %v7978_v44, %v7694_v23  ;;  %v8577_v10 = vld [vmem:[#allocation3 + $0x18] sm:$0xff] }
 0x479   : > { %v8141_v52 = vld [vmem:[#allocation3 + $0x90] sm:$0xff]  ;;  %v11707_v58 = vpop.f32.mrf.mxu0 }
 0x47a   : > { %v11757_v54 = vpop.f32.mrf.mxu1  ;;  %8529 = vst.msk [vmem:[#allocation3 + $0x98] sm:$0xff] %vm324_vm2, %v8497_v22  ;;  %v8496_v11 = vadd.f32 %v8409_v36, %v8141_v52  ;;  %8081 = vst.msk [vmem:[#allocation3 + $0xb0] sm:$0xff] %vm324_vm2, %v8049_v26  ;;  %v8052_v31 = vadd.f32 %v11707_v58, %v7697_v46  ;;  %v8576_v26 = vld [vmem:[#allocation3 + $0x10] sm:$0xff] }
 0x47b   : > { %v8144_v57 = vld [vmem:[#allocation3 + $0xa8] sm:$0xff]  ;;  %v7988_v21 = vpop.f32.mrf.mxu0 }
 0x47c   : > { %v8439_v1 = vpop.f32.mrf.mxu1  ;;  %8528 = vst.msk [vmem:[#allocation3 + $0x90] sm:$0xff] %vm324_vm2, %v8496_v11  ;;  %v8499_v32 = vadd.f32 %v11751_v19, %v8144_v57  ;;  %8084 = vst.msk [vmem:[#allocation3 + $0xc8] sm:$0xff] %vm324_vm2, %v8052_v31  ;;  %v8051_v41 = vadd.f32 %v7988_v21, %v7696_v14  ;;  %v8579_v31 = vld [vmem:[#allocation3 + $0x28] sm:$0xff] }
 0x47d   : > { %v8143_v53 = vld [vmem:[#allocation3 + $0xa0] sm:$0xff]  ;;  %v11710_v61 = vpop.f32.mrf.mxu0 }
 0x47e   : > { %v11760_v33 = vpop.f32.mrf.mxu1  ;;  %8531 = vst.msk [vmem:[#allocation3 + $0xa8] sm:$0xff] %vm324_vm2, %v8499_v32  ;;  %v8498_v59 = vadd.f32 %v8419_v5, %v8143_v53  ;;  %8083 = vst.msk [vmem:[#allocation3 + $0xc0] sm:$0xff] %vm324_vm2, %v8051_v41  ;;  %v8054_v28 = vadd.f32 %v11710_v61, %v7699_v8  ;;  %v8581_v8 = vld [vmem:[#allocation3 + $0x38] sm:$0xff] }
 0x47f   : > { %v8146_v50 = vld [vmem:[#allocation3 + $0xb8] sm:$0xff]  ;;  %v7998_v18 = vpop.f32.mrf.mxu0 }
 0x480   : > { %8530 = vst.msk [vmem:[#allocation3 + $0xa0] sm:$0xff] %vm324_vm2, %v8498_v59  ;;  %v8501_v9 = vadd.f32 %v11754_v35, %v8146_v50  ;;  %8086 = vst.msk [vmem:[#allocation3 + $0xd8] sm:$0xff] %vm324_vm2, %v8054_v28  ;;  %v8053_v63 = vadd.f32 %v7998_v18, %v7698_v25  ;;  %v8449_v4 = vpop.f32.mrf.mxu1  ;;  %v8580_v50 = vld [vmem:[#allocation3 + $0x30] sm:$0xff] }
 0x481   : > { %v8145_v56 = vld [vmem:[#allocation3 + $0xb0] sm:$0xff]  ;;  %v11713_v37 = vpop.f32.mrf.mxu0 }
 0x482   : > { %8533 = vst.msk [vmem:[#allocation3 + $0xb8] sm:$0xff] %vm324_vm2, %v8501_v9  ;;  %v8500_v55 = vadd.f32 %v8429_v43, %v8145_v56  ;;  %8085 = vst.msk [vmem:[#allocation3 + $0xd0] sm:$0xff] %vm324_vm2, %v8053_v63  ;;  %v8056_v29 = vadd.f32 %v11713_v37, %v7701_v0  ;;  %v11763_v27 = vpop.f32.mrf.mxu1  ;;  %v8583_v56 = vld [vmem:[#allocation3 + $0x48] sm:$0xff] }
 0x483   : > { %v8148_v15 = vld [vmem:[#allocation3 + $0xc8] sm:$0xff]  ;;  %v8008_v48 = vpop.f32.mrf.mxu0 }
 0x484   : > { %8532 = vst.msk [vmem:[#allocation3 + $0xb0] sm:$0xff] %vm324_vm2, %v8500_v55  ;;  %v8503_v20 = vadd.f32 %v11757_v54, %v8148_v15  ;;  %8088 = vst.msk [vmem:[#allocation3 + $0xe8] sm:$0xff] %vm324_vm2, %v8056_v29  ;;  %v8055_v60 = vadd.f32 %v8008_v48, %v7700_v30  ;;  %v8459_v3 = vpop.f32.mrf.mxu1  ;;  %v8582_v29 = vld [vmem:[#allocation3 + $0x40] sm:$0xff] }
 0x485   : > { %v8147_v24 = vld [vmem:[#allocation3 + $0xc0] sm:$0xff]  ;;  %v11716_v36 = vpop.f32.mrf.mxu0 }
 0x486   : > { %8535 = vst.msk [vmem:[#allocation3 + $0xc8] sm:$0xff] %vm324_vm2, %v8503_v20  ;;  %v8502_v45 = vadd.f32 %v8439_v1, %v8147_v24  ;;  %8087 = vst.msk [vmem:[#allocation3 + $0xe0] sm:$0xff] %vm324_vm2, %v8055_v60  ;;  %v8058_v7 = vadd.f32 %v11716_v36, %v7703_v47  ;;  %v11766_v40 = vpop.f32.mrf.mxu1  ;;  %v8578_v1 = vld [vmem:[#allocation3 + $0x20] sm:$0xff]  ;;  %v8585_v60 = vld [vmem:[#allocation3 + $0x58] sm:$0xff] }
 0x487   : > { %v8150_v34 = vld [vmem:[#allocation3 + $0xd8] sm:$0xff]  ;;  %v8018_v49 = vpop.f32.mrf.mxu0 }
 0x488   : > { %8534 = vst.msk [vmem:[#allocation3 + $0xc0] sm:$0xff] %vm324_vm2, %v8502_v45  ;;  %v8505_v19 = vadd.f32 %v11760_v33, %v8150_v34  ;;  %8090 = vst.msk [vmem:[#allocation3 + $0xf8] sm:$0xff] %vm324_vm2, %v8058_v7  ;;  %v8057_v17 = vadd.f32 %v8018_v49, %v7702_v38  ;;  %v8469_v46 = vpop.f32.mrf.mxu1  ;;  %v8584_v45 = vld [vmem:[#allocation3 + $0x50] sm:$0xff] }
 0x489   : > { %v8149_v13 = vld [vmem:[#allocation3 + $0xd0] sm:$0xff]  ;;  %v11771_v39 = vpop.f32.mrf.mxu0 }
 0x48a   : > { %8537 = vst.msk [vmem:[#allocation3 + $0xd8] sm:$0xff] %vm324_vm2, %v8505_v19  ;;  %v8504_v5 = vadd.f32 %v8449_v4, %v8149_v13  ;;  %8089 = vst.msk [vmem:[#allocation3 + $0xf0] sm:$0xff] %vm324_vm2, %v8057_v17  ;;  %v8930_v62 = vadd.f32 %v11771_v39, %v8575_v51  ;;  %v8587_v19 = vld [vmem:[#allocation3 + $0x68] sm:$0xff]  ;;  %v8586_v39 = vld [vmem:[#allocation3 + $0x60] sm:$0xff] }
 0x48b   : > { %v8152_v6 = vld [vmem:[#allocation3 + $0xe8] sm:$0xff]  ;;  %v8770_v12 = vpop.f32.mrf.mxu0 }
 0x48c   : > { %8536 = vst.msk [vmem:[#allocation3 + $0xd0] sm:$0xff] %vm324_vm2, %v8504_v5  ;;  %v8507_v35 = vadd.f32 %v11763_v27, %v8152_v6  ;;  %8962 = vst.msk [vmem:[#allocation3 + $0x8] sm:$0xff] %vm324_vm2, %v8930_v62  ;;  %v8929_v42 = vadd.f32 %v8770_v12, %v8574_v16  ;;  %v8589_v12 = vld [vmem:[#allocation3 + $0x78] sm:$0xff] }
 0x48d   : > { %v8151_v2 = vld [vmem:[#allocation3 + $0xe0] sm:$0xff]  ;;  %v11774_v23 = vpop.f32.mrf.mxu0 }
 0x48e   : > { %8539 = vst.msk [vmem:[#allocation3 + $0xe8] sm:$0xff] %vm324_vm2, %v8507_v35  ;;  %v8506_v44 = vadd.f32 %v8459_v3, %v8151_v2  ;;  %8961 = vst.msk [vmem:[#allocation3] sm:$0xff] %vm324_vm2, %v8929_v42  ;;  %v8932_v43 = vadd.f32 %v11774_v23, %v8577_v10  ;;  %v8588_v10 = vld [vmem:[#allocation3 + $0x70] sm:$0xff] }
 0x48f   : > { %v8154_v22 = vld [vmem:[#allocation3 + $0xf8] sm:$0xff]  ;;  %v8780_v52 = vpop.f32.mrf.mxu0 }
 0x490   : > { %8538 = vst.msk [vmem:[#allocation3 + $0xe0] sm:$0xff] %vm324_vm2, %v8506_v44  ;;  %8964 = vst.msk [vmem:[#allocation3 + $0x18] sm:$0xff] %vm324_vm2, %v8932_v43  ;;  %v8509_v58 = vadd.f32 %v11766_v40, %v8154_v22  ;;  %v8931_v54 = vadd.f32 %v8780_v52, %v8576_v26  ;;  %v8591_v26 = vld [vmem:[#allocation3 + $0x88] sm:$0xff] }
 0x491   : > { %v8153_v11 = vld [vmem:[#allocation3 + $0xf0] sm:$0xff]  ;;  %v11777_v57 = vpop.f32.mrf.mxu0 }
 0x492   : > { %8541 = vst.msk [vmem:[#allocation3 + $0xf8] sm:$0xff] %vm324_vm2, %v8509_v58  ;;  %8963 = vst.msk [vmem:[#allocation3 + $0x10] sm:$0xff] %vm324_vm2, %v8931_v54  ;;  %v8508_v14 = vadd.f32 %v8469_v46, %v8153_v11  ;;  %v8934_v21 = vadd.f32 %v11777_v57, %v8579_v31  ;;  %v8590_v11 = vld [vmem:[#allocation3 + $0x80] sm:$0xff] }
 0x493   : > { %v8790_v32 = vpop.f32.mrf.mxu0  ;;  %v8994_v53 = vld [vmem:[#allocation3 + $0x8] sm:$0xff] }
 0x494   : > { %8540 = vst.msk [vmem:[#allocation3 + $0xf0] sm:$0xff] %vm324_vm2, %v8508_v14  ;;  %8966 = vst.msk [vmem:[#allocation3 + $0x28] sm:$0xff] %vm324_vm2, %v8934_v21  ;;  %v8933_v41 = vadd.f32 %v8790_v32, %v8578_v1  ;;  %v9026_v18 = vmax.f32 %v8994_v53, 0.0  ;;  %v8593_v1 = vld [vmem:[#allocation3 + $0x98] sm:$0xff] }
 0x495   : > { %v11780_v61 = vpop.f32.mrf.mxu0  ;;  %v8993_v33 = vld [vmem:[#allocation3] sm:$0xff] }
 0x496   : > { %8965 = vst.msk [vmem:[#allocation3 + $0x20] sm:$0xff] %vm324_vm2, %v8933_v41  ;;  %v8936_v59 = vadd.f32 %v11780_v61, %v8581_v8  ;;  %v9025_v28 = vmax.f32 %v8993_v33, 0.0  ;;  %v8592_v61 = vld [vmem:[#allocation3 + $0x90] sm:$0xff] }
 0x497   : > { %v8800_v25 = vpop.f32.mrf.mxu0  ;;  %v8996_v63 = vld [vmem:[#allocation3 + $0x18] sm:$0xff] }
 0x498   : > { %8968 = vst.msk [vmem:[#allocation3 + $0x38] sm:$0xff] %vm324_vm2, %v8936_v59  ;;  %v8935_v9 = vadd.f32 %v8800_v25, %v8580_v50  ;;  %11819 = vmatprep.mubr.msk.f32.mxu1 %vm324_vm2, %v9025_v28  ;;  %v9028_v30 = vmax.f32 %v8996_v63, 0.0  ;;  %v8595_v25 = vld [vmem:[#allocation3 + $0xa8] sm:$0xff] }
 0x499   : > { %v11783_v4 = vpop.f32.mrf.mxu0  ;;  %11820 = vmatmul.mubr.msk.f32.vlgmr.msra.gmra.mxu1 %vm324_vm2, %v9026_v18  ;;  %v8995_v0 = vld [vmem:[#allocation3 + $0x10] sm:$0xff] }
 0x49a   : > { %8967 = vst.msk [vmem:[#allocation3 + $0x30] sm:$0xff] %vm324_vm2, %v8935_v9  ;;  %v8938_v37 = vadd.f32 %v11783_v4, %v8583_v56  ;;  %v9027_v55 = vmax.f32 %v8995_v0, 0.0  ;;  %v8594_v4 = vld [vmem:[#allocation3 + $0xa0] sm:$0xff] }
 0x49b   : > { %v8810_v15 = vpop.f32.mrf.mxu0  ;;  %v8998_v20 = vld [vmem:[#allocation3 + $0x28] sm:$0xff] }
 0x49c   : > { %8970 = vst.msk [vmem:[#allocation3 + $0x48] sm:$0xff] %vm324_vm2, %v8938_v37  ;;  %v8937_v48 = vadd.f32 %v8810_v15, %v8582_v29  ;;  %11822 = vmatprep.mubr.msk.f32.mxu1 %vm324_vm2, %v9027_v55  ;;  %v9030_v34 = vmax.f32 %v8998_v20, 0.0  ;;  %v8597_v15 = vld [vmem:[#allocation3 + $0xb8] sm:$0xff] }
 0x49d   : > { %v11786_v24 = vpop.f32.mrf.mxu0  ;;  %11823 = vmatmul.mubr.msk.f32.gmra.mxu1 %vm324_vm2, %v9028_v30  ;;  %v8997_v27 = vld [vmem:[#allocation3 + $0x20] sm:$0xff] }
 0x49e   : > { %8969 = vst.msk [vmem:[#allocation3 + $0x40] sm:$0xff] %vm324_vm2, %v8937_v48  ;;  %v8940_v47 = vadd.f32 %v11786_v24, %v8585_v60  ;;  %v9029_v36 = vmax.f32 %v8997_v27, 0.0  ;;  %v8596_v24 = vld [vmem:[#allocation3 + $0xb0] sm:$0xff] }
 0x49f   : > { %v8820_v7 = vpop.f32.mrf.mxu0  ;;  %v9000_v49 = vld [vmem:[#allocation3 + $0x38] sm:$0xff] }
 0x4a0   : > { %8972 = vst.msk [vmem:[#allocation3 + $0x58] sm:$0xff] %vm324_vm2, %v8940_v47  ;;  %v8939_v38 = vadd.f32 %v8820_v7, %v8584_v45  ;;  %11825 = vmatprep.mubr.msk.f32.mxu1 %vm324_vm2, %v9029_v36  ;;  %v9032_v62 = vmax.f32 %v9000_v49, 0.0  ;;  %v8599_v7 = vld [vmem:[#allocation3 + $0xc8] sm:$0xff] }
 0x4a1   : > { %v11789_v17 = vpop.f32.mrf.mxu0  ;;  %11826 = vmatmul.mubr.msk.f32.gmra.mxu1 %vm324_vm2, %v9030_v34  ;;  %v8999_v13 = vld [vmem:[#allocation3 + $0x30] sm:$0xff] }
 0x4a2   : > { %8971 = vst.msk [vmem:[#allocation3 + $0x50] sm:$0xff] %vm324_vm2, %v8939_v38  ;;  %v8942_v3 = vadd.f32 %v11789_v17, %v8587_v19  ;;  %v9031_v51 = vmax.f32 %v8999_v13, 0.0  ;;  %v8598_v17 = vld [vmem:[#allocation3 + $0xc0] sm:$0xff] }
 0x4a3   : > { %v8830_v5 = vpop.f32.mrf.mxu0  ;;  %v9002_v16 = vld [vmem:[#allocation3 + $0x48] sm:$0xff] }
 0x4a4   : > { %8974 = vst.msk [vmem:[#allocation3 + $0x68] sm:$0xff] %vm324_vm2, %v8942_v3  ;;  %v8941_v6 = vadd.f32 %v8830_v5, %v8586_v39  ;;  %11828 = vmatprep.mubr.msk.f32.mxu1 %vm324_vm2, %v9031_v51  ;;  %v9034_v44 = vmax.f32 %v9002_v16, 0.0  ;;  %v8601_v5 = vld [vmem:[#allocation3 + $0xd8] sm:$0xff] }
 0x4a5   : > { %v11792_v40 = vpop.f32.mrf.mxu0  ;;  %11829 = vmatmul.mubr.msk.f32.gmra.mxu1 %vm324_vm2, %v9032_v62  ;;  %v9001_v35 = vld [vmem:[#allocation3 + $0x40] sm:$0xff] }
 0x4a6   : > { %8973 = vst.msk [vmem:[#allocation3 + $0x60] sm:$0xff] %vm324_vm2, %v8941_v6  ;;  %v8944_v42 = vadd.f32 %v11792_v40, %v8589_v12  ;;  %v9033_v2 = vmax.f32 %v9001_v35, 0.0  ;;  %v8600_v40 = vld [vmem:[#allocation3 + $0xd0] sm:$0xff] }
 0x4a7   : > { %v8840_v23 = vpop.f32.mrf.mxu0  ;;  %v9004_v22 = vld [vmem:[#allocation3 + $0x58] sm:$0xff] }
 0x4a8   : > { %8976 = vst.msk [vmem:[#allocation3 + $0x78] sm:$0xff] %vm324_vm2, %v8944_v42  ;;  %v8943_v43 = vadd.f32 %v8840_v23, %v8588_v10  ;;  %11831 = vmatprep.mubr.msk.f32.mxu1 %vm324_vm2, %v9033_v2  ;;  %v9036_v57 = vmax.f32 %v9004_v22, 0.0  ;;  %v8603_v23 = vld [vmem:[#allocation3 + $0xe8] sm:$0xff] }
 0x4a9   : > { %v11795_v52 = vpop.f32.mrf.mxu0  ;;  %11832 = vmatmul.mubr.msk.f32.gmra.mxu1 %vm324_vm2, %v9034_v44  ;;  %v9003_v46 = vld [vmem:[#allocation3 + $0x50] sm:$0xff] }
 0x4aa   : > { %8975 = vst.msk [vmem:[#allocation3 + $0x70] sm:$0xff] %vm324_vm2, %v8943_v43  ;;  %v8946_v58 = vadd.f32 %v11795_v52, %v8591_v26  ;;  %v9035_v54 = vmax.f32 %v9003_v46, 0.0  ;;  %v8602_v52 = vld [vmem:[#allocation3 + $0xe0] sm:$0xff] }
 0x4ab   : > { %v8850_v31 = vpop.f32.mrf.mxu0  ;;  %v9006_v21 = vld [vmem:[#allocation3 + $0x68] sm:$0xff] }
 0x4ac   : > { %8978 = vst.msk [vmem:[#allocation3 + $0x88] sm:$0xff] %vm324_vm2, %v8946_v58  ;;  %v8945_v14 = vadd.f32 %v8850_v31, %v8590_v11  ;;  %11834 = vmatprep.mubr.msk.f32.mxu1 %vm324_vm2, %v9035_v54  ;;  %v9038_v59 = vmax.f32 %v9006_v21, 0.0  ;;  %v8605_v31 = vld [vmem:[#allocation3 + $0xf8] sm:$0xff] }
 0x4ad   : > { %v11798_v32 = vpop.f32.mrf.mxu0  ;;  %11835 = vmatmul.mubr.msk.f32.gmra.mxu1 %vm324_vm2, %v9036_v57  ;;  %v9005_v41 = vld [vmem:[#allocation3 + $0x60] sm:$0xff] }
 0x4ae   : > { %8977 = vst.msk [vmem:[#allocation3 + $0x80] sm:$0xff] %vm324_vm2, %v8945_v14  ;;  %v8948_v53 = vadd.f32 %v11798_v32, %v8593_v1  ;;  %v9037_v8 = vmax.f32 %v9005_v41, 0.0  ;;  %v8604_v32 = vld [vmem:[#allocation3 + $0xf0] sm:$0xff] }
 0x4af   : > { %v8860_v33 = vpop.f32.mrf.mxu0  ;;  %v9008_v50 = vld [vmem:[#allocation3 + $0x78] sm:$0xff] }
 0x4b0   : > { %8980 = vst.msk [vmem:[#allocation3 + $0x98] sm:$0xff] %vm324_vm2, %v8948_v53  ;;  %v8947_v28 = vadd.f32 %v8860_v33, %v8592_v61  ;;  %11837 = vmatprep.mubr.msk.f32.mxu1 %vm324_vm2, %v9037_v8  ;;  %v9040_v37 = vmax.f32 %v9008_v50, 0.0 }
 0x4b1   : > { %v11801_v18 = vpop.f32.mrf.mxu0  ;;  %11838 = vmatmul.mubr.msk.f32.gmra.mxu1 %vm324_vm2, %v9038_v59  ;;  %v9007_v9 = vld [vmem:[#allocation3 + $0x70] sm:$0xff] }
 0x4b2   : > { %8979 = vst.msk [vmem:[#allocation3 + $0x90] sm:$0xff] %vm324_vm2, %v8947_v28  ;;  %v8950_v63 = vadd.f32 %v11801_v18, %v8595_v25  ;;  %v9039_v56 = vmax.f32 %v9007_v9, 0.0 }
 0x4b3   : > { %v8870_v0 = vpop.f32.mrf.mxu0  ;;  %v9010_v29 = vld [vmem:[#allocation3 + $0x88] sm:$0xff] }
 0x4b4   : > { %8982 = vst.msk [vmem:[#allocation3 + $0xa8] sm:$0xff] %vm324_vm2, %v8950_v63  ;;  %v8949_v55 = vadd.f32 %v8870_v0, %v8594_v4  ;;  %11840 = vmatprep.mubr.msk.f32.mxu1 %vm324_vm2, %v9039_v56  ;;  %v9042_v47 = vmax.f32 %v9010_v29, 0.0 }
 0x4b5   : > { %v11804_v30 = vpop.f32.mrf.mxu0  ;;  %11841 = vmatmul.mubr.msk.f32.gmra.mxu1 %vm324_vm2, %v9040_v37  ;;  %v9009_v48 = vld [vmem:[#allocation3 + $0x80] sm:$0xff] }
 0x4b6   : > { %8981 = vst.msk [vmem:[#allocation3 + $0xa0] sm:$0xff] %vm324_vm2, %v8949_v55  ;;  %v8952_v20 = vadd.f32 %v11804_v30, %v8597_v15  ;;  %v9041_v60 = vmax.f32 %v9009_v48, 0.0  ;;  %v14808_v55 = vld [vmem:[#allocation8_spill] sm:$0xff]  ;;  %v14809_v48 = vld [vmem:[#allocation9_spill] sm:$0xff] }
 0x4b7   : > { %v8880_v27 = vpop.f32.mrf.mxu0  ;;  %v9012_v45 = vld [vmem:[#allocation3 + $0x98] sm:$0xff] }
 0x4b8   : > { %8984 = vst.msk [vmem:[#allocation3 + $0xb8] sm:$0xff] %vm324_vm2, %v8952_v20  ;;  %v8951_v36 = vadd.f32 %v8880_v27, %v8596_v24  ;;  %11843 = vmatprep.mubr.msk.f32.mxu1 %vm324_vm2, %v9041_v60  ;;  %v9044_v3 = vmax.f32 %v9012_v45, 0.0  ;;  %v14810_v27 = vld [vmem:[#allocation10_spill] sm:$0xff] }
 0x4b9   : > { %v11807_v34 = vpop.f32.mrf.mxu0  ;;  %11844 = vmatmul.mubr.msk.f32.gmra.mxu1 %vm324_vm2, %v9042_v47  ;;  %v9011_v38 = vld [vmem:[#allocation3 + $0x90] sm:$0xff] }
 0x4ba   : > { %8983 = vst.msk [vmem:[#allocation3 + $0xb0] sm:$0xff] %vm324_vm2, %v8951_v36  ;;  %v8954_v49 = vadd.f32 %v11807_v34, %v8599_v7  ;;  %v9043_v19 = vmax.f32 %v9011_v38, 0.0  ;;  %v14811_v7 = vld [vmem:[#allocation4_spill] sm:$0xff] }
 0x4bb   : > { %v8890_v13 = vpop.f32.mrf.mxu0  ;;  %v9014_v39 = vld [vmem:[#allocation3 + $0xa8] sm:$0xff] }
 0x4bc   : > { %8986 = vst.msk [vmem:[#allocation3 + $0xc8] sm:$0xff] %vm324_vm2, %v8954_v49  ;;  %v8953_v51 = vadd.f32 %v8890_v13, %v8598_v17  ;;  %11846 = vmatprep.mubr.msk.f32.mxu1 %vm324_vm2, %v9043_v19  ;;  %v9046_v42 = vmax.f32 %v9014_v39, 0.0  ;;  %v14812_v19 = vld [vmem:[#allocation5_spill] sm:$0xff] }
 0x4bd   : > { %v11810_v62 = vpop.f32.mrf.mxu0  ;;  %11847 = vmatmul.mubr.msk.f32.gmra.mxu1 %vm324_vm2, %v9044_v3  ;;  %v9013_v6 = vld [vmem:[#allocation3 + $0xa0] sm:$0xff] }
 0x4be   : > { %8985 = vst.msk [vmem:[#allocation3 + $0xc0] sm:$0xff] %vm324_vm2, %v8953_v51  ;;  %v8956_v16 = vadd.f32 %v11810_v62, %v8601_v5  ;;  %v9045_v12 = vmax.f32 %v9013_v6, 0.0  ;;  %v14813_v51 = vld [vmem:[#allocation6_spill] sm:$0xff]  ;;  %v14814_v6 = vld [vmem:[#allocation7_spill] sm:$0xff] }
 0x4bf   : > { %v8900_v35 = vpop.f32.mrf.mxu0  ;;  %v9016_v10 = vld [vmem:[#allocation3 + $0xb8] sm:$0xff] }
 0x4c0   : > { %8988 = vst.msk [vmem:[#allocation3 + $0xd8] sm:$0xff] %vm324_vm2, %v8956_v16  ;;  %v8955_v2 = vadd.f32 %v8900_v35, %v8600_v40  ;;  %11849 = vmatprep.mubr.msk.f32.mxu1 %vm324_vm2, %v9045_v12  ;;  %v9048_v58 = vmax.f32 %v9016_v10, 0.0  ;;  %v14815_v35 = vld [vmem:[#allocation11_spill] sm:$0xff] }
 0x4c1   : > { %v11813_v44 = vpop.f32.mrf.mxu0  ;;  %11850 = vmatmul.mubr.msk.f32.gmra.mxu1 %vm324_vm2, %v9046_v42  ;;  %v9015_v43 = vld [vmem:[#allocation3 + $0xb0] sm:$0xff] }
 0x4c2   : > { %8987 = vst.msk [vmem:[#allocation3 + $0xd0] sm:$0xff] %vm324_vm2, %v8955_v2  ;;  %v8958_v22 = vadd.f32 %v11813_v44, %v8603_v23  ;;  %v9047_v26 = vmax.f32 %v9015_v43, 0.0  ;;  %v14816_v23 = vld [vmem:[#allocation12_spill] sm:$0xff] }
 0x4c3   : > { %v8910_v46 = vpop.f32.mrf.mxu0  ;;  %v9018_v11 = vld [vmem:[#allocation3 + $0xc8] sm:$0xff] }
 0x4c4   : > { %8990 = vst.msk [vmem:[#allocation3 + $0xe8] sm:$0xff] %vm324_vm2, %v8958_v22  ;;  %v8957_v54 = vadd.f32 %v8910_v46, %v8602_v52  ;;  %11852 = vmatprep.mubr.msk.f32.mxu1 %vm324_vm2, %v9047_v26  ;;  %v9050_v53 = vmax.f32 %v9018_v11, 0.0  ;;  %v14817_v26 = vld [vmem:[#allocation14_spill] sm:$0xff] }
 0x4c5   : > { %v11816_v57 = vpop.f32.mrf.mxu0  ;;  %11853 = vmatmul.mubr.msk.f32.gmra.mxu1 %vm324_vm2, %v9048_v58  ;;  %v9017_v14 = vld [vmem:[#allocation3 + $0xc0] sm:$0xff] }
 0x4c6   : > { %8989 = vst.msk [vmem:[#allocation3 + $0xe0] sm:$0xff] %vm324_vm2, %v8957_v54  ;;  %v8960_v21 = vadd.f32 %v11816_v57, %v8605_v31  ;;  %v9049_v1 = vmax.f32 %v9017_v14, 0.0  ;;  %v14818_v54 = vld [vmem:[#allocation15_spill] sm:$0xff]  ;;  %v14819_v14 = vld [vmem:[#allocation18_spill] sm:$0xff] }
 0x4c7   : > { %v8920_v41 = vpop.f32.mrf.mxu0  ;;  %v9020_v61 = vld [vmem:[#allocation3 + $0xd8] sm:$0xff] }
 0x4c8   : > { %8992 = vst.msk [vmem:[#allocation3 + $0xf8] sm:$0xff] %vm324_vm2, %v8960_v21  ;;  %v8959_v8 = vadd.f32 %v8920_v41, %v8604_v32  ;;  %11855 = vmatprep.mubr.msk.f32.mxu1 %vm324_vm2, %v9049_v1  ;;  %v9052_v28 = vmax.f32 %v9020_v61, 0.0  ;;  %v14820_v41 = vld [vmem:[#allocation19_spill] sm:$0xff] }
 0x4c9   : > { %11856 = vmatmul.mubr.msk.f32.gmra.mxu1 %vm324_vm2, %v9050_v53  ;;  %v9019_v33 = vld [vmem:[#allocation3 + $0xd0] sm:$0xff] }
 0x4ca   : > { %8991 = vst.msk [vmem:[#allocation3 + $0xf0] sm:$0xff] %vm324_vm2, %v8959_v8  ;;  %v9051_v59 = vmax.f32 %v9019_v33, 0.0  ;;  %v14821_v33 = vld [vmem:[#allocation20_spill] sm:$0xff] }
 0x4cb   : > { %v9022_v50 = vld [vmem:[#allocation3 + $0xe8] sm:$0xff] }
 0x4cc   : > { %11858 = vmatprep.mubr.msk.f32.mxu1 %vm324_vm2, %v9051_v59  ;;  %v9054_v9 = vmax.f32 %v9022_v50, 0.0 }
 0x4cd   : > { %11859 = vmatmul.mubr.msk.f32.gmra.mxu1 %vm324_vm2, %v9052_v28  ;;  %v9021_v25 = vld [vmem:[#allocation3 + $0xe0] sm:$0xff] }
 0x4ce   : > { %v9053_v18 = vmax.f32 %v9021_v25, 0.0  ;;  %v14822_v25 = vld [vmem:[#allocation21_spill] sm:$0xff] }
 0x4cf   : > { %v9024_v63 = vld [vmem:[#allocation3 + $0xf8] sm:$0xff] }
 0x4d0   : > { %11861 = vmatprep.mubr.msk.f32.mxu1 %vm324_vm2, %v9053_v18  ;;  %v9056_v0 = vmax.f32 %v9024_v63, 0.0 }
 0x4d1   : > { %11862 = vmatmul.mubr.msk.f32.gmra.mxu1 %vm324_vm2, %v9054_v9  ;;  %v9023_v56 = vld [vmem:[#allocation3 + $0xf0] sm:$0xff] }
 0x4d2   : > { %v9055_v4 = vmax.f32 %v9023_v56, 0.0  ;;  %v14823_v56 = vld [vmem:[#allocation22_spill] sm:$0xff] }
 0x4d4   : > { %11864 = vmatprep.mubr.msk.f32.mxu1 %vm324_vm2, %v9055_v4 }
 0x4d5   : > { %11865 = vmatmul.mubr.msk.f32.gmra.mxu1 %vm324_vm2, %v9056_v0 }
 0x559   : > { %v11821_v37 = vpop.f32.mrf.mxu1 }
 0x55a   : > { %v9384_v29 = vadd.f32 %v11821_v37, %v14808_v55  ;;  %v14824_v55 = vld [vmem:[#allocation23_spill] sm:$0xff] }
 0x55b   : > { %v9224_v15 = vpop.f32.mrf.mxu1 }
 0x55c   : > { %v9416_v30 = vmax.f32 %v9384_v29, 0.0  ;;  %v9383_v20 = vadd.f32 %v9224_v15, %v14809_v48  ;;  %v14825_v48 = vld [vmem:[#allocation26_spill] sm:$0xff] }
 0x55d   : > { %v11824_v60 = vpop.f32.mrf.mxu1 }
 0x55e   : > { %9448 = vst.msk [vmem:[%s14579_s10 + $0x8] sm:$0xff] %vm171_vm0, %v9416_v30  ;;  %v9415_v24 = vmax.f32 %v9383_v20, 0.0  ;;  %v9386_v47 = vadd.f32 %v11824_v60, %v14810_v27  ;;  %v14826_v27 = vld [vmem:[#allocation27_spill] sm:$0xff] }
 0x55f   : > { %v9234_v36 = vpop.f32.mrf.mxu1 }
 0x560   : > { %9447 = vst.msk [vmem:[%s14579_s10] sm:$0xff] %vm171_vm0, %v9415_v24  ;;  %v9418_v45 = vmax.f32 %v9386_v47, 0.0  ;;  %v9385_v34 = vadd.f32 %v9234_v36, %v14811_v7  ;;  %v14827_v7 = vld [vmem:[#allocation29_spill] sm:$0xff] }
 0x561   : > { %v11827_v38 = vpop.f32.mrf.mxu1 }
 0x562   : > { %9450 = vst.msk [vmem:[%s14579_s10 + $0x18] sm:$0xff] %vm171_vm0, %v9418_v45  ;;  %v9417_v49 = vmax.f32 %v9385_v34, 0.0  ;;  %v9388_v17 = vadd.f32 %v11827_v38, %v14812_v19  ;;  %v14828_v19 = vld [vmem:[#allocation30_spill] sm:$0xff] }
 0x563   : > { %v9244_v13 = vpop.f32.mrf.mxu1 }
 0x564   : > { %9449 = vst.msk [vmem:[%s14579_s10 + $0x10] sm:$0xff] %vm171_vm0, %v9417_v49  ;;  %v9420_v3 = vmax.f32 %v9388_v17, 0.0  ;;  %v9387_v39 = vadd.f32 %v9244_v13, %v14813_v51  ;;  %v14829_v51 = vld [vmem:[#allocation31_spill] sm:$0xff] }
 0x565   : > { %v11830_v5 = vpop.f32.mrf.mxu1 }
 0x566   : > { %9452 = vst.msk [vmem:[%s14579_s10 + $0x28] sm:$0xff] %vm171_vm0, %v9420_v3  ;;  %v9419_v62 = vmax.f32 %v9387_v39, 0.0  ;;  %v9390_v16 = vadd.f32 %v11830_v5, %v14814_v6  ;;  %v14830_v6 = vld [vmem:[#allocation32_spill] sm:$0xff] }
 0x567   : > { %v9254_v12 = vpop.f32.mrf.mxu1 }
 0x568   : > { %9451 = vst.msk [vmem:[%s14579_s10 + $0x20] sm:$0xff] %vm171_vm0, %v9419_v62  ;;  %v9422_v40 = vmax.f32 %v9390_v16, 0.0  ;;  %v9389_v42 = vadd.f32 %v9254_v12, %v14815_v35  ;;  %v14831_v35 = vld [vmem:[#allocation33_spill] sm:$0xff] }
 0x569   : > { %v11833_v2 = vpop.f32.mrf.mxu1 }
 0x56a   : > { %9454 = vst.msk [vmem:[%s14579_s10 + $0x38] sm:$0xff] %vm171_vm0, %v9422_v40  ;;  %v9421_v10 = vmax.f32 %v9389_v42, 0.0  ;;  %v9392_v44 = vadd.f32 %v11833_v2, %v14816_v23  ;;  %v14832_v23 = vld [vmem:[#allocation34_spill] sm:$0xff] }
 0x56b   : > { %v9264_v43 = vpop.f32.mrf.mxu1 }
 0x56c   : > { %9453 = vst.msk [vmem:[%s14579_s10 + $0x30] sm:$0xff] %vm171_vm0, %v9421_v10  ;;  %v9424_v22 = vmax.f32 %v9392_v44, 0.0  ;;  %v9391_v52 = vadd.f32 %v9264_v43, %v14817_v26  ;;  %v14833_v26 = vld [vmem:[#allocation35_spill] sm:$0xff] }
 0x56d   : > { %v11836_v46 = vpop.f32.mrf.mxu1 }
 0x56e   : > { %9456 = vst.msk [vmem:[%s14579_s10 + $0x48] sm:$0xff] %vm171_vm0, %v9424_v22  ;;  %v9423_v58 = vmax.f32 %v9391_v52, 0.0  ;;  %v9394_v11 = vadd.f32 %v11836_v46, %v14818_v54  ;;  %v14834_v54 = vld [vmem:[#allocation36_spill] sm:$0xff] }
 0x56f   : > { %v9274_v31 = vpop.f32.mrf.mxu1 }
 0x570   : > { %9455 = vst.msk [vmem:[%s14579_s10 + $0x40] sm:$0xff] %vm171_vm0, %v9423_v58  ;;  %v9426_v57 = vmax.f32 %v9394_v11, 0.0  ;;  %v9393_v21 = vadd.f32 %v9274_v31, %v14819_v14  ;;  %v14835_v14 = vld [vmem:[#allocation37_spill] sm:$0xff] }
 0x571   : > { %v11839_v1 = vpop.f32.mrf.mxu1 }
 0x572   : > { %9458 = vst.msk [vmem:[%s14579_s10 + $0x58] sm:$0xff] %vm171_vm0, %v9426_v57  ;;  %v9425_v32 = vmax.f32 %v9393_v21, 0.0  ;;  %v9396_v53 = vadd.f32 %v11839_v1, %v14820_v41  ;;  %v14836_v41 = vld [vmem:[#allocation38_spill] sm:$0xff] }
 0x573   : > { %v9284_v8 = vpop.f32.mrf.mxu1 }
 0x574   : > { %9457 = vst.msk [vmem:[%s14579_s10 + $0x50] sm:$0xff] %vm171_vm0, %v9425_v32  ;;  %v9428_v61 = vmax.f32 %v9396_v53, 0.0  ;;  %v9395_v59 = vadd.f32 %v9284_v8, %v14821_v33  ;;  %v14837_v33 = vld [vmem:[#allocation39_spill] sm:$0xff] }
 0x575   : > { %v11842_v28 = vpop.f32.mrf.mxu1 }
 0x576   : > { %9460 = vst.msk [vmem:[%s14579_s10 + $0x68] sm:$0xff] %vm171_vm0, %v9428_v61  ;;  %v9427_v50 = vmax.f32 %v9395_v59, 0.0  ;;  %v9398_v18 = vadd.f32 %v11842_v28, %v14822_v25  ;;  %v14838_v25 = vld [vmem:[#allocation40_spill] sm:$0xff] }
 0x577   : > { %v9294_v9 = vpop.f32.mrf.mxu1 }
 0x578   : > { %9459 = vst.msk [vmem:[%s14579_s10 + $0x60] sm:$0xff] %vm171_vm0, %v9427_v50  ;;  %v9430_v63 = vmax.f32 %v9398_v18, 0.0  ;;  %v9397_v4 = vadd.f32 %v9294_v9, %v14823_v56  ;;  %v14839_v56 = vld [vmem:[#allocation42_spill] sm:$0xff] }
 0x579   : > { %v11845_v0 = vpop.f32.mrf.mxu1 }
 0x57a   : > { %9462 = vst.msk [vmem:[%s14579_s10 + $0x78] sm:$0xff] %vm171_vm0, %v9430_v63  ;;  %v9429_v37 = vmax.f32 %v9397_v4, 0.0  ;;  %v9400_v29 = vadd.f32 %v11845_v0, %v14824_v55 }
 0x57b   : > { %v9304_v15 = vpop.f32.mrf.mxu1 }
 0x57c   : > { %9461 = vst.msk [vmem:[%s14579_s10 + $0x70] sm:$0xff] %vm171_vm0, %v9429_v37  ;;  %v9432_v30 = vmax.f32 %v9400_v29, 0.0  ;;  %v9399_v20 = vadd.f32 %v9304_v15, %v14825_v48 }
 0x57d   : > { %v11848_v60 = vpop.f32.mrf.mxu1 }
 0x57e   : > { %9464 = vst.msk [vmem:[%s14579_s10 + $0x88] sm:$0xff] %vm171_vm0, %v9432_v30  ;;  %v9431_v24 = vmax.f32 %v9399_v20, 0.0  ;;  %v9402_v47 = vadd.f32 %v11848_v60, %v14826_v27 }
 0x57f   : > { %v9314_v36 = vpop.f32.mrf.mxu1 }
 0x580   : > { %9463 = vst.msk [vmem:[%s14579_s10 + $0x80] sm:$0xff] %vm171_vm0, %v9431_v24  ;;  %v9434_v45 = vmax.f32 %v9402_v47, 0.0  ;;  %v9401_v34 = vadd.f32 %v9314_v36, %v14827_v7 }
 0x581   : > { %v11851_v38 = vpop.f32.mrf.mxu1 }
 0x582   : > { %9466 = vst.msk [vmem:[%s14579_s10 + $0x98] sm:$0xff] %vm171_vm0, %v9434_v45  ;;  %v9433_v49 = vmax.f32 %v9401_v34, 0.0  ;;  %v9404_v17 = vadd.f32 %v11851_v38, %v14828_v19 }
 0x583   : > { %v9324_v13 = vpop.f32.mrf.mxu1 }
 0x584   : > { %9465 = vst.msk [vmem:[%s14579_s10 + $0x90] sm:$0xff] %vm171_vm0, %v9433_v49  ;;  %v9436_v3 = vmax.f32 %v9404_v17, 0.0  ;;  %v9403_v39 = vadd.f32 %v9324_v13, %v14829_v51 }
 0x585   : > { %v11854_v5 = vpop.f32.mrf.mxu1 }
 0x586   : > { %9468 = vst.msk [vmem:[%s14579_s10 + $0xa8] sm:$0xff] %vm171_vm0, %v9436_v3  ;;  %v9435_v62 = vmax.f32 %v9403_v39, 0.0  ;;  %v9406_v16 = vadd.f32 %v11854_v5, %v14830_v6 }
 0x587   : > { %v9334_v12 = vpop.f32.mrf.mxu1 }
 0x588   : > { %9467 = vst.msk [vmem:[%s14579_s10 + $0xa0] sm:$0xff] %vm171_vm0, %v9435_v62  ;;  %v9438_v40 = vmax.f32 %v9406_v16, 0.0  ;;  %v9405_v42 = vadd.f32 %v9334_v12, %v14831_v35 }
 0x589   : > { %v11857_v2 = vpop.f32.mrf.mxu1 }
 0x58a   : > { %9470 = vst.msk [vmem:[%s14579_s10 + $0xb8] sm:$0xff] %vm171_vm0, %v9438_v40  ;;  %v9437_v10 = vmax.f32 %v9405_v42, 0.0  ;;  %v9408_v44 = vadd.f32 %v11857_v2, %v14832_v23 }
 0x58b   : > { %v9344_v43 = vpop.f32.mrf.mxu1 }
 0x58c   : > { %9469 = vst.msk [vmem:[%s14579_s10 + $0xb0] sm:$0xff] %vm171_vm0, %v9437_v10  ;;  %v9440_v22 = vmax.f32 %v9408_v44, 0.0  ;;  %v9407_v52 = vadd.f32 %v9344_v43, %v14833_v26 }
 0x58d   : > { %v11860_v46 = vpop.f32.mrf.mxu1 }
 0x58e   : > { %9472 = vst.msk [vmem:[%s14579_s10 + $0xc8] sm:$0xff] %vm171_vm0, %v9440_v22  ;;  %v9439_v58 = vmax.f32 %v9407_v52, 0.0  ;;  %v9410_v11 = vadd.f32 %v11860_v46, %v14834_v54 }
 0x58f   : > { %v9354_v31 = vpop.f32.mrf.mxu1 }
 0x590   : > { %9471 = vst.msk [vmem:[%s14579_s10 + $0xc0] sm:$0xff] %vm171_vm0, %v9439_v58  ;;  %v9442_v57 = vmax.f32 %v9410_v11, 0.0  ;;  %v9409_v21 = vadd.f32 %v9354_v31, %v14835_v14 }
 0x591   : > { %v11863_v1 = vpop.f32.mrf.mxu1 }
 0x592   : > { %9474 = vst.msk [vmem:[%s14579_s10 + $0xd8] sm:$0xff] %vm171_vm0, %v9442_v57  ;;  %v9441_v32 = vmax.f32 %v9409_v21, 0.0  ;;  %v9412_v53 = vadd.f32 %v11863_v1, %v14836_v41 }
 0x593   : > { %v9364_v8 = vpop.f32.mrf.mxu1 }
 0x594   : > { %9473 = vst.msk [vmem:[%s14579_s10 + $0xd0] sm:$0xff] %vm171_vm0, %v9441_v32  ;;  %v9444_v61 = vmax.f32 %v9412_v53, 0.0  ;;  %v9411_v59 = vadd.f32 %v9364_v8, %v14837_v33 }
 0x595   : > { %v11866_v28 = vpop.f32.mrf.mxu1 }
 0x596   : > { %9476 = vst.msk [vmem:[%s14579_s10 + $0xe8] sm:$0xff] %vm171_vm0, %v9444_v61  ;;  %v9443_v50 = vmax.f32 %v9411_v59, 0.0  ;;  %v9414_v18 = vadd.f32 %v11866_v28, %v14838_v25 }
 0x597   : > { %v9374_v9 = vpop.f32.mrf.mxu1 }
 0x598   : > { %9475 = vst.msk [vmem:[%s14579_s10 + $0xe0] sm:$0xff] %vm171_vm0, %v9443_v50  ;;  %v9446_v63 = vmax.f32 %v9414_v18, 0.0  ;;  %v9413_v4 = vadd.f32 %v9374_v9, %v14839_v56 }
 0x59a   : > { %9478 = vst.msk [vmem:[%s14579_s10 + $0xf8] sm:$0xff] %vm171_vm0, %v9446_v63  ;;  %v9445_v0 = vmax.f32 %v9413_v4, 0.0 }
 0x59c   : > { %9477 = vst.msk [vmem:[%s14579_s10 + $0xf0] sm:$0xff] %vm171_vm0, %v9445_v0 }
 0x59d PF: > { %s13_s12 = sadd.s32 1, %s11914_s12  }
 0x59e   : > { %p10_p4 = scmp.ge.s32.totalorder %s13_s12, 4  }
 0x5a0   :  { %12 = sbr.rel (!%p10_p4) target bundleno = 1 (0x1), region = 82 }

</bundles_post_ra>
